<compile_context>
chip_gen: v7x
topology: tpu7x:2x2x1
jax: 0.10.0
libtpu: 0.0.40
codegen_flags: <defaults>
</compile_context>

<pallas_src>
import numpy as np
import jax
import jax.numpy as jnp
from jax.experimental import pallas as pl
from jax.experimental.pallas import tpu as pltpu


# Fixed module geometry: (B, 1, 28, 28) -> conv5x5 -> pool2 -> conv5x5 ->
# pool2 -> 16*4*4 -> 50 -> 10.  (Pool assumes even conv-output dims: 24->12,
# 8->4, which holds here.)
_IN_HW = 28
_IN_FEATS = _IN_HW * _IN_HW       # 784 real input features
_IN_FEATS_PAD = 896               # padded to 7*128 lanes (lane-dense K)
_C1_BLOCK = 896                   # 12*12*6 = 864 pooled conv1 feats, pad to 7*128
_C2_BLOCK = 256                   # 4*4*16 = 256 pooled conv2 feats (= 2*128)
_FC1_W = 128                      # 50 fc1 outputs, padded to one full lane tile
_OUT_W = 128                      # 10 logits, padded to one full lane tile


def _round_up(x, m):
    return ((x + m - 1) // m) * m


# ---------------------------------------------------------------------------
# The fused Pallas kernel: whole forward for one batch tile.
# ---------------------------------------------------------------------------
def _lenet_kernel(x_ref, w1_ref, b1_ref, w2_ref, b2_ref,
                  w3_ref, b3_ref, w4_ref, b4_ref, o_ref):
    f32 = jnp.float32
    bf16 = jnp.bfloat16

    # conv1 for all four 2x2-pool window positions in one lane-dense bf16
    # matmul with f32 accumulation: (tb, 896) @ (896, 4*896).
    y1 = jnp.dot(x_ref[...], w1_ref[...], preferred_element_type=f32)
    # 2x2 max-pool == elementwise max of the four 128-aligned column groups;
    # the bias is identical across the four groups, so add it once after max.
    p1 = jnp.maximum(
        jnp.maximum(y1[:, 0 * _C1_BLOCK:1 * _C1_BLOCK],
                    y1[:, 1 * _C1_BLOCK:2 * _C1_BLOCK]),
        jnp.maximum(y1[:, 2 * _C1_BLOCK:3 * _C1_BLOCK],
                    y1[:, 3 * _C1_BLOCK:4 * _C1_BLOCK])) + b1_ref[...]

    # conv2 + pool, same trick: (tb, 896) @ (896, 4*256).
    y2 = jnp.dot(p1.astype(bf16), w2_ref[...], preferred_element_type=f32)
    p2 = jnp.maximum(
        jnp.maximum(y2[:, 0 * _C2_BLOCK:1 * _C2_BLOCK],
                    y2[:, 1 * _C2_BLOCK:2 * _C2_BLOCK]),
        jnp.maximum(y2[:, 2 * _C2_BLOCK:3 * _C2_BLOCK],
                    y2[:, 3 * _C2_BLOCK:4 * _C2_BLOCK])) + b2_ref[...]

    # fc1 -> fc2 (the reference module has no activation functions).
    h = jnp.dot(p2.astype(bf16), w3_ref[...], preferred_element_type=f32) + b3_ref[...]
    o_ref[...] = (jnp.dot(h.astype(bf16), w4_ref[...],
                          preferred_element_type=f32) + b4_ref[...])


# ---------------------------------------------------------------------------
# One-time parameter packing (host-side, numpy): linearise conv+pool stages
# into dense matrices, reorder/pad fc weights, cast weights to bf16.
# ---------------------------------------------------------------------------
def _conv_pool_matrix(w, b, in_h, in_w, in_rows, out_block):
    """Dense (in_rows, 4*out_block) matrix for a valid 5x5 conv + 2x2 pool.

    Input columns are assumed ordered (row, col, in_chan), zero-padded up to
    `in_rows`.  Output columns are grouped by pool-window position
    wi = 2*di+dj (4 groups of `out_block`, zero-padded); within a group they
    are ordered (pool_row, pool_col, out_chan), so the pool is an elementwise
    max of the 4 groups.  The bias is returned post-pool: (1, out_block).
    """
    w = np.asarray(w, np.float32)
    b = np.asarray(b, np.float32)
    cout, cin, k, _ = w.shape
    ph_n, pw_n = (in_h - k + 1) // 2, (in_w - k + 1) // 2
    WI, PH, PW, C, CI, KI, KJ = np.meshgrid(
        np.arange(4), np.arange(ph_n), np.arange(pw_n), np.arange(cout),
        np.arange(cin), np.arange(k), np.arange(k), indexing="ij")
    oh = 2 * PH + WI // 2            # conv output row for this pool-window slot
    ow = 2 * PW + WI % 2
    in_col = ((oh + KI) * in_w + (ow + KJ)) * cin + CI
    out_col = WI * out_block + (PH * pw_n + PW) * cout + C
    mat = np.zeros((in_rows, 4 * out_block), np.float32)
    mat[in_col, out_col] = w[C, CI, KI, KJ]
    # Post-pool bias: one copy per pooled output column (row, col, chan).
    bias = np.zeros((1, out_block), np.float32)
    bias[0, :ph_n * pw_n * cout] = np.tile(b, ph_n * pw_n)
    return mat, bias


def pack_params(params):
    """One-time re-layout of PyTorch-style params into fused, lane-dense mats."""
    w1m, b1m = _conv_pool_matrix(params["conv1_w"], params["conv1_b"],
                                 _IN_HW, _IN_HW, in_rows=_IN_FEATS_PAD,
                                 out_block=_C1_BLOCK)
    w2m, b2m = _conv_pool_matrix(params["conv2_w"], params["conv2_b"],
                                 12, 12, in_rows=_C1_BLOCK,
                                 out_block=_C2_BLOCK)

    # fc1: reorder rows from this kernel's (row, col, chan) pooled layout to
    # PyTorch's NCHW flatten order (chan, row, col); pad N: 50 -> 128.
    lin1_w = np.asarray(params["lin1_w"], np.float32)       # (50, 256)
    lin1_b = np.asarray(params["lin1_b"], np.float32)
    ph, pw, c = np.meshgrid(np.arange(4), np.arange(4), np.arange(16),
                            indexing="ij")
    mine = ((ph * 4 + pw) * 16 + c).ravel()
    torch = (c * 16 + ph * 4 + pw).ravel()
    w3m = np.zeros((_C2_BLOCK, _FC1_W), np.float32)
    w3m[mine, :50] = lin1_w[:, torch].T
    b3m = np.zeros((1, _FC1_W), np.float32)
    b3m[0, :50] = lin1_b

    # fc2: (10, 50) -> zero-padded, transposed (128, 128).
    lin2_w = np.asarray(params["lin2_w"], np.float32)
    lin2_b = np.asarray(params["lin2_b"], np.float32)
    w4m = np.zeros((_FC1_W, _OUT_W), np.float32)
    w4m[:50, :10] = lin2_w.T
    b4m = np.zeros((1, _OUT_W), np.float32)
    b4m[0, :10] = lin2_b

    # Weights as bf16 (native MXU dtype); biases stay f32 (added to f32 accums).
    return (jnp.asarray(w1m, jnp.bfloat16), jnp.asarray(b1m, jnp.float32),
            jnp.asarray(w2m, jnp.bfloat16), jnp.asarray(b2m, jnp.float32),
            jnp.asarray(w3m, jnp.bfloat16), jnp.asarray(b3m, jnp.float32),
            jnp.asarray(w4m, jnp.bfloat16), jnp.asarray(b4m, jnp.float32))


# ---------------------------------------------------------------------------
# Forward pass: single fused pallas_call over batch tiles.
# ---------------------------------------------------------------------------
def _pick_batch_tile(b):
    """Batch tile / padded batch.  >= 2 grid steps when possible (two v7x
    TensorCores), 256-row tiles at large batch (256-wide v6e/v7x MXU)."""
    if b >= 512:
        tb = 256
    elif b >= 256:
        tb = 128
    else:
        # Aim for two grid steps; keep the tile a multiple of 16 sublanes
        # (bf16 packing) with a floor of 16.
        tb = min(128, max(16, _round_up(-(-b // 2), 16)))
    return tb, _round_up(b, tb)


@jax.jit
def classification_module_forward(packed, x):
    """x: (B, 1, 28, 28) float32 (NCHW, like PyTorch) -> logits (B, 10)."""
    w1m, b1m, w2m, b2m, w3m, b3m, w4m, b4m = packed
    b = x.shape[0]
    tb, bp = _pick_batch_tile(b)

    xf = x.reshape(b, _IN_FEATS).astype(jnp.bfloat16)
    xf = jnp.pad(xf, ((0, bp - b), (0, _IN_FEATS_PAD - _IN_FEATS)))

    # Constant weights/biases: whole-array VMEM residents (no per-step DMA,
    # no double buffering).
    res_spec = pl.BlockSpec(memory_space=pltpu.MemorySpace.VMEM)

    out = pl.pallas_call(
        _lenet_kernel,
        out_shape=jax.ShapeDtypeStruct((bp, _OUT_W), jnp.float32),
        grid=(bp // tb,),
        in_specs=[
            pl.BlockSpec((tb, _IN_FEATS_PAD), lambda i: (i, 0)),
            res_spec, res_spec,   # w1, b1
            res_spec, res_spec,   # w2, b2
            res_spec, res_spec,   # w3, b3
            res_spec, res_spec,   # w4, b4
        ],
        out_specs=pl.BlockSpec((tb, _OUT_W), lambda i: (i, 0)),
        compiler_params=pltpu.CompilerParams(
            dimension_semantics=("parallel",),
            vmem_limit_bytes=40 * 1024 * 1024,
        ),
    )(xf, w1m, b1m, w2m, b2m, w3m, b3m, w4m, b4m)

    return out[:b, :10]


# ---------------------------------------------------------------------------
# Parameters + plain-JAX reference (for verification only)
# ---------------------------------------------------------------------------
def init_params(key):
    ks = jax.random.split(key, 8)
    scale = 0.05
    return {
        "conv1_w": scale * jax.random.normal(ks[0], (6, 1, 5, 5), jnp.float32),
        "conv1_b": scale * jax.random.normal(ks[1], (6,), jnp.float32),
        "conv2_w": scale * jax.random.normal(ks[2], (16, 6, 5, 5), jnp.float32),
        "conv2_b": scale * jax.random.normal(ks[3], (16,), jnp.float32),
        "lin1_w": scale * jax.random.normal(ks[4], (50, 16 * 4 * 4), jnp.float32),
        "lin1_b": scale * jax.random.normal(ks[5], (50,), jnp.float32),
        "lin2_w": scale * jax.random.normal(ks[6], (10, 50), jnp.float32),
        "lin2_b": scale * jax.random.normal(ks[7], (10,), jnp.float32),
    }


def _reference_forward(params, x):
    """Plain-JAX re-implementation of the PyTorch module (verification)."""
    hp = jax.lax.Precision.HIGHEST

    def conv(x, w, b):                                   # valid 5x5, stride 1
        k = w.shape[-1]
        ho, wo = x.shape[2] - k + 1, x.shape[3] - k + 1
        out = jnp.zeros((x.shape[0], w.shape[0], ho, wo), jnp.float32)
        for i in range(k):
            for j in range(k):
                out = out + jnp.einsum("bchw,oc->bohw",
                                       x[:, :, i:i + ho, j:j + wo],
                                       w[:, :, i, j], precision=hp)
        return out + b[None, :, None, None]

    def pool(x):
        return jnp.maximum(
            jnp.maximum(x[:, :, 0::2, 0::2], x[:, :, 0::2, 1::2]),
            jnp.maximum(x[:, :, 1::2, 0::2], x[:, :, 1::2, 1::2]))

    h = pool(conv(x, params["conv1_w"], params["conv1_b"]))
    h = pool(conv(h, params["conv2_w"], params["conv2_b"]))
    h = h.reshape(-1, 16 * 4 * 4)
    h = jnp.dot(h, params["lin1_w"].T, precision=hp) + params["lin1_b"]
    h = jnp.dot(h, params["lin2_w"].T, precision=hp) + params["lin2_b"]
    return h


if __name__ == "__main__":
    key = jax.random.PRNGKey(0)
    pkey, xkey = jax.random.split(key)
    params = init_params(pkey)
    packed = pack_params(params)          # one-time host-side weight packing

    # Input consistent with the module: (B, 1, 28, 28) NCHW.
    x = jax.random.normal(xkey, (2, 1, 28, 28), jnp.float32)

    logits = classification_module_forward(packed, x)
    jax.block_until_ready(logits)
    assert logits.shape == (2, 10)

    # Verify against the plain-JAX f32 reference of the PyTorch forward.
    # Tolerance loosened vs. the f32 kernel since weights/activations are
    # bf16 on the MXU (accumulation stays f32).
    ref = _reference_forward(params, x)
    err = float(jnp.max(jnp.abs(logits - ref)))
    assert err < 2.5e-2, f"mismatch vs reference: {err}"

    print("KERNEL_OK")
</pallas_src>

<mosaic_0001>
module attributes {stable_mosaic.version = 11 : i64} {
  func.func @_lenet_kernel(%arg0: i32, %arg1: memref<16x896xbf16, #tpu.memory_space<vmem>>, %arg2: memref<896x3584xbf16, #tpu.memory_space<vmem>>, %arg3: memref<1x896xf32, #tpu.memory_space<vmem>>, %arg4: memref<896x1024xbf16, #tpu.memory_space<vmem>>, %arg5: memref<1x256xf32, #tpu.memory_space<vmem>>, %arg6: memref<256x128xbf16, #tpu.memory_space<vmem>>, %arg7: memref<1x128xf32, #tpu.memory_space<vmem>>, %arg8: memref<128x128xbf16, #tpu.memory_space<vmem>>, %arg9: memref<1x128xf32, #tpu.memory_space<vmem>>, %arg10: memref<16x128xf32, #tpu.memory_space<vmem>>) attributes {dimension_semantics = [#tpu.dimension_semantics<parallel>], iteration_bounds = array<i64: 1>, scalar_prefetch = 0 : i64, scratch_operands = 0 : i64, tpu.core_type = #tpu.core_type<tc>, window_params = [{transform_indices = @transform_0, window_bounds = array<i64: 16, 896>}, {pipeline_mode = #tpu.pipeline_mode<synchronous>, transform_indices = @transform_1, window_bounds = array<i64: 896, 3584>}, {pipeline_mode = #tpu.pipeline_mode<synchronous>, transform_indices = @transform_2, window_bounds = array<i64: 1, 896>}, {pipeline_mode = #tpu.pipeline_mode<synchronous>, transform_indices = @transform_3, window_bounds = array<i64: 896, 1024>}, {pipeline_mode = #tpu.pipeline_mode<synchronous>, transform_indices = @transform_4, window_bounds = array<i64: 1, 256>}, {pipeline_mode = #tpu.pipeline_mode<synchronous>, transform_indices = @transform_5, window_bounds = array<i64: 256, 128>}, {pipeline_mode = #tpu.pipeline_mode<synchronous>, transform_indices = @transform_6, window_bounds = array<i64: 1, 128>}, {pipeline_mode = #tpu.pipeline_mode<synchronous>, transform_indices = @transform_7, window_bounds = array<i64: 128, 128>}, {pipeline_mode = #tpu.pipeline_mode<synchronous>, transform_indices = @transform_8, window_bounds = array<i64: 1, 128>}, {transform_indices = @transform_9, window_bounds = array<i64: 16, 128>}]} {
    %c0 = arith.constant 0 : index
    %c0_0 = arith.constant 0 : index
    %0 = vector.load %arg1[%c0, %c0_0] : memref<16x896xbf16, #tpu.memory_space<vmem>>, vector<16x896xbf16>
    %c0_1 = arith.constant 0 : index
    %c0_2 = arith.constant 0 : index
    %1 = vector.load %arg2[%c0_1, %c0_2] : memref<896x3584xbf16, #tpu.memory_space<vmem>>, vector<896x3584xbf16>
    %cst = arith.constant dense<0.000000e+00> : vector<16x3584xf32>
    %2 = tpu.matmul %0, %1, %cst {dimension_numbers = #tpu.dot_dimension_numbers<[1], [0], [0], [1], [0, 0, 1, 1], [], []>} : vector<16x896xbf16>, vector<896x3584xbf16>, vector<16x3584xf32> -> vector<16x3584xf32>
    %3 = vector.extract_strided_slice %2 {offsets = [0, 0], sizes = [16, 896], strides = [1, 1]} : vector<16x3584xf32> to vector<16x896xf32>
    %4 = vector.extract_strided_slice %2 {offsets = [0, 896], sizes = [16, 896], strides = [1, 1]} : vector<16x3584xf32> to vector<16x896xf32>
    %5 = arith.maximumf %3, %4 : vector<16x896xf32>
    %6 = vector.extract_strided_slice %2 {offsets = [0, 1792], sizes = [16, 896], strides = [1, 1]} : vector<16x3584xf32> to vector<16x896xf32>
    %7 = vector.extract_strided_slice %2 {offsets = [0, 2688], sizes = [16, 896], strides = [1, 1]} : vector<16x3584xf32> to vector<16x896xf32>
    %8 = arith.maximumf %6, %7 : vector<16x896xf32>
    %9 = arith.maximumf %5, %8 : vector<16x896xf32>
    %c0_3 = arith.constant 0 : index
    %c0_4 = arith.constant 0 : index
    %10 = vector.load %arg3[%c0_3, %c0_4] : memref<1x896xf32, #tpu.memory_space<vmem>>, vector<1x896xf32>
    %11 = vector.broadcast %10 : vector<1x896xf32> to vector<16x896xf32>
    %12 = arith.addf %9, %11 : vector<16x896xf32>
    %13 = arith.truncf %12 : vector<16x896xf32> to vector<16x896xbf16>
    %c0_5 = arith.constant 0 : index
    %c0_6 = arith.constant 0 : index
    %14 = vector.load %arg4[%c0_5, %c0_6] : memref<896x1024xbf16, #tpu.memory_space<vmem>>, vector<896x1024xbf16>
    %cst_7 = arith.constant dense<0.000000e+00> : vector<16x1024xf32>
    %15 = tpu.matmul %13, %14, %cst_7 {dimension_numbers = #tpu.dot_dimension_numbers<[1], [0], [0], [1], [0, 0, 1, 1], [], []>} : vector<16x896xbf16>, vector<896x1024xbf16>, vector<16x1024xf32> -> vector<16x1024xf32>
    %16 = vector.extract_strided_slice %15 {offsets = [0, 0], sizes = [16, 256], strides = [1, 1]} : vector<16x1024xf32> to vector<16x256xf32>
    %17 = vector.extract_strided_slice %15 {offsets = [0, 256], sizes = [16, 256], strides = [1, 1]} : vector<16x1024xf32> to vector<16x256xf32>
    %18 = arith.maximumf %16, %17 : vector<16x256xf32>
    %19 = vector.extract_strided_slice %15 {offsets = [0, 512], sizes = [16, 256], strides = [1, 1]} : vector<16x1024xf32> to vector<16x256xf32>
    %20 = vector.extract_strided_slice %15 {offsets = [0, 768], sizes = [16, 256], strides = [1, 1]} : vector<16x1024xf32> to vector<16x256xf32>
    %21 = arith.maximumf %19, %20 : vector<16x256xf32>
    %22 = arith.maximumf %18, %21 : vector<16x256xf32>
    %c0_8 = arith.constant 0 : index
    %c0_9 = arith.constant 0 : index
    %23 = vector.load %arg5[%c0_8, %c0_9] : memref<1x256xf32, #tpu.memory_space<vmem>>, vector<1x256xf32>
    %24 = vector.broadcast %23 : vector<1x256xf32> to vector<16x256xf32>
    %25 = arith.addf %22, %24 : vector<16x256xf32>
    %26 = arith.truncf %25 : vector<16x256xf32> to vector<16x256xbf16>
    %c0_10 = arith.constant 0 : index
    %c0_11 = arith.constant 0 : index
    %27 = vector.load %arg6[%c0_10, %c0_11] : memref<256x128xbf16, #tpu.memory_space<vmem>>, vector<256x128xbf16>
    %cst_12 = arith.constant dense<0.000000e+00> : vector<16x128xf32>
    %28 = tpu.matmul %26, %27, %cst_12 {dimension_numbers = #tpu.dot_dimension_numbers<[1], [0], [0], [1], [0, 0, 1, 1], [], []>} : vector<16x256xbf16>, vector<256x128xbf16>, vector<16x128xf32> -> vector<16x128xf32>
    %c0_13 = arith.constant 0 : index
    %c0_14 = arith.constant 0 : index
    %29 = vector.load %arg7[%c0_13, %c0_14] : memref<1x128xf32, #tpu.memory_space<vmem>>, vector<1x128xf32>
    %30 = vector.broadcast %29 : vector<1x128xf32> to vector<16x128xf32>
    %31 = arith.addf %28, %30 : vector<16x128xf32>
    %32 = arith.truncf %31 : vector<16x128xf32> to vector<16x128xbf16>
    %c0_15 = arith.constant 0 : index
    %c0_16 = arith.constant 0 : index
    %33 = vector.load %arg8[%c0_15, %c0_16] : memref<128x128xbf16, #tpu.memory_space<vmem>>, vector<128x128xbf16>
    %cst_17 = arith.constant dense<0.000000e+00> : vector<16x128xf32>
    %34 = tpu.matmul %32, %33, %cst_17 {dimension_numbers = #tpu.dot_dimension_numbers<[1], [0], [0], [1], [0, 0, 1, 1], [], []>} : vector<16x128xbf16>, vector<128x128xbf16>, vector<16x128xf32> -> vector<16x128xf32>
    %c0_18 = arith.constant 0 : index
    %c0_19 = arith.constant 0 : index
    %35 = vector.load %arg9[%c0_18, %c0_19] : memref<1x128xf32, #tpu.memory_space<vmem>>, vector<1x128xf32>
    %36 = vector.broadcast %35 : vector<1x128xf32> to vector<16x128xf32>
    %37 = arith.addf %34, %36 : vector<16x128xf32>
    %c0_20 = arith.constant 0 : index
    %c0_21 = arith.constant 0 : index
    %38 = vector.load %arg10[%c0_20, %c0_21] : memref<16x128xf32, #tpu.memory_space<vmem>>, vector<16x128xf32>
    tpu.vector_store %arg10[%c0_20, %c0_21], %37 {strides = array<i32>} : memref<16x128xf32, #tpu.memory_space<vmem>>, vector<16x128xf32>,
    return
  }
  func.func @transform_0(%arg0: i32) -> (i32, i32) {
    %c0_i32 = arith.constant 0 : i32
    %c0_i32_0 = arith.constant 0 : i32
    return %arg0, %c0_i32 : i32, i32
  }
  func.func @transform_1(%arg0: i32) -> (i32, i32) {
    %c0_i32 = arith.constant 0 : i32
    %c0_i32_0 = arith.constant 0 : i32
    %c0_i32_1 = arith.constant 0 : i32
    return %c0_i32, %c0_i32_0 : i32, i32
  }
  func.func @transform_2(%arg0: i32) -> (i32, i32) {
    %c0_i32 = arith.constant 0 : i32
    %c0_i32_0 = arith.constant 0 : i32
    %c0_i32_1 = arith.constant 0 : i32
    return %c0_i32, %c0_i32_0 : i32, i32
  }
  func.func @transform_3(%arg0: i32) -> (i32, i32) {
    %c0_i32 = arith.constant 0 : i32
    %c0_i32_0 = arith.constant 0 : i32
    %c0_i32_1 = arith.constant 0 : i32
    return %c0_i32, %c0_i32_0 : i32, i32
  }
  func.func @transform_4(%arg0: i32) -> (i32, i32) {
    %c0_i32 = arith.constant 0 : i32
    %c0_i32_0 = arith.constant 0 : i32
    %c0_i32_1 = arith.constant 0 : i32
    return %c0_i32, %c0_i32_0 : i32, i32
  }
  func.func @transform_5(%arg0: i32) -> (i32, i32) {
    %c0_i32 = arith.constant 0 : i32
    %c0_i32_0 = arith.constant 0 : i32
    %c0_i32_1 = arith.constant 0 : i32
    return %c0_i32, %c0_i32_0 : i32, i32
  }
  func.func @transform_6(%arg0: i32) -> (i32, i32) {
    %c0_i32 = arith.constant 0 : i32
    %c0_i32_0 = arith.constant 0 : i32
    %c0_i32_1 = arith.constant 0 : i32
    return %c0_i32, %c0_i32_0 : i32, i32
  }
  func.func @transform_7(%arg0: i32) -> (i32, i32) {
    %c0_i32 = arith.constant 0 : i32
    %c0_i32_0 = arith.constant 0 : i32
    %c0_i32_1 = arith.constant 0 : i32
    return %c0_i32, %c0_i32_0 : i32, i32
  }
  func.func @transform_8(%arg0: i32) -> (i32, i32) {
    %c0_i32 = arith.constant 0 : i32
    %c0_i32_0 = arith.constant 0 : i32
    %c0_i32_1 = arith.constant 0 : i32
    return %c0_i32, %c0_i32_0 : i32, i32
  }
  func.func @transform_9(%arg0: i32) -> (i32, i32) {
    %c0_i32 = arith.constant 0 : i32
    %c0_i32_0 = arith.constant 0 : i32
    return %arg0, %c0_i32 : i32, i32
  }
}

</mosaic_0001>

<bundles_post_ra>
// kernel: classification_module_forward.1
= control target key start
LH: loop header
LB: loop body
LE: loop exit
PB: predicated region body
PF: predicated region fallthrough
CT: control target
= control target key end

     0   :  { %14 = vsyncpa [#allocation3], 0  ;;  %s21403_s0 = inlined_call_operand.vmem [shape: bf16[16,896], index: 0, kind: input, shape index: {}]   ;;  %s21404_s1 = inlined_call_operand.hbm [shape: bf16[896,3584], index: 1, kind: input, shape index: {}]   ;;  %s21405_s2 = inlined_call_operand.hbm [shape: f32[1,896], index: 2, kind: input, shape index: {}]   ;;  %s21406_s3 = inlined_call_operand.hbm [shape: bf16[896,1024], index: 3, kind: input, shape index: {}]   ;;  %s21407_s4 = inlined_call_operand.hbm [shape: f32[1,256], index: 4, kind: input, shape index: {}]   ;;  %s21408_s5 = inlined_call_operand.hbm [shape: bf16[256,128], index: 5, kind: input, shape index: {}]   ;;  %s21409_s6 = inlined_call_operand.hbm [shape: f32[1,128], index: 6, kind: input, shape index: {}]   ;;  %s21410_s7 = inlined_call_operand.hbm [shape: bf16[128,128], index: 7, kind: input, shape index: {}]   ;;  %s21411_s8 = inlined_call_operand.hbm [shape: f32[1,128], index: 8, kind: input, shape index: {}]   ;;  %s21412_s9 = inlined_call_operand.vmem [shape: f32[16,128], index: 9, kind: output, shape index: {}]  }
   0x1   :  { %15 = vsyncpa [#allocation5], 0 }
   0x2   :  { %16 = vsyncpa [#allocation8], 0 }
   0x3   :  { %17 = vsyncpa [#allocation11], 0 }
   0x4   :  { %18 = vsyncpa [#allocation14], 0  ;;  %s20739_s30 = smov [#allocation4]   ;;  %s20740_s11 = smov [#allocation7]  }
   0x5   :  { %s39_s10 = sshll.u32 %s20739_s30, 4  ;;  %s61_s12 = sshll.u32 %s20740_s11, 4  ;;  %s40_s10 = int_to_ptr.vmem [resolvable:$true] %s39_s10  ;;  %s62_s12 = int_to_ptr.vmem [resolvable:$true] %s61_s12 }
   0x6   :  { %s20553_s15 = scalar_lea.hbm %s21405_s2, 112 }
   0x7   :  { %p20554_p0 = scmp.ne.s32.totalorder %s21405_s2, %s20553_s15  ;;  %p20557_p1 = scmp.lt.u32.totalorder %s20553_s15, %s21405_s2 }
   0x9   :  { %p20559_p2 = pnand %p20557_p1, %p20554_p0 }
   0xb   :  { %20562 = shalt.err (!%p20559_p2)
}
   0xc   :  { %s20563_s20 = scalar_lea.vmem %s40_s10, 112  ;;  %s20567_s21 = scalar_lea.vmem %s40_s10, 128 }
   0xd   :  { %p20564_p3 = scmp.ne.s32.totalorder %s40_s10, %s20563_s20  ;;  %p20568_p4 = scmp.lt.s32.totalorder %s40_s10, %s40_s10 }
   0xe   :  { %p20569_p5 = scmp.lt.s32.totalorder %s20567_s21, %s20563_s20 }
  0x10   :  { %p20570_p6 = por %p20569_p5, %p20568_p4 }
  0x12   :  { %p20571_p7 = pnand %p20570_p6, %p20564_p3 }
  0x14   :  { %20574 = shalt.err (!%p20571_p7)
}
  0x15   :  { %42 = dma.hbm_to_vmem [thread:$0]  %s21405_s2, 112, %s40_s10, [#allocation5]  }
  0x16   :  { %s20575_s26 = scalar_lea.hbm %s21407_s4, 32 }
  0x17   :  { %p20576_p8 = scmp.ne.s32.totalorder %s21407_s4, %s20575_s26  ;;  %p20579_p9 = scmp.lt.u32.totalorder %s20575_s26, %s21407_s4 }
  0x19   :  { %p20581_p10 = pnand %p20579_p9, %p20576_p8 }
  0x1b   :  { %20584 = shalt.err (!%p20581_p10)
}
  0x1c   :  { %s20585_s11 = scalar_lea.vmem %s62_s12, 32  ;;  %p20590_p12 = scmp.lt.s32.totalorder %s62_s12, %s62_s12 }
  0x1d   :  { %p20586_p11 = scmp.ne.s32.totalorder %s62_s12, %s20585_s11  ;;  %p20591_p13 = scmp.lt.s32.totalorder %s20585_s11, %s20585_s11 }
  0x1f   :  { %p20592_p0 = por %p20591_p13, %p20590_p12 }
  0x21   :  { %p20593_p1 = pnand %p20592_p0, %p20586_p11 }
  0x23   :  { %20596 = shalt.err (!%p20593_p1)
}
  0x24   :  { %64 = dma.hbm_to_vmem [thread:$0]  %s21407_s4, 32, %s62_s12, [#allocation8]  }
  0x25   :  { %s20741_s13 = smov [#allocation10]   ;;  %s20742_s15 = smov [#allocation2]  }
  0x26   :  { %s83_s14 = sshll.u32 %s20741_s13, 4  ;;  %s26_s16 = sshll.u32 %s20742_s15, 4  ;;  %s84_s14 = int_to_ptr.vmem [resolvable:$true] %s83_s14  ;;  %s20830_s16 = int_to_ptr.vmem [resolvable:$true] %s26_s16 }
  0x27   :  { %s20597_s19 = scalar_lea.hbm %s21409_s6, 16 }
  0x28   :  { %p20598_p2 = scmp.ne.s32.totalorder %s21409_s6, %s20597_s19  ;;  %p20601_p3 = scmp.lt.u32.totalorder %s20597_s19, %s21409_s6 }
  0x2a   :  { %p20603_p4 = pnand %p20601_p3, %p20598_p2 }
  0x2c   :  { %20606 = shalt.err (!%p20603_p4)
}
  0x2d   :  { %s20607_s4 = scalar_lea.vmem %s84_s14, 16  ;;  %s20611_s12 = scalar_lea.vmem %s84_s14, 32 }
  0x2e   :  { %p20608_p5 = scmp.ne.s32.totalorder %s84_s14, %s20607_s4  ;;  %p20612_p6 = scmp.lt.s32.totalorder %s84_s14, %s84_s14 }
  0x2f   :  { %p20613_p7 = scmp.lt.s32.totalorder %s20611_s12, %s20607_s4 }
  0x31   :  { %p20614_p8 = por %p20613_p7, %p20612_p6 }
  0x33   :  { %p20615_p9 = pnand %p20614_p8, %p20608_p5 }
  0x35   :  { %20618 = shalt.err (!%p20615_p9)
}
  0x36   :  { %86 = dma.hbm_to_vmem [thread:$0]  %s21409_s6, 16, %s84_s14, [#allocation11]  }
  0x37   :  { %s20619_s28 = scalar_lea.hbm %s21404_s1, 200704 }
  0x38   :  { %p20620_p10 = scmp.ne.s32.totalorder %s21404_s1, %s20619_s28  ;;  %p20623_p11 = scmp.lt.u32.totalorder %s20619_s28, %s21404_s1 }
  0x3a   :  { %p20625_p12 = pnand %p20623_p11, %p20620_p10 }
  0x3c   :  { %20628 = shalt.err (!%p20625_p12)
}
  0x3d   :  { %s20629_s10 = scalar_lea.vmem %s20830_s16, 200704  ;;  %p20634_p0 = scmp.lt.s32.totalorder %s20830_s16, %s20830_s16 }
  0x3e   :  { %p20630_p13 = scmp.ne.s32.totalorder %s20830_s16, %s20629_s10  ;;  %p20635_p1 = scmp.lt.s32.totalorder %s20629_s10, %s20629_s10 }
  0x40   :  { %p20636_p2 = por %p20635_p1, %p20634_p0 }
  0x42   :  { %p20637_p3 = pnand %p20636_p2, %p20630_p13 }
  0x44   :  { %20640 = shalt.err (!%p20637_p3)
}
  0x45   :  { %s20743_s6 = smov 1792   ;;  %s20744_s13 = smov 112  }
  0x46   :  { %32 = dma.hbm_to_vmem [thread:$0]  %s21404_s1, 200704, %s20830_s16, [#allocation3], %s20743_s6, %s20743_s6, %s20744_s13  }
  0x47   :  { %s20745_s17 = smov [#allocation6]   ;;  %s20641_s21 = scalar_lea.hbm %s21406_s3, 57344 }
  0x48   :  { %s48_s18 = sshll.u32 %s20745_s17, 4  ;;  %p20642_p4 = scmp.ne.s32.totalorder %s21406_s3, %s20641_s21  ;;  %s49_s18 = int_to_ptr.vmem [resolvable:$true] %s48_s18 }
  0x49   :  { %p20645_p5 = scmp.lt.u32.totalorder %s20641_s21, %s21406_s3 }
  0x4b   :  { %p20647_p6 = pnand %p20645_p5, %p20642_p4 }
  0x4d   :  { %20650 = shalt.err (!%p20647_p6)
}
  0x4e   :  { %s20651_s24 = scalar_lea.vmem %s49_s18, 57344  ;;  %p20656_p8 = scmp.lt.s32.totalorder %s49_s18, %s49_s18 }
  0x4f   :  { %p20652_p7 = scmp.ne.s32.totalorder %s49_s18, %s20651_s24  ;;  %p20657_p9 = scmp.lt.s32.totalorder %s20651_s24, %s20651_s24 }
  0x51   :  { %p20658_p10 = por %p20657_p9, %p20656_p8 }
  0x53   :  { %p20659_p11 = pnand %p20658_p10, %p20652_p7 }
  0x55   :  { %20662 = shalt.err (!%p20659_p11)
}
  0x56   :  { %s20746_s1 = smov 512   ;;  %s20747_s16 = smov 32  }
  0x57   :  { %54 = dma.hbm_to_vmem [thread:$0]  %s21406_s3, 57344, %s49_s18, [#allocation5], %s20746_s1, %s20746_s1, %s20747_s16  }
  0x58   :  { %s20748_s27 = smov [#allocation9]   ;;  %s20663_s11 = scalar_lea.hbm %s21408_s5, 2048 }
  0x59   :  { %s70_s28 = sshll.u32 %s20748_s27, 4  ;;  %p20664_p12 = scmp.ne.s32.totalorder %s21408_s5, %s20663_s11  ;;  %s71_s28 = int_to_ptr.vmem [resolvable:$true] %s70_s28 }
  0x5a   :  { %p20667_p13 = scmp.lt.u32.totalorder %s20663_s11, %s21408_s5 }
  0x5c   :  { %p20669_p0 = pnand %p20667_p13, %p20664_p12 }
  0x5e   :  { %20672 = shalt.err (!%p20669_p0)
}
  0x5f   :  { %s20673_s14 = scalar_lea.vmem %s71_s28, 2048  ;;  %p20678_p2 = scmp.lt.s32.totalorder %s71_s28, %s71_s28 }
  0x60   :  { %p20674_p1 = scmp.ne.s32.totalorder %s71_s28, %s20673_s14  ;;  %p20679_p3 = scmp.lt.s32.totalorder %s20673_s14, %s20673_s14 }
  0x62   :  { %p20680_p4 = por %p20679_p3, %p20678_p2 }
  0x64   :  { %p20681_p5 = pnand %p20680_p4, %p20674_p1 }
  0x66   :  { %20684 = shalt.err (!%p20681_p5)
}
  0x67   :  { %s20749_s3 = smov 64   ;;  %s20750_s15 = smov 4  }
  0x68   :  { %76 = dma.hbm_to_vmem [thread:$0]  %s21408_s5, 2048, %s71_s28, [#allocation8], %s20749_s3, %s20749_s3, %s20750_s15  }
  0x69   :  { %s20751_s19 = smov [#allocation12]   ;;  %s20752_s21 = smov [#allocation13]  }
  0x6a   :  { %s92_s20 = sshll.u32 %s20751_s19, 4  ;;  %s105_s22 = sshll.u32 %s20752_s21, 4  ;;  %s93_s20 = int_to_ptr.vmem [resolvable:$true] %s92_s20  ;;  %s106_s22 = int_to_ptr.vmem [resolvable:$true] %s105_s22 }
  0x6b   :  { %s20685_s12 = scalar_lea.hbm %s21410_s7, 1024 }
  0x6c   :  { %p20686_p6 = scmp.ne.s32.totalorder %s21410_s7, %s20685_s12  ;;  %p20689_p7 = scmp.lt.u32.totalorder %s20685_s12, %s21410_s7 }
  0x6e   :  { %p20691_p8 = pnand %p20689_p7, %p20686_p6 }
  0x70   :  { %20694 = shalt.err (!%p20691_p8)
}
  0x71   :  { %s20695_s5 = scalar_lea.vmem %s93_s20, 1024  ;;  %p20700_p10 = scmp.lt.s32.totalorder %s93_s20, %s93_s20 }
  0x72   :  { %p20696_p9 = scmp.ne.s32.totalorder %s93_s20, %s20695_s5  ;;  %p20701_p11 = scmp.lt.s32.totalorder %s20695_s5, %s20695_s5 }
  0x74   :  { %p20702_p12 = por %p20701_p11, %p20700_p10 }
  0x76   :  { %p20703_p13 = pnand %p20702_p12, %p20696_p9 }
  0x78   :  { %20706 = shalt.err (!%p20703_p13)
}
  0x79   :  { %98 = dma.hbm_to_vmem [thread:$0]  %s21410_s7, 1024, %s93_s20, [#allocation11], %s20749_s3, %s20749_s3, %s20750_s15  }
  0x7a   :  { %s20707_s30 = scalar_lea.hbm %s21411_s8, 16 }
  0x7b   :  { %p20708_p0 = scmp.ne.s32.totalorder %s21411_s8, %s20707_s30  ;;  %p20711_p1 = scmp.lt.u32.totalorder %s20707_s30, %s21411_s8 }
  0x7d   :  { %p20713_p2 = pnand %p20711_p1, %p20708_p0 }
  0x7f   :  { %20716 = shalt.err (!%p20713_p2)
}
  0x80   :  { %s20717_s13 = scalar_lea.vmem %s106_s22, 16  ;;  %s20721_s14 = scalar_lea.vmem %s106_s22, 32 }
  0x81   :  { %p20718_p3 = scmp.ne.s32.totalorder %s106_s22, %s20717_s13  ;;  %p20722_p4 = scmp.lt.s32.totalorder %s106_s22, %s106_s22 }
  0x82   :  { %p20723_p5 = scmp.lt.s32.totalorder %s20721_s14, %s20717_s13 }
  0x84   :  { %p20724_p6 = por %p20723_p5, %p20722_p4 }
  0x86   :  { %p20725_p7 = pnand %p20724_p6, %p20718_p3 }
  0x88   :  { %20728 = shalt.err (!%p20725_p7)
}
  0x89   :  { %108 = dma.hbm_to_vmem [thread:$0]  %s21411_s8, 16, %s106_s22, [#allocation14]  }
  0x8a   :  { %20729 = dma.done.wait [#allocation3], 200704  }
  0x8b   :  { %20730 = vsyncadd [#allocation3], 4294766592 }
  0x8c   :  { %20731 = dma.done.wait [#allocation5], 57456  }
  0x8d   :  { %20732 = vsyncadd [#allocation5], 4294909840 }
  0x8e   :  { %20733 = dma.done.wait [#allocation8], 2080  }
  0x8f   :  { %20734 = vsyncadd [#allocation8], 4294965216 }
  0x90   :  { %20735 = dma.done.wait [#allocation11], 1040  }
  0x91   :  { %20736 = vsyncadd [#allocation11], 4294966256 }
  0x92   :  { %20737 = dma.done.wait [#allocation14], 16  }
  0x93   :  { %20738 = vsyncadd [#allocation14], 4294967280  ;;  %v18133_v0 = vld [vmem:[#allocation2 + $0x4] ss:$112 sps:$4 sm:$0xff]   ;;  %v18135_v1 = vld [vmem:[#allocation2 + $0xc] ss:$112 sps:$4 sm:$0xff]  }
  0x94   :  { %9586 = vmatprep.subr.bf16.mxu0 %v18133_v0  ;;  %v18137_v2 = vld [vmem:[#allocation2] ss:$112 sps:$4 sm:$0xff]   ;;  %v18138_v3 = vld [vmem:[#allocation2 + $0x8] ss:$112 sps:$4 sm:$0xff]   ;;  %9758 = vmatprep.subr.bf16.mxu1 %v18135_v1  ;;  %v18139_v4 = vld [vmem:[#allocation2 + $0xe4] ss:$112 sps:$4 sm:$0xff]  }
  0x95   :  { %9587 = vmatpush1.bf16.msra.mxu0 %v18137_v2  ;;  %9759 = vmatpush1.bf16.msra.mxu1 %v18138_v3  ;;  %v18141_v5 = vld [vmem:[#allocation2 + $0xec] ss:$112 sps:$4 sm:$0xff]   ;;  %v18143_v6 = vld [vmem:[#allocation2 + $0xe0] ss:$112 sps:$4 sm:$0xff]   ;;  %v18144_v7 = vld [vmem:[#allocation2 + $0xe8] ss:$112 sps:$4 sm:$0xff]  }
  0x96   :  { %9588 = vmatprep.subr.bf16.mxu0 %v18139_v4  ;;  %9760 = vmatprep.subr.bf16.mxu1 %v18141_v5  ;;  %v18145_v8 = vld [vmem:[#allocation2 + $0x1c4] ss:$112 sps:$4 sm:$0xff]   ;;  %v18147_v9 = vld [vmem:[#allocation2 + $0x1cc] ss:$112 sps:$4 sm:$0xff]   ;;  %v18149_v10 = vld [vmem:[#allocation2 + $0x1c0] ss:$112 sps:$4 sm:$0xff]  }
  0x97   :  { %v18150_v11 = vld [vmem:[#allocation2 + $0x1c8] ss:$112 sps:$4 sm:$0xff]   ;;  %v18151_v12 = vld [vmem:[#allocation2 + $0x2a4] ss:$112 sps:$4 sm:$0xff]   ;;  %v18153_v13 = vld [vmem:[#allocation2 + $0x2ac] ss:$112 sps:$4 sm:$0xff]  }
  0x98   :  { %v18155_v14 = vld [vmem:[#allocation2 + $0x2a0] ss:$112 sps:$4 sm:$0xff]   ;;  %v18156_v15 = vld [vmem:[#allocation2 + $0x2a8] ss:$112 sps:$4 sm:$0xff]   ;;  %v18157_v16 = vld [vmem:[#allocation2 + $0x384] ss:$112 sps:$4 sm:$0xff]  }
  0x99   :  { %9589 = vmatpush1.bf16.msra.mxu0 %v18143_v6  ;;  %9761 = vmatpush1.bf16.msra.mxu1 %v18144_v7  ;;  %v18159_v17 = vld [vmem:[#allocation2 + $0x38c] ss:$112 sps:$4 sm:$0xff]   ;;  %v18161_v18 = vld [vmem:[#allocation2 + $0x380] ss:$112 sps:$4 sm:$0xff]   ;;  %v18162_v19 = vld [vmem:[#allocation2 + $0x388] ss:$112 sps:$4 sm:$0xff]  }
  0x9a   :  { %9590 = vmatprep.subr.bf16.mxu0 %v18145_v8  ;;  %9762 = vmatprep.subr.bf16.mxu1 %v18147_v9  ;;  %v18163_v20 = vld [vmem:[#allocation2 + $0x464] ss:$112 sps:$4 sm:$0xff]   ;;  %v18165_v21 = vld [vmem:[#allocation2 + $0x46c] ss:$112 sps:$4 sm:$0xff]   ;;  %v18167_v22 = vld [vmem:[#allocation2 + $0x460] ss:$112 sps:$4 sm:$0xff]  }
  0x9b   :  { %v18168_v23 = vld [vmem:[#allocation2 + $0x468] ss:$112 sps:$4 sm:$0xff]   ;;  %v18169_v24 = vld [vmem:[#allocation2 + $0x544] ss:$112 sps:$4 sm:$0xff]   ;;  %v18171_v25 = vld [vmem:[#allocation2 + $0x54c] ss:$112 sps:$4 sm:$0xff]  }
  0x9c   :  { %v18173_v26 = vld [vmem:[#allocation2 + $0x540] ss:$112 sps:$4 sm:$0xff]   ;;  %v18174_v27 = vld [vmem:[#allocation2 + $0x548] ss:$112 sps:$4 sm:$0xff]   ;;  %v18175_v28 = vld [vmem:[#allocation2 + $0x624] ss:$112 sps:$4 sm:$0xff]  }
  0x9d   :  { %9591 = vmatpush1.bf16.msra.mxu0 %v18149_v10  ;;  %9763 = vmatpush1.bf16.msra.mxu1 %v18150_v11  ;;  %v18177_v29 = vld [vmem:[#allocation2 + $0x62c] ss:$112 sps:$4 sm:$0xff]   ;;  %v18179_v30 = vld [vmem:[#allocation2 + $0x620] ss:$112 sps:$4 sm:$0xff]   ;;  %v18180_v31 = vld [vmem:[#allocation2 + $0x628] ss:$112 sps:$4 sm:$0xff]  }
  0x9e   :  { %9592 = vmatprep.subr.bf16.mxu0 %v18151_v12  ;;  %9764 = vmatprep.subr.bf16.mxu1 %v18153_v13  ;;  %v18181_v32 = vld [vmem:[#allocation2 + $0x704] ss:$112 sps:$4 sm:$0xff]   ;;  %v18183_v33 = vld [vmem:[#allocation2 + $0x70c] ss:$112 sps:$4 sm:$0xff]   ;;  %v18185_v34 = vld [vmem:[#allocation2 + $0x700] ss:$112 sps:$4 sm:$0xff]  }
  0x9f   :  { %v18186_v35 = vld [vmem:[#allocation2 + $0x708] ss:$112 sps:$4 sm:$0xff]   ;;  %v18187_v36 = vld [vmem:[#allocation2 + $0x7e4] ss:$112 sps:$4 sm:$0xff]   ;;  %v18189_v37 = vld [vmem:[#allocation2 + $0x7ec] ss:$112 sps:$4 sm:$0xff]  }
  0xa0   :  { %v18191_v38 = vld [vmem:[#allocation2 + $0x7e0] ss:$112 sps:$4 sm:$0xff]   ;;  %v18192_v39 = vld [vmem:[#allocation2 + $0x7e8] ss:$112 sps:$4 sm:$0xff]   ;;  %v18193_v40 = vld [vmem:[#allocation2 + $0x8c4] ss:$112 sps:$4 sm:$0xff]  }
  0xa1   :  { %9593 = vmatpush1.bf16.msra.mxu0 %v18155_v14  ;;  %9765 = vmatpush1.bf16.msra.mxu1 %v18156_v15  ;;  %v18195_v41 = vld [vmem:[#allocation2 + $0x8cc] ss:$112 sps:$4 sm:$0xff]   ;;  %v18197_v42 = vld [vmem:[#allocation2 + $0x8c0] ss:$112 sps:$4 sm:$0xff]   ;;  %v18198_v43 = vld [vmem:[#allocation2 + $0x8c8] ss:$112 sps:$4 sm:$0xff]  }
  0xa2   :  { %9594 = vmatprep.subr.bf16.mxu0 %v18157_v16  ;;  %9766 = vmatprep.subr.bf16.mxu1 %v18159_v17  ;;  %v18199_v44 = vld [vmem:[#allocation2 + $0x9a4] ss:$112 sps:$4 sm:$0xff]   ;;  %v18201_v45 = vld [vmem:[#allocation2 + $0x9ac] ss:$112 sps:$4 sm:$0xff]   ;;  %v18203_v46 = vld [vmem:[#allocation2 + $0x9a0] ss:$112 sps:$4 sm:$0xff]  }
  0xa3   :  { %v18229_v47 = vld [vmem:[%s21403_s0 + $0x4] ss:$28 sps:$4 sm:$0xff]   ;;  %v18204_v48 = vld [vmem:[#allocation2 + $0x9a8] ss:$112 sps:$4 sm:$0xff]   ;;  %v18207_v50 = vld [vmem:[#allocation2 + $0xa8c] ss:$112 sps:$4 sm:$0xff]  }
  0xa4   :  { %v18205_v49 = vld [vmem:[#allocation2 + $0xa84] ss:$112 sps:$4 sm:$0xff]   ;;  %9618 = vmatprep.mubr.bf16.mxu0 %v18229_v47  ;;  %9790 = vmatprep.mubr.bf16.mxu1 %v18229_v47  ;;  %v18209_v51 = vld [vmem:[#allocation2 + $0xa80] ss:$112 sps:$4 sm:$0xff]   ;;  %v18210_v52 = vld [vmem:[#allocation2 + $0xa88] ss:$112 sps:$4 sm:$0xff]  }
  0xa5   :  { %9595 = vmatpush1.bf16.msra.mxu0 %v18161_v18  ;;  %9767 = vmatpush1.bf16.msra.mxu1 %v18162_v19  ;;  %v18211_v53 = vld [vmem:[#allocation2 + $0xb64] ss:$112 sps:$4 sm:$0xff]   ;;  %v18213_v54 = vld [vmem:[#allocation2 + $0xb6c] ss:$112 sps:$4 sm:$0xff]   ;;  %v18215_v55 = vld [vmem:[#allocation2 + $0xb60] ss:$112 sps:$4 sm:$0xff]  }
  0xa6   :  { %9596 = vmatprep.subr.bf16.mxu0 %v18163_v20  ;;  %9768 = vmatprep.subr.bf16.mxu1 %v18165_v21  ;;  %v18216_v56 = vld [vmem:[#allocation2 + $0xb68] ss:$112 sps:$4 sm:$0xff]   ;;  %v18217_v57 = vld [vmem:[#allocation2 + $0xc44] ss:$112 sps:$4 sm:$0xff]   ;;  %v18219_v58 = vld [vmem:[#allocation2 + $0xc4c] ss:$112 sps:$4 sm:$0xff]  }
  0xa7   :  { %v18221_v59 = vld [vmem:[#allocation2 + $0xc40] ss:$112 sps:$4 sm:$0xff]   ;;  %v18222_v60 = vld [vmem:[#allocation2 + $0xc48] ss:$112 sps:$4 sm:$0xff]   ;;  %v18223_v61 = vld [vmem:[#allocation2 + $0xd24] ss:$112 sps:$4 sm:$0xff]  }
  0xa8   :  { %v18225_v62 = vld [vmem:[#allocation2 + $0xd2c] ss:$112 sps:$4 sm:$0xff]   ;;  %v18227_v63 = vld [vmem:[#allocation2 + $0xd20] ss:$112 sps:$4 sm:$0xff]   ;;  %v18228_v0 = vld [vmem:[#allocation2 + $0xd28] ss:$112 sps:$4 sm:$0xff]  }
  0xa9   :  { %9597 = vmatpush1.bf16.msra.mxu0 %v18167_v22  ;;  %9769 = vmatpush1.bf16.msra.mxu1 %v18168_v23  ;;  %v18233_v1 = vld [vmem:[#allocation2 + $0xe04] ss:$112 sps:$4 sm:$0xff]   ;;  %v18236_v2 = vld [vmem:[#allocation2 + $0xe0c] ss:$112 sps:$4 sm:$0xff]   ;;  %v18231_v3 = vld [vmem:[#allocation2 + $0xe00] ss:$112 sps:$4 sm:$0xff]  }
  0xaa   :  { %9598 = vmatprep.subr.bf16.mxu0 %v18169_v24  ;;  %9770 = vmatprep.subr.bf16.mxu1 %v18171_v25  ;;  %v18234_v4 = vld [vmem:[#allocation2 + $0xe08] ss:$112 sps:$4 sm:$0xff]   ;;  %v18237_v5 = vld [vmem:[%s21403_s0] ss:$28 sps:$4 sm:$0xff]   ;;  %v18240_v6 = vld [vmem:[#allocation2 + $0xee4] ss:$112 sps:$4 sm:$0xff]  }
  0xab   :  { %v18243_v7 = vld [vmem:[#allocation2 + $0xeec] ss:$112 sps:$4 sm:$0xff]   ;;  %v18238_v8 = vld [vmem:[#allocation2 + $0xee0] ss:$112 sps:$4 sm:$0xff]   ;;  %v18241_v9 = vld [vmem:[#allocation2 + $0xee8] ss:$112 sps:$4 sm:$0xff]  }
  0xac   :  { %v18246_v10 = vld [vmem:[#allocation2 + $0xfc4] ss:$112 sps:$4 sm:$0xff]   ;;  %v18249_v11 = vld [vmem:[#allocation2 + $0xfcc] ss:$112 sps:$4 sm:$0xff]   ;;  %v18244_v12 = vld [vmem:[#allocation2 + $0xfc0] ss:$112 sps:$4 sm:$0xff]  }
  0xad   :  { %9599 = vmatpush1.bf16.msra.mxu0 %v18173_v26  ;;  %9771 = vmatpush1.bf16.msra.mxu1 %v18174_v27  ;;  %v18247_v13 = vld [vmem:[#allocation2 + $0xfc8] ss:$112 sps:$4 sm:$0xff]   ;;  %v18252_v14 = vld [vmem:[#allocation2 + $0x10a4] ss:$112 sps:$4 sm:$0xff]   ;;  %v18255_v15 = vld [vmem:[#allocation2 + $0x10ac] ss:$112 sps:$4 sm:$0xff]  }
  0xae   :  { %9600 = vmatprep.subr.bf16.mxu0 %v18175_v28  ;;  %9772 = vmatprep.subr.bf16.mxu1 %v18177_v29  ;;  %v18250_v16 = vld [vmem:[#allocation2 + $0x10a0] ss:$112 sps:$4 sm:$0xff]   ;;  %v18253_v17 = vld [vmem:[#allocation2 + $0x10a8] ss:$112 sps:$4 sm:$0xff]   ;;  %v18258_v18 = vld [vmem:[#allocation2 + $0x1184] ss:$112 sps:$4 sm:$0xff]  }
  0xaf   :  { %v18261_v19 = vld [vmem:[#allocation2 + $0x118c] ss:$112 sps:$4 sm:$0xff]   ;;  %v18256_v20 = vld [vmem:[#allocation2 + $0x1180] ss:$112 sps:$4 sm:$0xff]   ;;  %v18259_v21 = vld [vmem:[#allocation2 + $0x1188] ss:$112 sps:$4 sm:$0xff]  }
  0xb0   :  { %v18264_v22 = vld [vmem:[#allocation2 + $0x1264] ss:$112 sps:$4 sm:$0xff]   ;;  %v18267_v23 = vld [vmem:[#allocation2 + $0x126c] ss:$112 sps:$4 sm:$0xff]   ;;  %v18262_v24 = vld [vmem:[#allocation2 + $0x1260] ss:$112 sps:$4 sm:$0xff]  }
  0xb1   :  { %9601 = vmatpush1.bf16.msra.mxu0 %v18179_v30  ;;  %9773 = vmatpush1.bf16.msra.mxu1 %v18180_v31  ;;  %v18265_v25 = vld [vmem:[#allocation2 + $0x1268] ss:$112 sps:$4 sm:$0xff]   ;;  %v18270_v26 = vld [vmem:[#allocation2 + $0x1344] ss:$112 sps:$4 sm:$0xff]   ;;  %v18273_v27 = vld [vmem:[#allocation2 + $0x134c] ss:$112 sps:$4 sm:$0xff]  }
  0xb2   :  { %9602 = vmatprep.subr.bf16.mxu0 %v18181_v32  ;;  %9774 = vmatprep.subr.bf16.mxu1 %v18183_v33  ;;  %v18268_v28 = vld [vmem:[#allocation2 + $0x1340] ss:$112 sps:$4 sm:$0xff]   ;;  %v18328_v29 = vld [vmem:[%s21403_s0 + $0xc] ss:$28 sps:$4 sm:$0xff]   ;;  %v18276_v31 = vld [vmem:[#allocation2 + $0x1424] ss:$112 sps:$4 sm:$0xff]  }
  0xb3   :  { %v18271_v30 = vld [vmem:[#allocation2 + $0x1348] ss:$112 sps:$4 sm:$0xff]   ;;  %v18279_v32 = vld [vmem:[#allocation2 + $0x142c] ss:$112 sps:$4 sm:$0xff]   ;;  %v18274_v33 = vld [vmem:[#allocation2 + $0x1420] ss:$112 sps:$4 sm:$0xff]  }
  0xb4   :  { %v18300_v47 = vld [vmem:[#allocation2 + $0x17a4] ss:$112 sps:$4 sm:$0xff]   ;;  %vm20755_vm0 = vmmov 0  }
  0xb5   :  { %9603 = vmatpush1.bf16.msra.mxu0 %v18185_v34  ;;  %9775 = vmatpush1.bf16.msra.mxu1 %v18186_v35  ;;  %v18277_v34 = vld [vmem:[#allocation2 + $0x1428] ss:$112 sps:$4 sm:$0xff]   ;;  %v18282_v35 = vld [vmem:[#allocation2 + $0x1504] ss:$112 sps:$4 sm:$0xff]  }
  0xb6   :  { %9604 = vmatprep.subr.bf16.mxu0 %v18187_v36  ;;  %9776 = vmatprep.subr.bf16.mxu1 %v18189_v37  ;;  %v18285_v36 = vld [vmem:[#allocation2 + $0x150c] ss:$112 sps:$4 sm:$0xff]   ;;  %v18280_v37 = vld [vmem:[#allocation2 + $0x1500] ss:$112 sps:$4 sm:$0xff]  }
  0xb9   :  { %9605 = vmatpush1.bf16.msra.mxu0 %v18191_v38  ;;  %9777 = vmatpush1.bf16.msra.mxu1 %v18192_v39  ;;  %v18283_v38 = vld [vmem:[#allocation2 + $0x1508] ss:$112 sps:$4 sm:$0xff]   ;;  %v18288_v39 = vld [vmem:[#allocation2 + $0x15e4] ss:$112 sps:$4 sm:$0xff]  }
  0xba   :  { %9606 = vmatprep.subr.bf16.mxu0 %v18193_v40  ;;  %9778 = vmatprep.subr.bf16.mxu1 %v18195_v41  ;;  %v18291_v40 = vld [vmem:[#allocation2 + $0x15ec] ss:$112 sps:$4 sm:$0xff]   ;;  %v18286_v41 = vld [vmem:[#allocation2 + $0x15e0] ss:$112 sps:$4 sm:$0xff]  }
  0xbd   :  { %9607 = vmatpush1.bf16.msra.mxu0 %v18197_v42  ;;  %9779 = vmatpush1.bf16.msra.mxu1 %v18198_v43  ;;  %v18289_v42 = vld [vmem:[#allocation2 + $0x15e8] ss:$112 sps:$4 sm:$0xff]   ;;  %v18294_v43 = vld [vmem:[#allocation2 + $0x16c4] ss:$112 sps:$4 sm:$0xff]  }
  0xbe   :  { %9608 = vmatprep.subr.bf16.mxu0 %v18199_v44  ;;  %9780 = vmatprep.subr.bf16.mxu1 %v18201_v45  ;;  %v18297_v44 = vld [vmem:[#allocation2 + $0x16cc] ss:$112 sps:$4 sm:$0xff]   ;;  %v18292_v45 = vld [vmem:[#allocation2 + $0x16c0] ss:$112 sps:$4 sm:$0xff]  }
  0xc1   :  { %9609 = vmatpush1.bf16.msra.mxu0 %v18203_v46  ;;  %9781 = vmatpush1.bf16.msra.mxu1 %v18204_v48  ;;  %v18295_v46 = vld [vmem:[#allocation2 + $0x16c8] ss:$112 sps:$4 sm:$0xff]   ;;  %v18303_v48 = vld [vmem:[#allocation2 + $0x17ac] ss:$112 sps:$4 sm:$0xff]  }
  0xc2   :  { %9610 = vmatprep.subr.bf16.mxu0 %v18205_v49  ;;  %9782 = vmatprep.subr.bf16.mxu1 %v18207_v50  ;;  %v18298_v49 = vld [vmem:[#allocation2 + $0x17a0] ss:$112 sps:$4 sm:$0xff]   ;;  %v18301_v50 = vld [vmem:[#allocation2 + $0x17a8] ss:$112 sps:$4 sm:$0xff]  }
  0xc5   :  { %9611 = vmatpush1.bf16.msra.mxu0 %v18209_v51  ;;  %9783 = vmatpush1.bf16.msra.mxu1 %v18210_v52  ;;  %v18306_v51 = vld [vmem:[#allocation2 + $0x1884] ss:$112 sps:$4 sm:$0xff]   ;;  %v18309_v52 = vld [vmem:[#allocation2 + $0x188c] ss:$112 sps:$4 sm:$0xff]  }
  0xc6   :  { %9612 = vmatprep.subr.bf16.mxu0 %v18211_v53  ;;  %9784 = vmatprep.subr.bf16.mxu1 %v18213_v54  ;;  %v18304_v53 = vld [vmem:[#allocation2 + $0x1880] ss:$112 sps:$4 sm:$0xff]   ;;  %v18307_v54 = vld [vmem:[#allocation2 + $0x1888] ss:$112 sps:$4 sm:$0xff]  }
  0xc9   :  { %9613 = vmatpush1.bf16.msra.mxu0 %v18215_v55  ;;  %9785 = vmatpush1.bf16.msra.mxu1 %v18216_v56  ;;  %v18312_v55 = vld [vmem:[#allocation2 + $0x1964] ss:$112 sps:$4 sm:$0xff]   ;;  %v18315_v56 = vld [vmem:[#allocation2 + $0x196c] ss:$112 sps:$4 sm:$0xff]  }
  0xca   :  { %9614 = vmatprep.subr.bf16.mxu0 %v18217_v57  ;;  %9786 = vmatprep.subr.bf16.mxu1 %v18219_v58  ;;  %v18310_v57 = vld [vmem:[#allocation2 + $0x1960] ss:$112 sps:$4 sm:$0xff]   ;;  %v18313_v58 = vld [vmem:[#allocation2 + $0x1968] ss:$112 sps:$4 sm:$0xff]  }
  0xcd   :  { %9615 = vmatpush1.bf16.msra.mxu0 %v18221_v59  ;;  %9787 = vmatpush1.bf16.msra.mxu1 %v18222_v60  ;;  %v18318_v59 = vld [vmem:[#allocation2 + $0x1a44] ss:$112 sps:$4 sm:$0xff]   ;;  %v18321_v60 = vld [vmem:[#allocation2 + $0x1a4c] ss:$112 sps:$4 sm:$0xff]  }
  0xce   :  { %9616 = vmatprep.subr.bf16.mxu0 %v18223_v61  ;;  %9788 = vmatprep.subr.bf16.mxu1 %v18225_v62  ;;  %v18316_v61 = vld [vmem:[#allocation2 + $0x1a40] ss:$112 sps:$4 sm:$0xff]   ;;  %v18319_v62 = vld [vmem:[#allocation2 + $0x1a48] ss:$112 sps:$4 sm:$0xff]  }
  0xd1   :  { %9617 = vmatpush1.bf16.msra.mxu0 %v18227_v63  ;;  %9789 = vmatpush1.bf16.msra.mxu1 %v18228_v0  ;;  %v18324_v63 = vld [vmem:[#allocation2 + $0x1b24] ss:$112 sps:$4 sm:$0xff]   ;;  %v18327_v0 = vld [vmem:[#allocation2 + $0x1b2c] ss:$112 sps:$4 sm:$0xff]  }
  0xd2   :  { %9629 = vmatprep.subr.bf16.mxu0 %v18233_v1  ;;  %9801 = vmatprep.subr.bf16.mxu1 %v18236_v2  ;;  %v18322_v1 = vld [vmem:[#allocation2 + $0x1b20] ss:$112 sps:$4 sm:$0xff]   ;;  %v18325_v2 = vld [vmem:[#allocation2 + $0x1b28] ss:$112 sps:$4 sm:$0xff]  }
  0xd4   :  { %9619 = vmatmul.mubr.bf16.vlgmr.msra.gmra.mrb[0].mxu0 %v18237_v5  ;;  %9791 = vmatmul.mubr.bf16.vlgmr.msra.gmra.mrb[0].mxu1 %v18237_v5  ;;  %v18330_v5 = vld [vmem:[#allocation2 + $0x1c00] ss:$112 sps:$4 sm:$0xff]  }
  0xd5   :  { %9630 = vmatpush1.bf16.msra.mxu0 %v18231_v3  ;;  %9802 = vmatpush1.bf16.msra.mxu1 %v18234_v4  ;;  %v18332_v3 = vld [vmem:[#allocation2 + $0x1c04] ss:$112 sps:$4 sm:$0xff]   ;;  %v18335_v4 = vld [vmem:[#allocation2 + $0x1c0c] ss:$112 sps:$4 sm:$0xff]  }
  0xd6   :  { %9631 = vmatprep.subr.bf16.mxu0 %v18240_v6  ;;  %9803 = vmatprep.subr.bf16.mxu1 %v18243_v7  ;;  %v18333_v6 = vld [vmem:[#allocation2 + $0x1c08] ss:$112 sps:$4 sm:$0xff]  }
  0xd7   :  { %9661 = vmatprep.mubr.bf16.mxu0 %v18328_v29  ;;  %9833 = vmatprep.mubr.bf16.mxu1 %v18328_v29  ;;  %v18336_v7 = vld [vmem:[%s21403_s0 + $0x8] ss:$28 sps:$4 sm:$0xff]  }
  0xd8   :  { %v18369_v29 = vld [vmem:[#allocation2 + $0x2144] ss:$112 sps:$4 sm:$0xff]  }
  0xd9   :  { %9632 = vmatpush1.bf16.msra.mxu0 %v18238_v8  ;;  %9804 = vmatpush1.bf16.msra.mxu1 %v18241_v9  ;;  %v18339_v8 = vld [vmem:[#allocation2 + $0x1ce4] ss:$112 sps:$4 sm:$0xff]   ;;  %v18342_v9 = vld [vmem:[#allocation2 + $0x1cec] ss:$112 sps:$4 sm:$0xff]  }
  0xda   :  { %9633 = vmatprep.subr.bf16.mxu0 %v18246_v10  ;;  %9805 = vmatprep.subr.bf16.mxu1 %v18249_v11  ;;  %v18337_v10 = vld [vmem:[#allocation2 + $0x1ce0] ss:$112 sps:$4 sm:$0xff]  }
  0xdb   :  { %v18427_v11 = vld [vmem:[%s21403_s0 + $0x14] ss:$28 sps:$4 sm:$0xff]  }
  0xdd   :  { %9634 = vmatpush1.bf16.msra.mxu0 %v18244_v12  ;;  %9806 = vmatpush1.bf16.msra.mxu1 %v18247_v13  ;;  %v18340_v12 = vld [vmem:[#allocation2 + $0x1ce8] ss:$112 sps:$4 sm:$0xff]   ;;  %v18345_v13 = vld [vmem:[#allocation2 + $0x1dc4] ss:$112 sps:$4 sm:$0xff]  }
  0xde   :  { %9635 = vmatprep.subr.bf16.mxu0 %v18252_v14  ;;  %9807 = vmatprep.subr.bf16.mxu1 %v18255_v15  ;;  %v18348_v14 = vld [vmem:[#allocation2 + $0x1dcc] ss:$112 sps:$4 sm:$0xff]   ;;  %v18343_v15 = vld [vmem:[#allocation2 + $0x1dc0] ss:$112 sps:$4 sm:$0xff]  }
  0xe1   :  { %9636 = vmatpush1.bf16.msra.mxu0 %v18250_v16  ;;  %9808 = vmatpush1.bf16.msra.mxu1 %v18253_v17  ;;  %v18346_v16 = vld [vmem:[#allocation2 + $0x1dc8] ss:$112 sps:$4 sm:$0xff]   ;;  %v18351_v17 = vld [vmem:[#allocation2 + $0x1ea4] ss:$112 sps:$4 sm:$0xff]  }
  0xe2   :  { %9637 = vmatprep.subr.bf16.mxu0 %v18258_v18  ;;  %9809 = vmatprep.subr.bf16.mxu1 %v18261_v19  ;;  %v18354_v18 = vld [vmem:[#allocation2 + $0x1eac] ss:$112 sps:$4 sm:$0xff]   ;;  %v18349_v19 = vld [vmem:[#allocation2 + $0x1ea0] ss:$112 sps:$4 sm:$0xff]  }
  0xe5   :  { %9638 = vmatpush1.bf16.msra.mxu0 %v18256_v20  ;;  %9810 = vmatpush1.bf16.msra.mxu1 %v18259_v21  ;;  %v18352_v20 = vld [vmem:[#allocation2 + $0x1ea8] ss:$112 sps:$4 sm:$0xff]   ;;  %v18357_v21 = vld [vmem:[#allocation2 + $0x1f84] ss:$112 sps:$4 sm:$0xff]  }
  0xe6   :  { %9639 = vmatprep.subr.bf16.mxu0 %v18264_v22  ;;  %9811 = vmatprep.subr.bf16.mxu1 %v18267_v23  ;;  %v18360_v22 = vld [vmem:[#allocation2 + $0x1f8c] ss:$112 sps:$4 sm:$0xff]   ;;  %v18355_v23 = vld [vmem:[#allocation2 + $0x1f80] ss:$112 sps:$4 sm:$0xff]  }
  0xe9   :  { %9640 = vmatpush1.bf16.msra.mxu0 %v18262_v24  ;;  %9812 = vmatpush1.bf16.msra.mxu1 %v18265_v25  ;;  %v18358_v24 = vld [vmem:[#allocation2 + $0x1f88] ss:$112 sps:$4 sm:$0xff]   ;;  %v18363_v25 = vld [vmem:[#allocation2 + $0x2064] ss:$112 sps:$4 sm:$0xff]  }
  0xea   :  { %9641 = vmatprep.subr.bf16.mxu0 %v18270_v26  ;;  %9813 = vmatprep.subr.bf16.mxu1 %v18273_v27  ;;  %v18366_v26 = vld [vmem:[#allocation2 + $0x206c] ss:$112 sps:$4 sm:$0xff]   ;;  %v18361_v27 = vld [vmem:[#allocation2 + $0x2060] ss:$112 sps:$4 sm:$0xff]  }
  0xed   :  { %9642 = vmatpush1.bf16.msra.mxu0 %v18268_v28  ;;  %9814 = vmatpush1.bf16.msra.mxu1 %v18271_v30  ;;  %v18364_v28 = vld [vmem:[#allocation2 + $0x2068] ss:$112 sps:$4 sm:$0xff]   ;;  %v18372_v30 = vld [vmem:[#allocation2 + $0x214c] ss:$112 sps:$4 sm:$0xff]  }
  0xee   :  { %9643 = vmatprep.subr.bf16.mxu0 %v18276_v31  ;;  %9815 = vmatprep.subr.bf16.mxu1 %v18279_v32  ;;  %v18367_v31 = vld [vmem:[#allocation2 + $0x2140] ss:$112 sps:$4 sm:$0xff]   ;;  %v18370_v32 = vld [vmem:[#allocation2 + $0x2148] ss:$112 sps:$4 sm:$0xff]  }
  0xf1   :  { %9644 = vmatpush1.bf16.msra.mxu0 %v18274_v33  ;;  %9816 = vmatpush1.bf16.msra.mxu1 %v18277_v34  ;;  %v18375_v33 = vld [vmem:[#allocation2 + $0x2224] ss:$112 sps:$4 sm:$0xff]   ;;  %v18378_v34 = vld [vmem:[#allocation2 + $0x222c] ss:$112 sps:$4 sm:$0xff]  }
  0xf2   :  { %9645 = vmatprep.subr.bf16.mxu0 %v18282_v35  ;;  %9817 = vmatprep.subr.bf16.mxu1 %v18285_v36  ;;  %v18373_v35 = vld [vmem:[#allocation2 + $0x2220] ss:$112 sps:$4 sm:$0xff]   ;;  %v18376_v36 = vld [vmem:[#allocation2 + $0x2228] ss:$112 sps:$4 sm:$0xff]  }
  0xf5   :  { %9646 = vmatpush1.bf16.msra.mxu0 %v18280_v37  ;;  %9818 = vmatpush1.bf16.msra.mxu1 %v18283_v38  ;;  %v18381_v37 = vld [vmem:[#allocation2 + $0x2304] ss:$112 sps:$4 sm:$0xff]   ;;  %v18384_v38 = vld [vmem:[#allocation2 + $0x230c] ss:$112 sps:$4 sm:$0xff]  }
  0xf6   :  { %9647 = vmatprep.subr.bf16.mxu0 %v18288_v39  ;;  %9819 = vmatprep.subr.bf16.mxu1 %v18291_v40  ;;  %v18379_v39 = vld [vmem:[#allocation2 + $0x2300] ss:$112 sps:$4 sm:$0xff]   ;;  %v18382_v40 = vld [vmem:[#allocation2 + $0x2308] ss:$112 sps:$4 sm:$0xff]  }
  0xf9   :  { %9648 = vmatpush1.bf16.msra.mxu0 %v18286_v41  ;;  %9820 = vmatpush1.bf16.msra.mxu1 %v18289_v42  ;;  %v18387_v41 = vld [vmem:[#allocation2 + $0x23e4] ss:$112 sps:$4 sm:$0xff]   ;;  %v18390_v42 = vld [vmem:[#allocation2 + $0x23ec] ss:$112 sps:$4 sm:$0xff]  }
  0xfa   :  { %9649 = vmatprep.subr.bf16.mxu0 %v18294_v43  ;;  %9821 = vmatprep.subr.bf16.mxu1 %v18297_v44  ;;  %v18385_v43 = vld [vmem:[#allocation2 + $0x23e0] ss:$112 sps:$4 sm:$0xff]   ;;  %v18388_v44 = vld [vmem:[#allocation2 + $0x23e8] ss:$112 sps:$4 sm:$0xff]  }
  0xfd   :  { %9650 = vmatpush1.bf16.msra.mxu0 %v18292_v45  ;;  %9822 = vmatpush1.bf16.msra.mxu1 %v18295_v46  ;;  %v18393_v45 = vld [vmem:[#allocation2 + $0x24c4] ss:$112 sps:$4 sm:$0xff]   ;;  %v18396_v46 = vld [vmem:[#allocation2 + $0x24cc] ss:$112 sps:$4 sm:$0xff]  }
  0xfe   :  { %9651 = vmatprep.subr.bf16.mxu0 %v18300_v47  ;;  %9823 = vmatprep.subr.bf16.mxu1 %v18303_v48  ;;  %v18391_v47 = vld [vmem:[#allocation2 + $0x24c0] ss:$112 sps:$4 sm:$0xff]   ;;  %v18394_v48 = vld [vmem:[#allocation2 + $0x24c8] ss:$112 sps:$4 sm:$0xff]  }
 0x101   :  { %9652 = vmatpush1.bf16.msra.mxu0 %v18298_v49  ;;  %9824 = vmatpush1.bf16.msra.mxu1 %v18301_v50  ;;  %v18399_v49 = vld [vmem:[#allocation2 + $0x25a4] ss:$112 sps:$4 sm:$0xff]   ;;  %v18402_v50 = vld [vmem:[#allocation2 + $0x25ac] ss:$112 sps:$4 sm:$0xff]  }
 0x102   :  { %9653 = vmatprep.subr.bf16.mxu0 %v18306_v51  ;;  %9825 = vmatprep.subr.bf16.mxu1 %v18309_v52  ;;  %v18397_v51 = vld [vmem:[#allocation2 + $0x25a0] ss:$112 sps:$4 sm:$0xff]   ;;  %v18400_v52 = vld [vmem:[#allocation2 + $0x25a8] ss:$112 sps:$4 sm:$0xff]  }
 0x105   :  { %9654 = vmatpush1.bf16.msra.mxu0 %v18304_v53  ;;  %9826 = vmatpush1.bf16.msra.mxu1 %v18307_v54  ;;  %v18405_v53 = vld [vmem:[#allocation2 + $0x2684] ss:$112 sps:$4 sm:$0xff]   ;;  %v18408_v54 = vld [vmem:[#allocation2 + $0x268c] ss:$112 sps:$4 sm:$0xff]  }
 0x106   :  { %9655 = vmatprep.subr.bf16.mxu0 %v18312_v55  ;;  %9827 = vmatprep.subr.bf16.mxu1 %v18315_v56  ;;  %v18403_v55 = vld [vmem:[#allocation2 + $0x2680] ss:$112 sps:$4 sm:$0xff]   ;;  %v18406_v56 = vld [vmem:[#allocation2 + $0x2688] ss:$112 sps:$4 sm:$0xff]  }
 0x109   :  { %9656 = vmatpush1.bf16.msra.mxu0 %v18310_v57  ;;  %9828 = vmatpush1.bf16.msra.mxu1 %v18313_v58  ;;  %v18411_v57 = vld [vmem:[#allocation2 + $0x2764] ss:$112 sps:$4 sm:$0xff]   ;;  %v18414_v58 = vld [vmem:[#allocation2 + $0x276c] ss:$112 sps:$4 sm:$0xff]  }
 0x10a   :  { %9657 = vmatprep.subr.bf16.mxu0 %v18318_v59  ;;  %9829 = vmatprep.subr.bf16.mxu1 %v18321_v60  ;;  %v18409_v59 = vld [vmem:[#allocation2 + $0x2760] ss:$112 sps:$4 sm:$0xff]   ;;  %v18412_v60 = vld [vmem:[#allocation2 + $0x2768] ss:$112 sps:$4 sm:$0xff]  }
 0x10d   :  { %9658 = vmatpush1.bf16.msra.mxu0 %v18316_v61  ;;  %9830 = vmatpush1.bf16.msra.mxu1 %v18319_v62  ;;  %v18417_v61 = vld [vmem:[#allocation2 + $0x2844] ss:$112 sps:$4 sm:$0xff]   ;;  %v18420_v62 = vld [vmem:[#allocation2 + $0x284c] ss:$112 sps:$4 sm:$0xff]  }
 0x10e   :  { %9659 = vmatprep.subr.bf16.mxu0 %v18324_v63  ;;  %9831 = vmatprep.subr.bf16.mxu1 %v18327_v0  ;;  %v18415_v63 = vld [vmem:[#allocation2 + $0x2840] ss:$112 sps:$4 sm:$0xff]   ;;  %v18418_v0 = vld [vmem:[#allocation2 + $0x2848] ss:$112 sps:$4 sm:$0xff]  }
 0x111   :  { %9660 = vmatpush1.bf16.msra.mxu0 %v18322_v1  ;;  %9832 = vmatpush1.bf16.msra.mxu1 %v18325_v2  ;;  %v18423_v1 = vld [vmem:[#allocation2 + $0x2924] ss:$112 sps:$4 sm:$0xff]   ;;  %v18426_v2 = vld [vmem:[#allocation2 + $0x292c] ss:$112 sps:$4 sm:$0xff]  }
 0x112   :  { %9672 = vmatprep.subr.bf16.mxu0 %v18332_v3  ;;  %9844 = vmatprep.subr.bf16.mxu1 %v18335_v4  ;;  %v18421_v3 = vld [vmem:[#allocation2 + $0x2920] ss:$112 sps:$4 sm:$0xff]   ;;  %v18424_v4 = vld [vmem:[#allocation2 + $0x2928] ss:$112 sps:$4 sm:$0xff]  }
 0x114   :  { %9662 = vmatmul.mubr.bf16.vlgmr.msra.gmra.mrb[0].mxu0 %v18336_v7  ;;  %9834 = vmatmul.mubr.bf16.vlgmr.msra.gmra.mrb[0].mxu1 %v18336_v7  ;;  %v18429_v7 = vld [vmem:[#allocation2 + $0x2a00] ss:$112 sps:$4 sm:$0xff]  }
 0x115   :  { %9673 = vmatpush1.bf16.msra.mxu0 %v18330_v5  ;;  %9845 = vmatpush1.bf16.msra.mxu1 %v18333_v6  ;;  %v18431_v5 = vld [vmem:[#allocation2 + $0x2a04] ss:$112 sps:$4 sm:$0xff]   ;;  %v18434_v6 = vld [vmem:[#allocation2 + $0x2a0c] ss:$112 sps:$4 sm:$0xff]  }
 0x116   :  { %9674 = vmatprep.subr.bf16.mxu0 %v18339_v8  ;;  %9846 = vmatprep.subr.bf16.mxu1 %v18342_v9  ;;  %v18435_v8 = vld [vmem:[%s21403_s0 + $0x10] ss:$28 sps:$4 sm:$0xff]   ;;  %v18432_v9 = vld [vmem:[#allocation2 + $0x2a08] ss:$112 sps:$4 sm:$0xff]  }
 0x117   :  { %9704 = vmatprep.mubr.bf16.mxu0 %v18427_v11  ;;  %9876 = vmatprep.mubr.bf16.mxu1 %v18427_v11  ;;  %v18441_v11 = vld [vmem:[#allocation2 + $0x2aec] ss:$112 sps:$4 sm:$0xff]  }
 0x119   :  { %9675 = vmatpush1.bf16.msra.mxu0 %v18337_v10  ;;  %9847 = vmatpush1.bf16.msra.mxu1 %v18340_v12  ;;  %v18438_v10 = vld [vmem:[#allocation2 + $0x2ae4] ss:$112 sps:$4 sm:$0xff]   ;;  %v18436_v12 = vld [vmem:[#allocation2 + $0x2ae0] ss:$112 sps:$4 sm:$0xff]  }
 0x11a   :  { %9676 = vmatprep.subr.bf16.mxu0 %v18345_v13  ;;  %9848 = vmatprep.subr.bf16.mxu1 %v18348_v14  ;;  %v18439_v13 = vld [vmem:[#allocation2 + $0x2ae8] ss:$112 sps:$4 sm:$0xff]   ;;  %v18444_v14 = vld [vmem:[#allocation2 + $0x2bc4] ss:$112 sps:$4 sm:$0xff]  }
 0x11d   :  { %9677 = vmatpush1.bf16.msra.mxu0 %v18343_v15  ;;  %9849 = vmatpush1.bf16.msra.mxu1 %v18346_v16  ;;  %v18447_v15 = vld [vmem:[#allocation2 + $0x2bcc] ss:$112 sps:$4 sm:$0xff]   ;;  %v21413_v16 = vmov 0  }
 0x11e   :  { %9678 = vmatprep.subr.bf16.mxu0 %v18351_v17  ;;  %9850 = vmatprep.subr.bf16.mxu1 %v18354_v18  ;;  %v18442_v17 = vld [vmem:[#allocation2 + $0x2bc0] ss:$112 sps:$4 sm:$0xff]   ;;  %v18445_v18 = vld [vmem:[#allocation2 + $0x2bc8] ss:$112 sps:$4 sm:$0xff]  }
 0x121   :  { %9679 = vmatpush1.bf16.msra.mxu0 %v18349_v19  ;;  %9851 = vmatpush1.bf16.msra.mxu1 %v18352_v20  ;;  %v18450_v19 = vld [vmem:[#allocation2 + $0x2ca4] ss:$112 sps:$4 sm:$0xff]   ;;  %v18453_v20 = vld [vmem:[#allocation2 + $0x2cac] ss:$112 sps:$4 sm:$0xff]  }
 0x122   :  { %9680 = vmatprep.subr.bf16.mxu0 %v18357_v21  ;;  %9852 = vmatprep.subr.bf16.mxu1 %v18360_v22  ;;  %v18448_v21 = vld [vmem:[#allocation2 + $0x2ca0] ss:$112 sps:$4 sm:$0xff]   ;;  %v18451_v22 = vld [vmem:[#allocation2 + $0x2ca8] ss:$112 sps:$4 sm:$0xff]  }
 0x125   :  { %9681 = vmatpush1.bf16.msra.mxu0 %v18355_v23  ;;  %9853 = vmatpush1.bf16.msra.mxu1 %v18358_v24  ;;  %v18456_v23 = vld [vmem:[#allocation2 + $0x2d84] ss:$112 sps:$4 sm:$0xff]   ;;  %v18459_v24 = vld [vmem:[#allocation2 + $0x2d8c] ss:$112 sps:$4 sm:$0xff]  }
 0x126   :  { %9682 = vmatprep.subr.bf16.mxu0 %v18363_v25  ;;  %9854 = vmatprep.subr.bf16.mxu1 %v18366_v26  ;;  %v18454_v25 = vld [vmem:[#allocation2 + $0x2d80] ss:$112 sps:$4 sm:$0xff]   ;;  %v18457_v26 = vld [vmem:[#allocation2 + $0x2d88] ss:$112 sps:$4 sm:$0xff]  }
 0x129   :  { %9683 = vmatpush1.bf16.msra.mxu0 %v18361_v27  ;;  %9855 = vmatpush1.bf16.msra.mxu1 %v18364_v28  ;;  %v18462_v27 = vld [vmem:[#allocation2 + $0x2e64] ss:$112 sps:$4 sm:$0xff]   ;;  %v18465_v28 = vld [vmem:[#allocation2 + $0x2e6c] ss:$112 sps:$4 sm:$0xff]  }
 0x12a   :  { %9684 = vmatprep.subr.bf16.mxu0 %v18369_v29  ;;  %9856 = vmatprep.subr.bf16.mxu1 %v18372_v30  ;;  %v18460_v29 = vld [vmem:[#allocation2 + $0x2e60] ss:$112 sps:$4 sm:$0xff]   ;;  %v18463_v30 = vld [vmem:[#allocation2 + $0x2e68] ss:$112 sps:$4 sm:$0xff]  }
 0x12d   :  { %9685 = vmatpush1.bf16.msra.mxu0 %v18367_v31  ;;  %9857 = vmatpush1.bf16.msra.mxu1 %v18370_v32  ;;  %v18468_v31 = vld [vmem:[#allocation2 + $0x2f44] ss:$112 sps:$4 sm:$0xff]   ;;  %v18471_v32 = vld [vmem:[#allocation2 + $0x2f4c] ss:$112 sps:$4 sm:$0xff]  }
 0x12e   :  { %9686 = vmatprep.subr.bf16.mxu0 %v18375_v33  ;;  %9858 = vmatprep.subr.bf16.mxu1 %v18378_v34  ;;  %v18466_v33 = vld [vmem:[#allocation2 + $0x2f40] ss:$112 sps:$4 sm:$0xff]   ;;  %v18469_v34 = vld [vmem:[#allocation2 + $0x2f48] ss:$112 sps:$4 sm:$0xff]  }
 0x131   :  { %9687 = vmatpush1.bf16.msra.mxu0 %v18373_v35  ;;  %9859 = vmatpush1.bf16.msra.mxu1 %v18376_v36  ;;  %v18474_v35 = vld [vmem:[#allocation2 + $0x3024] ss:$112 sps:$4 sm:$0xff]   ;;  %v18477_v36 = vld [vmem:[#allocation2 + $0x302c] ss:$112 sps:$4 sm:$0xff]  }
 0x132   :  { %9688 = vmatprep.subr.bf16.mxu0 %v18381_v37  ;;  %9860 = vmatprep.subr.bf16.mxu1 %v18384_v38  ;;  %v18472_v37 = vld [vmem:[#allocation2 + $0x3020] ss:$112 sps:$4 sm:$0xff]   ;;  %v18475_v38 = vld [vmem:[#allocation2 + $0x3028] ss:$112 sps:$4 sm:$0xff]  }
 0x135   :  { %9689 = vmatpush1.bf16.msra.mxu0 %v18379_v39  ;;  %9861 = vmatpush1.bf16.msra.mxu1 %v18382_v40  ;;  %v18481_v39 = vld [vmem:[#allocation2 + $0x14] ss:$112 sps:$4 sm:$0xff]   ;;  %v18484_v40 = vld [vmem:[#allocation2 + $0x1c] ss:$112 sps:$4 sm:$0xff]  }
 0x136   :  { %9690 = vmatprep.subr.bf16.mxu0 %v18387_v41  ;;  %9862 = vmatprep.subr.bf16.mxu1 %v18390_v42  ;;  %v18478_v41 = vld [vmem:[%s21403_s0 + $0x18] ss:$28 sps:$4 sm:$0xff]   ;;  %v18479_v42 = vld [vmem:[#allocation2 + $0x10] ss:$112 sps:$4 sm:$0xff]  }
 0x139   :  { %9691 = vmatpush1.bf16.msra.mxu0 %v18385_v43  ;;  %9863 = vmatpush1.bf16.msra.mxu1 %v18388_v44  ;;  %v18482_v43 = vld [vmem:[#allocation2 + $0x18] ss:$112 sps:$4 sm:$0xff]   ;;  %v18487_v44 = vld [vmem:[#allocation2 + $0xf4] ss:$112 sps:$4 sm:$0xff]  }
 0x13a   :  { %9692 = vmatprep.subr.bf16.mxu0 %v18393_v45  ;;  %9864 = vmatprep.subr.bf16.mxu1 %v18396_v46  ;;  %v18490_v45 = vld [vmem:[#allocation2 + $0xfc] ss:$112 sps:$4 sm:$0xff]   ;;  %v18485_v46 = vld [vmem:[#allocation2 + $0xf0] ss:$112 sps:$4 sm:$0xff]  }
 0x13d   :  { %9693 = vmatpush1.bf16.msra.mxu0 %v18391_v47  ;;  %9865 = vmatpush1.bf16.msra.mxu1 %v18394_v48  ;;  %v18488_v47 = vld [vmem:[#allocation2 + $0xf8] ss:$112 sps:$4 sm:$0xff]   ;;  %v18493_v48 = vld [vmem:[#allocation2 + $0x1d4] ss:$112 sps:$4 sm:$0xff]  }
 0x13e   :  { %9694 = vmatprep.subr.bf16.mxu0 %v18399_v49  ;;  %9866 = vmatprep.subr.bf16.mxu1 %v18402_v50  ;;  %v18496_v49 = vld [vmem:[#allocation2 + $0x1dc] ss:$112 sps:$4 sm:$0xff]   ;;  %v20519_v50 = vld [vmem:[%s21403_s0 + $0x4] ss:$28 sps:$4 sm:$0xff]  }
 0x141   :  { %9695 = vmatpush1.bf16.msra.mxu0 %v18397_v51  ;;  %9867 = vmatpush1.bf16.msra.mxu1 %v18400_v52  ;;  %v18491_v51 = vld [vmem:[#allocation2 + $0x1d0] ss:$112 sps:$4 sm:$0xff]   ;;  %v18494_v52 = vld [vmem:[#allocation2 + $0x1d8] ss:$112 sps:$4 sm:$0xff]  }
 0x142   :  { %9696 = vmatprep.subr.bf16.mxu0 %v18405_v53  ;;  %9868 = vmatprep.subr.bf16.mxu1 %v18408_v54  ;;  %v18499_v53 = vld [vmem:[#allocation2 + $0x2b4] ss:$112 sps:$4 sm:$0xff]   ;;  %v18502_v54 = vld [vmem:[#allocation2 + $0x2bc] ss:$112 sps:$4 sm:$0xff]  }
 0x145   :  { %9697 = vmatpush1.bf16.msra.mxu0 %v18403_v55  ;;  %9869 = vmatpush1.bf16.msra.mxu1 %v18406_v56  ;;  %v18497_v55 = vld [vmem:[#allocation2 + $0x2b0] ss:$112 sps:$4 sm:$0xff]   ;;  %v18500_v56 = vld [vmem:[#allocation2 + $0x2b8] ss:$112 sps:$4 sm:$0xff]  }
 0x146   :  { %9698 = vmatprep.subr.bf16.mxu0 %v18411_v57  ;;  %9870 = vmatprep.subr.bf16.mxu1 %v18414_v58  ;;  %v18505_v57 = vld [vmem:[#allocation2 + $0x394] ss:$112 sps:$4 sm:$0xff]   ;;  %v18508_v58 = vld [vmem:[#allocation2 + $0x39c] ss:$112 sps:$4 sm:$0xff]  }
 0x149   :  { %9699 = vmatpush1.bf16.msra.mxu0 %v18409_v59  ;;  %9871 = vmatpush1.bf16.msra.mxu1 %v18412_v60  ;;  %v18503_v59 = vld [vmem:[#allocation2 + $0x390] ss:$112 sps:$4 sm:$0xff]   ;;  %v18506_v60 = vld [vmem:[#allocation2 + $0x398] ss:$112 sps:$4 sm:$0xff]  }
 0x14a   :  { %9700 = vmatprep.subr.bf16.mxu0 %v18417_v61  ;;  %9872 = vmatprep.subr.bf16.mxu1 %v18420_v62  ;;  %v18511_v61 = vld [vmem:[#allocation2 + $0x474] ss:$112 sps:$4 sm:$0xff]   ;;  %v18514_v62 = vld [vmem:[#allocation2 + $0x47c] ss:$112 sps:$4 sm:$0xff]  }
 0x14d   :  { %9701 = vmatpush1.bf16.msra.mxu0 %v18415_v63  ;;  %9873 = vmatpush1.bf16.msra.mxu1 %v18418_v0  ;;  %v18509_v63 = vld [vmem:[#allocation2 + $0x470] ss:$112 sps:$4 sm:$0xff]   ;;  %v18512_v0 = vld [vmem:[#allocation2 + $0x478] ss:$112 sps:$4 sm:$0xff]  }
 0x14e   :  { %9702 = vmatprep.subr.bf16.mxu0 %v18423_v1  ;;  %9874 = vmatprep.subr.bf16.mxu1 %v18426_v2  ;;  %v18517_v1 = vld [vmem:[#allocation2 + $0x554] ss:$112 sps:$4 sm:$0xff]   ;;  %v18520_v2 = vld [vmem:[#allocation2 + $0x55c] ss:$112 sps:$4 sm:$0xff]  }
 0x151   :  { %9703 = vmatpush1.bf16.msra.mxu0 %v18421_v3  ;;  %9875 = vmatpush1.bf16.msra.mxu1 %v18424_v4  ;;  %v18515_v3 = vld [vmem:[#allocation2 + $0x550] ss:$112 sps:$4 sm:$0xff]   ;;  %v18518_v4 = vld [vmem:[#allocation2 + $0x558] ss:$112 sps:$4 sm:$0xff]  }
 0x152   :  { %9715 = vmatprep.subr.bf16.mxu0 %v18431_v5  ;;  %9887 = vmatprep.subr.bf16.mxu1 %v18434_v6  ;;  %v18523_v5 = vld [vmem:[#allocation2 + $0x634] ss:$112 sps:$4 sm:$0xff]   ;;  %v18526_v6 = vld [vmem:[#allocation2 + $0x63c] ss:$112 sps:$4 sm:$0xff]  }
 0x154   :  { %9705 = vmatmul.mubr.bf16.vlgmr.msra.gmra.mrb[0].mxu0 %v18435_v8  ;;  %9877 = vmatmul.mubr.bf16.vlgmr.msra.gmra.mrb[0].mxu1 %v18435_v8  ;;  %v18524_v8 = vld [vmem:[#allocation2 + $0x638] ss:$112 sps:$4 sm:$0xff]  }
 0x155   :  { %9716 = vmatpush1.bf16.msra.mxu0 %v18429_v7  ;;  %9888 = vmatpush1.bf16.msra.mxu1 %v18432_v9  ;;  %v18521_v7 = vld [vmem:[#allocation2 + $0x630] ss:$112 sps:$4 sm:$0xff]   ;;  %v18529_v9 = vld [vmem:[#allocation2 + $0x714] ss:$112 sps:$4 sm:$0xff]  }
 0x156   :  { %9717 = vmatprep.subr.bf16.mxu0 %v18438_v10  ;;  %9889 = vmatprep.subr.bf16.mxu1 %v18441_v11  ;;  %v18532_v10 = vld [vmem:[#allocation2 + $0x71c] ss:$112 sps:$4 sm:$0xff]   ;;  %v18527_v11 = vld [vmem:[#allocation2 + $0x710] ss:$112 sps:$4 sm:$0xff]  }
 0x157   :  { %9747 = vmatprep.mubr.bf16.mxu0 %v21413_v16  ;;  %9919 = vmatprep.mubr.bf16.mxu1 %v21413_v16 }
 0x159   :  { %9718 = vmatpush1.bf16.msra.mxu0 %v18436_v12  ;;  %9890 = vmatpush1.bf16.msra.mxu1 %v18439_v13  ;;  %v18530_v12 = vld [vmem:[#allocation2 + $0x718] ss:$112 sps:$4 sm:$0xff]   ;;  %v18535_v13 = vld [vmem:[#allocation2 + $0x7f4] ss:$112 sps:$4 sm:$0xff]  }
 0x15a   :  { %9719 = vmatprep.subr.bf16.mxu0 %v18444_v14  ;;  %9891 = vmatprep.subr.bf16.mxu1 %v18447_v15  ;;  %v18538_v14 = vld [vmem:[#allocation2 + $0x7fc] ss:$112 sps:$4 sm:$0xff]   ;;  %v18533_v15 = vld [vmem:[#allocation2 + $0x7f0] ss:$112 sps:$4 sm:$0xff]  }
 0x15d   :  { %9720 = vmatpush1.bf16.msra.mxu0 %v18442_v17  ;;  %9892 = vmatpush1.bf16.msra.mxu1 %v18445_v18  ;;  %v18536_v17 = vld [vmem:[#allocation2 + $0x7f8] ss:$112 sps:$4 sm:$0xff]   ;;  %v18541_v18 = vld [vmem:[#allocation2 + $0x8d4] ss:$112 sps:$4 sm:$0xff]  }
 0x15e   :  { %9721 = vmatprep.subr.bf16.mxu0 %v18450_v19  ;;  %9893 = vmatprep.subr.bf16.mxu1 %v18453_v20  ;;  %v18544_v19 = vld [vmem:[#allocation2 + $0x8dc] ss:$112 sps:$4 sm:$0xff]   ;;  %v18539_v20 = vld [vmem:[#allocation2 + $0x8d0] ss:$112 sps:$4 sm:$0xff]  }
 0x161   :  { %9722 = vmatpush1.bf16.msra.mxu0 %v18448_v21  ;;  %9894 = vmatpush1.bf16.msra.mxu1 %v18451_v22  ;;  %v18542_v21 = vld [vmem:[#allocation2 + $0x8d8] ss:$112 sps:$4 sm:$0xff]   ;;  %v18547_v22 = vld [vmem:[#allocation2 + $0x9b4] ss:$112 sps:$4 sm:$0xff]  }
 0x162   :  { %9723 = vmatprep.subr.bf16.mxu0 %v18456_v23  ;;  %9895 = vmatprep.subr.bf16.mxu1 %v18459_v24  ;;  %v18550_v23 = vld [vmem:[#allocation2 + $0x9bc] ss:$112 sps:$4 sm:$0xff]   ;;  %v18545_v24 = vld [vmem:[#allocation2 + $0x9b0] ss:$112 sps:$4 sm:$0xff]  }
 0x165   :  { %9724 = vmatpush1.bf16.msra.mxu0 %v18454_v25  ;;  %9896 = vmatpush1.bf16.msra.mxu1 %v18457_v26  ;;  %v18548_v25 = vld [vmem:[#allocation2 + $0x9b8] ss:$112 sps:$4 sm:$0xff]   ;;  %v18553_v26 = vld [vmem:[#allocation2 + $0xa94] ss:$112 sps:$4 sm:$0xff]  }
 0x166   :  { %9725 = vmatprep.subr.bf16.mxu0 %v18462_v27  ;;  %9897 = vmatprep.subr.bf16.mxu1 %v18465_v28  ;;  %v18556_v27 = vld [vmem:[#allocation2 + $0xa9c] ss:$112 sps:$4 sm:$0xff]   ;;  %v18551_v28 = vld [vmem:[#allocation2 + $0xa90] ss:$112 sps:$4 sm:$0xff]  }
 0x169   :  { %9726 = vmatpush1.bf16.msra.mxu0 %v18460_v29  ;;  %9898 = vmatpush1.bf16.msra.mxu1 %v18463_v30  ;;  %v18554_v29 = vld [vmem:[#allocation2 + $0xa98] ss:$112 sps:$4 sm:$0xff]   ;;  %v18559_v30 = vld [vmem:[#allocation2 + $0xb74] ss:$112 sps:$4 sm:$0xff]  }
 0x16a   :  { %9727 = vmatprep.subr.bf16.mxu0 %v18468_v31  ;;  %9899 = vmatprep.subr.bf16.mxu1 %v18471_v32  ;;  %v18562_v31 = vld [vmem:[#allocation2 + $0xb7c] ss:$112 sps:$4 sm:$0xff]   ;;  %v18557_v32 = vld [vmem:[#allocation2 + $0xb70] ss:$112 sps:$4 sm:$0xff]  }
 0x16d   :  { %9728 = vmatpush1.bf16.msra.mxu0 %v18466_v33  ;;  %9900 = vmatpush1.bf16.msra.mxu1 %v18469_v34  ;;  %v18560_v33 = vld [vmem:[#allocation2 + $0xb78] ss:$112 sps:$4 sm:$0xff]   ;;  %v18565_v34 = vld [vmem:[#allocation2 + $0xc54] ss:$112 sps:$4 sm:$0xff]  }
 0x16e   :  { %9729 = vmatprep.subr.bf16.mxu0 %v18474_v35  ;;  %9901 = vmatprep.subr.bf16.mxu1 %v18477_v36  ;;  %v18568_v35 = vld [vmem:[#allocation2 + $0xc5c] ss:$112 sps:$4 sm:$0xff]   ;;  %v18563_v36 = vld [vmem:[#allocation2 + $0xc50] ss:$112 sps:$4 sm:$0xff]  }
 0x171   :  { %9730 = vmatpush1.bf16.msra.mxu0 %v18472_v37  ;;  %9902 = vmatpush1.bf16.msra.mxu1 %v18475_v38  ;;  %v18566_v37 = vld [vmem:[#allocation2 + $0xc58] ss:$112 sps:$4 sm:$0xff]   ;;  %v18571_v38 = vld [vmem:[#allocation2 + $0xd34] ss:$112 sps:$4 sm:$0xff]  }
 0x172   :  { %9930 = vmatprep.subr.bf16.mxu0 %v18481_v39  ;;  %10102 = vmatprep.subr.bf16.mxu1 %v18484_v40  ;;  %v18574_v39 = vld [vmem:[#allocation2 + $0xd3c] ss:$112 sps:$4 sm:$0xff]   ;;  %v18569_v40 = vld [vmem:[#allocation2 + $0xd30] ss:$112 sps:$4 sm:$0xff]  }
 0x174   :  { %9748 = vmatmul.mubr.bf16.vlgmr.msra.gmra.mrb[0].mxu0 %v18478_v41  ;;  %9920 = vmatmul.mubr.bf16.vlgmr.msra.gmra.mrb[0].mxu1 %v18478_v41  ;;  %v18572_v41 = vld [vmem:[#allocation2 + $0xd38] ss:$112 sps:$4 sm:$0xff]  }
 0x175   :  { %9931 = vmatpush1.bf16.msra.mxu0 %v18479_v42  ;;  %10103 = vmatpush1.bf16.msra.mxu1 %v18482_v43  ;;  %v18577_v42 = vld [vmem:[#allocation2 + $0xe14] ss:$112 sps:$4 sm:$0xff]   ;;  %v18580_v43 = vld [vmem:[#allocation2 + $0xe1c] ss:$112 sps:$4 sm:$0xff]  }
 0x176   :  { %9932 = vmatprep.subr.bf16.mxu0 %v18487_v44  ;;  %10104 = vmatprep.subr.bf16.mxu1 %v18490_v45  ;;  %v18575_v44 = vld [vmem:[#allocation2 + $0xe10] ss:$112 sps:$4 sm:$0xff]   ;;  %v18578_v45 = vld [vmem:[#allocation2 + $0xe18] ss:$112 sps:$4 sm:$0xff]  }
 0x177   :  { %9962 = vmatprep.mubr.bf16.mxu0 %v20519_v50  ;;  %10134 = vmatprep.mubr.bf16.mxu1 %v20519_v50  ;;  %v18584_v50 = vld [vmem:[#allocation2 + $0xef8] ss:$112 sps:$4 sm:$0xff]  }
 0x179   :  { %9933 = vmatpush1.bf16.msra.mxu0 %v18485_v46  ;;  %10105 = vmatpush1.bf16.msra.mxu1 %v18488_v47  ;;  %v18583_v46 = vld [vmem:[#allocation2 + $0xef4] ss:$112 sps:$4 sm:$0xff]   ;;  %v18586_v47 = vld [vmem:[#allocation2 + $0xefc] ss:$112 sps:$4 sm:$0xff]  }
 0x17a   :  { %9934 = vmatprep.subr.bf16.mxu0 %v18493_v48  ;;  %10106 = vmatprep.subr.bf16.mxu1 %v18496_v49  ;;  %v20520_v48 = vld [vmem:[%s21403_s0] ss:$28 sps:$4 sm:$0xff]  }
 0x17b   :  { %v18581_v49 = vld [vmem:[#allocation2 + $0xef0] ss:$112 sps:$4 sm:$0xff]  }
 0x17d   :  { %9935 = vmatpush1.bf16.msra.mxu0 %v18491_v51  ;;  %10107 = vmatpush1.bf16.msra.mxu1 %v18494_v52  ;;  %v18589_v51 = vld [vmem:[#allocation2 + $0xfd4] ss:$112 sps:$4 sm:$0xff]   ;;  %v18592_v52 = vld [vmem:[#allocation2 + $0xfdc] ss:$112 sps:$4 sm:$0xff]  }
 0x17e   :  { %9936 = vmatprep.subr.bf16.mxu0 %v18499_v53  ;;  %10108 = vmatprep.subr.bf16.mxu1 %v18502_v54  ;;  %v20521_v53 = vld [vmem:[%s21403_s0 + $0xc] ss:$28 sps:$4 sm:$0xff]   ;;  %v18587_v54 = vld [vmem:[#allocation2 + $0xfd0] ss:$112 sps:$4 sm:$0xff]  }
 0x181   :  { %9937 = vmatpush1.bf16.msra.mxu0 %v18497_v55  ;;  %10109 = vmatpush1.bf16.msra.mxu1 %v18500_v56  ;;  %v18590_v55 = vld [vmem:[#allocation2 + $0xfd8] ss:$112 sps:$4 sm:$0xff]   ;;  %v18595_v56 = vld [vmem:[#allocation2 + $0x10b4] ss:$112 sps:$4 sm:$0xff]  }
 0x182   :  { %9938 = vmatprep.subr.bf16.mxu0 %v18505_v57  ;;  %10110 = vmatprep.subr.bf16.mxu1 %v18508_v58  ;;  %v18598_v57 = vld [vmem:[#allocation2 + $0x10bc] ss:$112 sps:$4 sm:$0xff]   ;;  %v18593_v58 = vld [vmem:[#allocation2 + $0x10b0] ss:$112 sps:$4 sm:$0xff]  }
 0x185   :  { %9939 = vmatpush1.bf16.msra.mxu0 %v18503_v59  ;;  %10111 = vmatpush1.bf16.msra.mxu1 %v18506_v60  ;;  %v18596_v59 = vld [vmem:[#allocation2 + $0x10b8] ss:$112 sps:$4 sm:$0xff]   ;;  %v18601_v60 = vld [vmem:[#allocation2 + $0x1194] ss:$112 sps:$4 sm:$0xff]  }
 0x186   :  { %9940 = vmatprep.subr.bf16.mxu0 %v18511_v61  ;;  %10112 = vmatprep.subr.bf16.mxu1 %v18514_v62  ;;  %v18604_v61 = vld [vmem:[#allocation2 + $0x119c] ss:$112 sps:$4 sm:$0xff]   ;;  %v18599_v62 = vld [vmem:[#allocation2 + $0x1190] ss:$112 sps:$4 sm:$0xff]  }
 0x189   :  { %9941 = vmatpush1.bf16.msra.mxu0 %v18509_v63  ;;  %10113 = vmatpush1.bf16.msra.mxu1 %v18512_v0  ;;  %v18602_v63 = vld [vmem:[#allocation2 + $0x1198] ss:$112 sps:$4 sm:$0xff]   ;;  %v18607_v0 = vld [vmem:[#allocation2 + $0x1274] ss:$112 sps:$4 sm:$0xff]  }
 0x18a   :  { %9942 = vmatprep.subr.bf16.mxu0 %v18517_v1  ;;  %10114 = vmatprep.subr.bf16.mxu1 %v18520_v2  ;;  %v18610_v1 = vld [vmem:[#allocation2 + $0x127c] ss:$112 sps:$4 sm:$0xff]   ;;  %v18605_v2 = vld [vmem:[#allocation2 + $0x1270] ss:$112 sps:$4 sm:$0xff]  }
 0x18d   :  { %9943 = vmatpush1.bf16.msra.mxu0 %v18515_v3  ;;  %10115 = vmatpush1.bf16.msra.mxu1 %v18518_v4  ;;  %v18608_v3 = vld [vmem:[#allocation2 + $0x1278] ss:$112 sps:$4 sm:$0xff]   ;;  %v18613_v4 = vld [vmem:[#allocation2 + $0x1354] ss:$112 sps:$4 sm:$0xff]  }
 0x18e   :  { %9944 = vmatprep.subr.bf16.mxu0 %v18523_v5  ;;  %10116 = vmatprep.subr.bf16.mxu1 %v18526_v6  ;;  %v18616_v5 = vld [vmem:[#allocation2 + $0x135c] ss:$112 sps:$4 sm:$0xff]   ;;  %v18611_v6 = vld [vmem:[#allocation2 + $0x1350] ss:$112 sps:$4 sm:$0xff]  }
 0x191   :  { %9945 = vmatpush1.bf16.msra.mxu0 %v18521_v7  ;;  %10117 = vmatpush1.bf16.msra.mxu1 %v18524_v8  ;;  %v18614_v7 = vld [vmem:[#allocation2 + $0x1358] ss:$112 sps:$4 sm:$0xff]   ;;  %v18619_v8 = vld [vmem:[#allocation2 + $0x1434] ss:$112 sps:$4 sm:$0xff]  }
 0x192   :  { %9946 = vmatprep.subr.bf16.mxu0 %v18529_v9  ;;  %10118 = vmatprep.subr.bf16.mxu1 %v18532_v10  ;;  %v18622_v9 = vld [vmem:[#allocation2 + $0x143c] ss:$112 sps:$4 sm:$0xff]   ;;  %v18617_v10 = vld [vmem:[#allocation2 + $0x1430] ss:$112 sps:$4 sm:$0xff]  }
 0x195   :  { %9947 = vmatpush1.bf16.msra.mxu0 %v18527_v11  ;;  %10119 = vmatpush1.bf16.msra.mxu1 %v18530_v12  ;;  %v18620_v11 = vld [vmem:[#allocation2 + $0x1438] ss:$112 sps:$4 sm:$0xff]   ;;  %v18625_v12 = vld [vmem:[#allocation2 + $0x1514] ss:$112 sps:$4 sm:$0xff]  }
 0x196   :  { %9948 = vmatprep.subr.bf16.mxu0 %v18535_v13  ;;  %10120 = vmatprep.subr.bf16.mxu1 %v18538_v14  ;;  %v18628_v13 = vld [vmem:[#allocation2 + $0x151c] ss:$112 sps:$4 sm:$0xff]   ;;  %v18623_v14 = vld [vmem:[#allocation2 + $0x1510] ss:$112 sps:$4 sm:$0xff]  }
 0x199   :  { %9949 = vmatpush1.bf16.msra.mxu0 %v18533_v15  ;;  %10121 = vmatpush1.bf16.msra.mxu1 %v18536_v17  ;;  %v18626_v15 = vld [vmem:[#allocation2 + $0x1518] ss:$112 sps:$4 sm:$0xff]   ;;  %v18631_v17 = vld [vmem:[#allocation2 + $0x15f4] ss:$112 sps:$4 sm:$0xff]  }
 0x19a   :  { %9950 = vmatprep.subr.bf16.mxu0 %v18541_v18  ;;  %10122 = vmatprep.subr.bf16.mxu1 %v18544_v19  ;;  %v18634_v18 = vld [vmem:[#allocation2 + $0x15fc] ss:$112 sps:$4 sm:$0xff]   ;;  %v18629_v19 = vld [vmem:[#allocation2 + $0x15f0] ss:$112 sps:$4 sm:$0xff]  }
 0x19d   :  { %9951 = vmatpush1.bf16.msra.mxu0 %v18539_v20  ;;  %10123 = vmatpush1.bf16.msra.mxu1 %v18542_v21  ;;  %v18632_v20 = vld [vmem:[#allocation2 + $0x15f8] ss:$112 sps:$4 sm:$0xff]   ;;  %v18637_v21 = vld [vmem:[#allocation2 + $0x16d4] ss:$112 sps:$4 sm:$0xff]  }
 0x19e   :  { %9952 = vmatprep.subr.bf16.mxu0 %v18547_v22  ;;  %10124 = vmatprep.subr.bf16.mxu1 %v18550_v23  ;;  %v18640_v22 = vld [vmem:[#allocation2 + $0x16dc] ss:$112 sps:$4 sm:$0xff]   ;;  %v18635_v23 = vld [vmem:[#allocation2 + $0x16d0] ss:$112 sps:$4 sm:$0xff]  }
 0x1a1   :  { %9953 = vmatpush1.bf16.msra.mxu0 %v18545_v24  ;;  %10125 = vmatpush1.bf16.msra.mxu1 %v18548_v25  ;;  %v18638_v24 = vld [vmem:[#allocation2 + $0x16d8] ss:$112 sps:$4 sm:$0xff]   ;;  %v18643_v25 = vld [vmem:[#allocation2 + $0x17b4] ss:$112 sps:$4 sm:$0xff]  }
 0x1a2   :  { %9954 = vmatprep.subr.bf16.mxu0 %v18553_v26  ;;  %10126 = vmatprep.subr.bf16.mxu1 %v18556_v27  ;;  %v18646_v26 = vld [vmem:[#allocation2 + $0x17bc] ss:$112 sps:$4 sm:$0xff]   ;;  %v18641_v27 = vld [vmem:[#allocation2 + $0x17b0] ss:$112 sps:$4 sm:$0xff]  }
 0x1a5   :  { %9955 = vmatpush1.bf16.msra.mxu0 %v18551_v28  ;;  %10127 = vmatpush1.bf16.msra.mxu1 %v18554_v29  ;;  %v18644_v28 = vld [vmem:[#allocation2 + $0x17b8] ss:$112 sps:$4 sm:$0xff]   ;;  %v18649_v29 = vld [vmem:[#allocation2 + $0x1894] ss:$112 sps:$4 sm:$0xff]  }
 0x1a6   :  { %9956 = vmatprep.subr.bf16.mxu0 %v18559_v30  ;;  %10128 = vmatprep.subr.bf16.mxu1 %v18562_v31  ;;  %v18652_v30 = vld [vmem:[#allocation2 + $0x189c] ss:$112 sps:$4 sm:$0xff]   ;;  %v18647_v31 = vld [vmem:[#allocation2 + $0x1890] ss:$112 sps:$4 sm:$0xff]  }
 0x1a9   :  { %9957 = vmatpush1.bf16.msra.mxu0 %v18557_v32  ;;  %10129 = vmatpush1.bf16.msra.mxu1 %v18560_v33  ;;  %v18650_v32 = vld [vmem:[#allocation2 + $0x1898] ss:$112 sps:$4 sm:$0xff]   ;;  %v18655_v33 = vld [vmem:[#allocation2 + $0x1974] ss:$112 sps:$4 sm:$0xff]  }
 0x1aa   :  { %9958 = vmatprep.subr.bf16.mxu0 %v18565_v34  ;;  %10130 = vmatprep.subr.bf16.mxu1 %v18568_v35  ;;  %v18658_v34 = vld [vmem:[#allocation2 + $0x197c] ss:$112 sps:$4 sm:$0xff]   ;;  %v18653_v35 = vld [vmem:[#allocation2 + $0x1970] ss:$112 sps:$4 sm:$0xff]  }
 0x1ad   :  { %9959 = vmatpush1.bf16.msra.mxu0 %v18563_v36  ;;  %10131 = vmatpush1.bf16.msra.mxu1 %v18566_v37  ;;  %v18656_v36 = vld [vmem:[#allocation2 + $0x1978] ss:$112 sps:$4 sm:$0xff]   ;;  %v18661_v37 = vld [vmem:[#allocation2 + $0x1a54] ss:$112 sps:$4 sm:$0xff]  }
 0x1ae   :  { %9960 = vmatprep.subr.bf16.mxu0 %v18571_v38  ;;  %10132 = vmatprep.subr.bf16.mxu1 %v18574_v39  ;;  %v18664_v38 = vld [vmem:[#allocation2 + $0x1a5c] ss:$112 sps:$4 sm:$0xff]   ;;  %v18659_v39 = vld [vmem:[#allocation2 + $0x1a50] ss:$112 sps:$4 sm:$0xff]  }
 0x1b1   :  { %9961 = vmatpush1.bf16.msra.mxu0 %v18569_v40  ;;  %10133 = vmatpush1.bf16.msra.mxu1 %v18572_v41  ;;  %v18662_v40 = vld [vmem:[#allocation2 + $0x1a58] ss:$112 sps:$4 sm:$0xff]   ;;  %v18667_v41 = vld [vmem:[#allocation2 + $0x1b34] ss:$112 sps:$4 sm:$0xff]  }
 0x1b2   :  { %9973 = vmatprep.subr.bf16.mxu0 %v18577_v42  ;;  %10145 = vmatprep.subr.bf16.mxu1 %v18580_v43  ;;  %v18670_v42 = vld [vmem:[#allocation2 + $0x1b3c] ss:$112 sps:$4 sm:$0xff]   ;;  %v18665_v43 = vld [vmem:[#allocation2 + $0x1b30] ss:$112 sps:$4 sm:$0xff]  }
 0x1b4   :  { %9963 = vmatmul.mubr.bf16.vlgmr.msra.gmra.mrb[4].mxu0 %v20520_v48  ;;  %10135 = vmatmul.mubr.bf16.vlgmr.msra.gmra.mrb[4].mxu1 %v20520_v48  ;;  %v18674_v48 = vld [vmem:[#allocation2 + $0x1c18] ss:$112 sps:$4 sm:$0xff]  }
 0x1b5   :  { %9974 = vmatpush1.bf16.msra.mxu0 %v18575_v44  ;;  %10146 = vmatpush1.bf16.msra.mxu1 %v18578_v45  ;;  %v18668_v44 = vld [vmem:[#allocation2 + $0x1b38] ss:$112 sps:$4 sm:$0xff]   ;;  %v18673_v45 = vld [vmem:[#allocation2 + $0x1c14] ss:$112 sps:$4 sm:$0xff]  }
 0x1b6   :  { %9975 = vmatprep.subr.bf16.mxu0 %v18583_v46  ;;  %10147 = vmatprep.subr.bf16.mxu1 %v18586_v47  ;;  %v18676_v46 = vld [vmem:[#allocation2 + $0x1c1c] ss:$112 sps:$4 sm:$0xff]   ;;  %v18671_v47 = vld [vmem:[#allocation2 + $0x1c10] ss:$112 sps:$4 sm:$0xff]  }
 0x1b7   :  { %10005 = vmatprep.mubr.bf16.mxu0 %v20521_v53  ;;  %10177 = vmatprep.mubr.bf16.mxu1 %v20521_v53  ;;  %v18680_v53 = vld [vmem:[#allocation2 + $0x1cf8] ss:$112 sps:$4 sm:$0xff]  }
 0x1b9   :  { %9976 = vmatpush1.bf16.msra.mxu0 %v18581_v49  ;;  %10148 = vmatpush1.bf16.msra.mxu1 %v18584_v50  ;;  %v18679_v49 = vld [vmem:[#allocation2 + $0x1cf4] ss:$112 sps:$4 sm:$0xff]   ;;  %v18682_v50 = vld [vmem:[#allocation2 + $0x1cfc] ss:$112 sps:$4 sm:$0xff]  }
 0x1ba   :  { %9977 = vmatprep.subr.bf16.mxu0 %v18589_v51  ;;  %10149 = vmatprep.subr.bf16.mxu1 %v18592_v52  ;;  %v20522_v51 = vld [vmem:[%s21403_s0 + $0x8] ss:$28 sps:$4 sm:$0xff]   ;;  %v18677_v52 = vld [vmem:[#allocation2 + $0x1cf0] ss:$112 sps:$4 sm:$0xff]  }
 0x1bd   :  { %9978 = vmatpush1.bf16.msra.mxu0 %v18587_v54  ;;  %10150 = vmatpush1.bf16.msra.mxu1 %v18590_v55  ;;  %v18685_v54 = vld [vmem:[#allocation2 + $0x1dd4] ss:$112 sps:$4 sm:$0xff]   ;;  %v18688_v55 = vld [vmem:[#allocation2 + $0x1ddc] ss:$112 sps:$4 sm:$0xff]  }
 0x1be   :  { %9979 = vmatprep.subr.bf16.mxu0 %v18595_v56  ;;  %10151 = vmatprep.subr.bf16.mxu1 %v18598_v57  ;;  %v20523_v56 = vld [vmem:[%s21403_s0 + $0x14] ss:$28 sps:$4 sm:$0xff]  }
 0x1bf   :  { %v18683_v57 = vld [vmem:[#allocation2 + $0x1dd0] ss:$112 sps:$4 sm:$0xff]  }
 0x1c1   :  { %9980 = vmatpush1.bf16.msra.mxu0 %v18593_v58  ;;  %10152 = vmatpush1.bf16.msra.mxu1 %v18596_v59  ;;  %v18686_v58 = vld [vmem:[#allocation2 + $0x1dd8] ss:$112 sps:$4 sm:$0xff]   ;;  %v18691_v59 = vld [vmem:[#allocation2 + $0x1eb4] ss:$112 sps:$4 sm:$0xff]  }
 0x1c2   :  { %9981 = vmatprep.subr.bf16.mxu0 %v18601_v60  ;;  %10153 = vmatprep.subr.bf16.mxu1 %v18604_v61  ;;  %v18694_v60 = vld [vmem:[#allocation2 + $0x1ebc] ss:$112 sps:$4 sm:$0xff]   ;;  %v18689_v61 = vld [vmem:[#allocation2 + $0x1eb0] ss:$112 sps:$4 sm:$0xff]  }
 0x1c5   :  { %9982 = vmatpush1.bf16.msra.mxu0 %v18599_v62  ;;  %10154 = vmatpush1.bf16.msra.mxu1 %v18602_v63  ;;  %v18692_v62 = vld [vmem:[#allocation2 + $0x1eb8] ss:$112 sps:$4 sm:$0xff]   ;;  %v18697_v63 = vld [vmem:[#allocation2 + $0x1f94] ss:$112 sps:$4 sm:$0xff]  }
 0x1c6   :  { %9983 = vmatprep.subr.bf16.mxu0 %v18607_v0  ;;  %10155 = vmatprep.subr.bf16.mxu1 %v18610_v1  ;;  %v18700_v0 = vld [vmem:[#allocation2 + $0x1f9c] ss:$112 sps:$4 sm:$0xff]   ;;  %v18695_v1 = vld [vmem:[#allocation2 + $0x1f90] ss:$112 sps:$4 sm:$0xff]  }
 0x1c9   :  { %9984 = vmatpush1.bf16.msra.mxu0 %v18605_v2  ;;  %10156 = vmatpush1.bf16.msra.mxu1 %v18608_v3  ;;  %v18698_v2 = vld [vmem:[#allocation2 + $0x1f98] ss:$112 sps:$4 sm:$0xff]   ;;  %v18703_v3 = vld [vmem:[#allocation2 + $0x2074] ss:$112 sps:$4 sm:$0xff]  }
 0x1ca   :  { %9985 = vmatprep.subr.bf16.mxu0 %v18613_v4  ;;  %10157 = vmatprep.subr.bf16.mxu1 %v18616_v5  ;;  %v18706_v4 = vld [vmem:[#allocation2 + $0x207c] ss:$112 sps:$4 sm:$0xff]   ;;  %v18701_v5 = vld [vmem:[#allocation2 + $0x2070] ss:$112 sps:$4 sm:$0xff]  }
 0x1cd   :  { %9986 = vmatpush1.bf16.msra.mxu0 %v18611_v6  ;;  %10158 = vmatpush1.bf16.msra.mxu1 %v18614_v7  ;;  %v18704_v6 = vld [vmem:[#allocation2 + $0x2078] ss:$112 sps:$4 sm:$0xff]   ;;  %v18709_v7 = vld [vmem:[#allocation2 + $0x2154] ss:$112 sps:$4 sm:$0xff]  }
 0x1ce   :  { %9987 = vmatprep.subr.bf16.mxu0 %v18619_v8  ;;  %10159 = vmatprep.subr.bf16.mxu1 %v18622_v9  ;;  %v18712_v8 = vld [vmem:[#allocation2 + $0x215c] ss:$112 sps:$4 sm:$0xff]   ;;  %v18707_v9 = vld [vmem:[#allocation2 + $0x2150] ss:$112 sps:$4 sm:$0xff]  }
 0x1d1   :  { %9988 = vmatpush1.bf16.msra.mxu0 %v18617_v10  ;;  %10160 = vmatpush1.bf16.msra.mxu1 %v18620_v11  ;;  %v18710_v10 = vld [vmem:[#allocation2 + $0x2158] ss:$112 sps:$4 sm:$0xff]   ;;  %v18715_v11 = vld [vmem:[#allocation2 + $0x2234] ss:$112 sps:$4 sm:$0xff]  }
 0x1d2   :  { %9989 = vmatprep.subr.bf16.mxu0 %v18625_v12  ;;  %10161 = vmatprep.subr.bf16.mxu1 %v18628_v13  ;;  %v18718_v12 = vld [vmem:[#allocation2 + $0x223c] ss:$112 sps:$4 sm:$0xff]   ;;  %v18713_v13 = vld [vmem:[#allocation2 + $0x2230] ss:$112 sps:$4 sm:$0xff]  }
 0x1d5   :  { %9990 = vmatpush1.bf16.msra.mxu0 %v18623_v14  ;;  %10162 = vmatpush1.bf16.msra.mxu1 %v18626_v15  ;;  %v18716_v14 = vld [vmem:[#allocation2 + $0x2238] ss:$112 sps:$4 sm:$0xff]   ;;  %v18721_v15 = vld [vmem:[#allocation2 + $0x2314] ss:$112 sps:$4 sm:$0xff]  }
 0x1d6   :  { %9991 = vmatprep.subr.bf16.mxu0 %v18631_v17  ;;  %10163 = vmatprep.subr.bf16.mxu1 %v18634_v18  ;;  %v18724_v17 = vld [vmem:[#allocation2 + $0x231c] ss:$112 sps:$4 sm:$0xff]   ;;  %v18719_v18 = vld [vmem:[#allocation2 + $0x2310] ss:$112 sps:$4 sm:$0xff]  }
 0x1d9   :  { %9992 = vmatpush1.bf16.msra.mxu0 %v18629_v19  ;;  %10164 = vmatpush1.bf16.msra.mxu1 %v18632_v20  ;;  %v18722_v19 = vld [vmem:[#allocation2 + $0x2318] ss:$112 sps:$4 sm:$0xff]   ;;  %v18727_v20 = vld [vmem:[#allocation2 + $0x23f4] ss:$112 sps:$4 sm:$0xff]  }
 0x1da   :  { %9993 = vmatprep.subr.bf16.mxu0 %v18637_v21  ;;  %10165 = vmatprep.subr.bf16.mxu1 %v18640_v22  ;;  %v18730_v21 = vld [vmem:[#allocation2 + $0x23fc] ss:$112 sps:$4 sm:$0xff]   ;;  %v18725_v22 = vld [vmem:[#allocation2 + $0x23f0] ss:$112 sps:$4 sm:$0xff]  }
 0x1dd   :  { %9994 = vmatpush1.bf16.msra.mxu0 %v18635_v23  ;;  %10166 = vmatpush1.bf16.msra.mxu1 %v18638_v24  ;;  %v18728_v23 = vld [vmem:[#allocation2 + $0x23f8] ss:$112 sps:$4 sm:$0xff]   ;;  %v18733_v24 = vld [vmem:[#allocation2 + $0x24d4] ss:$112 sps:$4 sm:$0xff]  }
 0x1de   :  { %9995 = vmatprep.subr.bf16.mxu0 %v18643_v25  ;;  %10167 = vmatprep.subr.bf16.mxu1 %v18646_v26  ;;  %v18736_v25 = vld [vmem:[#allocation2 + $0x24dc] ss:$112 sps:$4 sm:$0xff]   ;;  %v18731_v26 = vld [vmem:[#allocation2 + $0x24d0] ss:$112 sps:$4 sm:$0xff]  }
 0x1e1   :  { %9996 = vmatpush1.bf16.msra.mxu0 %v18641_v27  ;;  %10168 = vmatpush1.bf16.msra.mxu1 %v18644_v28  ;;  %v18734_v27 = vld [vmem:[#allocation2 + $0x24d8] ss:$112 sps:$4 sm:$0xff]   ;;  %v18739_v28 = vld [vmem:[#allocation2 + $0x25b4] ss:$112 sps:$4 sm:$0xff]  }
 0x1e2   :  { %9997 = vmatprep.subr.bf16.mxu0 %v18649_v29  ;;  %10169 = vmatprep.subr.bf16.mxu1 %v18652_v30  ;;  %v18742_v29 = vld [vmem:[#allocation2 + $0x25bc] ss:$112 sps:$4 sm:$0xff]   ;;  %v18737_v30 = vld [vmem:[#allocation2 + $0x25b0] ss:$112 sps:$4 sm:$0xff]  }
 0x1e5   :  { %9998 = vmatpush1.bf16.msra.mxu0 %v18647_v31  ;;  %10170 = vmatpush1.bf16.msra.mxu1 %v18650_v32  ;;  %v18740_v31 = vld [vmem:[#allocation2 + $0x25b8] ss:$112 sps:$4 sm:$0xff]   ;;  %v18745_v32 = vld [vmem:[#allocation2 + $0x2694] ss:$112 sps:$4 sm:$0xff]  }
 0x1e6   :  { %9999 = vmatprep.subr.bf16.mxu0 %v18655_v33  ;;  %10171 = vmatprep.subr.bf16.mxu1 %v18658_v34  ;;  %v18748_v33 = vld [vmem:[#allocation2 + $0x269c] ss:$112 sps:$4 sm:$0xff]   ;;  %v18743_v34 = vld [vmem:[#allocation2 + $0x2690] ss:$112 sps:$4 sm:$0xff]  }
 0x1e9   :  { %10000 = vmatpush1.bf16.msra.mxu0 %v18653_v35  ;;  %10172 = vmatpush1.bf16.msra.mxu1 %v18656_v36  ;;  %v18746_v35 = vld [vmem:[#allocation2 + $0x2698] ss:$112 sps:$4 sm:$0xff]   ;;  %v18751_v36 = vld [vmem:[#allocation2 + $0x2774] ss:$112 sps:$4 sm:$0xff]  }
 0x1ea   :  { %10001 = vmatprep.subr.bf16.mxu0 %v18661_v37  ;;  %10173 = vmatprep.subr.bf16.mxu1 %v18664_v38  ;;  %v18754_v37 = vld [vmem:[#allocation2 + $0x277c] ss:$112 sps:$4 sm:$0xff]   ;;  %v18749_v38 = vld [vmem:[#allocation2 + $0x2770] ss:$112 sps:$4 sm:$0xff]  }
 0x1ed   :  { %10002 = vmatpush1.bf16.msra.mxu0 %v18659_v39  ;;  %10174 = vmatpush1.bf16.msra.mxu1 %v18662_v40  ;;  %v18752_v39 = vld [vmem:[#allocation2 + $0x2778] ss:$112 sps:$4 sm:$0xff]   ;;  %v18757_v40 = vld [vmem:[#allocation2 + $0x2854] ss:$112 sps:$4 sm:$0xff]  }
 0x1ee   :  { %10003 = vmatprep.subr.bf16.mxu0 %v18667_v41  ;;  %10175 = vmatprep.subr.bf16.mxu1 %v18670_v42  ;;  %v18760_v41 = vld [vmem:[#allocation2 + $0x285c] ss:$112 sps:$4 sm:$0xff]   ;;  %v18755_v42 = vld [vmem:[#allocation2 + $0x2850] ss:$112 sps:$4 sm:$0xff]  }
 0x1f1   :  { %10004 = vmatpush1.bf16.msra.mxu0 %v18665_v43  ;;  %10176 = vmatpush1.bf16.msra.mxu1 %v18668_v44  ;;  %v18758_v43 = vld [vmem:[#allocation2 + $0x2858] ss:$112 sps:$4 sm:$0xff]   ;;  %v18763_v44 = vld [vmem:[#allocation2 + $0x2934] ss:$112 sps:$4 sm:$0xff]  }
 0x1f2   :  { %10016 = vmatprep.subr.bf16.mxu0 %v18673_v45  ;;  %10188 = vmatprep.subr.bf16.mxu1 %v18676_v46  ;;  %v18766_v45 = vld [vmem:[#allocation2 + $0x293c] ss:$112 sps:$4 sm:$0xff]   ;;  %v18761_v46 = vld [vmem:[#allocation2 + $0x2930] ss:$112 sps:$4 sm:$0xff]  }
 0x1f4   :  { %10006 = vmatmul.mubr.bf16.vlgmr.msra.gmra.mrb[4].mxu0 %v20522_v51  ;;  %10178 = vmatmul.mubr.bf16.vlgmr.msra.gmra.mrb[4].mxu1 %v20522_v51  ;;  %v18770_v51 = vld [vmem:[#allocation2 + $0x2a18] ss:$112 sps:$4 sm:$0xff]  }
 0x1f5   :  { %10017 = vmatpush1.bf16.msra.mxu0 %v18671_v47  ;;  %10189 = vmatpush1.bf16.msra.mxu1 %v18674_v48  ;;  %v18764_v47 = vld [vmem:[#allocation2 + $0x2938] ss:$112 sps:$4 sm:$0xff]   ;;  %v18769_v48 = vld [vmem:[#allocation2 + $0x2a14] ss:$112 sps:$4 sm:$0xff]  }
 0x1f6   :  { %10018 = vmatprep.subr.bf16.mxu0 %v18679_v49  ;;  %10190 = vmatprep.subr.bf16.mxu1 %v18682_v50  ;;  %v18772_v49 = vld [vmem:[#allocation2 + $0x2a1c] ss:$112 sps:$4 sm:$0xff]   ;;  %v18767_v50 = vld [vmem:[#allocation2 + $0x2a10] ss:$112 sps:$4 sm:$0xff]  }
 0x1f7   :  { %10048 = vmatprep.mubr.bf16.mxu0 %v20523_v56  ;;  %10220 = vmatprep.mubr.bf16.mxu1 %v20523_v56  ;;  %v18776_v56 = vld [vmem:[#allocation2 + $0x2af8] ss:$112 sps:$4 sm:$0xff]  }
 0x1f9   :  { %10019 = vmatpush1.bf16.msra.mxu0 %v18677_v52  ;;  %10191 = vmatpush1.bf16.msra.mxu1 %v18680_v53  ;;  %v18775_v52 = vld [vmem:[#allocation2 + $0x2af4] ss:$112 sps:$4 sm:$0xff]   ;;  %v18778_v53 = vld [vmem:[#allocation2 + $0x2afc] ss:$112 sps:$4 sm:$0xff]  }
 0x1fa   :  { %10020 = vmatprep.subr.bf16.mxu0 %v18685_v54  ;;  %10192 = vmatprep.subr.bf16.mxu1 %v18688_v55  ;;  %v20524_v54 = vld [vmem:[%s21403_s0 + $0x10] ss:$28 sps:$4 sm:$0xff]  }
 0x1fb   :  { %v18773_v55 = vld [vmem:[#allocation2 + $0x2af0] ss:$112 sps:$4 sm:$0xff]  }
 0x1fd   :  { %10021 = vmatpush1.bf16.msra.mxu0 %v18683_v57  ;;  %10193 = vmatpush1.bf16.msra.mxu1 %v18686_v58  ;;  %v18781_v57 = vld [vmem:[#allocation2 + $0x2bd4] ss:$112 sps:$4 sm:$0xff]   ;;  %v18784_v58 = vld [vmem:[#allocation2 + $0x2bdc] ss:$112 sps:$4 sm:$0xff]  }
 0x1fe   :  { %10022 = vmatprep.subr.bf16.mxu0 %v18691_v59  ;;  %10194 = vmatprep.subr.bf16.mxu1 %v18694_v60  ;;  %v18779_v59 = vld [vmem:[#allocation2 + $0x2bd0] ss:$112 sps:$4 sm:$0xff]   ;;  %v18782_v60 = vld [vmem:[#allocation2 + $0x2bd8] ss:$112 sps:$4 sm:$0xff]  }
 0x201   :  { %10023 = vmatpush1.bf16.msra.mxu0 %v18689_v61  ;;  %10195 = vmatpush1.bf16.msra.mxu1 %v18692_v62  ;;  %v18787_v61 = vld [vmem:[#allocation2 + $0x2cb4] ss:$112 sps:$4 sm:$0xff]   ;;  %v18790_v62 = vld [vmem:[#allocation2 + $0x2cbc] ss:$112 sps:$4 sm:$0xff]  }
 0x202   :  { %10024 = vmatprep.subr.bf16.mxu0 %v18697_v63  ;;  %10196 = vmatprep.subr.bf16.mxu1 %v18700_v0  ;;  %v18785_v63 = vld [vmem:[#allocation2 + $0x2cb0] ss:$112 sps:$4 sm:$0xff]   ;;  %v18788_v0 = vld [vmem:[#allocation2 + $0x2cb8] ss:$112 sps:$4 sm:$0xff]  }
 0x205   :  { %10025 = vmatpush1.bf16.msra.mxu0 %v18695_v1  ;;  %10197 = vmatpush1.bf16.msra.mxu1 %v18698_v2  ;;  %v18793_v1 = vld [vmem:[#allocation2 + $0x2d94] ss:$112 sps:$4 sm:$0xff]   ;;  %v18796_v2 = vld [vmem:[#allocation2 + $0x2d9c] ss:$112 sps:$4 sm:$0xff]  }
 0x206   :  { %10026 = vmatprep.subr.bf16.mxu0 %v18703_v3  ;;  %10198 = vmatprep.subr.bf16.mxu1 %v18706_v4  ;;  %v18791_v3 = vld [vmem:[#allocation2 + $0x2d90] ss:$112 sps:$4 sm:$0xff]   ;;  %v18794_v4 = vld [vmem:[#allocation2 + $0x2d98] ss:$112 sps:$4 sm:$0xff]  }
 0x209   :  { %10027 = vmatpush1.bf16.msra.mxu0 %v18701_v5  ;;  %10199 = vmatpush1.bf16.msra.mxu1 %v18704_v6  ;;  %v18799_v5 = vld [vmem:[#allocation2 + $0x2e74] ss:$112 sps:$4 sm:$0xff]   ;;  %v18802_v6 = vld [vmem:[#allocation2 + $0x2e7c] ss:$112 sps:$4 sm:$0xff]  }
 0x20a   :  { %10028 = vmatprep.subr.bf16.mxu0 %v18709_v7  ;;  %10200 = vmatprep.subr.bf16.mxu1 %v18712_v8  ;;  %v18797_v7 = vld [vmem:[#allocation2 + $0x2e70] ss:$112 sps:$4 sm:$0xff]   ;;  %v18800_v8 = vld [vmem:[#allocation2 + $0x2e78] ss:$112 sps:$4 sm:$0xff]  }
 0x20d   :  { %10029 = vmatpush1.bf16.msra.mxu0 %v18707_v9  ;;  %10201 = vmatpush1.bf16.msra.mxu1 %v18710_v10  ;;  %v18805_v9 = vld [vmem:[#allocation2 + $0x2f54] ss:$112 sps:$4 sm:$0xff]   ;;  %v18808_v10 = vld [vmem:[#allocation2 + $0x2f5c] ss:$112 sps:$4 sm:$0xff]  }
 0x20e   :  { %10030 = vmatprep.subr.bf16.mxu0 %v18715_v11  ;;  %10202 = vmatprep.subr.bf16.mxu1 %v18718_v12 }
 0x211   :  { %10031 = vmatpush1.bf16.msra.mxu0 %v18713_v13  ;;  %10203 = vmatpush1.bf16.msra.mxu1 %v18716_v14 }
 0x212   :  { %10032 = vmatprep.subr.bf16.mxu0 %v18721_v15  ;;  %10204 = vmatprep.subr.bf16.mxu1 %v18724_v17 }
 0x215   :  { %10033 = vmatpush1.bf16.msra.mxu0 %v18719_v18  ;;  %10205 = vmatpush1.bf16.msra.mxu1 %v18722_v19  ;;  %v18803_v18 = vld [vmem:[#allocation2 + $0x2f50] ss:$112 sps:$4 sm:$0xff]   ;;  %v18806_v19 = vld [vmem:[#allocation2 + $0x2f58] ss:$112 sps:$4 sm:$0xff]  }
 0x216   :  { %10034 = vmatprep.subr.bf16.mxu0 %v18727_v20  ;;  %10206 = vmatprep.subr.bf16.mxu1 %v18730_v21 }
 0x219   :  { %10035 = vmatpush1.bf16.msra.mxu0 %v18725_v22  ;;  %10207 = vmatpush1.bf16.msra.mxu1 %v18728_v23  ;;  %v18811_v22 = vld [vmem:[#allocation2 + $0x3034] ss:$112 sps:$4 sm:$0xff]   ;;  %v18814_v23 = vld [vmem:[#allocation2 + $0x303c] ss:$112 sps:$4 sm:$0xff]  }
 0x21a   :  { %10036 = vmatprep.subr.bf16.mxu0 %v18733_v24  ;;  %10208 = vmatprep.subr.bf16.mxu1 %v18736_v25  ;;  %v18809_v24 = vld [vmem:[#allocation2 + $0x3030] ss:$112 sps:$4 sm:$0xff]   ;;  %v18812_v25 = vld [vmem:[#allocation2 + $0x3038] ss:$112 sps:$4 sm:$0xff]  }
 0x21d   :  { %10037 = vmatpush1.bf16.msra.mxu0 %v18731_v26  ;;  %10209 = vmatpush1.bf16.msra.mxu1 %v18734_v27  ;;  %v18817_v26 = vld [vmem:[#allocation2 + $0x24] ss:$112 sps:$4 sm:$0xff]   ;;  %v18820_v27 = vld [vmem:[#allocation2 + $0x2c] ss:$112 sps:$4 sm:$0xff]  }
 0x21e   :  { %10038 = vmatprep.subr.bf16.mxu0 %v18739_v28  ;;  %10210 = vmatprep.subr.bf16.mxu1 %v18742_v29  ;;  %v18815_v28 = vld [vmem:[#allocation2 + $0x20] ss:$112 sps:$4 sm:$0xff]   ;;  %v18818_v29 = vld [vmem:[#allocation2 + $0x28] ss:$112 sps:$4 sm:$0xff]  }
 0x221   :  { %10039 = vmatpush1.bf16.msra.mxu0 %v18737_v30  ;;  %10211 = vmatpush1.bf16.msra.mxu1 %v18740_v31  ;;  %v18823_v30 = vld [vmem:[#allocation2 + $0x104] ss:$112 sps:$4 sm:$0xff]   ;;  %v18826_v31 = vld [vmem:[#allocation2 + $0x10c] ss:$112 sps:$4 sm:$0xff]  }
 0x222   :  { %10040 = vmatprep.subr.bf16.mxu0 %v18745_v32  ;;  %10212 = vmatprep.subr.bf16.mxu1 %v18748_v33  ;;  %v20525_v32 = vld [vmem:[%s21403_s0 + $0x18] ss:$28 sps:$4 sm:$0xff]   ;;  %v18821_v33 = vld [vmem:[#allocation2 + $0x100] ss:$112 sps:$4 sm:$0xff]  }
 0x225   :  { %10041 = vmatpush1.bf16.msra.mxu0 %v18743_v34  ;;  %10213 = vmatpush1.bf16.msra.mxu1 %v18746_v35  ;;  %v18824_v34 = vld [vmem:[#allocation2 + $0x108] ss:$112 sps:$4 sm:$0xff]   ;;  %v18829_v35 = vld [vmem:[#allocation2 + $0x1e4] ss:$112 sps:$4 sm:$0xff]  }
 0x226   :  { %10042 = vmatprep.subr.bf16.mxu0 %v18751_v36  ;;  %10214 = vmatprep.subr.bf16.mxu1 %v18754_v37  ;;  %v18832_v36 = vld [vmem:[#allocation2 + $0x1ec] ss:$112 sps:$4 sm:$0xff]   ;;  %v20526_v37 = vld [vmem:[%s21403_s0 + $0x4] ss:$28 sps:$4 sm:$0xff]  }
 0x229   :  { %10043 = vmatpush1.bf16.msra.mxu0 %v18749_v38  ;;  %10215 = vmatpush1.bf16.msra.mxu1 %v18752_v39  ;;  %v18827_v38 = vld [vmem:[#allocation2 + $0x1e0] ss:$112 sps:$4 sm:$0xff]   ;;  %v18830_v39 = vld [vmem:[#allocation2 + $0x1e8] ss:$112 sps:$4 sm:$0xff]  }
 0x22a   :  { %10044 = vmatprep.subr.bf16.mxu0 %v18757_v40  ;;  %10216 = vmatprep.subr.bf16.mxu1 %v18760_v41  ;;  %v18835_v40 = vld [vmem:[#allocation2 + $0x2c4] ss:$112 sps:$4 sm:$0xff]   ;;  %v18838_v41 = vld [vmem:[#allocation2 + $0x2cc] ss:$112 sps:$4 sm:$0xff]  }
 0x22d   :  { %10045 = vmatpush1.bf16.msra.mxu0 %v18755_v42  ;;  %10217 = vmatpush1.bf16.msra.mxu1 %v18758_v43  ;;  %v18833_v42 = vld [vmem:[#allocation2 + $0x2c0] ss:$112 sps:$4 sm:$0xff]   ;;  %v18836_v43 = vld [vmem:[#allocation2 + $0x2c8] ss:$112 sps:$4 sm:$0xff]  }
 0x22e   :  { %10046 = vmatprep.subr.bf16.mxu0 %v18763_v44  ;;  %10218 = vmatprep.subr.bf16.mxu1 %v18766_v45  ;;  %v18841_v44 = vld [vmem:[#allocation2 + $0x3a4] ss:$112 sps:$4 sm:$0xff]   ;;  %v18844_v45 = vld [vmem:[#allocation2 + $0x3ac] ss:$112 sps:$4 sm:$0xff]  }
 0x231   :  { %10047 = vmatpush1.bf16.msra.mxu0 %v18761_v46  ;;  %10219 = vmatpush1.bf16.msra.mxu1 %v18764_v47  ;;  %v18839_v46 = vld [vmem:[#allocation2 + $0x3a0] ss:$112 sps:$4 sm:$0xff]   ;;  %v18842_v47 = vld [vmem:[#allocation2 + $0x3a8] ss:$112 sps:$4 sm:$0xff]  }
 0x232   :  { %10059 = vmatprep.subr.bf16.mxu0 %v18769_v48  ;;  %10231 = vmatprep.subr.bf16.mxu1 %v18772_v49  ;;  %v18847_v48 = vld [vmem:[#allocation2 + $0x484] ss:$112 sps:$4 sm:$0xff]   ;;  %v18850_v49 = vld [vmem:[#allocation2 + $0x48c] ss:$112 sps:$4 sm:$0xff]  }
 0x234   :  { %10049 = vmatmul.mubr.bf16.vlgmr.msra.gmra.mrb[4].mxu0 %v20524_v54  ;;  %10221 = vmatmul.mubr.bf16.vlgmr.msra.gmra.mrb[4].mxu1 %v20524_v54  ;;  %v18851_v54 = vld [vmem:[#allocation2 + $0x560] ss:$112 sps:$4 sm:$0xff]  }
 0x235   :  { %10060 = vmatpush1.bf16.msra.mxu0 %v18767_v50  ;;  %10232 = vmatpush1.bf16.msra.mxu1 %v18770_v51  ;;  %v18845_v50 = vld [vmem:[#allocation2 + $0x480] ss:$112 sps:$4 sm:$0xff]   ;;  %v18848_v51 = vld [vmem:[#allocation2 + $0x488] ss:$112 sps:$4 sm:$0xff]  }
 0x236   :  { %10061 = vmatprep.subr.bf16.mxu0 %v18775_v52  ;;  %10233 = vmatprep.subr.bf16.mxu1 %v18778_v53  ;;  %v18853_v52 = vld [vmem:[#allocation2 + $0x564] ss:$112 sps:$4 sm:$0xff]   ;;  %v18856_v53 = vld [vmem:[#allocation2 + $0x56c] ss:$112 sps:$4 sm:$0xff]  }
 0x237   :  { %10091 = vmatprep.mubr.bf16.mxu0 %v21413_v16  ;;  %10263 = vmatprep.mubr.bf16.mxu1 %v21413_v16 }
 0x239   :  { %10062 = vmatpush1.bf16.msra.mxu0 %v18773_v55  ;;  %10234 = vmatpush1.bf16.msra.mxu1 %v18776_v56  ;;  %v18854_v55 = vld [vmem:[#allocation2 + $0x568] ss:$112 sps:$4 sm:$0xff]   ;;  %v18859_v56 = vld [vmem:[#allocation2 + $0x644] ss:$112 sps:$4 sm:$0xff]  }
 0x23a   :  { %10063 = vmatprep.subr.bf16.mxu0 %v18781_v57  ;;  %10235 = vmatprep.subr.bf16.mxu1 %v18784_v58  ;;  %v18862_v57 = vld [vmem:[#allocation2 + $0x64c] ss:$112 sps:$4 sm:$0xff]   ;;  %v18857_v58 = vld [vmem:[#allocation2 + $0x640] ss:$112 sps:$4 sm:$0xff]  }
 0x23d   :  { %10064 = vmatpush1.bf16.msra.mxu0 %v18779_v59  ;;  %10236 = vmatpush1.bf16.msra.mxu1 %v18782_v60  ;;  %v18860_v59 = vld [vmem:[#allocation2 + $0x648] ss:$112 sps:$4 sm:$0xff]   ;;  %v18865_v60 = vld [vmem:[#allocation2 + $0x724] ss:$112 sps:$4 sm:$0xff]  }
 0x23e   :  { %10065 = vmatprep.subr.bf16.mxu0 %v18787_v61  ;;  %10237 = vmatprep.subr.bf16.mxu1 %v18790_v62  ;;  %v18868_v61 = vld [vmem:[#allocation2 + $0x72c] ss:$112 sps:$4 sm:$0xff]   ;;  %v18863_v62 = vld [vmem:[#allocation2 + $0x720] ss:$112 sps:$4 sm:$0xff]  }
 0x241   :  { %10066 = vmatpush1.bf16.msra.mxu0 %v18785_v63  ;;  %10238 = vmatpush1.bf16.msra.mxu1 %v18788_v0  ;;  %v18866_v63 = vld [vmem:[#allocation2 + $0x728] ss:$112 sps:$4 sm:$0xff]   ;;  %v18871_v0 = vld [vmem:[#allocation2 + $0x804] ss:$112 sps:$4 sm:$0xff]  }
 0x242   :  { %10067 = vmatprep.subr.bf16.mxu0 %v18793_v1  ;;  %10239 = vmatprep.subr.bf16.mxu1 %v18796_v2  ;;  %v18874_v1 = vld [vmem:[#allocation2 + $0x80c] ss:$112 sps:$4 sm:$0xff]   ;;  %v18869_v2 = vld [vmem:[#allocation2 + $0x800] ss:$112 sps:$4 sm:$0xff]  }
 0x245   :  { %10068 = vmatpush1.bf16.msra.mxu0 %v18791_v3  ;;  %10240 = vmatpush1.bf16.msra.mxu1 %v18794_v4  ;;  %v18872_v3 = vld [vmem:[#allocation2 + $0x808] ss:$112 sps:$4 sm:$0xff]   ;;  %v18877_v4 = vld [vmem:[#allocation2 + $0x8e4] ss:$112 sps:$4 sm:$0xff]  }
 0x246   :  { %10069 = vmatprep.subr.bf16.mxu0 %v18799_v5  ;;  %10241 = vmatprep.subr.bf16.mxu1 %v18802_v6  ;;  %v18880_v5 = vld [vmem:[#allocation2 + $0x8ec] ss:$112 sps:$4 sm:$0xff]   ;;  %v18875_v6 = vld [vmem:[#allocation2 + $0x8e0] ss:$112 sps:$4 sm:$0xff]  }
 0x247   :  { %v20952_v11 = vpop.f32.mrb[0].mxu0  ;;  %v20954_v12 = vpop.f32.mrb[0].mxu1 }
 0x248   :  { %v20956_v13 = vpop.f32.mrb[1].mxu0  ;;  %v20958_v14 = vpop.f32.mrb[1].mxu1 }
 0x249   :  { %v20960_v15 = vpop.f32.mrb[2].mxu0  ;;  %v20962_v17 = vpop.f32.mrb[2].mxu1  ;;  %10070 = vmatpush1.bf16.msra.mxu0 %v18797_v7  ;;  %10242 = vmatpush1.bf16.msra.mxu1 %v18800_v8  ;;  %v18878_v7 = vld [vmem:[#allocation2 + $0x8e8] ss:$112 sps:$4 sm:$0xff]   ;;  %v18883_v8 = vld [vmem:[#allocation2 + $0x9c4] ss:$112 sps:$4 sm:$0xff]  }
 0x24a   :  { %v20964_v20 = vpop.f32.mrb[3].mxu0  ;;  %v20966_v21 = vpop.f32.mrb[3].mxu1  ;;  %10071 = vmatprep.subr.bf16.mxu0 %v18805_v9  ;;  %10243 = vmatprep.subr.bf16.mxu1 %v18808_v10  ;;  %v18886_v9 = vld [vmem:[#allocation2 + $0x9cc] ss:$112 sps:$4 sm:$0xff]   ;;  %v18881_v10 = vld [vmem:[#allocation2 + $0x9c0] ss:$112 sps:$4 sm:$0xff]  }
 0x24d   :  { %10072 = vmatpush1.bf16.msra.mxu0 %v18803_v18  ;;  %10244 = vmatpush1.bf16.msra.mxu1 %v18806_v19  ;;  %v18884_v18 = vld [vmem:[#allocation2 + $0x9c8] ss:$112 sps:$4 sm:$0xff]   ;;  %v18889_v19 = vld [vmem:[#allocation2 + $0xaa4] ss:$112 sps:$4 sm:$0xff]  }
 0x24e   :  { %10073 = vmatprep.subr.bf16.mxu0 %v18811_v22  ;;  %10245 = vmatprep.subr.bf16.mxu1 %v18814_v23  ;;  %v18892_v22 = vld [vmem:[#allocation2 + $0xaac] ss:$112 sps:$4 sm:$0xff]   ;;  %v18887_v23 = vld [vmem:[#allocation2 + $0xaa0] ss:$112 sps:$4 sm:$0xff]  }
 0x251   :  { %10074 = vmatpush1.bf16.msra.mxu0 %v18809_v24  ;;  %10246 = vmatpush1.bf16.msra.mxu1 %v18812_v25  ;;  %v18890_v24 = vld [vmem:[#allocation2 + $0xaa8] ss:$112 sps:$4 sm:$0xff]   ;;  %v18895_v25 = vld [vmem:[#allocation2 + $0xb84] ss:$112 sps:$4 sm:$0xff]  }
 0x252   :  { %10274 = vmatprep.subr.bf16.mxu0 %v18817_v26  ;;  %10446 = vmatprep.subr.bf16.mxu1 %v18820_v27  ;;  %v18898_v26 = vld [vmem:[#allocation2 + $0xb8c] ss:$112 sps:$4 sm:$0xff]   ;;  %v18893_v27 = vld [vmem:[#allocation2 + $0xb80] ss:$112 sps:$4 sm:$0xff]  }
 0x254   :  { %10092 = vmatmul.mubr.bf16.vlgmr.msra.gmra.mrb[4].mxu0 %v20525_v32  ;;  %10264 = vmatmul.mubr.bf16.vlgmr.msra.gmra.mrb[4].mxu1 %v20525_v32  ;;  %v18902_v32 = vld [vmem:[#allocation2 + $0xc68] ss:$112 sps:$4 sm:$0xff]  }
 0x255   :  { %10275 = vmatpush1.bf16.msra.mxu0 %v18815_v28  ;;  %10447 = vmatpush1.bf16.msra.mxu1 %v18818_v29  ;;  %v18896_v28 = vld [vmem:[#allocation2 + $0xb88] ss:$112 sps:$4 sm:$0xff]   ;;  %v18901_v29 = vld [vmem:[#allocation2 + $0xc64] ss:$112 sps:$4 sm:$0xff]  }
 0x256   :  { %10276 = vmatprep.subr.bf16.mxu0 %v18823_v30  ;;  %10448 = vmatprep.subr.bf16.mxu1 %v18826_v31  ;;  %v18904_v30 = vld [vmem:[#allocation2 + $0xc6c] ss:$112 sps:$4 sm:$0xff]   ;;  %v18899_v31 = vld [vmem:[#allocation2 + $0xc60] ss:$112 sps:$4 sm:$0xff]  }
 0x257   :  { %10306 = vmatprep.mubr.bf16.mxu0 %v20526_v37  ;;  %10478 = vmatprep.mubr.bf16.mxu1 %v20526_v37  ;;  %v18913_v37 = vld [vmem:[#allocation2 + $0xe24] ss:$112 sps:$4 sm:$0xff]  }
 0x259   :  { %10277 = vmatpush1.bf16.msra.mxu0 %v18821_v33  ;;  %10449 = vmatpush1.bf16.msra.mxu1 %v18824_v34  ;;  %v18907_v33 = vld [vmem:[#allocation2 + $0xd44] ss:$112 sps:$4 sm:$0xff]   ;;  %v18910_v34 = vld [vmem:[#allocation2 + $0xd4c] ss:$112 sps:$4 sm:$0xff]  }
 0x25a   :  { %10278 = vmatprep.subr.bf16.mxu0 %v18829_v35  ;;  %10450 = vmatprep.subr.bf16.mxu1 %v18832_v36  ;;  %v18905_v35 = vld [vmem:[#allocation2 + $0xd40] ss:$112 sps:$4 sm:$0xff]   ;;  %v18908_v36 = vld [vmem:[#allocation2 + $0xd48] ss:$112 sps:$4 sm:$0xff]  }
 0x25d   :  { %10279 = vmatpush1.bf16.msra.mxu0 %v18827_v38  ;;  %10451 = vmatpush1.bf16.msra.mxu1 %v18830_v39  ;;  %v18916_v38 = vld [vmem:[#allocation2 + $0xe2c] ss:$112 sps:$4 sm:$0xff]   ;;  %v18911_v39 = vld [vmem:[#allocation2 + $0xe20] ss:$112 sps:$4 sm:$0xff]  }
 0x25e   :  { %10280 = vmatprep.subr.bf16.mxu0 %v18835_v40  ;;  %10452 = vmatprep.subr.bf16.mxu1 %v18838_v41  ;;  %v18914_v40 = vld [vmem:[#allocation2 + $0xe28] ss:$112 sps:$4 sm:$0xff]   ;;  %v18919_v41 = vld [vmem:[#allocation2 + $0xf04] ss:$112 sps:$4 sm:$0xff]  }
 0x261   :  { %10281 = vmatpush1.bf16.msra.mxu0 %v18833_v42  ;;  %10453 = vmatpush1.bf16.msra.mxu1 %v18836_v43  ;;  %v18922_v42 = vld [vmem:[#allocation2 + $0xf0c] ss:$112 sps:$4 sm:$0xff]  }
 0x262   :  { %10282 = vmatprep.subr.bf16.mxu0 %v18841_v44  ;;  %10454 = vmatprep.subr.bf16.mxu1 %v18844_v45  ;;  %v20527_v43 = vld [vmem:[%s21403_s0] ss:$28 sps:$4 sm:$0xff]   ;;  %v18920_v45 = vld [vmem:[#allocation2 + $0xf08] ss:$112 sps:$4 sm:$0xff]  }
 0x263   :  { %v18917_v44 = vld [vmem:[#allocation2 + $0xf00] ss:$112 sps:$4 sm:$0xff]  }
 0x265   :  { %10283 = vmatpush1.bf16.msra.mxu0 %v18839_v46  ;;  %10455 = vmatpush1.bf16.msra.mxu1 %v18842_v47  ;;  %v18925_v46 = vld [vmem:[#allocation2 + $0xfe4] ss:$112 sps:$4 sm:$0xff]   ;;  %v18928_v47 = vld [vmem:[#allocation2 + $0xfec] ss:$112 sps:$4 sm:$0xff]  }
 0x266   :  { %10284 = vmatprep.subr.bf16.mxu0 %v18847_v48  ;;  %10456 = vmatprep.subr.bf16.mxu1 %v18850_v49  ;;  %v20528_v48 = vld [vmem:[%s21403_s0 + $0xc] ss:$28 sps:$4 sm:$0xff]   ;;  %v18923_v49 = vld [vmem:[#allocation2 + $0xfe0] ss:$112 sps:$4 sm:$0xff]  }
 0x269   :  { %10285 = vmatpush1.bf16.msra.mxu0 %v18845_v50  ;;  %10457 = vmatpush1.bf16.msra.mxu1 %v18848_v51  ;;  %v18926_v50 = vld [vmem:[#allocation2 + $0xfe8] ss:$112 sps:$4 sm:$0xff]   ;;  %v18931_v51 = vld [vmem:[#allocation2 + $0x10c4] ss:$112 sps:$4 sm:$0xff]  }
 0x26a   :  { %10286 = vmatprep.subr.bf16.mxu0 %v18853_v52  ;;  %10458 = vmatprep.subr.bf16.mxu1 %v18856_v53  ;;  %v18934_v52 = vld [vmem:[#allocation2 + $0x10cc] ss:$112 sps:$4 sm:$0xff]   ;;  %v18929_v53 = vld [vmem:[#allocation2 + $0x10c0] ss:$112 sps:$4 sm:$0xff]  }
 0x26d   :  { %10287 = vmatpush1.bf16.msra.mxu0 %v18851_v54  ;;  %10459 = vmatpush1.bf16.msra.mxu1 %v18854_v55  ;;  %v18932_v54 = vld [vmem:[#allocation2 + $0x10c8] ss:$112 sps:$4 sm:$0xff]   ;;  %v18937_v55 = vld [vmem:[#allocation2 + $0x11a4] ss:$112 sps:$4 sm:$0xff]  }
 0x26e   :  { %10288 = vmatprep.subr.bf16.mxu0 %v18859_v56  ;;  %10460 = vmatprep.subr.bf16.mxu1 %v18862_v57  ;;  %v18940_v56 = vld [vmem:[#allocation2 + $0x11ac] ss:$112 sps:$4 sm:$0xff]   ;;  %v18935_v57 = vld [vmem:[#allocation2 + $0x11a0] ss:$112 sps:$4 sm:$0xff]  }
 0x271   :  { %10289 = vmatpush1.bf16.msra.mxu0 %v18857_v58  ;;  %10461 = vmatpush1.bf16.msra.mxu1 %v18860_v59  ;;  %v18938_v58 = vld [vmem:[#allocation2 + $0x11a8] ss:$112 sps:$4 sm:$0xff]   ;;  %v18943_v59 = vld [vmem:[#allocation2 + $0x1284] ss:$112 sps:$4 sm:$0xff]  }
 0x272   :  { %10290 = vmatprep.subr.bf16.mxu0 %v18865_v60  ;;  %10462 = vmatprep.subr.bf16.mxu1 %v18868_v61  ;;  %v18946_v60 = vld [vmem:[#allocation2 + $0x128c] ss:$112 sps:$4 sm:$0xff]   ;;  %v18941_v61 = vld [vmem:[#allocation2 + $0x1280] ss:$112 sps:$4 sm:$0xff]  }
 0x275   :  { %10291 = vmatpush1.bf16.msra.mxu0 %v18863_v62  ;;  %10463 = vmatpush1.bf16.msra.mxu1 %v18866_v63  ;;  %v18944_v62 = vld [vmem:[#allocation2 + $0x1288] ss:$112 sps:$4 sm:$0xff]   ;;  %v18949_v63 = vld [vmem:[#allocation2 + $0x1364] ss:$112 sps:$4 sm:$0xff]  }
 0x276   :  { %10292 = vmatprep.subr.bf16.mxu0 %v18871_v0  ;;  %10464 = vmatprep.subr.bf16.mxu1 %v18874_v1  ;;  %v18952_v0 = vld [vmem:[#allocation2 + $0x136c] ss:$112 sps:$4 sm:$0xff]   ;;  %v18947_v1 = vld [vmem:[#allocation2 + $0x1360] ss:$112 sps:$4 sm:$0xff]  }
 0x279   :  { %10293 = vmatpush1.bf16.msra.mxu0 %v18869_v2  ;;  %10465 = vmatpush1.bf16.msra.mxu1 %v18872_v3  ;;  %v18950_v2 = vld [vmem:[#allocation2 + $0x1368] ss:$112 sps:$4 sm:$0xff]   ;;  %v18955_v3 = vld [vmem:[#allocation2 + $0x1444] ss:$112 sps:$4 sm:$0xff]  }
 0x27a   :  { %10294 = vmatprep.subr.bf16.mxu0 %v18877_v4  ;;  %10466 = vmatprep.subr.bf16.mxu1 %v18880_v5  ;;  %v18958_v4 = vld [vmem:[#allocation2 + $0x144c] ss:$112 sps:$4 sm:$0xff]   ;;  %v18953_v5 = vld [vmem:[#allocation2 + $0x1440] ss:$112 sps:$4 sm:$0xff]  }
 0x27d   :  { %10295 = vmatpush1.bf16.msra.mxu0 %v18875_v6  ;;  %10467 = vmatpush1.bf16.msra.mxu1 %v18878_v7  ;;  %v18956_v6 = vld [vmem:[#allocation2 + $0x1448] ss:$112 sps:$4 sm:$0xff]   ;;  %v18961_v7 = vld [vmem:[#allocation2 + $0x1524] ss:$112 sps:$4 sm:$0xff]  }
 0x27e   :  { %10296 = vmatprep.subr.bf16.mxu0 %v18883_v8  ;;  %10468 = vmatprep.subr.bf16.mxu1 %v18886_v9  ;;  %v18964_v8 = vld [vmem:[#allocation2 + $0x152c] ss:$112 sps:$4 sm:$0xff]   ;;  %v18959_v9 = vld [vmem:[#allocation2 + $0x1520] ss:$112 sps:$4 sm:$0xff]  }
 0x281   :  { %10297 = vmatpush1.bf16.msra.mxu0 %v18881_v10  ;;  %10469 = vmatpush1.bf16.msra.mxu1 %v18884_v18  ;;  %v18962_v10 = vld [vmem:[#allocation2 + $0x1528] ss:$112 sps:$4 sm:$0xff]   ;;  %v18967_v18 = vld [vmem:[#allocation2 + $0x1604] ss:$112 sps:$4 sm:$0xff]  }
 0x282   :  { %10298 = vmatprep.subr.bf16.mxu0 %v18889_v19  ;;  %10470 = vmatprep.subr.bf16.mxu1 %v18892_v22  ;;  %v18970_v19 = vld [vmem:[#allocation2 + $0x160c] ss:$112 sps:$4 sm:$0xff]   ;;  %v18965_v22 = vld [vmem:[#allocation2 + $0x1600] ss:$112 sps:$4 sm:$0xff]  }
 0x285   :  { %10299 = vmatpush1.bf16.msra.mxu0 %v18887_v23  ;;  %10471 = vmatpush1.bf16.msra.mxu1 %v18890_v24  ;;  %v18968_v23 = vld [vmem:[#allocation2 + $0x1608] ss:$112 sps:$4 sm:$0xff]   ;;  %v18973_v24 = vld [vmem:[#allocation2 + $0x16e4] ss:$112 sps:$4 sm:$0xff]  }
 0x286   :  { %10300 = vmatprep.subr.bf16.mxu0 %v18895_v25  ;;  %10472 = vmatprep.subr.bf16.mxu1 %v18898_v26  ;;  %v18976_v25 = vld [vmem:[#allocation2 + $0x16ec] ss:$112 sps:$4 sm:$0xff]   ;;  %v18971_v26 = vld [vmem:[#allocation2 + $0x16e0] ss:$112 sps:$4 sm:$0xff]  }
 0x289   :  { %10301 = vmatpush1.bf16.msra.mxu0 %v18893_v27  ;;  %10473 = vmatpush1.bf16.msra.mxu1 %v18896_v28  ;;  %v18974_v27 = vld [vmem:[#allocation2 + $0x16e8] ss:$112 sps:$4 sm:$0xff]   ;;  %v18979_v28 = vld [vmem:[#allocation2 + $0x17c4] ss:$112 sps:$4 sm:$0xff]  }
 0x28a   :  { %10302 = vmatprep.subr.bf16.mxu0 %v18901_v29  ;;  %10474 = vmatprep.subr.bf16.mxu1 %v18904_v30  ;;  %v18982_v29 = vld [vmem:[#allocation2 + $0x17cc] ss:$112 sps:$4 sm:$0xff]   ;;  %v18977_v30 = vld [vmem:[#allocation2 + $0x17c0] ss:$112 sps:$4 sm:$0xff]  }
 0x28d   :  { %10303 = vmatpush1.bf16.msra.mxu0 %v18899_v31  ;;  %10475 = vmatpush1.bf16.msra.mxu1 %v18902_v32  ;;  %v18980_v31 = vld [vmem:[#allocation2 + $0x17c8] ss:$112 sps:$4 sm:$0xff]   ;;  %v18985_v32 = vld [vmem:[#allocation2 + $0x18a4] ss:$112 sps:$4 sm:$0xff]  }
 0x28e   :  { %10304 = vmatprep.subr.bf16.mxu0 %v18907_v33  ;;  %10476 = vmatprep.subr.bf16.mxu1 %v18910_v34  ;;  %v18988_v33 = vld [vmem:[#allocation2 + $0x18ac] ss:$112 sps:$4 sm:$0xff]   ;;  %v18983_v34 = vld [vmem:[#allocation2 + $0x18a0] ss:$112 sps:$4 sm:$0xff]  }
 0x291   :  { %10305 = vmatpush1.bf16.msra.mxu0 %v18905_v35  ;;  %10477 = vmatpush1.bf16.msra.mxu1 %v18908_v36  ;;  %v18986_v35 = vld [vmem:[#allocation2 + $0x18a8] ss:$112 sps:$4 sm:$0xff]   ;;  %v18991_v36 = vld [vmem:[#allocation2 + $0x1984] ss:$112 sps:$4 sm:$0xff]  }
 0x292   :  { %10317 = vmatprep.subr.bf16.mxu0 %v18913_v37  ;;  %10489 = vmatprep.subr.bf16.mxu1 %v18916_v38  ;;  %v18994_v37 = vld [vmem:[#allocation2 + $0x198c] ss:$112 sps:$4 sm:$0xff]   ;;  %v18989_v38 = vld [vmem:[#allocation2 + $0x1980] ss:$112 sps:$4 sm:$0xff]  }
 0x294   :  { %10307 = vmatmul.mubr.bf16.vlgmr.msra.gmra.mrb[8].mxu0 %v20527_v43  ;;  %10479 = vmatmul.mubr.bf16.vlgmr.msra.gmra.mrb[8].mxu1 %v20527_v43  ;;  %v18998_v43 = vld [vmem:[#allocation2 + $0x1a68] ss:$112 sps:$4 sm:$0xff]  }
 0x295   :  { %10318 = vmatpush1.bf16.msra.mxu0 %v18911_v39  ;;  %10490 = vmatpush1.bf16.msra.mxu1 %v18914_v40  ;;  %v18992_v39 = vld [vmem:[#allocation2 + $0x1988] ss:$112 sps:$4 sm:$0xff]   ;;  %v18997_v40 = vld [vmem:[#allocation2 + $0x1a64] ss:$112 sps:$4 sm:$0xff]  }
 0x296   :  { %10319 = vmatprep.subr.bf16.mxu0 %v18919_v41  ;;  %10491 = vmatprep.subr.bf16.mxu1 %v18922_v42  ;;  %v19000_v41 = vld [vmem:[#allocation2 + $0x1a6c] ss:$112 sps:$4 sm:$0xff]   ;;  %v18995_v42 = vld [vmem:[#allocation2 + $0x1a60] ss:$112 sps:$4 sm:$0xff]  }
 0x297   :  { %10349 = vmatprep.mubr.bf16.mxu0 %v20528_v48  ;;  %10521 = vmatprep.mubr.bf16.mxu1 %v20528_v48  ;;  %v19009_v48 = vld [vmem:[#allocation2 + $0x1c24] ss:$112 sps:$4 sm:$0xff]  }
 0x299   :  { %10320 = vmatpush1.bf16.msra.mxu0 %v18917_v44  ;;  %10492 = vmatpush1.bf16.msra.mxu1 %v18920_v45  ;;  %v19003_v44 = vld [vmem:[#allocation2 + $0x1b44] ss:$112 sps:$4 sm:$0xff]   ;;  %v19006_v45 = vld [vmem:[#allocation2 + $0x1b4c] ss:$112 sps:$4 sm:$0xff]  }
 0x29a   :  { %10321 = vmatprep.subr.bf16.mxu0 %v18925_v46  ;;  %10493 = vmatprep.subr.bf16.mxu1 %v18928_v47  ;;  %v19001_v46 = vld [vmem:[#allocation2 + $0x1b40] ss:$112 sps:$4 sm:$0xff]   ;;  %v19004_v47 = vld [vmem:[#allocation2 + $0x1b48] ss:$112 sps:$4 sm:$0xff]  }
 0x29d   :  { %10322 = vmatpush1.bf16.msra.mxu0 %v18923_v49  ;;  %10494 = vmatpush1.bf16.msra.mxu1 %v18926_v50  ;;  %v19012_v49 = vld [vmem:[#allocation2 + $0x1c2c] ss:$112 sps:$4 sm:$0xff]   ;;  %v19007_v50 = vld [vmem:[#allocation2 + $0x1c20] ss:$112 sps:$4 sm:$0xff]  }
 0x29e   :  { %10323 = vmatprep.subr.bf16.mxu0 %v18931_v51  ;;  %10495 = vmatprep.subr.bf16.mxu1 %v18934_v52  ;;  %v19010_v51 = vld [vmem:[#allocation2 + $0x1c28] ss:$112 sps:$4 sm:$0xff]   ;;  %v19015_v52 = vld [vmem:[#allocation2 + $0x1d04] ss:$112 sps:$4 sm:$0xff]  }
 0x2a1   :  { %10324 = vmatpush1.bf16.msra.mxu0 %v18929_v53  ;;  %10496 = vmatpush1.bf16.msra.mxu1 %v18932_v54  ;;  %v19018_v53 = vld [vmem:[#allocation2 + $0x1d0c] ss:$112 sps:$4 sm:$0xff]   ;;  %v20529_v54 = vld [vmem:[%s21403_s0 + $0x8] ss:$28 sps:$4 sm:$0xff]  }
 0x2a2   :  { %10325 = vmatprep.subr.bf16.mxu0 %v18937_v55  ;;  %10497 = vmatprep.subr.bf16.mxu1 %v18940_v56  ;;  %v19013_v55 = vld [vmem:[#allocation2 + $0x1d00] ss:$112 sps:$4 sm:$0xff]   ;;  %v19016_v56 = vld [vmem:[#allocation2 + $0x1d08] ss:$112 sps:$4 sm:$0xff]  }
 0x2a5   :  { %10326 = vmatpush1.bf16.msra.mxu0 %v18935_v57  ;;  %10498 = vmatpush1.bf16.msra.mxu1 %v18938_v58  ;;  %v19021_v57 = vld [vmem:[#allocation2 + $0x1de4] ss:$112 sps:$4 sm:$0xff]   ;;  %v19024_v58 = vld [vmem:[#allocation2 + $0x1dec] ss:$112 sps:$4 sm:$0xff]  }
 0x2a6   :  { %10327 = vmatprep.subr.bf16.mxu0 %v18943_v59  ;;  %10499 = vmatprep.subr.bf16.mxu1 %v18946_v60  ;;  %v20530_v59 = vld [vmem:[%s21403_s0 + $0x14] ss:$28 sps:$4 sm:$0xff]  }
 0x2a7   :  { %v19019_v60 = vld [vmem:[#allocation2 + $0x1de0] ss:$112 sps:$4 sm:$0xff]  }
 0x2a9   :  { %10328 = vmatpush1.bf16.msra.mxu0 %v18941_v61  ;;  %10500 = vmatpush1.bf16.msra.mxu1 %v18944_v62  ;;  %v19022_v61 = vld [vmem:[#allocation2 + $0x1de8] ss:$112 sps:$4 sm:$0xff]   ;;  %v19027_v62 = vld [vmem:[#allocation2 + $0x1ec4] ss:$112 sps:$4 sm:$0xff]  }
 0x2aa   :  { %10329 = vmatprep.subr.bf16.mxu0 %v18949_v63  ;;  %10501 = vmatprep.subr.bf16.mxu1 %v18952_v0  ;;  %v19030_v63 = vld [vmem:[#allocation2 + $0x1ecc] ss:$112 sps:$4 sm:$0xff]   ;;  %v19025_v0 = vld [vmem:[#allocation2 + $0x1ec0] ss:$112 sps:$4 sm:$0xff]  }
 0x2ad   :  { %10330 = vmatpush1.bf16.msra.mxu0 %v18947_v1  ;;  %10502 = vmatpush1.bf16.msra.mxu1 %v18950_v2  ;;  %v19028_v1 = vld [vmem:[#allocation2 + $0x1ec8] ss:$112 sps:$4 sm:$0xff]   ;;  %v19033_v2 = vld [vmem:[#allocation2 + $0x1fa4] ss:$112 sps:$4 sm:$0xff]  }
 0x2ae   :  { %10331 = vmatprep.subr.bf16.mxu0 %v18955_v3  ;;  %10503 = vmatprep.subr.bf16.mxu1 %v18958_v4  ;;  %v19036_v3 = vld [vmem:[#allocation2 + $0x1fac] ss:$112 sps:$4 sm:$0xff]   ;;  %v19031_v4 = vld [vmem:[#allocation2 + $0x1fa0] ss:$112 sps:$4 sm:$0xff]  }
 0x2b1   :  { %10332 = vmatpush1.bf16.msra.mxu0 %v18953_v5  ;;  %10504 = vmatpush1.bf16.msra.mxu1 %v18956_v6  ;;  %v19034_v5 = vld [vmem:[#allocation2 + $0x1fa8] ss:$112 sps:$4 sm:$0xff]   ;;  %v19039_v6 = vld [vmem:[#allocation2 + $0x2084] ss:$112 sps:$4 sm:$0xff]  }
 0x2b2   :  { %10333 = vmatprep.subr.bf16.mxu0 %v18961_v7  ;;  %10505 = vmatprep.subr.bf16.mxu1 %v18964_v8  ;;  %v19042_v7 = vld [vmem:[#allocation2 + $0x208c] ss:$112 sps:$4 sm:$0xff]   ;;  %v19037_v8 = vld [vmem:[#allocation2 + $0x2080] ss:$112 sps:$4 sm:$0xff]  }
 0x2b5   :  { %10334 = vmatpush1.bf16.msra.mxu0 %v18959_v9  ;;  %10506 = vmatpush1.bf16.msra.mxu1 %v18962_v10  ;;  %v19040_v9 = vld [vmem:[#allocation2 + $0x2088] ss:$112 sps:$4 sm:$0xff]   ;;  %v19045_v10 = vld [vmem:[#allocation2 + $0x2164] ss:$112 sps:$4 sm:$0xff]  }
 0x2b6   :  { %10335 = vmatprep.subr.bf16.mxu0 %v18967_v18  ;;  %10507 = vmatprep.subr.bf16.mxu1 %v18970_v19  ;;  %v19048_v18 = vld [vmem:[#allocation2 + $0x216c] ss:$112 sps:$4 sm:$0xff]   ;;  %v19043_v19 = vld [vmem:[#allocation2 + $0x2160] ss:$112 sps:$4 sm:$0xff]  }
 0x2b9   :  { %10336 = vmatpush1.bf16.msra.mxu0 %v18965_v22  ;;  %10508 = vmatpush1.bf16.msra.mxu1 %v18968_v23  ;;  %v19046_v22 = vld [vmem:[#allocation2 + $0x2168] ss:$112 sps:$4 sm:$0xff]   ;;  %v19051_v23 = vld [vmem:[#allocation2 + $0x2244] ss:$112 sps:$4 sm:$0xff]  }
 0x2ba   :  { %10337 = vmatprep.subr.bf16.mxu0 %v18973_v24  ;;  %10509 = vmatprep.subr.bf16.mxu1 %v18976_v25  ;;  %v19054_v24 = vld [vmem:[#allocation2 + $0x224c] ss:$112 sps:$4 sm:$0xff]   ;;  %v19049_v25 = vld [vmem:[#allocation2 + $0x2240] ss:$112 sps:$4 sm:$0xff]  }
 0x2bd   :  { %10338 = vmatpush1.bf16.msra.mxu0 %v18971_v26  ;;  %10510 = vmatpush1.bf16.msra.mxu1 %v18974_v27  ;;  %v19052_v26 = vld [vmem:[#allocation2 + $0x2248] ss:$112 sps:$4 sm:$0xff]   ;;  %v19057_v27 = vld [vmem:[#allocation2 + $0x2324] ss:$112 sps:$4 sm:$0xff]  }
 0x2be   :  { %10339 = vmatprep.subr.bf16.mxu0 %v18979_v28  ;;  %10511 = vmatprep.subr.bf16.mxu1 %v18982_v29  ;;  %v19060_v28 = vld [vmem:[#allocation2 + $0x232c] ss:$112 sps:$4 sm:$0xff]   ;;  %v19055_v29 = vld [vmem:[#allocation2 + $0x2320] ss:$112 sps:$4 sm:$0xff]  }
 0x2c1   :  { %10340 = vmatpush1.bf16.msra.mxu0 %v18977_v30  ;;  %10512 = vmatpush1.bf16.msra.mxu1 %v18980_v31  ;;  %v19058_v30 = vld [vmem:[#allocation2 + $0x2328] ss:$112 sps:$4 sm:$0xff]   ;;  %v19063_v31 = vld [vmem:[#allocation2 + $0x2404] ss:$112 sps:$4 sm:$0xff]  }
 0x2c2   :  { %10341 = vmatprep.subr.bf16.mxu0 %v18985_v32  ;;  %10513 = vmatprep.subr.bf16.mxu1 %v18988_v33  ;;  %v19066_v32 = vld [vmem:[#allocation2 + $0x240c] ss:$112 sps:$4 sm:$0xff]   ;;  %v19061_v33 = vld [vmem:[#allocation2 + $0x2400] ss:$112 sps:$4 sm:$0xff]  }
 0x2c5   :  { %10342 = vmatpush1.bf16.msra.mxu0 %v18983_v34  ;;  %10514 = vmatpush1.bf16.msra.mxu1 %v18986_v35  ;;  %v19064_v34 = vld [vmem:[#allocation2 + $0x2408] ss:$112 sps:$4 sm:$0xff]   ;;  %v19069_v35 = vld [vmem:[#allocation2 + $0x24e4] ss:$112 sps:$4 sm:$0xff]  }
 0x2c6   :  { %10343 = vmatprep.subr.bf16.mxu0 %v18991_v36  ;;  %10515 = vmatprep.subr.bf16.mxu1 %v18994_v37  ;;  %v19072_v36 = vld [vmem:[#allocation2 + $0x24ec] ss:$112 sps:$4 sm:$0xff]   ;;  %v19067_v37 = vld [vmem:[#allocation2 + $0x24e0] ss:$112 sps:$4 sm:$0xff]  }
 0x2c9   :  { %10344 = vmatpush1.bf16.msra.mxu0 %v18989_v38  ;;  %10516 = vmatpush1.bf16.msra.mxu1 %v18992_v39  ;;  %v19070_v38 = vld [vmem:[#allocation2 + $0x24e8] ss:$112 sps:$4 sm:$0xff]   ;;  %v19075_v39 = vld [vmem:[#allocation2 + $0x25c4] ss:$112 sps:$4 sm:$0xff]  }
 0x2ca   :  { %10345 = vmatprep.subr.bf16.mxu0 %v18997_v40  ;;  %10517 = vmatprep.subr.bf16.mxu1 %v19000_v41  ;;  %v19078_v40 = vld [vmem:[#allocation2 + $0x25cc] ss:$112 sps:$4 sm:$0xff]   ;;  %v19073_v41 = vld [vmem:[#allocation2 + $0x25c0] ss:$112 sps:$4 sm:$0xff]  }
 0x2cd   :  { %10346 = vmatpush1.bf16.msra.mxu0 %v18995_v42  ;;  %10518 = vmatpush1.bf16.msra.mxu1 %v18998_v43  ;;  %v19076_v42 = vld [vmem:[#allocation2 + $0x25c8] ss:$112 sps:$4 sm:$0xff]   ;;  %v19081_v43 = vld [vmem:[#allocation2 + $0x26a4] ss:$112 sps:$4 sm:$0xff]  }
 0x2ce   :  { %10347 = vmatprep.subr.bf16.mxu0 %v19003_v44  ;;  %10519 = vmatprep.subr.bf16.mxu1 %v19006_v45  ;;  %v19084_v44 = vld [vmem:[#allocation2 + $0x26ac] ss:$112 sps:$4 sm:$0xff]   ;;  %v19079_v45 = vld [vmem:[#allocation2 + $0x26a0] ss:$112 sps:$4 sm:$0xff]  }
 0x2d1   :  { %10348 = vmatpush1.bf16.msra.mxu0 %v19001_v46  ;;  %10520 = vmatpush1.bf16.msra.mxu1 %v19004_v47  ;;  %v19082_v46 = vld [vmem:[#allocation2 + $0x26a8] ss:$112 sps:$4 sm:$0xff]   ;;  %v19087_v47 = vld [vmem:[#allocation2 + $0x2784] ss:$112 sps:$4 sm:$0xff]  }
 0x2d2   :  { %10360 = vmatprep.subr.bf16.mxu0 %v19009_v48  ;;  %10532 = vmatprep.subr.bf16.mxu1 %v19012_v49  ;;  %v19090_v48 = vld [vmem:[#allocation2 + $0x278c] ss:$112 sps:$4 sm:$0xff]   ;;  %v19085_v49 = vld [vmem:[#allocation2 + $0x2780] ss:$112 sps:$4 sm:$0xff]  }
 0x2d4   :  { %10350 = vmatmul.mubr.bf16.vlgmr.msra.gmra.mrb[8].mxu0 %v20529_v54  ;;  %10522 = vmatmul.mubr.bf16.vlgmr.msra.gmra.mrb[8].mxu1 %v20529_v54  ;;  %v19094_v54 = vld [vmem:[#allocation2 + $0x2868] ss:$112 sps:$4 sm:$0xff]  }
 0x2d5   :  { %10361 = vmatpush1.bf16.msra.mxu0 %v19007_v50  ;;  %10533 = vmatpush1.bf16.msra.mxu1 %v19010_v51  ;;  %v19088_v50 = vld [vmem:[#allocation2 + $0x2788] ss:$112 sps:$4 sm:$0xff]   ;;  %v19093_v51 = vld [vmem:[#allocation2 + $0x2864] ss:$112 sps:$4 sm:$0xff]  }
 0x2d6   :  { %10362 = vmatprep.subr.bf16.mxu0 %v19015_v52  ;;  %10534 = vmatprep.subr.bf16.mxu1 %v19018_v53  ;;  %v19096_v52 = vld [vmem:[#allocation2 + $0x286c] ss:$112 sps:$4 sm:$0xff]   ;;  %v19091_v53 = vld [vmem:[#allocation2 + $0x2860] ss:$112 sps:$4 sm:$0xff]  }
 0x2d7   :  { %10392 = vmatprep.mubr.bf16.mxu0 %v20530_v59  ;;  %10564 = vmatprep.mubr.bf16.mxu1 %v20530_v59  ;;  %v19105_v59 = vld [vmem:[#allocation2 + $0x2a24] ss:$112 sps:$4 sm:$0xff]  }
 0x2d9   :  { %10363 = vmatpush1.bf16.msra.mxu0 %v19013_v55  ;;  %10535 = vmatpush1.bf16.msra.mxu1 %v19016_v56  ;;  %v19099_v55 = vld [vmem:[#allocation2 + $0x2944] ss:$112 sps:$4 sm:$0xff]   ;;  %v19102_v56 = vld [vmem:[#allocation2 + $0x294c] ss:$112 sps:$4 sm:$0xff]  }
 0x2da   :  { %10364 = vmatprep.subr.bf16.mxu0 %v19021_v57  ;;  %10536 = vmatprep.subr.bf16.mxu1 %v19024_v58  ;;  %v19097_v57 = vld [vmem:[#allocation2 + $0x2940] ss:$112 sps:$4 sm:$0xff]   ;;  %v19100_v58 = vld [vmem:[#allocation2 + $0x2948] ss:$112 sps:$4 sm:$0xff]  }
 0x2dd   :  { %10365 = vmatpush1.bf16.msra.mxu0 %v19019_v60  ;;  %10537 = vmatpush1.bf16.msra.mxu1 %v19022_v61  ;;  %v19108_v60 = vld [vmem:[#allocation2 + $0x2a2c] ss:$112 sps:$4 sm:$0xff]   ;;  %v19103_v61 = vld [vmem:[#allocation2 + $0x2a20] ss:$112 sps:$4 sm:$0xff]  }
 0x2de   :  { %10366 = vmatprep.subr.bf16.mxu0 %v19027_v62  ;;  %10538 = vmatprep.subr.bf16.mxu1 %v19030_v63  ;;  %v19106_v62 = vld [vmem:[#allocation2 + $0x2a28] ss:$112 sps:$4 sm:$0xff]   ;;  %v19111_v63 = vld [vmem:[#allocation2 + $0x2b04] ss:$112 sps:$4 sm:$0xff]  }
 0x2e1   :  { %10367 = vmatpush1.bf16.msra.mxu0 %v19025_v0  ;;  %10539 = vmatpush1.bf16.msra.mxu1 %v19028_v1  ;;  %v19114_v0 = vld [vmem:[#allocation2 + $0x2b0c] ss:$112 sps:$4 sm:$0xff]  }
 0x2e2   :  { %10368 = vmatprep.subr.bf16.mxu0 %v19033_v2  ;;  %10540 = vmatprep.subr.bf16.mxu1 %v19036_v3  ;;  %v20531_v1 = vld [vmem:[%s21403_s0 + $0x10] ss:$28 sps:$4 sm:$0xff]   ;;  %v19112_v3 = vld [vmem:[#allocation2 + $0x2b08] ss:$112 sps:$4 sm:$0xff]  }
 0x2e3   :  { %v19109_v2 = vld [vmem:[#allocation2 + $0x2b00] ss:$112 sps:$4 sm:$0xff]  }
 0x2e5   :  { %10369 = vmatpush1.bf16.msra.mxu0 %v19031_v4  ;;  %10541 = vmatpush1.bf16.msra.mxu1 %v19034_v5  ;;  %v19117_v4 = vld [vmem:[#allocation2 + $0x2be4] ss:$112 sps:$4 sm:$0xff]   ;;  %v19120_v5 = vld [vmem:[#allocation2 + $0x2bec] ss:$112 sps:$4 sm:$0xff]  }
 0x2e6   :  { %10370 = vmatprep.subr.bf16.mxu0 %v19039_v6  ;;  %10542 = vmatprep.subr.bf16.mxu1 %v19042_v7  ;;  %v19115_v6 = vld [vmem:[#allocation2 + $0x2be0] ss:$112 sps:$4 sm:$0xff]   ;;  %v19118_v7 = vld [vmem:[#allocation2 + $0x2be8] ss:$112 sps:$4 sm:$0xff]  }
 0x2e9   :  { %10371 = vmatpush1.bf16.msra.mxu0 %v19037_v8  ;;  %10543 = vmatpush1.bf16.msra.mxu1 %v19040_v9  ;;  %v19123_v8 = vld [vmem:[#allocation2 + $0x2cc4] ss:$112 sps:$4 sm:$0xff]   ;;  %v19126_v9 = vld [vmem:[#allocation2 + $0x2ccc] ss:$112 sps:$4 sm:$0xff]  }
 0x2ea   :  { %10372 = vmatprep.subr.bf16.mxu0 %v19045_v10  ;;  %10544 = vmatprep.subr.bf16.mxu1 %v19048_v18  ;;  %v19121_v10 = vld [vmem:[#allocation2 + $0x2cc0] ss:$112 sps:$4 sm:$0xff]   ;;  %v19124_v18 = vld [vmem:[#allocation2 + $0x2cc8] ss:$112 sps:$4 sm:$0xff]  }
 0x2ed   :  { %10373 = vmatpush1.bf16.msra.mxu0 %v19043_v19  ;;  %10545 = vmatpush1.bf16.msra.mxu1 %v19046_v22  ;;  %v19129_v19 = vld [vmem:[#allocation2 + $0x2da4] ss:$112 sps:$4 sm:$0xff]   ;;  %v19132_v22 = vld [vmem:[#allocation2 + $0x2dac] ss:$112 sps:$4 sm:$0xff]  }
 0x2ee   :  { %10374 = vmatprep.subr.bf16.mxu0 %v19051_v23  ;;  %10546 = vmatprep.subr.bf16.mxu1 %v19054_v24  ;;  %v19127_v23 = vld [vmem:[#allocation2 + $0x2da0] ss:$112 sps:$4 sm:$0xff]   ;;  %v19130_v24 = vld [vmem:[#allocation2 + $0x2da8] ss:$112 sps:$4 sm:$0xff]  }
 0x2f1   :  { %10375 = vmatpush1.bf16.msra.mxu0 %v19049_v25  ;;  %10547 = vmatpush1.bf16.msra.mxu1 %v19052_v26  ;;  %v19135_v25 = vld [vmem:[#allocation2 + $0x2e84] ss:$112 sps:$4 sm:$0xff]   ;;  %v19138_v26 = vld [vmem:[#allocation2 + $0x2e8c] ss:$112 sps:$4 sm:$0xff]  }
 0x2f2   :  { %10376 = vmatprep.subr.bf16.mxu0 %v19057_v27  ;;  %10548 = vmatprep.subr.bf16.mxu1 %v19060_v28  ;;  %v19133_v27 = vld [vmem:[#allocation2 + $0x2e80] ss:$112 sps:$4 sm:$0xff]   ;;  %v19136_v28 = vld [vmem:[#allocation2 + $0x2e88] ss:$112 sps:$4 sm:$0xff]  }
 0x2f5   :  { %10377 = vmatpush1.bf16.msra.mxu0 %v19055_v29  ;;  %10549 = vmatpush1.bf16.msra.mxu1 %v19058_v30  ;;  %v19141_v29 = vld [vmem:[#allocation2 + $0x2f64] ss:$112 sps:$4 sm:$0xff]   ;;  %v19144_v30 = vld [vmem:[#allocation2 + $0x2f6c] ss:$112 sps:$4 sm:$0xff]  }
 0x2f6   :  { %10378 = vmatprep.subr.bf16.mxu0 %v19063_v31  ;;  %10550 = vmatprep.subr.bf16.mxu1 %v19066_v32 }
 0x2f9   :  { %10379 = vmatpush1.bf16.msra.mxu0 %v19061_v33  ;;  %10551 = vmatpush1.bf16.msra.mxu1 %v19064_v34 }
 0x2fa   :  { %10380 = vmatprep.subr.bf16.mxu0 %v19069_v35  ;;  %10552 = vmatprep.subr.bf16.mxu1 %v19072_v36 }
 0x2fd   :  { %10381 = vmatpush1.bf16.msra.mxu0 %v19067_v37  ;;  %10553 = vmatpush1.bf16.msra.mxu1 %v19070_v38  ;;  %v19139_v38 = vld [vmem:[#allocation2 + $0x2f60] ss:$112 sps:$4 sm:$0xff]  }
 0x2fe   :  { %10382 = vmatprep.subr.bf16.mxu0 %v19075_v39  ;;  %10554 = vmatprep.subr.bf16.mxu1 %v19078_v40  ;;  %v19142_v39 = vld [vmem:[#allocation2 + $0x2f68] ss:$112 sps:$4 sm:$0xff]  }
 0x301   :  { %10383 = vmatpush1.bf16.msra.mxu0 %v19073_v41  ;;  %10555 = vmatpush1.bf16.msra.mxu1 %v19076_v42  ;;  %v19147_v42 = vld [vmem:[#allocation2 + $0x3044] ss:$112 sps:$4 sm:$0xff]  }
 0x302   :  { %10384 = vmatprep.subr.bf16.mxu0 %v19081_v43  ;;  %10556 = vmatprep.subr.bf16.mxu1 %v19084_v44  ;;  %v19150_v43 = vld [vmem:[#allocation2 + $0x304c] ss:$112 sps:$4 sm:$0xff]  }
 0x305   :  { %10385 = vmatpush1.bf16.msra.mxu0 %v19079_v45  ;;  %10557 = vmatpush1.bf16.msra.mxu1 %v19082_v46  ;;  %v19145_v45 = vld [vmem:[#allocation2 + $0x3040] ss:$112 sps:$4 sm:$0xff]   ;;  %v19148_v46 = vld [vmem:[#allocation2 + $0x3048] ss:$112 sps:$4 sm:$0xff]  }
 0x306   :  { %10386 = vmatprep.subr.bf16.mxu0 %v19087_v47  ;;  %10558 = vmatprep.subr.bf16.mxu1 %v19090_v48  ;;  %v19153_v47 = vld [vmem:[#allocation2 + $0x34] ss:$112 sps:$4 sm:$0xff]   ;;  %v19156_v48 = vld [vmem:[#allocation2 + $0x3c] ss:$112 sps:$4 sm:$0xff]  }
 0x309   :  { %10387 = vmatpush1.bf16.msra.mxu0 %v19085_v49  ;;  %10559 = vmatpush1.bf16.msra.mxu1 %v19088_v50  ;;  %v19151_v49 = vld [vmem:[#allocation2 + $0x30] ss:$112 sps:$4 sm:$0xff]   ;;  %v19154_v50 = vld [vmem:[#allocation2 + $0x38] ss:$112 sps:$4 sm:$0xff]  }
 0x30a   :  { %10388 = vmatprep.subr.bf16.mxu0 %v19093_v51  ;;  %10560 = vmatprep.subr.bf16.mxu1 %v19096_v52  ;;  %v19159_v51 = vld [vmem:[#allocation2 + $0x114] ss:$112 sps:$4 sm:$0xff]   ;;  %v19162_v52 = vld [vmem:[#allocation2 + $0x11c] ss:$112 sps:$4 sm:$0xff]  }
 0x30d   :  { %10389 = vmatpush1.bf16.msra.mxu0 %v19091_v53  ;;  %10561 = vmatpush1.bf16.msra.mxu1 %v19094_v54  ;;  %v20532_v53 = vld [vmem:[%s21403_s0 + $0x18] ss:$28 sps:$4 sm:$0xff]   ;;  %v19157_v54 = vld [vmem:[#allocation2 + $0x110] ss:$112 sps:$4 sm:$0xff]  }
 0x30e   :  { %10390 = vmatprep.subr.bf16.mxu0 %v19099_v55  ;;  %10562 = vmatprep.subr.bf16.mxu1 %v19102_v56  ;;  %v19160_v55 = vld [vmem:[#allocation2 + $0x118] ss:$112 sps:$4 sm:$0xff]   ;;  %v19165_v56 = vld [vmem:[#allocation2 + $0x1f4] ss:$112 sps:$4 sm:$0xff]  }
 0x311   :  { %10391 = vmatpush1.bf16.msra.mxu0 %v19097_v57  ;;  %10563 = vmatpush1.bf16.msra.mxu1 %v19100_v58  ;;  %v19168_v57 = vld [vmem:[#allocation2 + $0x1fc] ss:$112 sps:$4 sm:$0xff]   ;;  %v20533_v58 = vld [vmem:[%s21403_s0 + $0x4] ss:$28 sps:$4 sm:$0xff]  }
 0x312   :  { %10403 = vmatprep.subr.bf16.mxu0 %v19105_v59  ;;  %10575 = vmatprep.subr.bf16.mxu1 %v19108_v60  ;;  %v19163_v59 = vld [vmem:[#allocation2 + $0x1f0] ss:$112 sps:$4 sm:$0xff]   ;;  %v19166_v60 = vld [vmem:[#allocation2 + $0x1f8] ss:$112 sps:$4 sm:$0xff]  }
 0x314   :  { %10393 = vmatmul.mubr.bf16.vlgmr.msra.gmra.mrb[8].mxu0 %v20531_v1  ;;  %10565 = vmatmul.mubr.bf16.vlgmr.msra.gmra.mrb[8].mxu1 %v20531_v1  ;;  %v19177_v1 = vld [vmem:[#allocation2 + $0x3b4] ss:$112 sps:$4 sm:$0xff]  }
 0x315   :  { %10404 = vmatpush1.bf16.msra.mxu0 %v19103_v61  ;;  %10576 = vmatpush1.bf16.msra.mxu1 %v19106_v62  ;;  %v19171_v61 = vld [vmem:[#allocation2 + $0x2d4] ss:$112 sps:$4 sm:$0xff]   ;;  %v19174_v62 = vld [vmem:[#allocation2 + $0x2dc] ss:$112 sps:$4 sm:$0xff]  }
 0x316   :  { %10405 = vmatprep.subr.bf16.mxu0 %v19111_v63  ;;  %10577 = vmatprep.subr.bf16.mxu1 %v19114_v0  ;;  %v19169_v63 = vld [vmem:[#allocation2 + $0x2d0] ss:$112 sps:$4 sm:$0xff]   ;;  %v19172_v0 = vld [vmem:[#allocation2 + $0x2d8] ss:$112 sps:$4 sm:$0xff]  }
 0x317   :  { %10435 = vmatprep.mubr.bf16.mxu0 %v21413_v16  ;;  %10607 = vmatprep.mubr.bf16.mxu1 %v21413_v16 }
 0x319   :  { %10406 = vmatpush1.bf16.msra.mxu0 %v19109_v2  ;;  %10578 = vmatpush1.bf16.msra.mxu1 %v19112_v3  ;;  %v19180_v2 = vld [vmem:[#allocation2 + $0x3bc] ss:$112 sps:$4 sm:$0xff]   ;;  %v19175_v3 = vld [vmem:[#allocation2 + $0x3b0] ss:$112 sps:$4 sm:$0xff]  }
 0x31a   :  { %10407 = vmatprep.subr.bf16.mxu0 %v19117_v4  ;;  %10579 = vmatprep.subr.bf16.mxu1 %v19120_v5  ;;  %v19178_v4 = vld [vmem:[#allocation2 + $0x3b8] ss:$112 sps:$4 sm:$0xff]   ;;  %v19183_v5 = vld [vmem:[#allocation2 + $0x494] ss:$112 sps:$4 sm:$0xff]  }
 0x31d   :  { %10408 = vmatpush1.bf16.msra.mxu0 %v19115_v6  ;;  %10580 = vmatpush1.bf16.msra.mxu1 %v19118_v7  ;;  %v19186_v6 = vld [vmem:[#allocation2 + $0x49c] ss:$112 sps:$4 sm:$0xff]   ;;  %v19181_v7 = vld [vmem:[#allocation2 + $0x490] ss:$112 sps:$4 sm:$0xff]  }
 0x31e   :  { %10409 = vmatprep.subr.bf16.mxu0 %v19123_v8  ;;  %10581 = vmatprep.subr.bf16.mxu1 %v19126_v9  ;;  %v19184_v8 = vld [vmem:[#allocation2 + $0x498] ss:$112 sps:$4 sm:$0xff]   ;;  %v19189_v9 = vld [vmem:[#allocation2 + $0x574] ss:$112 sps:$4 sm:$0xff]  }
 0x321   :  { %10410 = vmatpush1.bf16.msra.mxu0 %v19121_v10  ;;  %10582 = vmatpush1.bf16.msra.mxu1 %v19124_v18  ;;  %v19192_v10 = vld [vmem:[#allocation2 + $0x57c] ss:$112 sps:$4 sm:$0xff]   ;;  %v19187_v18 = vld [vmem:[#allocation2 + $0x570] ss:$112 sps:$4 sm:$0xff]  }
 0x322   :  { %10411 = vmatprep.subr.bf16.mxu0 %v19129_v19  ;;  %10583 = vmatprep.subr.bf16.mxu1 %v19132_v22  ;;  %v19190_v19 = vld [vmem:[#allocation2 + $0x578] ss:$112 sps:$4 sm:$0xff]   ;;  %v19195_v22 = vld [vmem:[#allocation2 + $0x654] ss:$112 sps:$4 sm:$0xff]  }
 0x325   :  { %10412 = vmatpush1.bf16.msra.mxu0 %v19127_v23  ;;  %10584 = vmatpush1.bf16.msra.mxu1 %v19130_v24  ;;  %v19198_v23 = vld [vmem:[#allocation2 + $0x65c] ss:$112 sps:$4 sm:$0xff]   ;;  %v19193_v24 = vld [vmem:[#allocation2 + $0x650] ss:$112 sps:$4 sm:$0xff]  }
 0x326   :  { %10413 = vmatprep.subr.bf16.mxu0 %v19135_v25  ;;  %10585 = vmatprep.subr.bf16.mxu1 %v19138_v26  ;;  %v19196_v25 = vld [vmem:[#allocation2 + $0x658] ss:$112 sps:$4 sm:$0xff]   ;;  %v19201_v26 = vld [vmem:[#allocation2 + $0x734] ss:$112 sps:$4 sm:$0xff]  }
 0x327   :  { %v20991_v31 = vpop.f32.mrb[4].mxu0  ;;  %v20993_v32 = vpop.f32.mrb[4].mxu1 }
 0x328   :  { %v20995_v33 = vpop.f32.mrb[5].mxu0  ;;  %v20997_v34 = vpop.f32.mrb[5].mxu1 }
 0x329   :  { %v21001_v36 = vpop.f32.mrb[6].mxu0  ;;  %v21003_v37 = vpop.f32.mrb[6].mxu1  ;;  %10414 = vmatpush1.bf16.msra.mxu0 %v19133_v27  ;;  %10586 = vmatpush1.bf16.msra.mxu1 %v19136_v28  ;;  %v19204_v27 = vld [vmem:[#allocation2 + $0x73c] ss:$112 sps:$4 sm:$0xff]   ;;  %v19199_v28 = vld [vmem:[#allocation2 + $0x730] ss:$112 sps:$4 sm:$0xff]  }
 0x32a   :  { %v21005_v40 = vpop.f32.mrb[7].mxu0  ;;  %v21007_v41 = vpop.f32.mrb[7].mxu1  ;;  %10415 = vmatprep.subr.bf16.mxu0 %v19141_v29  ;;  %10587 = vmatprep.subr.bf16.mxu1 %v19144_v30  ;;  %v19202_v29 = vld [vmem:[#allocation2 + $0x738] ss:$112 sps:$4 sm:$0xff]   ;;  %v19207_v30 = vld [vmem:[#allocation2 + $0x814] ss:$112 sps:$4 sm:$0xff]  }
 0x32d   :  { %10416 = vmatpush1.bf16.msra.mxu0 %v19139_v38  ;;  %10588 = vmatpush1.bf16.msra.mxu1 %v19142_v39  ;;  %v19210_v38 = vld [vmem:[#allocation2 + $0x81c] ss:$112 sps:$4 sm:$0xff]   ;;  %v19205_v39 = vld [vmem:[#allocation2 + $0x810] ss:$112 sps:$4 sm:$0xff]  }
 0x32e   :  { %10417 = vmatprep.subr.bf16.mxu0 %v19147_v42  ;;  %10589 = vmatprep.subr.bf16.mxu1 %v19150_v43  ;;  %v19208_v42 = vld [vmem:[#allocation2 + $0x818] ss:$112 sps:$4 sm:$0xff]   ;;  %v19213_v43 = vld [vmem:[#allocation2 + $0x8f4] ss:$112 sps:$4 sm:$0xff]  }
 0x331   :  { %10418 = vmatpush1.bf16.msra.mxu0 %v19145_v45  ;;  %10590 = vmatpush1.bf16.msra.mxu1 %v19148_v46  ;;  %v19216_v45 = vld [vmem:[#allocation2 + $0x8fc] ss:$112 sps:$4 sm:$0xff]   ;;  %v19211_v46 = vld [vmem:[#allocation2 + $0x8f0] ss:$112 sps:$4 sm:$0xff]  }
 0x332   :  { %10618 = vmatprep.subr.bf16.mxu0 %v19153_v47  ;;  %10790 = vmatprep.subr.bf16.mxu1 %v19156_v48  ;;  %v19214_v47 = vld [vmem:[#allocation2 + $0x8f8] ss:$112 sps:$4 sm:$0xff]   ;;  %v19219_v48 = vld [vmem:[#allocation2 + $0x9d4] ss:$112 sps:$4 sm:$0xff]  }
 0x334   :  { %10436 = vmatmul.mubr.bf16.vlgmr.msra.gmra.mrb[8].mxu0 %v20532_v53  ;;  %10608 = vmatmul.mubr.bf16.vlgmr.msra.gmra.mrb[8].mxu1 %v20532_v53  ;;  %v19228_v53 = vld [vmem:[#allocation2 + $0xabc] ss:$112 sps:$4 sm:$0xff]  }
 0x335   :  { %10619 = vmatpush1.bf16.msra.mxu0 %v19151_v49  ;;  %10791 = vmatpush1.bf16.msra.mxu1 %v19154_v50  ;;  %v19222_v49 = vld [vmem:[#allocation2 + $0x9dc] ss:$112 sps:$4 sm:$0xff]   ;;  %v19217_v50 = vld [vmem:[#allocation2 + $0x9d0] ss:$112 sps:$4 sm:$0xff]  }
 0x336   :  { %10620 = vmatprep.subr.bf16.mxu0 %v19159_v51  ;;  %10792 = vmatprep.subr.bf16.mxu1 %v19162_v52  ;;  %v19220_v51 = vld [vmem:[#allocation2 + $0x9d8] ss:$112 sps:$4 sm:$0xff]   ;;  %v19225_v52 = vld [vmem:[#allocation2 + $0xab4] ss:$112 sps:$4 sm:$0xff]  }
 0x337   :  { %10650 = vmatprep.mubr.bf16.mxu0 %v20533_v58  ;;  %10822 = vmatprep.mubr.bf16.mxu1 %v20533_v58  ;;  %v19229_v58 = vld [vmem:[#allocation2 + $0xb90] ss:$112 sps:$4 sm:$0xff]  }
 0x339   :  { %10621 = vmatpush1.bf16.msra.mxu0 %v19157_v54  ;;  %10793 = vmatpush1.bf16.msra.mxu1 %v19160_v55  ;;  %v19223_v54 = vld [vmem:[#allocation2 + $0xab0] ss:$112 sps:$4 sm:$0xff]   ;;  %v19226_v55 = vld [vmem:[#allocation2 + $0xab8] ss:$112 sps:$4 sm:$0xff]  }
 0x33a   :  { %10622 = vmatprep.subr.bf16.mxu0 %v19165_v56  ;;  %10794 = vmatprep.subr.bf16.mxu1 %v19168_v57  ;;  %v19231_v56 = vld [vmem:[#allocation2 + $0xb94] ss:$112 sps:$4 sm:$0xff]   ;;  %v19234_v57 = vld [vmem:[#allocation2 + $0xb9c] ss:$112 sps:$4 sm:$0xff]  }
 0x33d   :  { %10623 = vmatpush1.bf16.msra.mxu0 %v19163_v59  ;;  %10795 = vmatpush1.bf16.msra.mxu1 %v19166_v60  ;;  %v19232_v59 = vld [vmem:[#allocation2 + $0xb98] ss:$112 sps:$4 sm:$0xff]   ;;  %v19237_v60 = vld [vmem:[#allocation2 + $0xc74] ss:$112 sps:$4 sm:$0xff]  }
 0x33e   :  { %10624 = vmatprep.subr.bf16.mxu0 %v19171_v61  ;;  %10796 = vmatprep.subr.bf16.mxu1 %v19174_v62  ;;  %v19240_v61 = vld [vmem:[#allocation2 + $0xc7c] ss:$112 sps:$4 sm:$0xff]   ;;  %v19235_v62 = vld [vmem:[#allocation2 + $0xc70] ss:$112 sps:$4 sm:$0xff]  }
 0x341   :  { %10625 = vmatpush1.bf16.msra.mxu0 %v19169_v63  ;;  %10797 = vmatpush1.bf16.msra.mxu1 %v19172_v0  ;;  %v19238_v63 = vld [vmem:[#allocation2 + $0xc78] ss:$112 sps:$4 sm:$0xff]   ;;  %v19243_v0 = vld [vmem:[#allocation2 + $0xd54] ss:$112 sps:$4 sm:$0xff]  }
 0x342   :  { %10626 = vmatprep.subr.bf16.mxu0 %v19177_v1  ;;  %10798 = vmatprep.subr.bf16.mxu1 %v19180_v2  ;;  %v19246_v1 = vld [vmem:[#allocation2 + $0xd5c] ss:$112 sps:$4 sm:$0xff]   ;;  %v19241_v2 = vld [vmem:[#allocation2 + $0xd50] ss:$112 sps:$4 sm:$0xff]  }
 0x345   :  { %10627 = vmatpush1.bf16.msra.mxu0 %v19175_v3  ;;  %10799 = vmatpush1.bf16.msra.mxu1 %v19178_v4  ;;  %v19244_v3 = vld [vmem:[#allocation2 + $0xd58] ss:$112 sps:$4 sm:$0xff]   ;;  %v19249_v4 = vld [vmem:[#allocation2 + $0xe34] ss:$112 sps:$4 sm:$0xff]  }
 0x346   :  { %10628 = vmatprep.subr.bf16.mxu0 %v19183_v5  ;;  %10800 = vmatprep.subr.bf16.mxu1 %v19186_v6  ;;  %v19252_v5 = vld [vmem:[#allocation2 + $0xe3c] ss:$112 sps:$4 sm:$0xff]   ;;  %v19247_v6 = vld [vmem:[#allocation2 + $0xe30] ss:$112 sps:$4 sm:$0xff]  }
 0x349   :  { %10629 = vmatpush1.bf16.msra.mxu0 %v19181_v7  ;;  %10801 = vmatpush1.bf16.msra.mxu1 %v19184_v8  ;;  %v19250_v7 = vld [vmem:[#allocation2 + $0xe38] ss:$112 sps:$4 sm:$0xff]   ;;  %v19255_v8 = vld [vmem:[#allocation2 + $0xf14] ss:$112 sps:$4 sm:$0xff]  }
 0x34a   :  { %10630 = vmatprep.subr.bf16.mxu0 %v19189_v9  ;;  %10802 = vmatprep.subr.bf16.mxu1 %v19192_v10  ;;  %v19258_v9 = vld [vmem:[#allocation2 + $0xf1c] ss:$112 sps:$4 sm:$0xff]  }
 0x34b   :  { %v20534_v10 = vld [vmem:[%s21403_s0] ss:$28 sps:$4 sm:$0xff]  }
 0x34d   :  { %10631 = vmatpush1.bf16.msra.mxu0 %v19187_v18  ;;  %10803 = vmatpush1.bf16.msra.mxu1 %v19190_v19  ;;  %v19253_v18 = vld [vmem:[#allocation2 + $0xf10] ss:$112 sps:$4 sm:$0xff]   ;;  %v19256_v19 = vld [vmem:[#allocation2 + $0xf18] ss:$112 sps:$4 sm:$0xff]  }
 0x34e   :  { %10632 = vmatprep.subr.bf16.mxu0 %v19195_v22  ;;  %10804 = vmatprep.subr.bf16.mxu1 %v19198_v23  ;;  %v19261_v22 = vld [vmem:[#allocation2 + $0xff4] ss:$112 sps:$4 sm:$0xff]   ;;  %v19264_v23 = vld [vmem:[#allocation2 + $0xffc] ss:$112 sps:$4 sm:$0xff]  }
 0x351   :  { %10633 = vmatpush1.bf16.msra.mxu0 %v19193_v24  ;;  %10805 = vmatpush1.bf16.msra.mxu1 %v19196_v25  ;;  %v20535_v24 = vld [vmem:[%s21403_s0 + $0xc] ss:$28 sps:$4 sm:$0xff]   ;;  %v19259_v25 = vld [vmem:[#allocation2 + $0xff0] ss:$112 sps:$4 sm:$0xff]  }
 0x352   :  { %10634 = vmatprep.subr.bf16.mxu0 %v19201_v26  ;;  %10806 = vmatprep.subr.bf16.mxu1 %v19204_v27  ;;  %v19262_v26 = vld [vmem:[#allocation2 + $0xff8] ss:$112 sps:$4 sm:$0xff]   ;;  %v19267_v27 = vld [vmem:[#allocation2 + $0x10d4] ss:$112 sps:$4 sm:$0xff]  }
 0x355   :  { %10635 = vmatpush1.bf16.msra.mxu0 %v19199_v28  ;;  %10807 = vmatpush1.bf16.msra.mxu1 %v19202_v29  ;;  %v19270_v28 = vld [vmem:[#allocation2 + $0x10dc] ss:$112 sps:$4 sm:$0xff]   ;;  %v19265_v29 = vld [vmem:[#allocation2 + $0x10d0] ss:$112 sps:$4 sm:$0xff]  }
 0x356   :  { %10636 = vmatprep.subr.bf16.mxu0 %v19207_v30  ;;  %10808 = vmatprep.subr.bf16.mxu1 %v19210_v38  ;;  %v19268_v30 = vld [vmem:[#allocation2 + $0x10d8] ss:$112 sps:$4 sm:$0xff]   ;;  %v19273_v38 = vld [vmem:[#allocation2 + $0x11b4] ss:$112 sps:$4 sm:$0xff]  }
 0x359   :  { %10637 = vmatpush1.bf16.msra.mxu0 %v19205_v39  ;;  %10809 = vmatpush1.bf16.msra.mxu1 %v19208_v42  ;;  %v19276_v39 = vld [vmem:[#allocation2 + $0x11bc] ss:$112 sps:$4 sm:$0xff]   ;;  %v19271_v42 = vld [vmem:[#allocation2 + $0x11b0] ss:$112 sps:$4 sm:$0xff]  }
 0x35a   :  { %10638 = vmatprep.subr.bf16.mxu0 %v19213_v43  ;;  %10810 = vmatprep.subr.bf16.mxu1 %v19216_v45  ;;  %v19274_v43 = vld [vmem:[#allocation2 + $0x11b8] ss:$112 sps:$4 sm:$0xff]   ;;  %v19279_v45 = vld [vmem:[#allocation2 + $0x1294] ss:$112 sps:$4 sm:$0xff]  }
 0x35d   :  { %10639 = vmatpush1.bf16.msra.mxu0 %v19211_v46  ;;  %10811 = vmatpush1.bf16.msra.mxu1 %v19214_v47  ;;  %v19282_v46 = vld [vmem:[#allocation2 + $0x129c] ss:$112 sps:$4 sm:$0xff]   ;;  %v19277_v47 = vld [vmem:[#allocation2 + $0x1290] ss:$112 sps:$4 sm:$0xff]  }
 0x35e   :  { %10640 = vmatprep.subr.bf16.mxu0 %v19219_v48  ;;  %10812 = vmatprep.subr.bf16.mxu1 %v19222_v49  ;;  %v19280_v48 = vld [vmem:[#allocation2 + $0x1298] ss:$112 sps:$4 sm:$0xff]   ;;  %v19285_v49 = vld [vmem:[#allocation2 + $0x1374] ss:$112 sps:$4 sm:$0xff]  }
 0x361   :  { %10641 = vmatpush1.bf16.msra.mxu0 %v19217_v50  ;;  %10813 = vmatpush1.bf16.msra.mxu1 %v19220_v51  ;;  %v19288_v50 = vld [vmem:[#allocation2 + $0x137c] ss:$112 sps:$4 sm:$0xff]   ;;  %v19283_v51 = vld [vmem:[#allocation2 + $0x1370] ss:$112 sps:$4 sm:$0xff]  }
 0x362   :  { %10642 = vmatprep.subr.bf16.mxu0 %v19225_v52  ;;  %10814 = vmatprep.subr.bf16.mxu1 %v19228_v53  ;;  %v19286_v52 = vld [vmem:[#allocation2 + $0x1378] ss:$112 sps:$4 sm:$0xff]   ;;  %v19291_v53 = vld [vmem:[#allocation2 + $0x1454] ss:$112 sps:$4 sm:$0xff]  }
 0x365   :  { %10643 = vmatpush1.bf16.msra.mxu0 %v19223_v54  ;;  %10815 = vmatpush1.bf16.msra.mxu1 %v19226_v55  ;;  %v19294_v54 = vld [vmem:[#allocation2 + $0x145c] ss:$112 sps:$4 sm:$0xff]   ;;  %v19289_v55 = vld [vmem:[#allocation2 + $0x1450] ss:$112 sps:$4 sm:$0xff]  }
 0x366   :  { %10644 = vmatprep.subr.bf16.mxu0 %v19231_v56  ;;  %10816 = vmatprep.subr.bf16.mxu1 %v19234_v57  ;;  %v19292_v56 = vld [vmem:[#allocation2 + $0x1458] ss:$112 sps:$4 sm:$0xff]   ;;  %v19297_v57 = vld [vmem:[#allocation2 + $0x1534] ss:$112 sps:$4 sm:$0xff]  }
 0x369   :  { %10645 = vmatpush1.bf16.msra.mxu0 %v19229_v58  ;;  %10817 = vmatpush1.bf16.msra.mxu1 %v19232_v59  ;;  %v19300_v58 = vld [vmem:[#allocation2 + $0x153c] ss:$112 sps:$4 sm:$0xff]   ;;  %v19295_v59 = vld [vmem:[#allocation2 + $0x1530] ss:$112 sps:$4 sm:$0xff]  }
 0x36a   :  { %10646 = vmatprep.subr.bf16.mxu0 %v19237_v60  ;;  %10818 = vmatprep.subr.bf16.mxu1 %v19240_v61  ;;  %v19298_v60 = vld [vmem:[#allocation2 + $0x1538] ss:$112 sps:$4 sm:$0xff]   ;;  %v19303_v61 = vld [vmem:[#allocation2 + $0x1614] ss:$112 sps:$4 sm:$0xff]  }
 0x36d   :  { %10647 = vmatpush1.bf16.msra.mxu0 %v19235_v62  ;;  %10819 = vmatpush1.bf16.msra.mxu1 %v19238_v63  ;;  %v19306_v62 = vld [vmem:[#allocation2 + $0x161c] ss:$112 sps:$4 sm:$0xff]   ;;  %v19301_v63 = vld [vmem:[#allocation2 + $0x1610] ss:$112 sps:$4 sm:$0xff]  }
 0x36e   :  { %10648 = vmatprep.subr.bf16.mxu0 %v19243_v0  ;;  %10820 = vmatprep.subr.bf16.mxu1 %v19246_v1  ;;  %v19304_v0 = vld [vmem:[#allocation2 + $0x1618] ss:$112 sps:$4 sm:$0xff]   ;;  %v19309_v1 = vld [vmem:[#allocation2 + $0x16f4] ss:$112 sps:$4 sm:$0xff]  }
 0x371   :  { %10649 = vmatpush1.bf16.msra.mxu0 %v19241_v2  ;;  %10821 = vmatpush1.bf16.msra.mxu1 %v19244_v3  ;;  %v19312_v2 = vld [vmem:[#allocation2 + $0x16fc] ss:$112 sps:$4 sm:$0xff]   ;;  %v19307_v3 = vld [vmem:[#allocation2 + $0x16f0] ss:$112 sps:$4 sm:$0xff]  }
 0x372   :  { %10661 = vmatprep.subr.bf16.mxu0 %v19249_v4  ;;  %10833 = vmatprep.subr.bf16.mxu1 %v19252_v5  ;;  %v19310_v4 = vld [vmem:[#allocation2 + $0x16f8] ss:$112 sps:$4 sm:$0xff]   ;;  %v19315_v5 = vld [vmem:[#allocation2 + $0x17d4] ss:$112 sps:$4 sm:$0xff]  }
 0x374   :  { %10651 = vmatmul.mubr.bf16.vlgmr.msra.gmra.mrb[12].mxu0 %v20534_v10  ;;  %10823 = vmatmul.mubr.bf16.vlgmr.msra.gmra.mrb[12].mxu1 %v20534_v10  ;;  %v19324_v10 = vld [vmem:[#allocation2 + $0x18bc] ss:$112 sps:$4 sm:$0xff]  }
 0x375   :  { %10662 = vmatpush1.bf16.msra.mxu0 %v19247_v6  ;;  %10834 = vmatpush1.bf16.msra.mxu1 %v19250_v7  ;;  %v19318_v6 = vld [vmem:[#allocation2 + $0x17dc] ss:$112 sps:$4 sm:$0xff]   ;;  %v19313_v7 = vld [vmem:[#allocation2 + $0x17d0] ss:$112 sps:$4 sm:$0xff]  }
 0x376   :  { %10663 = vmatprep.subr.bf16.mxu0 %v19255_v8  ;;  %10835 = vmatprep.subr.bf16.mxu1 %v19258_v9  ;;  %v19316_v8 = vld [vmem:[#allocation2 + $0x17d8] ss:$112 sps:$4 sm:$0xff]   ;;  %v19321_v9 = vld [vmem:[#allocation2 + $0x18b4] ss:$112 sps:$4 sm:$0xff]  }
 0x377   :  { %10693 = vmatprep.mubr.bf16.mxu0 %v20535_v24  ;;  %10865 = vmatprep.mubr.bf16.mxu1 %v20535_v24  ;;  %v19325_v24 = vld [vmem:[#allocation2 + $0x1990] ss:$112 sps:$4 sm:$0xff]  }
 0x379   :  { %10664 = vmatpush1.bf16.msra.mxu0 %v19253_v18  ;;  %10836 = vmatpush1.bf16.msra.mxu1 %v19256_v19  ;;  %v19319_v18 = vld [vmem:[#allocation2 + $0x18b0] ss:$112 sps:$4 sm:$0xff]   ;;  %v19322_v19 = vld [vmem:[#allocation2 + $0x18b8] ss:$112 sps:$4 sm:$0xff]  }
 0x37a   :  { %10665 = vmatprep.subr.bf16.mxu0 %v19261_v22  ;;  %10837 = vmatprep.subr.bf16.mxu1 %v19264_v23  ;;  %v19327_v22 = vld [vmem:[#allocation2 + $0x1994] ss:$112 sps:$4 sm:$0xff]   ;;  %v19330_v23 = vld [vmem:[#allocation2 + $0x199c] ss:$112 sps:$4 sm:$0xff]  }
 0x37d   :  { %10666 = vmatpush1.bf16.msra.mxu0 %v19259_v25  ;;  %10838 = vmatpush1.bf16.msra.mxu1 %v19262_v26  ;;  %v19328_v25 = vld [vmem:[#allocation2 + $0x1998] ss:$112 sps:$4 sm:$0xff]   ;;  %v19333_v26 = vld [vmem:[#allocation2 + $0x1a74] ss:$112 sps:$4 sm:$0xff]  }
 0x37e   :  { %10667 = vmatprep.subr.bf16.mxu0 %v19267_v27  ;;  %10839 = vmatprep.subr.bf16.mxu1 %v19270_v28  ;;  %v19336_v27 = vld [vmem:[#allocation2 + $0x1a7c] ss:$112 sps:$4 sm:$0xff]   ;;  %v19331_v28 = vld [vmem:[#allocation2 + $0x1a70] ss:$112 sps:$4 sm:$0xff]  }
 0x381   :  { %10668 = vmatpush1.bf16.msra.mxu0 %v19265_v29  ;;  %10840 = vmatpush1.bf16.msra.mxu1 %v19268_v30  ;;  %v19334_v29 = vld [vmem:[#allocation2 + $0x1a78] ss:$112 sps:$4 sm:$0xff]   ;;  %v19339_v30 = vld [vmem:[#allocation2 + $0x1b54] ss:$112 sps:$4 sm:$0xff]  }
 0x382   :  { %10669 = vmatprep.subr.bf16.mxu0 %v19273_v38  ;;  %10841 = vmatprep.subr.bf16.mxu1 %v19276_v39  ;;  %v19342_v38 = vld [vmem:[#allocation2 + $0x1b5c] ss:$112 sps:$4 sm:$0xff]   ;;  %v19337_v39 = vld [vmem:[#allocation2 + $0x1b50] ss:$112 sps:$4 sm:$0xff]  }
 0x385   :  { %10670 = vmatpush1.bf16.msra.mxu0 %v19271_v42  ;;  %10842 = vmatpush1.bf16.msra.mxu1 %v19274_v43  ;;  %v19340_v42 = vld [vmem:[#allocation2 + $0x1b58] ss:$112 sps:$4 sm:$0xff]   ;;  %v19345_v43 = vld [vmem:[#allocation2 + $0x1c34] ss:$112 sps:$4 sm:$0xff]  }
 0x386   :  { %10671 = vmatprep.subr.bf16.mxu0 %v19279_v45  ;;  %10843 = vmatprep.subr.bf16.mxu1 %v19282_v46  ;;  %v19348_v45 = vld [vmem:[#allocation2 + $0x1c3c] ss:$112 sps:$4 sm:$0xff]   ;;  %v19343_v46 = vld [vmem:[#allocation2 + $0x1c30] ss:$112 sps:$4 sm:$0xff]  }
 0x389   :  { %10672 = vmatpush1.bf16.msra.mxu0 %v19277_v47  ;;  %10844 = vmatpush1.bf16.msra.mxu1 %v19280_v48  ;;  %v19346_v47 = vld [vmem:[#allocation2 + $0x1c38] ss:$112 sps:$4 sm:$0xff]   ;;  %v19351_v48 = vld [vmem:[#allocation2 + $0x1d14] ss:$112 sps:$4 sm:$0xff]  }
 0x38a   :  { %10673 = vmatprep.subr.bf16.mxu0 %v19285_v49  ;;  %10845 = vmatprep.subr.bf16.mxu1 %v19288_v50  ;;  %v19354_v49 = vld [vmem:[#allocation2 + $0x1d1c] ss:$112 sps:$4 sm:$0xff]   ;;  %v20536_v50 = vld [vmem:[%s21403_s0 + $0x8] ss:$28 sps:$4 sm:$0xff]  }
 0x38d   :  { %10674 = vmatpush1.bf16.msra.mxu0 %v19283_v51  ;;  %10846 = vmatpush1.bf16.msra.mxu1 %v19286_v52  ;;  %v19349_v51 = vld [vmem:[#allocation2 + $0x1d10] ss:$112 sps:$4 sm:$0xff]   ;;  %v19352_v52 = vld [vmem:[#allocation2 + $0x1d18] ss:$112 sps:$4 sm:$0xff]  }
 0x38e   :  { %10675 = vmatprep.subr.bf16.mxu0 %v19291_v53  ;;  %10847 = vmatprep.subr.bf16.mxu1 %v19294_v54  ;;  %v19357_v53 = vld [vmem:[#allocation2 + $0x1df4] ss:$112 sps:$4 sm:$0xff]   ;;  %v19360_v54 = vld [vmem:[#allocation2 + $0x1dfc] ss:$112 sps:$4 sm:$0xff]  }
 0x391   :  { %10676 = vmatpush1.bf16.msra.mxu0 %v19289_v55  ;;  %10848 = vmatpush1.bf16.msra.mxu1 %v19292_v56  ;;  %v20537_v55 = vld [vmem:[%s21403_s0 + $0x14] ss:$28 sps:$4 sm:$0xff]  }
 0x392   :  { %10677 = vmatprep.subr.bf16.mxu0 %v19297_v57  ;;  %10849 = vmatprep.subr.bf16.mxu1 %v19300_v58  ;;  %v19355_v56 = vld [vmem:[#allocation2 + $0x1df0] ss:$112 sps:$4 sm:$0xff]   ;;  %v19358_v57 = vld [vmem:[#allocation2 + $0x1df8] ss:$112 sps:$4 sm:$0xff]   ;;  %v19363_v58 = vld [vmem:[#allocation2 + $0x1ed4] ss:$112 sps:$4 sm:$0xff]  }
 0x395   :  { %10678 = vmatpush1.bf16.msra.mxu0 %v19295_v59  ;;  %10850 = vmatpush1.bf16.msra.mxu1 %v19298_v60  ;;  %v19366_v59 = vld [vmem:[#allocation2 + $0x1edc] ss:$112 sps:$4 sm:$0xff]   ;;  %v19361_v60 = vld [vmem:[#allocation2 + $0x1ed0] ss:$112 sps:$4 sm:$0xff]  }
 0x396   :  { %10679 = vmatprep.subr.bf16.mxu0 %v19303_v61  ;;  %10851 = vmatprep.subr.bf16.mxu1 %v19306_v62  ;;  %v19364_v61 = vld [vmem:[#allocation2 + $0x1ed8] ss:$112 sps:$4 sm:$0xff]   ;;  %v19369_v62 = vld [vmem:[#allocation2 + $0x1fb4] ss:$112 sps:$4 sm:$0xff]  }
 0x399   :  { %10680 = vmatpush1.bf16.msra.mxu0 %v19301_v63  ;;  %10852 = vmatpush1.bf16.msra.mxu1 %v19304_v0  ;;  %v19372_v63 = vld [vmem:[#allocation2 + $0x1fbc] ss:$112 sps:$4 sm:$0xff]   ;;  %v19367_v0 = vld [vmem:[#allocation2 + $0x1fb0] ss:$112 sps:$4 sm:$0xff]  }
 0x39a   :  { %10681 = vmatprep.subr.bf16.mxu0 %v19309_v1  ;;  %10853 = vmatprep.subr.bf16.mxu1 %v19312_v2  ;;  %v19370_v1 = vld [vmem:[#allocation2 + $0x1fb8] ss:$112 sps:$4 sm:$0xff]   ;;  %v19375_v2 = vld [vmem:[#allocation2 + $0x2094] ss:$112 sps:$4 sm:$0xff]  }
 0x39d   :  { %10682 = vmatpush1.bf16.msra.mxu0 %v19307_v3  ;;  %10854 = vmatpush1.bf16.msra.mxu1 %v19310_v4  ;;  %v19378_v3 = vld [vmem:[#allocation2 + $0x209c] ss:$112 sps:$4 sm:$0xff]   ;;  %v19373_v4 = vld [vmem:[#allocation2 + $0x2090] ss:$112 sps:$4 sm:$0xff]  }
 0x39e   :  { %10683 = vmatprep.subr.bf16.mxu0 %v19315_v5  ;;  %10855 = vmatprep.subr.bf16.mxu1 %v19318_v6  ;;  %v19376_v5 = vld [vmem:[#allocation2 + $0x2098] ss:$112 sps:$4 sm:$0xff]   ;;  %v19381_v6 = vld [vmem:[#allocation2 + $0x2174] ss:$112 sps:$4 sm:$0xff]  }
 0x3a1   :  { %10684 = vmatpush1.bf16.msra.mxu0 %v19313_v7  ;;  %10856 = vmatpush1.bf16.msra.mxu1 %v19316_v8  ;;  %v19384_v7 = vld [vmem:[#allocation2 + $0x217c] ss:$112 sps:$4 sm:$0xff]   ;;  %v19379_v8 = vld [vmem:[#allocation2 + $0x2170] ss:$112 sps:$4 sm:$0xff]  }
 0x3a2   :  { %10685 = vmatprep.subr.bf16.mxu0 %v19321_v9  ;;  %10857 = vmatprep.subr.bf16.mxu1 %v19324_v10  ;;  %v19382_v9 = vld [vmem:[#allocation2 + $0x2178] ss:$112 sps:$4 sm:$0xff]   ;;  %v19387_v10 = vld [vmem:[#allocation2 + $0x2254] ss:$112 sps:$4 sm:$0xff]  }
 0x3a5   :  { %10686 = vmatpush1.bf16.msra.mxu0 %v19319_v18  ;;  %10858 = vmatpush1.bf16.msra.mxu1 %v19322_v19  ;;  %v19390_v18 = vld [vmem:[#allocation2 + $0x225c] ss:$112 sps:$4 sm:$0xff]   ;;  %v19385_v19 = vld [vmem:[#allocation2 + $0x2250] ss:$112 sps:$4 sm:$0xff]  }
 0x3a6   :  { %10687 = vmatprep.subr.bf16.mxu0 %v19327_v22  ;;  %10859 = vmatprep.subr.bf16.mxu1 %v19330_v23  ;;  %v19388_v22 = vld [vmem:[#allocation2 + $0x2258] ss:$112 sps:$4 sm:$0xff]   ;;  %v19393_v23 = vld [vmem:[#allocation2 + $0x2334] ss:$112 sps:$4 sm:$0xff]  }
 0x3a9   :  { %10688 = vmatpush1.bf16.msra.mxu0 %v19325_v24  ;;  %10860 = vmatpush1.bf16.msra.mxu1 %v19328_v25  ;;  %v19396_v24 = vld [vmem:[#allocation2 + $0x233c] ss:$112 sps:$4 sm:$0xff]   ;;  %v19391_v25 = vld [vmem:[#allocation2 + $0x2330] ss:$112 sps:$4 sm:$0xff]  }
 0x3aa   :  { %10689 = vmatprep.subr.bf16.mxu0 %v19333_v26  ;;  %10861 = vmatprep.subr.bf16.mxu1 %v19336_v27  ;;  %v19394_v26 = vld [vmem:[#allocation2 + $0x2338] ss:$112 sps:$4 sm:$0xff]   ;;  %v19399_v27 = vld [vmem:[#allocation2 + $0x2414] ss:$112 sps:$4 sm:$0xff]  }
 0x3ad   :  { %10690 = vmatpush1.bf16.msra.mxu0 %v19331_v28  ;;  %10862 = vmatpush1.bf16.msra.mxu1 %v19334_v29  ;;  %v19402_v28 = vld [vmem:[#allocation2 + $0x241c] ss:$112 sps:$4 sm:$0xff]   ;;  %v19397_v29 = vld [vmem:[#allocation2 + $0x2410] ss:$112 sps:$4 sm:$0xff]  }
 0x3ae   :  { %10691 = vmatprep.subr.bf16.mxu0 %v19339_v30  ;;  %10863 = vmatprep.subr.bf16.mxu1 %v19342_v38  ;;  %v19400_v30 = vld [vmem:[#allocation2 + $0x2418] ss:$112 sps:$4 sm:$0xff]   ;;  %v19405_v38 = vld [vmem:[#allocation2 + $0x24f4] ss:$112 sps:$4 sm:$0xff]  }
 0x3b1   :  { %10692 = vmatpush1.bf16.msra.mxu0 %v19337_v39  ;;  %10864 = vmatpush1.bf16.msra.mxu1 %v19340_v42  ;;  %v19408_v39 = vld [vmem:[#allocation2 + $0x24fc] ss:$112 sps:$4 sm:$0xff]   ;;  %v19403_v42 = vld [vmem:[#allocation2 + $0x24f0] ss:$112 sps:$4 sm:$0xff]  }
 0x3b2   :  { %10704 = vmatprep.subr.bf16.mxu0 %v19345_v43  ;;  %10876 = vmatprep.subr.bf16.mxu1 %v19348_v45  ;;  %v19406_v43 = vld [vmem:[#allocation2 + $0x24f8] ss:$112 sps:$4 sm:$0xff]   ;;  %v19411_v45 = vld [vmem:[#allocation2 + $0x25d4] ss:$112 sps:$4 sm:$0xff]  }
 0x3b4   :  { %10694 = vmatmul.mubr.bf16.vlgmr.msra.gmra.mrb[12].mxu0 %v20536_v50  ;;  %10866 = vmatmul.mubr.bf16.vlgmr.msra.gmra.mrb[12].mxu1 %v20536_v50  ;;  %v19420_v50 = vld [vmem:[#allocation2 + $0x26bc] ss:$112 sps:$4 sm:$0xff]  }
 0x3b5   :  { %10705 = vmatpush1.bf16.msra.mxu0 %v19343_v46  ;;  %10877 = vmatpush1.bf16.msra.mxu1 %v19346_v47  ;;  %v19414_v46 = vld [vmem:[#allocation2 + $0x25dc] ss:$112 sps:$4 sm:$0xff]   ;;  %v19409_v47 = vld [vmem:[#allocation2 + $0x25d0] ss:$112 sps:$4 sm:$0xff]  }
 0x3b6   :  { %10706 = vmatprep.subr.bf16.mxu0 %v19351_v48  ;;  %10878 = vmatprep.subr.bf16.mxu1 %v19354_v49  ;;  %v19412_v48 = vld [vmem:[#allocation2 + $0x25d8] ss:$112 sps:$4 sm:$0xff]   ;;  %v19417_v49 = vld [vmem:[#allocation2 + $0x26b4] ss:$112 sps:$4 sm:$0xff]  }
 0x3b7   :  { %10736 = vmatprep.mubr.bf16.mxu0 %v20537_v55  ;;  %10908 = vmatprep.mubr.bf16.mxu1 %v20537_v55  ;;  %v19421_v55 = vld [vmem:[#allocation2 + $0x2790] ss:$112 sps:$4 sm:$0xff]  }
 0x3b9   :  { %10707 = vmatpush1.bf16.msra.mxu0 %v19349_v51  ;;  %10879 = vmatpush1.bf16.msra.mxu1 %v19352_v52  ;;  %v19415_v51 = vld [vmem:[#allocation2 + $0x26b0] ss:$112 sps:$4 sm:$0xff]   ;;  %v19418_v52 = vld [vmem:[#allocation2 + $0x26b8] ss:$112 sps:$4 sm:$0xff]  }
 0x3ba   :  { %10708 = vmatprep.subr.bf16.mxu0 %v19357_v53  ;;  %10880 = vmatprep.subr.bf16.mxu1 %v19360_v54  ;;  %v19423_v53 = vld [vmem:[#allocation2 + $0x2794] ss:$112 sps:$4 sm:$0xff]   ;;  %v19426_v54 = vld [vmem:[#allocation2 + $0x279c] ss:$112 sps:$4 sm:$0xff]  }
 0x3bd   :  { %10709 = vmatpush1.bf16.msra.mxu0 %v19355_v56  ;;  %10881 = vmatpush1.bf16.msra.mxu1 %v19358_v57  ;;  %v19424_v56 = vld [vmem:[#allocation2 + $0x2798] ss:$112 sps:$4 sm:$0xff]   ;;  %v19429_v57 = vld [vmem:[#allocation2 + $0x2874] ss:$112 sps:$4 sm:$0xff]  }
 0x3be   :  { %10710 = vmatprep.subr.bf16.mxu0 %v19363_v58  ;;  %10882 = vmatprep.subr.bf16.mxu1 %v19366_v59  ;;  %v19432_v58 = vld [vmem:[#allocation2 + $0x287c] ss:$112 sps:$4 sm:$0xff]   ;;  %v19427_v59 = vld [vmem:[#allocation2 + $0x2870] ss:$112 sps:$4 sm:$0xff]  }
 0x3c1   :  { %10711 = vmatpush1.bf16.msra.mxu0 %v19361_v60  ;;  %10883 = vmatpush1.bf16.msra.mxu1 %v19364_v61  ;;  %v19430_v60 = vld [vmem:[#allocation2 + $0x2878] ss:$112 sps:$4 sm:$0xff]   ;;  %v19435_v61 = vld [vmem:[#allocation2 + $0x2954] ss:$112 sps:$4 sm:$0xff]  }
 0x3c2   :  { %10712 = vmatprep.subr.bf16.mxu0 %v19369_v62  ;;  %10884 = vmatprep.subr.bf16.mxu1 %v19372_v63  ;;  %v19438_v62 = vld [vmem:[#allocation2 + $0x295c] ss:$112 sps:$4 sm:$0xff]   ;;  %v19433_v63 = vld [vmem:[#allocation2 + $0x2950] ss:$112 sps:$4 sm:$0xff]  }
 0x3c5   :  { %10713 = vmatpush1.bf16.msra.mxu0 %v19367_v0  ;;  %10885 = vmatpush1.bf16.msra.mxu1 %v19370_v1  ;;  %v19436_v0 = vld [vmem:[#allocation2 + $0x2958] ss:$112 sps:$4 sm:$0xff]   ;;  %v19441_v1 = vld [vmem:[#allocation2 + $0x2a34] ss:$112 sps:$4 sm:$0xff]  }
 0x3c6   :  { %10714 = vmatprep.subr.bf16.mxu0 %v19375_v2  ;;  %10886 = vmatprep.subr.bf16.mxu1 %v19378_v3  ;;  %v19444_v2 = vld [vmem:[#allocation2 + $0x2a3c] ss:$112 sps:$4 sm:$0xff]   ;;  %v19439_v3 = vld [vmem:[#allocation2 + $0x2a30] ss:$112 sps:$4 sm:$0xff]  }
 0x3c9   :  { %10715 = vmatpush1.bf16.msra.mxu0 %v19373_v4  ;;  %10887 = vmatpush1.bf16.msra.mxu1 %v19376_v5  ;;  %v19442_v4 = vld [vmem:[#allocation2 + $0x2a38] ss:$112 sps:$4 sm:$0xff]   ;;  %v19447_v5 = vld [vmem:[#allocation2 + $0x2b14] ss:$112 sps:$4 sm:$0xff]  }
 0x3ca   :  { %10716 = vmatprep.subr.bf16.mxu0 %v19381_v6  ;;  %10888 = vmatprep.subr.bf16.mxu1 %v19384_v7  ;;  %v19450_v6 = vld [vmem:[#allocation2 + $0x2b1c] ss:$112 sps:$4 sm:$0xff]  }
 0x3cb   :  { %v21032_v7 = vld [vmem:[%s21403_s0 + $0x10] ss:$28 sps:$4 sm:$0xff]  }
 0x3cd   :  { %10717 = vmatpush1.bf16.msra.mxu0 %v19379_v8  ;;  %10889 = vmatpush1.bf16.msra.mxu1 %v19382_v9  ;;  %v19445_v8 = vld [vmem:[#allocation2 + $0x2b10] ss:$112 sps:$4 sm:$0xff]   ;;  %v19448_v9 = vld [vmem:[#allocation2 + $0x2b18] ss:$112 sps:$4 sm:$0xff]  }
 0x3ce   :  { %10718 = vmatprep.subr.bf16.mxu0 %v19387_v10  ;;  %10890 = vmatprep.subr.bf16.mxu1 %v19390_v18  ;;  %v19453_v10 = vld [vmem:[#allocation2 + $0x2bf4] ss:$112 sps:$4 sm:$0xff]   ;;  %v19456_v18 = vld [vmem:[#allocation2 + $0x2bfc] ss:$112 sps:$4 sm:$0xff]  }
 0x3d1   :  { %10719 = vmatpush1.bf16.msra.mxu0 %v19385_v19  ;;  %10891 = vmatpush1.bf16.msra.mxu1 %v19388_v22  ;;  %v19451_v19 = vld [vmem:[#allocation2 + $0x2bf0] ss:$112 sps:$4 sm:$0xff]   ;;  %v19454_v22 = vld [vmem:[#allocation2 + $0x2bf8] ss:$112 sps:$4 sm:$0xff]  }
 0x3d2   :  { %10720 = vmatprep.subr.bf16.mxu0 %v19393_v23  ;;  %10892 = vmatprep.subr.bf16.mxu1 %v19396_v24  ;;  %v19459_v23 = vld [vmem:[#allocation2 + $0x2cd4] ss:$112 sps:$4 sm:$0xff]   ;;  %v19462_v24 = vld [vmem:[#allocation2 + $0x2cdc] ss:$112 sps:$4 sm:$0xff]  }
 0x3d5   :  { %10721 = vmatpush1.bf16.msra.mxu0 %v19391_v25  ;;  %10893 = vmatpush1.bf16.msra.mxu1 %v19394_v26  ;;  %v19457_v25 = vld [vmem:[#allocation2 + $0x2cd0] ss:$112 sps:$4 sm:$0xff]   ;;  %v19460_v26 = vld [vmem:[#allocation2 + $0x2cd8] ss:$112 sps:$4 sm:$0xff]  }
 0x3d6   :  { %10722 = vmatprep.subr.bf16.mxu0 %v19399_v27  ;;  %10894 = vmatprep.subr.bf16.mxu1 %v19402_v28  ;;  %v19465_v27 = vld [vmem:[#allocation2 + $0x2db4] ss:$112 sps:$4 sm:$0xff]   ;;  %v19468_v28 = vld [vmem:[#allocation2 + $0x2dbc] ss:$112 sps:$4 sm:$0xff]  }
 0x3d9   :  { %10723 = vmatpush1.bf16.msra.mxu0 %v19397_v29  ;;  %10895 = vmatpush1.bf16.msra.mxu1 %v19400_v30  ;;  %v19463_v29 = vld [vmem:[#allocation2 + $0x2db0] ss:$112 sps:$4 sm:$0xff]   ;;  %v19466_v30 = vld [vmem:[#allocation2 + $0x2db8] ss:$112 sps:$4 sm:$0xff]  }
 0x3da   :  { %10724 = vmatprep.subr.bf16.mxu0 %v19405_v38  ;;  %10896 = vmatprep.subr.bf16.mxu1 %v19408_v39  ;;  %v19471_v38 = vld [vmem:[#allocation2 + $0x2e94] ss:$112 sps:$4 sm:$0xff]   ;;  %v19474_v39 = vld [vmem:[#allocation2 + $0x2e9c] ss:$112 sps:$4 sm:$0xff]  }
 0x3dd   :  { %10725 = vmatpush1.bf16.msra.mxu0 %v19403_v42  ;;  %10897 = vmatpush1.bf16.msra.mxu1 %v19406_v43  ;;  %v19469_v42 = vld [vmem:[#allocation2 + $0x2e90] ss:$112 sps:$4 sm:$0xff]   ;;  %v19472_v43 = vld [vmem:[#allocation2 + $0x2e98] ss:$112 sps:$4 sm:$0xff]  }
 0x3de   :  { %10726 = vmatprep.subr.bf16.mxu0 %v19411_v45  ;;  %10898 = vmatprep.subr.bf16.mxu1 %v19414_v46  ;;  %v19477_v45 = vld [vmem:[#allocation2 + $0x2f74] ss:$112 sps:$4 sm:$0xff]   ;;  %v19480_v46 = vld [vmem:[#allocation2 + $0x2f7c] ss:$112 sps:$4 sm:$0xff]  }
 0x3e1   :  { %10727 = vmatpush1.bf16.msra.mxu0 %v19409_v47  ;;  %10899 = vmatpush1.bf16.msra.mxu1 %v19412_v48 }
 0x3e2   :  { %10728 = vmatprep.subr.bf16.mxu0 %v19417_v49  ;;  %10900 = vmatprep.subr.bf16.mxu1 %v19420_v50 }
 0x3e5   :  { %10729 = vmatpush1.bf16.msra.mxu0 %v19415_v51  ;;  %10901 = vmatpush1.bf16.msra.mxu1 %v19418_v52 }
 0x3e6   :  { %10730 = vmatprep.subr.bf16.mxu0 %v19423_v53  ;;  %10902 = vmatprep.subr.bf16.mxu1 %v19426_v54  ;;  %v20170_v54 = vld [vmem:[#allocation2 + $0x14c] ss:$112 sps:$4 sm:$0xff]  }
 0x3e9   :  { %10731 = vmatpush1.bf16.msra.mxu0 %v19421_v55  ;;  %10903 = vmatpush1.bf16.msra.mxu1 %v19424_v56 }
 0x3ea   :  { %10732 = vmatprep.subr.bf16.mxu0 %v19429_v57  ;;  %10904 = vmatprep.subr.bf16.mxu1 %v19432_v58  ;;  %v19475_v57 = vld [vmem:[#allocation2 + $0x2f70] ss:$112 sps:$4 sm:$0xff]   ;;  %v19478_v58 = vld [vmem:[#allocation2 + $0x2f78] ss:$112 sps:$4 sm:$0xff]  }
 0x3ed   :  { %10733 = vmatpush1.bf16.msra.mxu0 %v19427_v59  ;;  %10905 = vmatpush1.bf16.msra.mxu1 %v19430_v60  ;;  %v20164_v60 = vld [vmem:[#allocation2 + $0x6c] ss:$112 sps:$4 sm:$0xff]  }
 0x3ee   :  { %10734 = vmatprep.subr.bf16.mxu0 %v19435_v61  ;;  %10906 = vmatprep.subr.bf16.mxu1 %v19438_v62 }
 0x3f1   :  { %10735 = vmatpush1.bf16.msra.mxu0 %v19433_v63  ;;  %10907 = vmatpush1.bf16.msra.mxu1 %v19436_v0  ;;  %v19483_v63 = vld [vmem:[#allocation2 + $0x3054] ss:$112 sps:$4 sm:$0xff]   ;;  %v19486_v0 = vld [vmem:[#allocation2 + $0x305c] ss:$112 sps:$4 sm:$0xff]  }
 0x3f2   :  { %10747 = vmatprep.subr.bf16.mxu0 %v19441_v1  ;;  %10919 = vmatprep.subr.bf16.mxu1 %v19444_v2  ;;  %v19826_v2 = vld [vmem:[#allocation2 + $0x58] ss:$112 sps:$4 sm:$0xff]  }
 0x3f4   :  { %10737 = vmatmul.mubr.bf16.vlgmr.msra.gmra.mrb[12].mxu0 %v21032_v7  ;;  %10909 = vmatmul.mubr.bf16.vlgmr.msra.gmra.mrb[12].mxu1 %v21032_v7 }
 0x3f5   :  { %10748 = vmatpush1.bf16.msra.mxu0 %v19439_v3  ;;  %10920 = vmatpush1.bf16.msra.mxu1 %v19442_v4  ;;  %v19481_v3 = vld [vmem:[#allocation2 + $0x3050] ss:$112 sps:$4 sm:$0xff]   ;;  %v19484_v4 = vld [vmem:[#allocation2 + $0x3058] ss:$112 sps:$4 sm:$0xff]  }
 0x3f6   :  { %10749 = vmatprep.subr.bf16.mxu0 %v19447_v5  ;;  %10921 = vmatprep.subr.bf16.mxu1 %v19450_v6  ;;  %v19489_v5 = vld [vmem:[#allocation2 + $0x44] ss:$112 sps:$4 sm:$0xff]   ;;  %v19492_v6 = vld [vmem:[#allocation2 + $0x4c] ss:$112 sps:$4 sm:$0xff]  }
 0x3f7   :  { %10779 = vmatprep.mubr.bf16.mxu0 %v21413_v16  ;;  %10951 = vmatprep.mubr.bf16.mxu1 %v21413_v16 }
 0x3f9   :  { %10750 = vmatpush1.bf16.msra.mxu0 %v19445_v8  ;;  %10922 = vmatpush1.bf16.msra.mxu1 %v19448_v9  ;;  %v19487_v8 = vld [vmem:[#allocation2 + $0x40] ss:$112 sps:$4 sm:$0xff]   ;;  %v19490_v9 = vld [vmem:[#allocation2 + $0x48] ss:$112 sps:$4 sm:$0xff]  }
 0x3fa   :  { %10751 = vmatprep.subr.bf16.mxu0 %v19453_v10  ;;  %10923 = vmatprep.subr.bf16.mxu1 %v19456_v18  ;;  %v19495_v10 = vld [vmem:[#allocation2 + $0x124] ss:$112 sps:$4 sm:$0xff]   ;;  %v19498_v18 = vld [vmem:[#allocation2 + $0x12c] ss:$112 sps:$4 sm:$0xff]  }
 0x3fd   :  { %10752 = vmatpush1.bf16.msra.mxu0 %v19451_v19  ;;  %10924 = vmatpush1.bf16.msra.mxu1 %v19454_v22  ;;  %v21073_v19 = vld [vmem:[%s21403_s0 + $0x18] ss:$28 sps:$4 sm:$0xff]   ;;  %v19493_v22 = vld [vmem:[#allocation2 + $0x120] ss:$112 sps:$4 sm:$0xff]  }
 0x3fe   :  { %10753 = vmatprep.subr.bf16.mxu0 %v19459_v23  ;;  %10925 = vmatprep.subr.bf16.mxu1 %v19462_v24  ;;  %v19496_v23 = vld [vmem:[#allocation2 + $0x128] ss:$112 sps:$4 sm:$0xff]   ;;  %v19501_v24 = vld [vmem:[#allocation2 + $0x204] ss:$112 sps:$4 sm:$0xff]  }
 0x401   :  { %10754 = vmatpush1.bf16.msra.mxu0 %v19457_v25  ;;  %10926 = vmatpush1.bf16.msra.mxu1 %v19460_v26  ;;  %v19504_v25 = vld [vmem:[#allocation2 + $0x20c] ss:$112 sps:$4 sm:$0xff]   ;;  %v21080_v26 = vld [vmem:[%s21403_s0 + $0x4] ss:$28 sps:$4 sm:$0xff]  }
 0x402   :  { %10755 = vmatprep.subr.bf16.mxu0 %v19465_v27  ;;  %10927 = vmatprep.subr.bf16.mxu1 %v19468_v28  ;;  %v19499_v27 = vld [vmem:[#allocation2 + $0x200] ss:$112 sps:$4 sm:$0xff]   ;;  %v19502_v28 = vld [vmem:[#allocation2 + $0x208] ss:$112 sps:$4 sm:$0xff]  }
 0x405   :  { %10756 = vmatpush1.bf16.msra.mxu0 %v19463_v29  ;;  %10928 = vmatpush1.bf16.msra.mxu1 %v19466_v30  ;;  %v19507_v29 = vld [vmem:[#allocation2 + $0x2e4] ss:$112 sps:$4 sm:$0xff]   ;;  %v19510_v30 = vld [vmem:[#allocation2 + $0x2ec] ss:$112 sps:$4 sm:$0xff]  }
 0x406   :  { %10757 = vmatprep.subr.bf16.mxu0 %v19471_v38  ;;  %10929 = vmatprep.subr.bf16.mxu1 %v19474_v39  ;;  %v19505_v38 = vld [vmem:[#allocation2 + $0x2e0] ss:$112 sps:$4 sm:$0xff]   ;;  %v19508_v39 = vld [vmem:[#allocation2 + $0x2e8] ss:$112 sps:$4 sm:$0xff]  }
 0x407   :  { %v21038_v47 = vpop.f32.mrb[8].mxu0  ;;  %v21040_v48 = vpop.f32.mrb[8].mxu1 }
 0x408   :  { %v11995_v49 = vmax.f32 %v20956_v13, %v21038_v47  ;;  %v21046_v51 = vpop.f32.mrb[9].mxu0  ;;  %v21048_v52 = vpop.f32.mrb[9].mxu1 }
 0x409   :  { %v21054_v55 = vpop.f32.mrb[10].mxu0  ;;  %v21056_v56 = vpop.f32.mrb[10].mxu1  ;;  %10758 = vmatpush1.bf16.msra.mxu0 %v19469_v42  ;;  %10930 = vmatpush1.bf16.msra.mxu1 %v19472_v43  ;;  %v19513_v42 = vld [vmem:[#allocation2 + $0x3c4] ss:$112 sps:$4 sm:$0xff]   ;;  %v19516_v43 = vld [vmem:[#allocation2 + $0x3cc] ss:$112 sps:$4 sm:$0xff]  }
 0x40a   :  { %v21062_v61 = vpop.f32.mrb[11].mxu0  ;;  %v21064_v62 = vpop.f32.mrb[11].mxu1  ;;  %10759 = vmatprep.subr.bf16.mxu0 %v19477_v45  ;;  %10931 = vmatprep.subr.bf16.mxu1 %v19480_v46  ;;  %v19511_v45 = vld [vmem:[#allocation2 + $0x3c0] ss:$112 sps:$4 sm:$0xff]   ;;  %v19514_v46 = vld [vmem:[#allocation2 + $0x3c8] ss:$112 sps:$4 sm:$0xff]  }
 0x40d   :  { %10760 = vmatpush1.bf16.msra.mxu0 %v19475_v57  ;;  %10932 = vmatpush1.bf16.msra.mxu1 %v19478_v58  ;;  %v19519_v57 = vld [vmem:[#allocation2 + $0x4a4] ss:$112 sps:$4 sm:$0xff]   ;;  %v19522_v58 = vld [vmem:[#allocation2 + $0x4ac] ss:$112 sps:$4 sm:$0xff]  }
 0x40e   :  { %10761 = vmatprep.subr.bf16.mxu0 %v19483_v63  ;;  %10933 = vmatprep.subr.bf16.mxu1 %v19486_v0  ;;  %v19517_v63 = vld [vmem:[#allocation2 + $0x4a0] ss:$112 sps:$4 sm:$0xff]   ;;  %v19520_v0 = vld [vmem:[#allocation2 + $0x4a8] ss:$112 sps:$4 sm:$0xff]  }
 0x411   :  { %10762 = vmatpush1.bf16.msra.mxu0 %v19481_v3  ;;  %10934 = vmatpush1.bf16.msra.mxu1 %v19484_v4  ;;  %v19525_v3 = vld [vmem:[#allocation2 + $0x584] ss:$112 sps:$4 sm:$0xff]   ;;  %v19528_v4 = vld [vmem:[#allocation2 + $0x58c] ss:$112 sps:$4 sm:$0xff]  }
 0x412   :  { %10962 = vmatprep.subr.bf16.mxu0 %v19489_v5  ;;  %11134 = vmatprep.subr.bf16.mxu1 %v19492_v6  ;;  %v19523_v5 = vld [vmem:[#allocation2 + $0x580] ss:$112 sps:$4 sm:$0xff]   ;;  %v19526_v6 = vld [vmem:[#allocation2 + $0x588] ss:$112 sps:$4 sm:$0xff]  }
 0x414   :  { %10780 = vmatmul.mubr.bf16.vlgmr.msra.gmra.mrb[12].mxu0 %v21073_v19  ;;  %10952 = vmatmul.mubr.bf16.vlgmr.msra.gmra.mrb[12].mxu1 %v21073_v19 }
 0x415   :  { %10963 = vmatpush1.bf16.msra.mxu0 %v19487_v8  ;;  %11135 = vmatpush1.bf16.msra.mxu1 %v19490_v9  ;;  %v19531_v8 = vld [vmem:[#allocation2 + $0x664] ss:$112 sps:$4 sm:$0xff]   ;;  %v19534_v9 = vld [vmem:[#allocation2 + $0x66c] ss:$112 sps:$4 sm:$0xff]  }
 0x416   :  { %10964 = vmatprep.subr.bf16.mxu0 %v19495_v10  ;;  %11136 = vmatprep.subr.bf16.mxu1 %v19498_v18  ;;  %v19529_v10 = vld [vmem:[#allocation2 + $0x660] ss:$112 sps:$4 sm:$0xff]   ;;  %v19532_v18 = vld [vmem:[#allocation2 + $0x668] ss:$112 sps:$4 sm:$0xff]  }
 0x417   :  { %10994 = vmatprep.mubr.bf16.mxu0 %v21080_v26  ;;  %11166 = vmatprep.mubr.bf16.mxu1 %v21080_v26 }
 0x419   :  { %10965 = vmatpush1.bf16.msra.mxu0 %v19493_v22  ;;  %11137 = vmatpush1.bf16.msra.mxu1 %v19496_v23  ;;  %v19537_v22 = vld [vmem:[#allocation2 + $0x744] ss:$112 sps:$4 sm:$0xff]   ;;  %v19540_v23 = vld [vmem:[#allocation2 + $0x74c] ss:$112 sps:$4 sm:$0xff]  }
 0x41a   :  { %10966 = vmatprep.subr.bf16.mxu0 %v19501_v24  ;;  %11138 = vmatprep.subr.bf16.mxu1 %v19504_v25  ;;  %v19535_v24 = vld [vmem:[#allocation2 + $0x740] ss:$112 sps:$4 sm:$0xff]   ;;  %v19538_v25 = vld [vmem:[#allocation2 + $0x748] ss:$112 sps:$4 sm:$0xff]  }
 0x41d   :  { %10967 = vmatpush1.bf16.msra.mxu0 %v19499_v27  ;;  %11139 = vmatpush1.bf16.msra.mxu1 %v19502_v28  ;;  %v19543_v27 = vld [vmem:[#allocation2 + $0x824] ss:$112 sps:$4 sm:$0xff]   ;;  %v19546_v28 = vld [vmem:[#allocation2 + $0x82c] ss:$112 sps:$4 sm:$0xff]  }
 0x41e   :  { %10968 = vmatprep.subr.bf16.mxu0 %v19507_v29  ;;  %11140 = vmatprep.subr.bf16.mxu1 %v19510_v30  ;;  %v19541_v29 = vld [vmem:[#allocation2 + $0x820] ss:$112 sps:$4 sm:$0xff]   ;;  %v19544_v30 = vld [vmem:[#allocation2 + $0x828] ss:$112 sps:$4 sm:$0xff]  }
 0x421   :  { %10969 = vmatpush1.bf16.msra.mxu0 %v19505_v38  ;;  %11141 = vmatpush1.bf16.msra.mxu1 %v19508_v39  ;;  %v19549_v38 = vld [vmem:[#allocation2 + $0x904] ss:$112 sps:$4 sm:$0xff]   ;;  %v19552_v39 = vld [vmem:[#allocation2 + $0x90c] ss:$112 sps:$4 sm:$0xff]  }
 0x422   :  { %10970 = vmatprep.subr.bf16.mxu0 %v19513_v42  ;;  %11142 = vmatprep.subr.bf16.mxu1 %v19516_v43  ;;  %v19547_v42 = vld [vmem:[#allocation2 + $0x900] ss:$112 sps:$4 sm:$0xff]   ;;  %v19550_v43 = vld [vmem:[#allocation2 + $0x908] ss:$112 sps:$4 sm:$0xff]  }
 0x425   :  { %10971 = vmatpush1.bf16.msra.mxu0 %v19511_v45  ;;  %11143 = vmatpush1.bf16.msra.mxu1 %v19514_v46  ;;  %v19555_v45 = vld [vmem:[#allocation2 + $0x9e4] ss:$112 sps:$4 sm:$0xff]   ;;  %v19558_v46 = vld [vmem:[#allocation2 + $0x9ec] ss:$112 sps:$4 sm:$0xff]  }
 0x426   :  { %10972 = vmatprep.subr.bf16.mxu0 %v19519_v57  ;;  %11144 = vmatprep.subr.bf16.mxu1 %v19522_v58  ;;  %v19553_v57 = vld [vmem:[#allocation2 + $0x9e0] ss:$112 sps:$4 sm:$0xff]   ;;  %v19556_v58 = vld [vmem:[#allocation2 + $0x9e8] ss:$112 sps:$4 sm:$0xff]  }
 0x429   :  { %10973 = vmatpush1.bf16.msra.mxu0 %v19517_v63  ;;  %11145 = vmatpush1.bf16.msra.mxu1 %v19520_v0  ;;  %v19561_v63 = vld [vmem:[#allocation2 + $0xac4] ss:$112 sps:$4 sm:$0xff]   ;;  %v19564_v0 = vld [vmem:[#allocation2 + $0xacc] ss:$112 sps:$4 sm:$0xff]  }
 0x42a   :  { %10974 = vmatprep.subr.bf16.mxu0 %v19525_v3  ;;  %11146 = vmatprep.subr.bf16.mxu1 %v19528_v4  ;;  %v19559_v3 = vld [vmem:[#allocation2 + $0xac0] ss:$112 sps:$4 sm:$0xff]   ;;  %v19562_v4 = vld [vmem:[#allocation2 + $0xac8] ss:$112 sps:$4 sm:$0xff]  }
 0x42d   :  { %10975 = vmatpush1.bf16.msra.mxu0 %v19523_v5  ;;  %11147 = vmatpush1.bf16.msra.mxu1 %v19526_v6  ;;  %v19567_v5 = vld [vmem:[#allocation2 + $0xba4] ss:$112 sps:$4 sm:$0xff]   ;;  %v19570_v6 = vld [vmem:[#allocation2 + $0xbac] ss:$112 sps:$4 sm:$0xff]  }
 0x42e   :  { %10976 = vmatprep.subr.bf16.mxu0 %v19531_v8  ;;  %11148 = vmatprep.subr.bf16.mxu1 %v19534_v9  ;;  %v19565_v8 = vld [vmem:[#allocation2 + $0xba0] ss:$112 sps:$4 sm:$0xff]   ;;  %v19568_v9 = vld [vmem:[#allocation2 + $0xba8] ss:$112 sps:$4 sm:$0xff]  }
 0x431   :  { %10977 = vmatpush1.bf16.msra.mxu0 %v19529_v10  ;;  %11149 = vmatpush1.bf16.msra.mxu1 %v19532_v18  ;;  %v19573_v10 = vld [vmem:[#allocation2 + $0xc84] ss:$112 sps:$4 sm:$0xff]   ;;  %v19576_v18 = vld [vmem:[#allocation2 + $0xc8c] ss:$112 sps:$4 sm:$0xff]  }
 0x432   :  { %10978 = vmatprep.subr.bf16.mxu0 %v19537_v22  ;;  %11150 = vmatprep.subr.bf16.mxu1 %v19540_v23  ;;  %v19571_v22 = vld [vmem:[#allocation2 + $0xc80] ss:$112 sps:$4 sm:$0xff]   ;;  %v19574_v23 = vld [vmem:[#allocation2 + $0xc88] ss:$112 sps:$4 sm:$0xff]  }
 0x435   :  { %10979 = vmatpush1.bf16.msra.mxu0 %v19535_v24  ;;  %11151 = vmatpush1.bf16.msra.mxu1 %v19538_v25  ;;  %v19579_v24 = vld [vmem:[#allocation2 + $0xd64] ss:$112 sps:$4 sm:$0xff]   ;;  %v19582_v25 = vld [vmem:[#allocation2 + $0xd6c] ss:$112 sps:$4 sm:$0xff]  }
 0x436   :  { %10980 = vmatprep.subr.bf16.mxu0 %v19543_v27  ;;  %11152 = vmatprep.subr.bf16.mxu1 %v19546_v28  ;;  %v19577_v27 = vld [vmem:[#allocation2 + $0xd60] ss:$112 sps:$4 sm:$0xff]   ;;  %v19580_v28 = vld [vmem:[#allocation2 + $0xd68] ss:$112 sps:$4 sm:$0xff]  }
 0x439   :  { %10981 = vmatpush1.bf16.msra.mxu0 %v19541_v29  ;;  %11153 = vmatpush1.bf16.msra.mxu1 %v19544_v30  ;;  %v19585_v29 = vld [vmem:[#allocation2 + $0xe44] ss:$112 sps:$4 sm:$0xff]   ;;  %v19588_v30 = vld [vmem:[#allocation2 + $0xe4c] ss:$112 sps:$4 sm:$0xff]  }
 0x43a   :  { %10982 = vmatprep.subr.bf16.mxu0 %v19549_v38  ;;  %11154 = vmatprep.subr.bf16.mxu1 %v19552_v39  ;;  %v19583_v38 = vld [vmem:[#allocation2 + $0xe40] ss:$112 sps:$4 sm:$0xff]   ;;  %v19586_v39 = vld [vmem:[#allocation2 + $0xe48] ss:$112 sps:$4 sm:$0xff]  }
 0x43d   :  { %10983 = vmatpush1.bf16.msra.mxu0 %v19547_v42  ;;  %11155 = vmatpush1.bf16.msra.mxu1 %v19550_v43  ;;  %v19591_v42 = vld [vmem:[#allocation2 + $0xf24] ss:$112 sps:$4 sm:$0xff]   ;;  %v19594_v43 = vld [vmem:[#allocation2 + $0xf2c] ss:$112 sps:$4 sm:$0xff]  }
 0x43e   :  { %10984 = vmatprep.subr.bf16.mxu0 %v19555_v45  ;;  %11156 = vmatprep.subr.bf16.mxu1 %v19558_v46  ;;  %v21087_v45 = vld [vmem:[%s21403_s0] ss:$28 sps:$4 sm:$0xff]  }
 0x43f   :  { %v19589_v46 = vld [vmem:[#allocation2 + $0xf20] ss:$112 sps:$4 sm:$0xff]  }
 0x441   :  { %10985 = vmatpush1.bf16.msra.mxu0 %v19553_v57  ;;  %11157 = vmatpush1.bf16.msra.mxu1 %v19556_v58  ;;  %v19592_v57 = vld [vmem:[#allocation2 + $0xf28] ss:$112 sps:$4 sm:$0xff]   ;;  %v19597_v58 = vld [vmem:[#allocation2 + $0x1004] ss:$112 sps:$4 sm:$0xff]  }
 0x442   :  { %10986 = vmatprep.subr.bf16.mxu0 %v19561_v63  ;;  %11158 = vmatprep.subr.bf16.mxu1 %v19564_v0  ;;  %v19600_v63 = vld [vmem:[#allocation2 + $0x100c] ss:$112 sps:$4 sm:$0xff]  }
 0x443   :  { %v21094_v0 = vld [vmem:[%s21403_s0 + $0xc] ss:$28 sps:$4 sm:$0xff]  }
 0x445   :  { %10987 = vmatpush1.bf16.msra.mxu0 %v19559_v3  ;;  %11159 = vmatpush1.bf16.msra.mxu1 %v19562_v4  ;;  %v19595_v3 = vld [vmem:[#allocation2 + $0x1000] ss:$112 sps:$4 sm:$0xff]   ;;  %v19598_v4 = vld [vmem:[#allocation2 + $0x1008] ss:$112 sps:$4 sm:$0xff]  }
 0x446   :  { %10988 = vmatprep.subr.bf16.mxu0 %v19567_v5  ;;  %11160 = vmatprep.subr.bf16.mxu1 %v19570_v6  ;;  %v19603_v5 = vld [vmem:[#allocation2 + $0x10e4] ss:$112 sps:$4 sm:$0xff]   ;;  %v19606_v6 = vld [vmem:[#allocation2 + $0x10ec] ss:$112 sps:$4 sm:$0xff]  }
 0x449   :  { %10989 = vmatpush1.bf16.msra.mxu0 %v19565_v8  ;;  %11161 = vmatpush1.bf16.msra.mxu1 %v19568_v9  ;;  %v19601_v8 = vld [vmem:[#allocation2 + $0x10e0] ss:$112 sps:$4 sm:$0xff]   ;;  %v19604_v9 = vld [vmem:[#allocation2 + $0x10e8] ss:$112 sps:$4 sm:$0xff]  }
 0x44a   :  { %10990 = vmatprep.subr.bf16.mxu0 %v19573_v10  ;;  %11162 = vmatprep.subr.bf16.mxu1 %v19576_v18  ;;  %v19609_v10 = vld [vmem:[#allocation2 + $0x11c4] ss:$112 sps:$4 sm:$0xff]   ;;  %v19612_v18 = vld [vmem:[#allocation2 + $0x11cc] ss:$112 sps:$4 sm:$0xff]  }
 0x44d   :  { %10991 = vmatpush1.bf16.msra.mxu0 %v19571_v22  ;;  %11163 = vmatpush1.bf16.msra.mxu1 %v19574_v23  ;;  %v19607_v22 = vld [vmem:[#allocation2 + $0x11c0] ss:$112 sps:$4 sm:$0xff]   ;;  %v19610_v23 = vld [vmem:[#allocation2 + $0x11c8] ss:$112 sps:$4 sm:$0xff]  }
 0x44e   :  { %10992 = vmatprep.subr.bf16.mxu0 %v19579_v24  ;;  %11164 = vmatprep.subr.bf16.mxu1 %v19582_v25  ;;  %v19615_v24 = vld [vmem:[#allocation2 + $0x12a4] ss:$112 sps:$4 sm:$0xff]   ;;  %v19618_v25 = vld [vmem:[#allocation2 + $0x12ac] ss:$112 sps:$4 sm:$0xff]  }
 0x451   :  { %10993 = vmatpush1.bf16.msra.mxu0 %v19577_v27  ;;  %11165 = vmatpush1.bf16.msra.mxu1 %v19580_v28  ;;  %v19613_v27 = vld [vmem:[#allocation2 + $0x12a0] ss:$112 sps:$4 sm:$0xff]   ;;  %v19616_v28 = vld [vmem:[#allocation2 + $0x12a8] ss:$112 sps:$4 sm:$0xff]  }
 0x452   :  { %11005 = vmatprep.subr.bf16.mxu0 %v19585_v29  ;;  %11177 = vmatprep.subr.bf16.mxu1 %v19588_v30  ;;  %v19621_v29 = vld [vmem:[#allocation2 + $0x1384] ss:$112 sps:$4 sm:$0xff]   ;;  %v19624_v30 = vld [vmem:[#allocation2 + $0x138c] ss:$112 sps:$4 sm:$0xff]  }
 0x454   :  { %10995 = vmatmul.mubr.bf16.vlgmr.msra.gmra.mrb[16].mxu0 %v21087_v45  ;;  %11167 = vmatmul.mubr.bf16.vlgmr.msra.gmra.mrb[16].mxu1 %v21087_v45 }
 0x455   :  { %11006 = vmatpush1.bf16.msra.mxu0 %v19583_v38  ;;  %11178 = vmatpush1.bf16.msra.mxu1 %v19586_v39  ;;  %v19619_v38 = vld [vmem:[#allocation2 + $0x1380] ss:$112 sps:$4 sm:$0xff]   ;;  %v19622_v39 = vld [vmem:[#allocation2 + $0x1388] ss:$112 sps:$4 sm:$0xff]  }
 0x456   :  { %11007 = vmatprep.subr.bf16.mxu0 %v19591_v42  ;;  %11179 = vmatprep.subr.bf16.mxu1 %v19594_v43  ;;  %v19627_v42 = vld [vmem:[#allocation2 + $0x1464] ss:$112 sps:$4 sm:$0xff]   ;;  %v19630_v43 = vld [vmem:[#allocation2 + $0x146c] ss:$112 sps:$4 sm:$0xff]  }
 0x457   :  { %11037 = vmatprep.mubr.bf16.mxu0 %v21094_v0  ;;  %11209 = vmatprep.mubr.bf16.mxu1 %v21094_v0 }
 0x459   :  { %11008 = vmatpush1.bf16.msra.mxu0 %v19589_v46  ;;  %11180 = vmatpush1.bf16.msra.mxu1 %v19592_v57  ;;  %v19625_v46 = vld [vmem:[#allocation2 + $0x1460] ss:$112 sps:$4 sm:$0xff]   ;;  %v19628_v57 = vld [vmem:[#allocation2 + $0x1468] ss:$112 sps:$4 sm:$0xff]  }
 0x45a   :  { %11009 = vmatprep.subr.bf16.mxu0 %v19597_v58  ;;  %11181 = vmatprep.subr.bf16.mxu1 %v19600_v63  ;;  %v19633_v58 = vld [vmem:[#allocation2 + $0x1544] ss:$112 sps:$4 sm:$0xff]   ;;  %v19636_v63 = vld [vmem:[#allocation2 + $0x154c] ss:$112 sps:$4 sm:$0xff]  }
 0x45d   :  { %11010 = vmatpush1.bf16.msra.mxu0 %v19595_v3  ;;  %11182 = vmatpush1.bf16.msra.mxu1 %v19598_v4  ;;  %v19631_v3 = vld [vmem:[#allocation2 + $0x1540] ss:$112 sps:$4 sm:$0xff]   ;;  %v19634_v4 = vld [vmem:[#allocation2 + $0x1548] ss:$112 sps:$4 sm:$0xff]  }
 0x45e   :  { %11011 = vmatprep.subr.bf16.mxu0 %v19603_v5  ;;  %11183 = vmatprep.subr.bf16.mxu1 %v19606_v6  ;;  %v19639_v5 = vld [vmem:[#allocation2 + $0x1624] ss:$112 sps:$4 sm:$0xff]   ;;  %v19642_v6 = vld [vmem:[#allocation2 + $0x162c] ss:$112 sps:$4 sm:$0xff]  }
 0x461   :  { %11012 = vmatpush1.bf16.msra.mxu0 %v19601_v8  ;;  %11184 = vmatpush1.bf16.msra.mxu1 %v19604_v9  ;;  %v19637_v8 = vld [vmem:[#allocation2 + $0x1620] ss:$112 sps:$4 sm:$0xff]   ;;  %v19640_v9 = vld [vmem:[#allocation2 + $0x1628] ss:$112 sps:$4 sm:$0xff]  }
 0x462   :  { %11013 = vmatprep.subr.bf16.mxu0 %v19609_v10  ;;  %11185 = vmatprep.subr.bf16.mxu1 %v19612_v18  ;;  %v19645_v10 = vld [vmem:[#allocation2 + $0x1704] ss:$112 sps:$4 sm:$0xff]   ;;  %v19648_v18 = vld [vmem:[#allocation2 + $0x170c] ss:$112 sps:$4 sm:$0xff]  }
 0x465   :  { %11014 = vmatpush1.bf16.msra.mxu0 %v19607_v22  ;;  %11186 = vmatpush1.bf16.msra.mxu1 %v19610_v23  ;;  %v19643_v22 = vld [vmem:[#allocation2 + $0x1700] ss:$112 sps:$4 sm:$0xff]   ;;  %v19646_v23 = vld [vmem:[#allocation2 + $0x1708] ss:$112 sps:$4 sm:$0xff]  }
 0x466   :  { %11015 = vmatprep.subr.bf16.mxu0 %v19615_v24  ;;  %11187 = vmatprep.subr.bf16.mxu1 %v19618_v25  ;;  %v19651_v24 = vld [vmem:[#allocation2 + $0x17e4] ss:$112 sps:$4 sm:$0xff]   ;;  %v19654_v25 = vld [vmem:[#allocation2 + $0x17ec] ss:$112 sps:$4 sm:$0xff]  }
 0x469   :  { %11016 = vmatpush1.bf16.msra.mxu0 %v19613_v27  ;;  %11188 = vmatpush1.bf16.msra.mxu1 %v19616_v28  ;;  %v19649_v27 = vld [vmem:[#allocation2 + $0x17e0] ss:$112 sps:$4 sm:$0xff]   ;;  %v19652_v28 = vld [vmem:[#allocation2 + $0x17e8] ss:$112 sps:$4 sm:$0xff]  }
 0x46a   :  { %11017 = vmatprep.subr.bf16.mxu0 %v19621_v29  ;;  %11189 = vmatprep.subr.bf16.mxu1 %v19624_v30  ;;  %v19657_v29 = vld [vmem:[#allocation2 + $0x18c4] ss:$112 sps:$4 sm:$0xff]   ;;  %v19660_v30 = vld [vmem:[#allocation2 + $0x18cc] ss:$112 sps:$4 sm:$0xff]  }
 0x46d   :  { %11018 = vmatpush1.bf16.msra.mxu0 %v19619_v38  ;;  %11190 = vmatpush1.bf16.msra.mxu1 %v19622_v39  ;;  %v19655_v38 = vld [vmem:[#allocation2 + $0x18c0] ss:$112 sps:$4 sm:$0xff]   ;;  %v19658_v39 = vld [vmem:[#allocation2 + $0x18c8] ss:$112 sps:$4 sm:$0xff]  }
 0x46e   :  { %11019 = vmatprep.subr.bf16.mxu0 %v19627_v42  ;;  %11191 = vmatprep.subr.bf16.mxu1 %v19630_v43  ;;  %v19663_v42 = vld [vmem:[#allocation2 + $0x19a4] ss:$112 sps:$4 sm:$0xff]   ;;  %v19666_v43 = vld [vmem:[#allocation2 + $0x19ac] ss:$112 sps:$4 sm:$0xff]  }
 0x471   :  { %11020 = vmatpush1.bf16.msra.mxu0 %v19625_v46  ;;  %11192 = vmatpush1.bf16.msra.mxu1 %v19628_v57  ;;  %v19661_v46 = vld [vmem:[#allocation2 + $0x19a0] ss:$112 sps:$4 sm:$0xff]   ;;  %v19664_v57 = vld [vmem:[#allocation2 + $0x19a8] ss:$112 sps:$4 sm:$0xff]  }
 0x472   :  { %11021 = vmatprep.subr.bf16.mxu0 %v19633_v58  ;;  %11193 = vmatprep.subr.bf16.mxu1 %v19636_v63  ;;  %v19669_v58 = vld [vmem:[#allocation2 + $0x1a84] ss:$112 sps:$4 sm:$0xff]   ;;  %v19672_v63 = vld [vmem:[#allocation2 + $0x1a8c] ss:$112 sps:$4 sm:$0xff]  }
 0x475   :  { %11022 = vmatpush1.bf16.msra.mxu0 %v19631_v3  ;;  %11194 = vmatpush1.bf16.msra.mxu1 %v19634_v4  ;;  %v19667_v3 = vld [vmem:[#allocation2 + $0x1a80] ss:$112 sps:$4 sm:$0xff]   ;;  %v19670_v4 = vld [vmem:[#allocation2 + $0x1a88] ss:$112 sps:$4 sm:$0xff]  }
 0x476   :  { %11023 = vmatprep.subr.bf16.mxu0 %v19639_v5  ;;  %11195 = vmatprep.subr.bf16.mxu1 %v19642_v6  ;;  %v19675_v5 = vld [vmem:[#allocation2 + $0x1b64] ss:$112 sps:$4 sm:$0xff]   ;;  %v19678_v6 = vld [vmem:[#allocation2 + $0x1b6c] ss:$112 sps:$4 sm:$0xff]  }
 0x479   :  { %11024 = vmatpush1.bf16.msra.mxu0 %v19637_v8  ;;  %11196 = vmatpush1.bf16.msra.mxu1 %v19640_v9  ;;  %v19673_v8 = vld [vmem:[#allocation2 + $0x1b60] ss:$112 sps:$4 sm:$0xff]   ;;  %v19676_v9 = vld [vmem:[#allocation2 + $0x1b68] ss:$112 sps:$4 sm:$0xff]  }
 0x47a   :  { %11025 = vmatprep.subr.bf16.mxu0 %v19645_v10  ;;  %11197 = vmatprep.subr.bf16.mxu1 %v19648_v18  ;;  %v19681_v10 = vld [vmem:[#allocation2 + $0x1c44] ss:$112 sps:$4 sm:$0xff]   ;;  %v19684_v18 = vld [vmem:[#allocation2 + $0x1c4c] ss:$112 sps:$4 sm:$0xff]  }
 0x47d   :  { %11026 = vmatpush1.bf16.msra.mxu0 %v19643_v22  ;;  %11198 = vmatpush1.bf16.msra.mxu1 %v19646_v23  ;;  %v19679_v22 = vld [vmem:[#allocation2 + $0x1c40] ss:$112 sps:$4 sm:$0xff]   ;;  %v19682_v23 = vld [vmem:[#allocation2 + $0x1c48] ss:$112 sps:$4 sm:$0xff]  }
 0x47e   :  { %11027 = vmatprep.subr.bf16.mxu0 %v19651_v24  ;;  %11199 = vmatprep.subr.bf16.mxu1 %v19654_v25  ;;  %v19687_v24 = vld [vmem:[#allocation2 + $0x1d24] ss:$112 sps:$4 sm:$0xff]   ;;  %v19690_v25 = vld [vmem:[#allocation2 + $0x1d2c] ss:$112 sps:$4 sm:$0xff]  }
 0x481   :  { %11028 = vmatpush1.bf16.msra.mxu0 %v19649_v27  ;;  %11200 = vmatpush1.bf16.msra.mxu1 %v19652_v28  ;;  %v21101_v27 = vld [vmem:[%s21403_s0 + $0x8] ss:$28 sps:$4 sm:$0xff]   ;;  %v19685_v28 = vld [vmem:[#allocation2 + $0x1d20] ss:$112 sps:$4 sm:$0xff]  }
 0x482   :  { %11029 = vmatprep.subr.bf16.mxu0 %v19657_v29  ;;  %11201 = vmatprep.subr.bf16.mxu1 %v19660_v30  ;;  %v19688_v29 = vld [vmem:[#allocation2 + $0x1d28] ss:$112 sps:$4 sm:$0xff]   ;;  %v19693_v30 = vld [vmem:[#allocation2 + $0x1e04] ss:$112 sps:$4 sm:$0xff]  }
 0x485   :  { %11030 = vmatpush1.bf16.msra.mxu0 %v19655_v38  ;;  %11202 = vmatpush1.bf16.msra.mxu1 %v19658_v39  ;;  %v19696_v38 = vld [vmem:[#allocation2 + $0x1e0c] ss:$112 sps:$4 sm:$0xff]   ;;  %v21108_v39 = vld [vmem:[%s21403_s0 + $0x14] ss:$28 sps:$4 sm:$0xff]  }
 0x486   :  { %11031 = vmatprep.subr.bf16.mxu0 %v19663_v42  ;;  %11203 = vmatprep.subr.bf16.mxu1 %v19666_v43  ;;  %v19691_v42 = vld [vmem:[#allocation2 + $0x1e00] ss:$112 sps:$4 sm:$0xff]   ;;  %v19694_v43 = vld [vmem:[#allocation2 + $0x1e08] ss:$112 sps:$4 sm:$0xff]  }
 0x489   :  { %11032 = vmatpush1.bf16.msra.mxu0 %v19661_v46  ;;  %11204 = vmatpush1.bf16.msra.mxu1 %v19664_v57  ;;  %v19699_v46 = vld [vmem:[#allocation2 + $0x1ee4] ss:$112 sps:$4 sm:$0xff]   ;;  %v19702_v57 = vld [vmem:[#allocation2 + $0x1eec] ss:$112 sps:$4 sm:$0xff]  }
 0x48a   :  { %11033 = vmatprep.subr.bf16.mxu0 %v19669_v58  ;;  %11205 = vmatprep.subr.bf16.mxu1 %v19672_v63  ;;  %v19697_v58 = vld [vmem:[#allocation2 + $0x1ee0] ss:$112 sps:$4 sm:$0xff]   ;;  %v19700_v63 = vld [vmem:[#allocation2 + $0x1ee8] ss:$112 sps:$4 sm:$0xff]  }
 0x48d   :  { %11034 = vmatpush1.bf16.msra.mxu0 %v19667_v3  ;;  %11206 = vmatpush1.bf16.msra.mxu1 %v19670_v4  ;;  %v19705_v3 = vld [vmem:[#allocation2 + $0x1fc4] ss:$112 sps:$4 sm:$0xff]   ;;  %v19708_v4 = vld [vmem:[#allocation2 + $0x1fcc] ss:$112 sps:$4 sm:$0xff]  }
 0x48e   :  { %11035 = vmatprep.subr.bf16.mxu0 %v19675_v5  ;;  %11207 = vmatprep.subr.bf16.mxu1 %v19678_v6  ;;  %v19703_v5 = vld [vmem:[#allocation2 + $0x1fc0] ss:$112 sps:$4 sm:$0xff]   ;;  %v19706_v6 = vld [vmem:[#allocation2 + $0x1fc8] ss:$112 sps:$4 sm:$0xff]  }
 0x491   :  { %11036 = vmatpush1.bf16.msra.mxu0 %v19673_v8  ;;  %11208 = vmatpush1.bf16.msra.mxu1 %v19676_v9  ;;  %v19711_v8 = vld [vmem:[#allocation2 + $0x20a4] ss:$112 sps:$4 sm:$0xff]   ;;  %v19714_v9 = vld [vmem:[#allocation2 + $0x20ac] ss:$112 sps:$4 sm:$0xff]  }
 0x492   :  { %11048 = vmatprep.subr.bf16.mxu0 %v19681_v10  ;;  %11220 = vmatprep.subr.bf16.mxu1 %v19684_v18  ;;  %v19709_v10 = vld [vmem:[#allocation2 + $0x20a0] ss:$112 sps:$4 sm:$0xff]   ;;  %v19712_v18 = vld [vmem:[#allocation2 + $0x20a8] ss:$112 sps:$4 sm:$0xff]  }
 0x494   :  { %11038 = vmatmul.mubr.bf16.vlgmr.msra.gmra.mrb[16].mxu0 %v21101_v27  ;;  %11210 = vmatmul.mubr.bf16.vlgmr.msra.gmra.mrb[16].mxu1 %v21101_v27 }
 0x495   :  { %11049 = vmatpush1.bf16.msra.mxu0 %v19679_v22  ;;  %11221 = vmatpush1.bf16.msra.mxu1 %v19682_v23  ;;  %v19717_v22 = vld [vmem:[#allocation2 + $0x2184] ss:$112 sps:$4 sm:$0xff]   ;;  %v19720_v23 = vld [vmem:[#allocation2 + $0x218c] ss:$112 sps:$4 sm:$0xff]  }
 0x496   :  { %11050 = vmatprep.subr.bf16.mxu0 %v19687_v24  ;;  %11222 = vmatprep.subr.bf16.mxu1 %v19690_v25  ;;  %v19715_v24 = vld [vmem:[#allocation2 + $0x2180] ss:$112 sps:$4 sm:$0xff]   ;;  %v19718_v25 = vld [vmem:[#allocation2 + $0x2188] ss:$112 sps:$4 sm:$0xff]  }
 0x497   :  { %11080 = vmatprep.mubr.bf16.mxu0 %v21108_v39  ;;  %11252 = vmatprep.mubr.bf16.mxu1 %v21108_v39 }
 0x499   :  { %11051 = vmatpush1.bf16.msra.mxu0 %v19685_v28  ;;  %11223 = vmatpush1.bf16.msra.mxu1 %v19688_v29  ;;  %v19723_v28 = vld [vmem:[#allocation2 + $0x2264] ss:$112 sps:$4 sm:$0xff]   ;;  %v19726_v29 = vld [vmem:[#allocation2 + $0x226c] ss:$112 sps:$4 sm:$0xff]  }
 0x49a   :  { %11052 = vmatprep.subr.bf16.mxu0 %v19693_v30  ;;  %11224 = vmatprep.subr.bf16.mxu1 %v19696_v38  ;;  %v19721_v30 = vld [vmem:[#allocation2 + $0x2260] ss:$112 sps:$4 sm:$0xff]   ;;  %v19724_v38 = vld [vmem:[#allocation2 + $0x2268] ss:$112 sps:$4 sm:$0xff]  }
 0x49d   :  { %11053 = vmatpush1.bf16.msra.mxu0 %v19691_v42  ;;  %11225 = vmatpush1.bf16.msra.mxu1 %v19694_v43  ;;  %v19729_v42 = vld [vmem:[#allocation2 + $0x2344] ss:$112 sps:$4 sm:$0xff]   ;;  %v19732_v43 = vld [vmem:[#allocation2 + $0x234c] ss:$112 sps:$4 sm:$0xff]  }
 0x49e   :  { %11054 = vmatprep.subr.bf16.mxu0 %v19699_v46  ;;  %11226 = vmatprep.subr.bf16.mxu1 %v19702_v57  ;;  %v19727_v46 = vld [vmem:[#allocation2 + $0x2340] ss:$112 sps:$4 sm:$0xff]   ;;  %v19730_v57 = vld [vmem:[#allocation2 + $0x2348] ss:$112 sps:$4 sm:$0xff]  }
 0x4a1   :  { %11055 = vmatpush1.bf16.msra.mxu0 %v19697_v58  ;;  %11227 = vmatpush1.bf16.msra.mxu1 %v19700_v63  ;;  %v19735_v58 = vld [vmem:[#allocation2 + $0x2424] ss:$112 sps:$4 sm:$0xff]   ;;  %v19738_v63 = vld [vmem:[#allocation2 + $0x242c] ss:$112 sps:$4 sm:$0xff]  }
 0x4a2   :  { %11056 = vmatprep.subr.bf16.mxu0 %v19705_v3  ;;  %11228 = vmatprep.subr.bf16.mxu1 %v19708_v4  ;;  %v19733_v3 = vld [vmem:[#allocation2 + $0x2420] ss:$112 sps:$4 sm:$0xff]   ;;  %v19736_v4 = vld [vmem:[#allocation2 + $0x2428] ss:$112 sps:$4 sm:$0xff]  }
 0x4a5   :  { %11057 = vmatpush1.bf16.msra.mxu0 %v19703_v5  ;;  %11229 = vmatpush1.bf16.msra.mxu1 %v19706_v6  ;;  %v19741_v5 = vld [vmem:[#allocation2 + $0x2504] ss:$112 sps:$4 sm:$0xff]   ;;  %v19744_v6 = vld [vmem:[#allocation2 + $0x250c] ss:$112 sps:$4 sm:$0xff]  }
 0x4a6   :  { %11058 = vmatprep.subr.bf16.mxu0 %v19711_v8  ;;  %11230 = vmatprep.subr.bf16.mxu1 %v19714_v9  ;;  %v19739_v8 = vld [vmem:[#allocation2 + $0x2500] ss:$112 sps:$4 sm:$0xff]   ;;  %v19742_v9 = vld [vmem:[#allocation2 + $0x2508] ss:$112 sps:$4 sm:$0xff]  }
 0x4a9   :  { %11059 = vmatpush1.bf16.msra.mxu0 %v19709_v10  ;;  %11231 = vmatpush1.bf16.msra.mxu1 %v19712_v18  ;;  %v19747_v10 = vld [vmem:[#allocation2 + $0x25e4] ss:$112 sps:$4 sm:$0xff]   ;;  %v19750_v18 = vld [vmem:[#allocation2 + $0x25ec] ss:$112 sps:$4 sm:$0xff]  }
 0x4aa   :  { %11060 = vmatprep.subr.bf16.mxu0 %v19717_v22  ;;  %11232 = vmatprep.subr.bf16.mxu1 %v19720_v23  ;;  %v19745_v22 = vld [vmem:[#allocation2 + $0x25e0] ss:$112 sps:$4 sm:$0xff]   ;;  %v19748_v23 = vld [vmem:[#allocation2 + $0x25e8] ss:$112 sps:$4 sm:$0xff]  }
 0x4ad   :  { %11061 = vmatpush1.bf16.msra.mxu0 %v19715_v24  ;;  %11233 = vmatpush1.bf16.msra.mxu1 %v19718_v25  ;;  %v19753_v24 = vld [vmem:[#allocation2 + $0x26c4] ss:$112 sps:$4 sm:$0xff]   ;;  %v19756_v25 = vld [vmem:[#allocation2 + $0x26cc] ss:$112 sps:$4 sm:$0xff]  }
 0x4ae   :  { %11062 = vmatprep.subr.bf16.mxu0 %v19723_v28  ;;  %11234 = vmatprep.subr.bf16.mxu1 %v19726_v29  ;;  %v19751_v28 = vld [vmem:[#allocation2 + $0x26c0] ss:$112 sps:$4 sm:$0xff]   ;;  %v19754_v29 = vld [vmem:[#allocation2 + $0x26c8] ss:$112 sps:$4 sm:$0xff]  }
 0x4b1   :  { %11063 = vmatpush1.bf16.msra.mxu0 %v19721_v30  ;;  %11235 = vmatpush1.bf16.msra.mxu1 %v19724_v38  ;;  %v19759_v30 = vld [vmem:[#allocation2 + $0x27a4] ss:$112 sps:$4 sm:$0xff]   ;;  %v19762_v38 = vld [vmem:[#allocation2 + $0x27ac] ss:$112 sps:$4 sm:$0xff]  }
 0x4b2   :  { %11064 = vmatprep.subr.bf16.mxu0 %v19729_v42  ;;  %11236 = vmatprep.subr.bf16.mxu1 %v19732_v43  ;;  %v19757_v42 = vld [vmem:[#allocation2 + $0x27a0] ss:$112 sps:$4 sm:$0xff]   ;;  %v19760_v43 = vld [vmem:[#allocation2 + $0x27a8] ss:$112 sps:$4 sm:$0xff]  }
 0x4b5   :  { %11065 = vmatpush1.bf16.msra.mxu0 %v19727_v46  ;;  %11237 = vmatpush1.bf16.msra.mxu1 %v19730_v57  ;;  %v19765_v46 = vld [vmem:[#allocation2 + $0x2884] ss:$112 sps:$4 sm:$0xff]   ;;  %v19768_v57 = vld [vmem:[#allocation2 + $0x288c] ss:$112 sps:$4 sm:$0xff]  }
 0x4b6   :  { %11066 = vmatprep.subr.bf16.mxu0 %v19735_v58  ;;  %11238 = vmatprep.subr.bf16.mxu1 %v19738_v63  ;;  %v19763_v58 = vld [vmem:[#allocation2 + $0x2880] ss:$112 sps:$4 sm:$0xff]   ;;  %v19766_v63 = vld [vmem:[#allocation2 + $0x2888] ss:$112 sps:$4 sm:$0xff]  }
 0x4b9   :  { %11067 = vmatpush1.bf16.msra.mxu0 %v19733_v3  ;;  %11239 = vmatpush1.bf16.msra.mxu1 %v19736_v4  ;;  %v19771_v3 = vld [vmem:[#allocation2 + $0x2964] ss:$112 sps:$4 sm:$0xff]   ;;  %v19774_v4 = vld [vmem:[#allocation2 + $0x296c] ss:$112 sps:$4 sm:$0xff]  }
 0x4ba   :  { %11068 = vmatprep.subr.bf16.mxu0 %v19741_v5  ;;  %11240 = vmatprep.subr.bf16.mxu1 %v19744_v6  ;;  %v19769_v5 = vld [vmem:[#allocation2 + $0x2960] ss:$112 sps:$4 sm:$0xff]   ;;  %v19772_v6 = vld [vmem:[#allocation2 + $0x2968] ss:$112 sps:$4 sm:$0xff]  }
 0x4bd   :  { %11069 = vmatpush1.bf16.msra.mxu0 %v19739_v8  ;;  %11241 = vmatpush1.bf16.msra.mxu1 %v19742_v9  ;;  %v19777_v8 = vld [vmem:[#allocation2 + $0x2a44] ss:$112 sps:$4 sm:$0xff]   ;;  %v19780_v9 = vld [vmem:[#allocation2 + $0x2a4c] ss:$112 sps:$4 sm:$0xff]  }
 0x4be   :  { %11070 = vmatprep.subr.bf16.mxu0 %v19747_v10  ;;  %11242 = vmatprep.subr.bf16.mxu1 %v19750_v18  ;;  %v19775_v10 = vld [vmem:[#allocation2 + $0x2a40] ss:$112 sps:$4 sm:$0xff]   ;;  %v19778_v18 = vld [vmem:[#allocation2 + $0x2a48] ss:$112 sps:$4 sm:$0xff]  }
 0x4c1   :  { %11071 = vmatpush1.bf16.msra.mxu0 %v19745_v22  ;;  %11243 = vmatpush1.bf16.msra.mxu1 %v19748_v23  ;;  %v19783_v22 = vld [vmem:[#allocation2 + $0x2b24] ss:$112 sps:$4 sm:$0xff]   ;;  %v19786_v23 = vld [vmem:[#allocation2 + $0x2b2c] ss:$112 sps:$4 sm:$0xff]  }
 0x4c2   :  { %11072 = vmatprep.subr.bf16.mxu0 %v19753_v24  ;;  %11244 = vmatprep.subr.bf16.mxu1 %v19756_v25  ;;  %v19781_v24 = vld [vmem:[#allocation2 + $0x2b20] ss:$112 sps:$4 sm:$0xff]   ;;  %v19784_v25 = vld [vmem:[#allocation2 + $0x2b28] ss:$112 sps:$4 sm:$0xff]  }
 0x4c5   :  { %11073 = vmatpush1.bf16.msra.mxu0 %v19751_v28  ;;  %11245 = vmatpush1.bf16.msra.mxu1 %v19754_v29  ;;  %v19789_v28 = vld [vmem:[#allocation2 + $0x2c04] ss:$112 sps:$4 sm:$0xff]   ;;  %v19792_v29 = vld [vmem:[#allocation2 + $0x2c0c] ss:$112 sps:$4 sm:$0xff]  }
 0x4c6   :  { %11074 = vmatprep.subr.bf16.mxu0 %v19759_v30  ;;  %11246 = vmatprep.subr.bf16.mxu1 %v19762_v38  ;;  %v19787_v30 = vld [vmem:[#allocation2 + $0x2c00] ss:$112 sps:$4 sm:$0xff]   ;;  %v19790_v38 = vld [vmem:[#allocation2 + $0x2c08] ss:$112 sps:$4 sm:$0xff]  }
 0x4c9   :  { %11075 = vmatpush1.bf16.msra.mxu0 %v19757_v42  ;;  %11247 = vmatpush1.bf16.msra.mxu1 %v19760_v43  ;;  %v19795_v42 = vld [vmem:[#allocation2 + $0x2ce4] ss:$112 sps:$4 sm:$0xff]   ;;  %v19793_v43 = vld [vmem:[#allocation2 + $0x2ce0] ss:$112 sps:$4 sm:$0xff]  }
 0x4ca   :  { %11076 = vmatprep.subr.bf16.mxu0 %v19765_v46  ;;  %11248 = vmatprep.subr.bf16.mxu1 %v19768_v57  ;;  %v19796_v46 = vld [vmem:[#allocation2 + $0x2ce8] ss:$112 sps:$4 sm:$0xff]   ;;  %v19801_v57 = vld [vmem:[#allocation2 + $0x2dc4] ss:$112 sps:$4 sm:$0xff]  }
 0x4cd   :  { %11077 = vmatpush1.bf16.msra.mxu0 %v19763_v58  ;;  %11249 = vmatpush1.bf16.msra.mxu1 %v19766_v63  ;;  %v19804_v58 = vld [vmem:[#allocation2 + $0x2dcc] ss:$112 sps:$4 sm:$0xff]   ;;  %v19799_v63 = vld [vmem:[#allocation2 + $0x2dc0] ss:$112 sps:$4 sm:$0xff]  }
 0x4ce   :  { %11078 = vmatprep.subr.bf16.mxu0 %v19771_v3  ;;  %11250 = vmatprep.subr.bf16.mxu1 %v19774_v4  ;;  %v19802_v3 = vld [vmem:[#allocation2 + $0x2dc8] ss:$112 sps:$4 sm:$0xff]   ;;  %v19807_v4 = vld [vmem:[#allocation2 + $0x2ea4] ss:$112 sps:$4 sm:$0xff]  }
 0x4d1   :  { %11079 = vmatpush1.bf16.msra.mxu0 %v19769_v5  ;;  %11251 = vmatpush1.bf16.msra.mxu1 %v19772_v6  ;;  %v19810_v5 = vld [vmem:[#allocation2 + $0x2eac] ss:$112 sps:$4 sm:$0xff]   ;;  %v19805_v6 = vld [vmem:[#allocation2 + $0x2ea0] ss:$112 sps:$4 sm:$0xff]  }
 0x4d2   :  { %11091 = vmatprep.subr.bf16.mxu0 %v19777_v8  ;;  %11263 = vmatprep.subr.bf16.mxu1 %v19780_v9  ;;  %v19808_v8 = vld [vmem:[#allocation2 + $0x2ea8] ss:$112 sps:$4 sm:$0xff]   ;;  %v19813_v9 = vld [vmem:[#allocation2 + $0x2f84] ss:$112 sps:$4 sm:$0xff]  }
 0x4d4   :  { %11081 = vmatmul.mubr.bf16.vlgmr.msra.gmra.mrb[16].mxu0 %v21032_v7  ;;  %11253 = vmatmul.mubr.bf16.vlgmr.msra.gmra.mrb[16].mxu1 %v21032_v7  ;;  %v19798_v7 = vld [vmem:[#allocation2 + $0x2cec] ss:$112 sps:$4 sm:$0xff]  }
 0x4d5   :  { %11092 = vmatpush1.bf16.msra.mxu0 %v19775_v10  ;;  %11264 = vmatpush1.bf16.msra.mxu1 %v19778_v18  ;;  %v19816_v10 = vld [vmem:[#allocation2 + $0x2f8c] ss:$112 sps:$4 sm:$0xff]  }
 0x4d6   :  { %11093 = vmatprep.subr.bf16.mxu0 %v19783_v22  ;;  %11265 = vmatprep.subr.bf16.mxu1 %v19786_v23  ;;  %v20183_v23 = vld [vmem:[#allocation2 + $0x3e0] ss:$112 sps:$4 sm:$0xff]  }
 0x4d7   :  { %11123 = vmatprep.mubr.bf16.mxu0 %v21413_v16  ;;  %11295 = vmatprep.mubr.bf16.mxu1 %v21413_v16 }
 0x4d9   :  { %11094 = vmatpush1.bf16.msra.mxu0 %v19781_v24  ;;  %11266 = vmatpush1.bf16.msra.mxu1 %v19784_v25 }
 0x4da   :  { %11095 = vmatprep.subr.bf16.mxu0 %v19789_v28  ;;  %11267 = vmatprep.subr.bf16.mxu1 %v19792_v29  ;;  %v20167_v28 = vld [vmem:[#allocation2 + $0x144] ss:$112 sps:$4 sm:$0xff]  }
 0x4dd   :  { %11096 = vmatpush1.bf16.msra.mxu0 %v19787_v30  ;;  %11268 = vmatpush1.bf16.msra.mxu1 %v19790_v38  ;;  %v19811_v38 = vld [vmem:[#allocation2 + $0x2f80] ss:$112 sps:$4 sm:$0xff]  }
 0x4de   :  { %11097 = vmatprep.subr.bf16.mxu0 %v19795_v42  ;;  %11269 = vmatprep.subr.bf16.mxu1 %v19798_v7  ;;  %v19814_v42 = vld [vmem:[#allocation2 + $0x2f88] ss:$112 sps:$4 sm:$0xff]   ;;  %v20161_v7 = vld [vmem:[#allocation2 + $0x64] ss:$112 sps:$4 sm:$0xff]  }
 0x4e1   :  { %11098 = vmatpush1.bf16.msra.mxu0 %v19793_v43  ;;  %11270 = vmatpush1.bf16.msra.mxu1 %v19796_v46 }
 0x4e2   :  { %11099 = vmatprep.subr.bf16.mxu0 %v19801_v57  ;;  %11271 = vmatprep.subr.bf16.mxu1 %v19804_v58  ;;  %v19819_v57 = vld [vmem:[#allocation2 + $0x3064] ss:$112 sps:$4 sm:$0xff]   ;;  %v19822_v58 = vld [vmem:[#allocation2 + $0x306c] ss:$112 sps:$4 sm:$0xff]  }
 0x4e5   :  { %11100 = vmatpush1.bf16.msra.mxu0 %v19799_v63  ;;  %11272 = vmatpush1.bf16.msra.mxu1 %v19802_v3  ;;  %v19817_v3 = vld [vmem:[#allocation2 + $0x3060] ss:$112 sps:$4 sm:$0xff]   ;;  %v20156_v63 = vld [vmem:[#allocation2 + $0x3078] ss:$112 sps:$4 sm:$0xff]  }
 0x4e6   :  { %11101 = vmatprep.subr.bf16.mxu0 %v19807_v4  ;;  %11273 = vmatprep.subr.bf16.mxu1 %v19810_v5  ;;  %v19820_v4 = vld [vmem:[#allocation2 + $0x3068] ss:$112 sps:$4 sm:$0xff]   ;;  %v19825_v5 = vld [vmem:[#allocation2 + $0x54] ss:$112 sps:$4 sm:$0xff]  }
 0x4e7   :  { %v21116_v18 = vpop.f32.mrb[12].mxu0  ;;  %v21118_v22 = vpop.f32.mrb[12].mxu1 }
 0x4e8   :  { %v21122_v24 = vpop.f32.mrb[13].mxu0  ;;  %v21124_v25 = vpop.f32.mrb[13].mxu1 }
 0x4e9   :  { %v21128_v29 = vpop.f32.mrb[14].mxu0  ;;  %v21130_v30 = vpop.f32.mrb[14].mxu1  ;;  %11102 = vmatpush1.bf16.msra.mxu0 %v19805_v6  ;;  %11274 = vmatpush1.bf16.msra.mxu1 %v19808_v8  ;;  %v19828_v6 = vld [vmem:[#allocation2 + $0x5c] ss:$112 sps:$4 sm:$0xff]   ;;  %v19823_v8 = vld [vmem:[#allocation2 + $0x50] ss:$112 sps:$4 sm:$0xff]  }
 0x4ea   :  { %v21134_v43 = vpop.f32.mrb[15].mxu0  ;;  %v21136_v46 = vpop.f32.mrb[15].mxu1  ;;  %11103 = vmatprep.subr.bf16.mxu0 %v19813_v9  ;;  %11275 = vmatprep.subr.bf16.mxu1 %v19816_v10  ;;  %v19831_v9 = vld [vmem:[#allocation2 + $0x134] ss:$112 sps:$4 sm:$0xff]   ;;  %v19834_v10 = vld [vmem:[#allocation2 + $0x13c] ss:$112 sps:$4 sm:$0xff]  }
 0x4eb   :  { %21418 = vst [vmem:[#allocation20_spill] sm:$0xff] %v21134_v43  ;;  %v21420_v43 = vmax.f32 %v20954_v12, %v21046_v51  ;;  %v20489_v51 = vld [vmem:[#allocation2 + $0x3080] ss:$112 sps:$4 sm:$0xff]  }
 0x4ed   :  { %11104 = vmatpush1.bf16.msra.mxu0 %v19811_v38  ;;  %11276 = vmatpush1.bf16.msra.mxu1 %v19814_v42  ;;  %v19829_v38 = vld [vmem:[#allocation2 + $0x130] ss:$112 sps:$4 sm:$0xff]   ;;  %v19832_v42 = vld [vmem:[#allocation2 + $0x138] ss:$112 sps:$4 sm:$0xff]  }
 0x4ee   :  { %11105 = vmatprep.subr.bf16.mxu0 %v19819_v57  ;;  %11277 = vmatprep.subr.bf16.mxu1 %v19822_v58  ;;  %v19837_v57 = vld [vmem:[#allocation2 + $0x214] ss:$112 sps:$4 sm:$0xff]   ;;  %v19840_v58 = vld [vmem:[#allocation2 + $0x21c] ss:$112 sps:$4 sm:$0xff]  }
 0x4f1   :  { %11106 = vmatpush1.bf16.msra.mxu0 %v19817_v3  ;;  %11278 = vmatpush1.bf16.msra.mxu1 %v19820_v4  ;;  %v19835_v3 = vld [vmem:[#allocation2 + $0x210] ss:$112 sps:$4 sm:$0xff]   ;;  %v19838_v4 = vld [vmem:[#allocation2 + $0x218] ss:$112 sps:$4 sm:$0xff]  }
 0x4f2   :  { %11306 = vmatprep.subr.bf16.mxu0 %v19825_v5  ;;  %11478 = vmatprep.subr.bf16.mxu1 %v19828_v6  ;;  %v19843_v5 = vld [vmem:[#allocation2 + $0x2f4] ss:$112 sps:$4 sm:$0xff]   ;;  %v19844_v6 = vld [vmem:[#allocation2 + $0x2f8] ss:$112 sps:$4 sm:$0xff]  }
 0x4f4   :  { %11124 = vmatmul.mubr.bf16.vlgmr.msra.gmra.mrb[16].mxu0 %v21073_v19  ;;  %11296 = vmatmul.mubr.bf16.vlgmr.msra.gmra.mrb[16].mxu1 %v21073_v19  ;;  %v19846_v19 = vld [vmem:[#allocation2 + $0x2fc] ss:$112 sps:$4 sm:$0xff]  }
 0x4f5   :  { %11307 = vmatpush1.bf16.msra.mxu0 %v19823_v8  ;;  %11479 = vmatpush1.bf16.msra.mxu1 %v19826_v2  ;;  %v19841_v2 = vld [vmem:[#allocation2 + $0x2f0] ss:$112 sps:$4 sm:$0xff]   ;;  %v19849_v8 = vld [vmem:[#allocation2 + $0x3d4] ss:$112 sps:$4 sm:$0xff]  }
 0x4f6   :  { %11308 = vmatprep.subr.bf16.mxu0 %v19831_v9  ;;  %11480 = vmatprep.subr.bf16.mxu1 %v19834_v10  ;;  %v19852_v9 = vld [vmem:[#allocation2 + $0x3dc] ss:$112 sps:$4 sm:$0xff]   ;;  %v19847_v10 = vld [vmem:[#allocation2 + $0x3d0] ss:$112 sps:$4 sm:$0xff]  }
 0x4f7   :  { %11338 = vmatprep.mubr.bf16.mxu0 %v21080_v26  ;;  %11510 = vmatprep.mubr.bf16.mxu1 %v21080_v26  ;;  %v19850_v26 = vld [vmem:[#allocation2 + $0x3d8] ss:$112 sps:$4 sm:$0xff]  }
 0x4f9   :  { %11309 = vmatpush1.bf16.msra.mxu0 %v19829_v38  ;;  %11481 = vmatpush1.bf16.msra.mxu1 %v19832_v42  ;;  %v19855_v38 = vld [vmem:[#allocation2 + $0x4b4] ss:$112 sps:$4 sm:$0xff]   ;;  %v19858_v42 = vld [vmem:[#allocation2 + $0x4bc] ss:$112 sps:$4 sm:$0xff]  }
 0x4fa   :  { %11310 = vmatprep.subr.bf16.mxu0 %v19837_v57  ;;  %11482 = vmatprep.subr.bf16.mxu1 %v19840_v58  ;;  %v19853_v57 = vld [vmem:[#allocation2 + $0x4b0] ss:$112 sps:$4 sm:$0xff]   ;;  %v19856_v58 = vld [vmem:[#allocation2 + $0x4b8] ss:$112 sps:$4 sm:$0xff]  }
 0x4fd   :  { %11311 = vmatpush1.bf16.msra.mxu0 %v19835_v3  ;;  %11483 = vmatpush1.bf16.msra.mxu1 %v19838_v4  ;;  %v19861_v3 = vld [vmem:[#allocation2 + $0x594] ss:$112 sps:$4 sm:$0xff]   ;;  %v19864_v4 = vld [vmem:[#allocation2 + $0x59c] ss:$112 sps:$4 sm:$0xff]  }
 0x4fe   :  { %11312 = vmatprep.subr.bf16.mxu0 %v19843_v5  ;;  %11484 = vmatprep.subr.bf16.mxu1 %v19846_v19  ;;  %v19859_v5 = vld [vmem:[#allocation2 + $0x590] ss:$112 sps:$4 sm:$0xff]   ;;  %v19862_v19 = vld [vmem:[#allocation2 + $0x598] ss:$112 sps:$4 sm:$0xff]  }
 0x501   :  { %11313 = vmatpush1.bf16.msra.mxu0 %v19841_v2  ;;  %11485 = vmatpush1.bf16.msra.mxu1 %v19844_v6  ;;  %v19867_v2 = vld [vmem:[#allocation2 + $0x674] ss:$112 sps:$4 sm:$0xff]   ;;  %v19870_v6 = vld [vmem:[#allocation2 + $0x67c] ss:$112 sps:$4 sm:$0xff]  }
 0x502   :  { %11314 = vmatprep.subr.bf16.mxu0 %v19849_v8  ;;  %11486 = vmatprep.subr.bf16.mxu1 %v19852_v9  ;;  %v19865_v8 = vld [vmem:[#allocation2 + $0x670] ss:$112 sps:$4 sm:$0xff]   ;;  %v19868_v9 = vld [vmem:[#allocation2 + $0x678] ss:$112 sps:$4 sm:$0xff]  }
 0x505   :  { %11315 = vmatpush1.bf16.msra.mxu0 %v19847_v10  ;;  %11487 = vmatpush1.bf16.msra.mxu1 %v19850_v26  ;;  %v19873_v10 = vld [vmem:[#allocation2 + $0x754] ss:$112 sps:$4 sm:$0xff]   ;;  %v19876_v26 = vld [vmem:[#allocation2 + $0x75c] ss:$112 sps:$4 sm:$0xff]  }
 0x506   :  { %11316 = vmatprep.subr.bf16.mxu0 %v19855_v38  ;;  %11488 = vmatprep.subr.bf16.mxu1 %v19858_v42  ;;  %v19871_v38 = vld [vmem:[#allocation2 + $0x750] ss:$112 sps:$4 sm:$0xff]   ;;  %v19874_v42 = vld [vmem:[#allocation2 + $0x758] ss:$112 sps:$4 sm:$0xff]  }
 0x509   :  { %11317 = vmatpush1.bf16.msra.mxu0 %v19853_v57  ;;  %11489 = vmatpush1.bf16.msra.mxu1 %v19856_v58  ;;  %v19879_v57 = vld [vmem:[#allocation2 + $0x834] ss:$112 sps:$4 sm:$0xff]   ;;  %v19882_v58 = vld [vmem:[#allocation2 + $0x83c] ss:$112 sps:$4 sm:$0xff]  }
 0x50a   :  { %11318 = vmatprep.subr.bf16.mxu0 %v19861_v3  ;;  %11490 = vmatprep.subr.bf16.mxu1 %v19864_v4  ;;  %v19877_v3 = vld [vmem:[#allocation2 + $0x830] ss:$112 sps:$4 sm:$0xff]   ;;  %v19880_v4 = vld [vmem:[#allocation2 + $0x838] ss:$112 sps:$4 sm:$0xff]  }
 0x50d   :  { %11319 = vmatpush1.bf16.msra.mxu0 %v19859_v5  ;;  %11491 = vmatpush1.bf16.msra.mxu1 %v19862_v19  ;;  %v19885_v5 = vld [vmem:[#allocation2 + $0x914] ss:$112 sps:$4 sm:$0xff]   ;;  %v19888_v19 = vld [vmem:[#allocation2 + $0x91c] ss:$112 sps:$4 sm:$0xff]  }
 0x50e   :  { %11320 = vmatprep.subr.bf16.mxu0 %v19867_v2  ;;  %11492 = vmatprep.subr.bf16.mxu1 %v19870_v6  ;;  %v19883_v2 = vld [vmem:[#allocation2 + $0x910] ss:$112 sps:$4 sm:$0xff]   ;;  %v19886_v6 = vld [vmem:[#allocation2 + $0x918] ss:$112 sps:$4 sm:$0xff]  }
 0x511   :  { %11321 = vmatpush1.bf16.msra.mxu0 %v19865_v8  ;;  %11493 = vmatpush1.bf16.msra.mxu1 %v19868_v9  ;;  %v19891_v8 = vld [vmem:[#allocation2 + $0x9f4] ss:$112 sps:$4 sm:$0xff]   ;;  %v19894_v9 = vld [vmem:[#allocation2 + $0x9fc] ss:$112 sps:$4 sm:$0xff]  }
 0x512   :  { %11322 = vmatprep.subr.bf16.mxu0 %v19873_v10  ;;  %11494 = vmatprep.subr.bf16.mxu1 %v19876_v26  ;;  %v19889_v10 = vld [vmem:[#allocation2 + $0x9f0] ss:$112 sps:$4 sm:$0xff]   ;;  %v19892_v26 = vld [vmem:[#allocation2 + $0x9f8] ss:$112 sps:$4 sm:$0xff]  }
 0x515   :  { %11323 = vmatpush1.bf16.msra.mxu0 %v19871_v38  ;;  %11495 = vmatpush1.bf16.msra.mxu1 %v19874_v42  ;;  %v19897_v38 = vld [vmem:[#allocation2 + $0xad4] ss:$112 sps:$4 sm:$0xff]   ;;  %v19900_v42 = vld [vmem:[#allocation2 + $0xadc] ss:$112 sps:$4 sm:$0xff]  }
 0x516   :  { %11324 = vmatprep.subr.bf16.mxu0 %v19879_v57  ;;  %11496 = vmatprep.subr.bf16.mxu1 %v19882_v58  ;;  %v19895_v57 = vld [vmem:[#allocation2 + $0xad0] ss:$112 sps:$4 sm:$0xff]   ;;  %v19898_v58 = vld [vmem:[#allocation2 + $0xad8] ss:$112 sps:$4 sm:$0xff]  }
 0x519   :  { %11325 = vmatpush1.bf16.msra.mxu0 %v19877_v3  ;;  %11497 = vmatpush1.bf16.msra.mxu1 %v19880_v4  ;;  %v19903_v3 = vld [vmem:[#allocation2 + $0xbb4] ss:$112 sps:$4 sm:$0xff]   ;;  %v19906_v4 = vld [vmem:[#allocation2 + $0xbbc] ss:$112 sps:$4 sm:$0xff]  }
 0x51a   :  { %11326 = vmatprep.subr.bf16.mxu0 %v19885_v5  ;;  %11498 = vmatprep.subr.bf16.mxu1 %v19888_v19  ;;  %v19901_v5 = vld [vmem:[#allocation2 + $0xbb0] ss:$112 sps:$4 sm:$0xff]   ;;  %v19904_v19 = vld [vmem:[#allocation2 + $0xbb8] ss:$112 sps:$4 sm:$0xff]  }
 0x51d   :  { %11327 = vmatpush1.bf16.msra.mxu0 %v19883_v2  ;;  %11499 = vmatpush1.bf16.msra.mxu1 %v19886_v6  ;;  %v19909_v2 = vld [vmem:[#allocation2 + $0xc94] ss:$112 sps:$4 sm:$0xff]   ;;  %v19912_v6 = vld [vmem:[#allocation2 + $0xc9c] ss:$112 sps:$4 sm:$0xff]  }
 0x51e   :  { %11328 = vmatprep.subr.bf16.mxu0 %v19891_v8  ;;  %11500 = vmatprep.subr.bf16.mxu1 %v19894_v9  ;;  %v19907_v8 = vld [vmem:[#allocation2 + $0xc90] ss:$112 sps:$4 sm:$0xff]   ;;  %v19910_v9 = vld [vmem:[#allocation2 + $0xc98] ss:$112 sps:$4 sm:$0xff]  }
 0x521   :  { %11329 = vmatpush1.bf16.msra.mxu0 %v19889_v10  ;;  %11501 = vmatpush1.bf16.msra.mxu1 %v19892_v26  ;;  %v19915_v10 = vld [vmem:[#allocation2 + $0xd74] ss:$112 sps:$4 sm:$0xff]   ;;  %v19918_v26 = vld [vmem:[#allocation2 + $0xd7c] ss:$112 sps:$4 sm:$0xff]  }
 0x522   :  { %11330 = vmatprep.subr.bf16.mxu0 %v19897_v38  ;;  %11502 = vmatprep.subr.bf16.mxu1 %v19900_v42  ;;  %v19913_v38 = vld [vmem:[#allocation2 + $0xd70] ss:$112 sps:$4 sm:$0xff]   ;;  %v19916_v42 = vld [vmem:[#allocation2 + $0xd78] ss:$112 sps:$4 sm:$0xff]  }
 0x525   :  { %11331 = vmatpush1.bf16.msra.mxu0 %v19895_v57  ;;  %11503 = vmatpush1.bf16.msra.mxu1 %v19898_v58  ;;  %v19921_v57 = vld [vmem:[#allocation2 + $0xe54] ss:$112 sps:$4 sm:$0xff]   ;;  %v19924_v58 = vld [vmem:[#allocation2 + $0xe5c] ss:$112 sps:$4 sm:$0xff]  }
 0x526   :  { %11332 = vmatprep.subr.bf16.mxu0 %v19903_v3  ;;  %11504 = vmatprep.subr.bf16.mxu1 %v19906_v4  ;;  %v19919_v3 = vld [vmem:[#allocation2 + $0xe50] ss:$112 sps:$4 sm:$0xff]   ;;  %v19922_v4 = vld [vmem:[#allocation2 + $0xe58] ss:$112 sps:$4 sm:$0xff]  }
 0x529   :  { %11333 = vmatpush1.bf16.msra.mxu0 %v19901_v5  ;;  %11505 = vmatpush1.bf16.msra.mxu1 %v19904_v19  ;;  %v19927_v5 = vld [vmem:[#allocation2 + $0xf34] ss:$112 sps:$4 sm:$0xff]   ;;  %v19930_v19 = vld [vmem:[#allocation2 + $0xf3c] ss:$112 sps:$4 sm:$0xff]  }
 0x52a   :  { %11334 = vmatprep.subr.bf16.mxu0 %v19909_v2  ;;  %11506 = vmatprep.subr.bf16.mxu1 %v19912_v6  ;;  %v19925_v2 = vld [vmem:[#allocation2 + $0xf30] ss:$112 sps:$4 sm:$0xff]   ;;  %v19928_v6 = vld [vmem:[#allocation2 + $0xf38] ss:$112 sps:$4 sm:$0xff]  }
 0x52d   :  { %11335 = vmatpush1.bf16.msra.mxu0 %v19907_v8  ;;  %11507 = vmatpush1.bf16.msra.mxu1 %v19910_v9  ;;  %v19933_v8 = vld [vmem:[#allocation2 + $0x1014] ss:$112 sps:$4 sm:$0xff]   ;;  %v19936_v9 = vld [vmem:[#allocation2 + $0x101c] ss:$112 sps:$4 sm:$0xff]  }
 0x52e   :  { %11336 = vmatprep.subr.bf16.mxu0 %v19915_v10  ;;  %11508 = vmatprep.subr.bf16.mxu1 %v19918_v26  ;;  %v19931_v10 = vld [vmem:[#allocation2 + $0x1010] ss:$112 sps:$4 sm:$0xff]   ;;  %v19934_v26 = vld [vmem:[#allocation2 + $0x1018] ss:$112 sps:$4 sm:$0xff]  }
 0x531   :  { %11337 = vmatpush1.bf16.msra.mxu0 %v19913_v38  ;;  %11509 = vmatpush1.bf16.msra.mxu1 %v19916_v42  ;;  %v19939_v38 = vld [vmem:[#allocation2 + $0x10f4] ss:$112 sps:$4 sm:$0xff]   ;;  %v19937_v42 = vld [vmem:[#allocation2 + $0x10f0] ss:$112 sps:$4 sm:$0xff]  }
 0x532   :  { %11349 = vmatprep.subr.bf16.mxu0 %v19921_v57  ;;  %11521 = vmatprep.subr.bf16.mxu1 %v19924_v58  ;;  %v19940_v57 = vld [vmem:[#allocation2 + $0x10f8] ss:$112 sps:$4 sm:$0xff]   ;;  %v19945_v58 = vld [vmem:[#allocation2 + $0x11d4] ss:$112 sps:$4 sm:$0xff]  }
 0x534   :  { %11339 = vmatmul.mubr.bf16.vlgmr.msra.gmra.mrb[20].mxu0 %v21087_v45  ;;  %11511 = vmatmul.mubr.bf16.vlgmr.msra.gmra.mrb[20].mxu1 %v21087_v45  ;;  %v19942_v45 = vld [vmem:[#allocation2 + $0x10fc] ss:$112 sps:$4 sm:$0xff]  }
 0x535   :  { %11350 = vmatpush1.bf16.msra.mxu0 %v19919_v3  ;;  %11522 = vmatpush1.bf16.msra.mxu1 %v19922_v4  ;;  %v19948_v3 = vld [vmem:[#allocation2 + $0x11dc] ss:$112 sps:$4 sm:$0xff]   ;;  %v19943_v4 = vld [vmem:[#allocation2 + $0x11d0] ss:$112 sps:$4 sm:$0xff]  }
 0x536   :  { %11351 = vmatprep.subr.bf16.mxu0 %v19927_v5  ;;  %11523 = vmatprep.subr.bf16.mxu1 %v19930_v19  ;;  %v19951_v5 = vld [vmem:[#allocation2 + $0x12b4] ss:$112 sps:$4 sm:$0xff]   ;;  %v19954_v19 = vld [vmem:[#allocation2 + $0x12bc] ss:$112 sps:$4 sm:$0xff]  }
 0x537   :  { %11381 = vmatprep.mubr.bf16.mxu0 %v21094_v0  ;;  %11553 = vmatprep.mubr.bf16.mxu1 %v21094_v0  ;;  %v19946_v0 = vld [vmem:[#allocation2 + $0x11d8] ss:$112 sps:$4 sm:$0xff]  }
 0x539   :  { %11352 = vmatpush1.bf16.msra.mxu0 %v19925_v2  ;;  %11524 = vmatpush1.bf16.msra.mxu1 %v19928_v6  ;;  %v19949_v2 = vld [vmem:[#allocation2 + $0x12b0] ss:$112 sps:$4 sm:$0xff]   ;;  %v19952_v6 = vld [vmem:[#allocation2 + $0x12b8] ss:$112 sps:$4 sm:$0xff]  }
 0x53a   :  { %11353 = vmatprep.subr.bf16.mxu0 %v19933_v8  ;;  %11525 = vmatprep.subr.bf16.mxu1 %v19936_v9  ;;  %v19957_v8 = vld [vmem:[#allocation2 + $0x1394] ss:$112 sps:$4 sm:$0xff]   ;;  %v19960_v9 = vld [vmem:[#allocation2 + $0x139c] ss:$112 sps:$4 sm:$0xff]  }
 0x53d   :  { %11354 = vmatpush1.bf16.msra.mxu0 %v19931_v10  ;;  %11526 = vmatpush1.bf16.msra.mxu1 %v19934_v26  ;;  %v19955_v10 = vld [vmem:[#allocation2 + $0x1390] ss:$112 sps:$4 sm:$0xff]   ;;  %v19958_v26 = vld [vmem:[#allocation2 + $0x1398] ss:$112 sps:$4 sm:$0xff]  }
 0x53e   :  { %11355 = vmatprep.subr.bf16.mxu0 %v19939_v38  ;;  %11527 = vmatprep.subr.bf16.mxu1 %v19942_v45  ;;  %v19963_v38 = vld [vmem:[#allocation2 + $0x1474] ss:$112 sps:$4 sm:$0xff]   ;;  %v19966_v45 = vld [vmem:[#allocation2 + $0x147c] ss:$112 sps:$4 sm:$0xff]  }
 0x541   :  { %11356 = vmatpush1.bf16.msra.mxu0 %v19937_v42  ;;  %11528 = vmatpush1.bf16.msra.mxu1 %v19940_v57  ;;  %v19961_v42 = vld [vmem:[#allocation2 + $0x1470] ss:$112 sps:$4 sm:$0xff]   ;;  %v19964_v57 = vld [vmem:[#allocation2 + $0x1478] ss:$112 sps:$4 sm:$0xff]  }
 0x542   :  { %11357 = vmatprep.subr.bf16.mxu0 %v19945_v58  ;;  %11529 = vmatprep.subr.bf16.mxu1 %v19948_v3  ;;  %v19969_v58 = vld [vmem:[#allocation2 + $0x1554] ss:$112 sps:$4 sm:$0xff]   ;;  %v19972_v3 = vld [vmem:[#allocation2 + $0x155c] ss:$112 sps:$4 sm:$0xff]  }
 0x545   :  { %11358 = vmatpush1.bf16.msra.mxu0 %v19943_v4  ;;  %11530 = vmatpush1.bf16.msra.mxu1 %v19946_v0  ;;  %v19967_v4 = vld [vmem:[#allocation2 + $0x1550] ss:$112 sps:$4 sm:$0xff]   ;;  %v19970_v0 = vld [vmem:[#allocation2 + $0x1558] ss:$112 sps:$4 sm:$0xff]  }
 0x546   :  { %11359 = vmatprep.subr.bf16.mxu0 %v19951_v5  ;;  %11531 = vmatprep.subr.bf16.mxu1 %v19954_v19  ;;  %v19975_v5 = vld [vmem:[#allocation2 + $0x1634] ss:$112 sps:$4 sm:$0xff]   ;;  %v19978_v19 = vld [vmem:[#allocation2 + $0x163c] ss:$112 sps:$4 sm:$0xff]  }
 0x549   :  { %11360 = vmatpush1.bf16.msra.mxu0 %v19949_v2  ;;  %11532 = vmatpush1.bf16.msra.mxu1 %v19952_v6  ;;  %v19973_v2 = vld [vmem:[#allocation2 + $0x1630] ss:$112 sps:$4 sm:$0xff]   ;;  %v19976_v6 = vld [vmem:[#allocation2 + $0x1638] ss:$112 sps:$4 sm:$0xff]  }
 0x54a   :  { %11361 = vmatprep.subr.bf16.mxu0 %v19957_v8  ;;  %11533 = vmatprep.subr.bf16.mxu1 %v19960_v9  ;;  %v19981_v8 = vld [vmem:[#allocation2 + $0x1714] ss:$112 sps:$4 sm:$0xff]   ;;  %v19984_v9 = vld [vmem:[#allocation2 + $0x171c] ss:$112 sps:$4 sm:$0xff]  }
 0x54d   :  { %11362 = vmatpush1.bf16.msra.mxu0 %v19955_v10  ;;  %11534 = vmatpush1.bf16.msra.mxu1 %v19958_v26  ;;  %v19979_v10 = vld [vmem:[#allocation2 + $0x1710] ss:$112 sps:$4 sm:$0xff]   ;;  %v19982_v26 = vld [vmem:[#allocation2 + $0x1718] ss:$112 sps:$4 sm:$0xff]  }
 0x54e   :  { %11363 = vmatprep.subr.bf16.mxu0 %v19963_v38  ;;  %11535 = vmatprep.subr.bf16.mxu1 %v19966_v45  ;;  %v19987_v38 = vld [vmem:[#allocation2 + $0x17f4] ss:$112 sps:$4 sm:$0xff]   ;;  %v19990_v45 = vld [vmem:[#allocation2 + $0x17fc] ss:$112 sps:$4 sm:$0xff]  }
 0x551   :  { %11364 = vmatpush1.bf16.msra.mxu0 %v19961_v42  ;;  %11536 = vmatpush1.bf16.msra.mxu1 %v19964_v57  ;;  %v19985_v42 = vld [vmem:[#allocation2 + $0x17f0] ss:$112 sps:$4 sm:$0xff]   ;;  %v19988_v57 = vld [vmem:[#allocation2 + $0x17f8] ss:$112 sps:$4 sm:$0xff]  }
 0x552   :  { %11365 = vmatprep.subr.bf16.mxu0 %v19969_v58  ;;  %11537 = vmatprep.subr.bf16.mxu1 %v19972_v3  ;;  %v19993_v58 = vld [vmem:[#allocation2 + $0x18d4] ss:$112 sps:$4 sm:$0xff]   ;;  %v19996_v3 = vld [vmem:[#allocation2 + $0x18dc] ss:$112 sps:$4 sm:$0xff]  }
 0x555   :  { %11366 = vmatpush1.bf16.msra.mxu0 %v19967_v4  ;;  %11538 = vmatpush1.bf16.msra.mxu1 %v19970_v0  ;;  %v19991_v4 = vld [vmem:[#allocation2 + $0x18d0] ss:$112 sps:$4 sm:$0xff]   ;;  %v19994_v0 = vld [vmem:[#allocation2 + $0x18d8] ss:$112 sps:$4 sm:$0xff]  }
 0x556   :  { %11367 = vmatprep.subr.bf16.mxu0 %v19975_v5  ;;  %11539 = vmatprep.subr.bf16.mxu1 %v19978_v19  ;;  %v19999_v5 = vld [vmem:[#allocation2 + $0x19b4] ss:$112 sps:$4 sm:$0xff]   ;;  %v20002_v19 = vld [vmem:[#allocation2 + $0x19bc] ss:$112 sps:$4 sm:$0xff]  }
 0x559   :  { %11368 = vmatpush1.bf16.msra.mxu0 %v19973_v2  ;;  %11540 = vmatpush1.bf16.msra.mxu1 %v19976_v6  ;;  %v19997_v2 = vld [vmem:[#allocation2 + $0x19b0] ss:$112 sps:$4 sm:$0xff]   ;;  %v20000_v6 = vld [vmem:[#allocation2 + $0x19b8] ss:$112 sps:$4 sm:$0xff]  }
 0x55a   :  { %11369 = vmatprep.subr.bf16.mxu0 %v19981_v8  ;;  %11541 = vmatprep.subr.bf16.mxu1 %v19984_v9  ;;  %v20005_v8 = vld [vmem:[#allocation2 + $0x1a94] ss:$112 sps:$4 sm:$0xff]   ;;  %v20008_v9 = vld [vmem:[#allocation2 + $0x1a9c] ss:$112 sps:$4 sm:$0xff]  }
 0x55d   :  { %11370 = vmatpush1.bf16.msra.mxu0 %v19979_v10  ;;  %11542 = vmatpush1.bf16.msra.mxu1 %v19982_v26  ;;  %v20003_v10 = vld [vmem:[#allocation2 + $0x1a90] ss:$112 sps:$4 sm:$0xff]   ;;  %v20006_v26 = vld [vmem:[#allocation2 + $0x1a98] ss:$112 sps:$4 sm:$0xff]  }
 0x55e   :  { %11371 = vmatprep.subr.bf16.mxu0 %v19987_v38  ;;  %11543 = vmatprep.subr.bf16.mxu1 %v19990_v45  ;;  %v20011_v38 = vld [vmem:[#allocation2 + $0x1b74] ss:$112 sps:$4 sm:$0xff]   ;;  %v20014_v45 = vld [vmem:[#allocation2 + $0x1b7c] ss:$112 sps:$4 sm:$0xff]  }
 0x561   :  { %11372 = vmatpush1.bf16.msra.mxu0 %v19985_v42  ;;  %11544 = vmatpush1.bf16.msra.mxu1 %v19988_v57  ;;  %v20009_v42 = vld [vmem:[#allocation2 + $0x1b70] ss:$112 sps:$4 sm:$0xff]   ;;  %v20012_v57 = vld [vmem:[#allocation2 + $0x1b78] ss:$112 sps:$4 sm:$0xff]  }
 0x562   :  { %11373 = vmatprep.subr.bf16.mxu0 %v19993_v58  ;;  %11545 = vmatprep.subr.bf16.mxu1 %v19996_v3  ;;  %v20017_v58 = vld [vmem:[#allocation2 + $0x1c54] ss:$112 sps:$4 sm:$0xff]   ;;  %v20020_v3 = vld [vmem:[#allocation2 + $0x1c5c] ss:$112 sps:$4 sm:$0xff]  }
 0x565   :  { %11374 = vmatpush1.bf16.msra.mxu0 %v19991_v4  ;;  %11546 = vmatpush1.bf16.msra.mxu1 %v19994_v0  ;;  %v20015_v4 = vld [vmem:[#allocation2 + $0x1c50] ss:$112 sps:$4 sm:$0xff]   ;;  %v20018_v0 = vld [vmem:[#allocation2 + $0x1c58] ss:$112 sps:$4 sm:$0xff]  }
 0x566   :  { %11375 = vmatprep.subr.bf16.mxu0 %v19999_v5  ;;  %11547 = vmatprep.subr.bf16.mxu1 %v20002_v19  ;;  %v20023_v5 = vld [vmem:[#allocation2 + $0x1d34] ss:$112 sps:$4 sm:$0xff]   ;;  %v20026_v19 = vld [vmem:[#allocation2 + $0x1d3c] ss:$112 sps:$4 sm:$0xff]  }
 0x569   :  { %11376 = vmatpush1.bf16.msra.mxu0 %v19997_v2  ;;  %11548 = vmatpush1.bf16.msra.mxu1 %v20000_v6  ;;  %v20021_v2 = vld [vmem:[#allocation2 + $0x1d30] ss:$112 sps:$4 sm:$0xff]   ;;  %v20024_v6 = vld [vmem:[#allocation2 + $0x1d38] ss:$112 sps:$4 sm:$0xff]  }
 0x56a   :  { %11377 = vmatprep.subr.bf16.mxu0 %v20005_v8  ;;  %11549 = vmatprep.subr.bf16.mxu1 %v20008_v9  ;;  %v20029_v8 = vld [vmem:[#allocation2 + $0x1e14] ss:$112 sps:$4 sm:$0xff]   ;;  %v20032_v9 = vld [vmem:[#allocation2 + $0x1e1c] ss:$112 sps:$4 sm:$0xff]  }
 0x56d   :  { %11378 = vmatpush1.bf16.msra.mxu0 %v20003_v10  ;;  %11550 = vmatpush1.bf16.msra.mxu1 %v20006_v26  ;;  %v20027_v10 = vld [vmem:[#allocation2 + $0x1e10] ss:$112 sps:$4 sm:$0xff]   ;;  %v20030_v26 = vld [vmem:[#allocation2 + $0x1e18] ss:$112 sps:$4 sm:$0xff]  }
 0x56e   :  { %11379 = vmatprep.subr.bf16.mxu0 %v20011_v38  ;;  %11551 = vmatprep.subr.bf16.mxu1 %v20014_v45  ;;  %v20035_v38 = vld [vmem:[#allocation2 + $0x1ef4] ss:$112 sps:$4 sm:$0xff]   ;;  %v20033_v45 = vld [vmem:[#allocation2 + $0x1ef0] ss:$112 sps:$4 sm:$0xff]  }
 0x571   :  { %11380 = vmatpush1.bf16.msra.mxu0 %v20009_v42  ;;  %11552 = vmatpush1.bf16.msra.mxu1 %v20012_v57  ;;  %v20036_v42 = vld [vmem:[#allocation2 + $0x1ef8] ss:$112 sps:$4 sm:$0xff]   ;;  %v20041_v57 = vld [vmem:[#allocation2 + $0x1fd4] ss:$112 sps:$4 sm:$0xff]  }
 0x572   :  { %11392 = vmatprep.subr.bf16.mxu0 %v20017_v58  ;;  %11564 = vmatprep.subr.bf16.mxu1 %v20020_v3  ;;  %v20044_v58 = vld [vmem:[#allocation2 + $0x1fdc] ss:$112 sps:$4 sm:$0xff]   ;;  %v20039_v3 = vld [vmem:[#allocation2 + $0x1fd0] ss:$112 sps:$4 sm:$0xff]  }
 0x574   :  { %11382 = vmatmul.mubr.bf16.vlgmr.msra.gmra.mrb[20].mxu0 %v21101_v27  ;;  %11554 = vmatmul.mubr.bf16.vlgmr.msra.gmra.mrb[20].mxu1 %v21101_v27  ;;  %v20038_v27 = vld [vmem:[#allocation2 + $0x1efc] ss:$112 sps:$4 sm:$0xff]  }
 0x575   :  { %11393 = vmatpush1.bf16.msra.mxu0 %v20015_v4  ;;  %11565 = vmatpush1.bf16.msra.mxu1 %v20018_v0  ;;  %v20047_v4 = vld [vmem:[#allocation2 + $0x20b4] ss:$112 sps:$4 sm:$0xff]   ;;  %v20050_v0 = vld [vmem:[#allocation2 + $0x20bc] ss:$112 sps:$4 sm:$0xff]  }
 0x576   :  { %11394 = vmatprep.subr.bf16.mxu0 %v20023_v5  ;;  %11566 = vmatprep.subr.bf16.mxu1 %v20026_v19  ;;  %v20045_v5 = vld [vmem:[#allocation2 + $0x20b0] ss:$112 sps:$4 sm:$0xff]   ;;  %v20048_v19 = vld [vmem:[#allocation2 + $0x20b8] ss:$112 sps:$4 sm:$0xff]  }
 0x577   :  { %11424 = vmatprep.mubr.bf16.mxu0 %v21108_v39  ;;  %11596 = vmatprep.mubr.bf16.mxu1 %v21108_v39  ;;  %v20042_v39 = vld [vmem:[#allocation2 + $0x1fd8] ss:$112 sps:$4 sm:$0xff]  }
 0x579   :  { %11395 = vmatpush1.bf16.msra.mxu0 %v20021_v2  ;;  %11567 = vmatpush1.bf16.msra.mxu1 %v20024_v6  ;;  %v20053_v2 = vld [vmem:[#allocation2 + $0x2194] ss:$112 sps:$4 sm:$0xff]   ;;  %v20056_v6 = vld [vmem:[#allocation2 + $0x219c] ss:$112 sps:$4 sm:$0xff]  }
 0x57a   :  { %11396 = vmatprep.subr.bf16.mxu0 %v20029_v8  ;;  %11568 = vmatprep.subr.bf16.mxu1 %v20032_v9  ;;  %v20051_v8 = vld [vmem:[#allocation2 + $0x2190] ss:$112 sps:$4 sm:$0xff]   ;;  %v20054_v9 = vld [vmem:[#allocation2 + $0x2198] ss:$112 sps:$4 sm:$0xff]  }
 0x57d   :  { %11397 = vmatpush1.bf16.msra.mxu0 %v20027_v10  ;;  %11569 = vmatpush1.bf16.msra.mxu1 %v20030_v26  ;;  %v20059_v10 = vld [vmem:[#allocation2 + $0x2274] ss:$112 sps:$4 sm:$0xff]   ;;  %v20062_v26 = vld [vmem:[#allocation2 + $0x227c] ss:$112 sps:$4 sm:$0xff]  }
 0x57e   :  { %11398 = vmatprep.subr.bf16.mxu0 %v20035_v38  ;;  %11570 = vmatprep.subr.bf16.mxu1 %v20038_v27  ;;  %v20057_v38 = vld [vmem:[#allocation2 + $0x2270] ss:$112 sps:$4 sm:$0xff]   ;;  %v20060_v27 = vld [vmem:[#allocation2 + $0x2278] ss:$112 sps:$4 sm:$0xff]  }
 0x581   :  { %11399 = vmatpush1.bf16.msra.mxu0 %v20033_v45  ;;  %11571 = vmatpush1.bf16.msra.mxu1 %v20036_v42  ;;  %v20065_v45 = vld [vmem:[#allocation2 + $0x2354] ss:$112 sps:$4 sm:$0xff]   ;;  %v20068_v42 = vld [vmem:[#allocation2 + $0x235c] ss:$112 sps:$4 sm:$0xff]  }
 0x582   :  { %11400 = vmatprep.subr.bf16.mxu0 %v20041_v57  ;;  %11572 = vmatprep.subr.bf16.mxu1 %v20044_v58  ;;  %v20063_v57 = vld [vmem:[#allocation2 + $0x2350] ss:$112 sps:$4 sm:$0xff]   ;;  %v20066_v58 = vld [vmem:[#allocation2 + $0x2358] ss:$112 sps:$4 sm:$0xff]  }
 0x585   :  { %11401 = vmatpush1.bf16.msra.mxu0 %v20039_v3  ;;  %11573 = vmatpush1.bf16.msra.mxu1 %v20042_v39  ;;  %v20071_v3 = vld [vmem:[#allocation2 + $0x2434] ss:$112 sps:$4 sm:$0xff]   ;;  %v20074_v39 = vld [vmem:[#allocation2 + $0x243c] ss:$112 sps:$4 sm:$0xff]  }
 0x586   :  { %11402 = vmatprep.subr.bf16.mxu0 %v20047_v4  ;;  %11574 = vmatprep.subr.bf16.mxu1 %v20050_v0  ;;  %v20069_v4 = vld [vmem:[#allocation2 + $0x2430] ss:$112 sps:$4 sm:$0xff]   ;;  %v20072_v0 = vld [vmem:[#allocation2 + $0x2438] ss:$112 sps:$4 sm:$0xff]  }
 0x589   :  { %11403 = vmatpush1.bf16.msra.mxu0 %v20045_v5  ;;  %11575 = vmatpush1.bf16.msra.mxu1 %v20048_v19  ;;  %v20077_v5 = vld [vmem:[#allocation2 + $0x2514] ss:$112 sps:$4 sm:$0xff]   ;;  %v20080_v19 = vld [vmem:[#allocation2 + $0x251c] ss:$112 sps:$4 sm:$0xff]  }
 0x58a   :  { %11404 = vmatprep.subr.bf16.mxu0 %v20053_v2  ;;  %11576 = vmatprep.subr.bf16.mxu1 %v20056_v6  ;;  %v20075_v2 = vld [vmem:[#allocation2 + $0x2510] ss:$112 sps:$4 sm:$0xff]   ;;  %v20078_v6 = vld [vmem:[#allocation2 + $0x2518] ss:$112 sps:$4 sm:$0xff]  }
 0x58d   :  { %11405 = vmatpush1.bf16.msra.mxu0 %v20051_v8  ;;  %11577 = vmatpush1.bf16.msra.mxu1 %v20054_v9  ;;  %v20083_v8 = vld [vmem:[#allocation2 + $0x25f4] ss:$112 sps:$4 sm:$0xff]   ;;  %v20086_v9 = vld [vmem:[#allocation2 + $0x25fc] ss:$112 sps:$4 sm:$0xff]  }
 0x58e   :  { %11406 = vmatprep.subr.bf16.mxu0 %v20059_v10  ;;  %11578 = vmatprep.subr.bf16.mxu1 %v20062_v26  ;;  %v20081_v10 = vld [vmem:[#allocation2 + $0x25f0] ss:$112 sps:$4 sm:$0xff]   ;;  %v20084_v26 = vld [vmem:[#allocation2 + $0x25f8] ss:$112 sps:$4 sm:$0xff]  }
 0x591   :  { %11407 = vmatpush1.bf16.msra.mxu0 %v20057_v38  ;;  %11579 = vmatpush1.bf16.msra.mxu1 %v20060_v27  ;;  %v20089_v38 = vld [vmem:[#allocation2 + $0x26d4] ss:$112 sps:$4 sm:$0xff]   ;;  %v20092_v27 = vld [vmem:[#allocation2 + $0x26dc] ss:$112 sps:$4 sm:$0xff]  }
 0x592   :  { %11408 = vmatprep.subr.bf16.mxu0 %v20065_v45  ;;  %11580 = vmatprep.subr.bf16.mxu1 %v20068_v42  ;;  %v20087_v45 = vld [vmem:[#allocation2 + $0x26d0] ss:$112 sps:$4 sm:$0xff]   ;;  %v20090_v42 = vld [vmem:[#allocation2 + $0x26d8] ss:$112 sps:$4 sm:$0xff]  }
 0x595   :  { %11409 = vmatpush1.bf16.msra.mxu0 %v20063_v57  ;;  %11581 = vmatpush1.bf16.msra.mxu1 %v20066_v58  ;;  %v20095_v57 = vld [vmem:[#allocation2 + $0x27b4] ss:$112 sps:$4 sm:$0xff]   ;;  %v20098_v58 = vld [vmem:[#allocation2 + $0x27bc] ss:$112 sps:$4 sm:$0xff]  }
 0x596   :  { %11410 = vmatprep.subr.bf16.mxu0 %v20071_v3  ;;  %11582 = vmatprep.subr.bf16.mxu1 %v20074_v39  ;;  %v20093_v3 = vld [vmem:[#allocation2 + $0x27b0] ss:$112 sps:$4 sm:$0xff]   ;;  %v20096_v39 = vld [vmem:[#allocation2 + $0x27b8] ss:$112 sps:$4 sm:$0xff]  }
 0x599   :  { %11411 = vmatpush1.bf16.msra.mxu0 %v20069_v4  ;;  %11583 = vmatpush1.bf16.msra.mxu1 %v20072_v0  ;;  %v20101_v4 = vld [vmem:[#allocation2 + $0x2894] ss:$112 sps:$4 sm:$0xff]   ;;  %v20104_v0 = vld [vmem:[#allocation2 + $0x289c] ss:$112 sps:$4 sm:$0xff]  }
 0x59a   :  { %11412 = vmatprep.subr.bf16.mxu0 %v20077_v5  ;;  %11584 = vmatprep.subr.bf16.mxu1 %v20080_v19  ;;  %v20099_v5 = vld [vmem:[#allocation2 + $0x2890] ss:$112 sps:$4 sm:$0xff]   ;;  %v20102_v19 = vld [vmem:[#allocation2 + $0x2898] ss:$112 sps:$4 sm:$0xff]  }
 0x59d   :  { %11413 = vmatpush1.bf16.msra.mxu0 %v20075_v2  ;;  %11585 = vmatpush1.bf16.msra.mxu1 %v20078_v6  ;;  %v20107_v2 = vld [vmem:[#allocation2 + $0x2974] ss:$112 sps:$4 sm:$0xff]   ;;  %v20110_v6 = vld [vmem:[#allocation2 + $0x297c] ss:$112 sps:$4 sm:$0xff]  }
 0x59e   :  { %11414 = vmatprep.subr.bf16.mxu0 %v20083_v8  ;;  %11586 = vmatprep.subr.bf16.mxu1 %v20086_v9  ;;  %v20105_v8 = vld [vmem:[#allocation2 + $0x2970] ss:$112 sps:$4 sm:$0xff]   ;;  %v20108_v9 = vld [vmem:[#allocation2 + $0x2978] ss:$112 sps:$4 sm:$0xff]  }
 0x5a1   :  { %11415 = vmatpush1.bf16.msra.mxu0 %v20081_v10  ;;  %11587 = vmatpush1.bf16.msra.mxu1 %v20084_v26  ;;  %v20113_v10 = vld [vmem:[#allocation2 + $0x2a54] ss:$112 sps:$4 sm:$0xff]   ;;  %v20116_v26 = vld [vmem:[#allocation2 + $0x2a5c] ss:$112 sps:$4 sm:$0xff]  }
 0x5a2   :  { %11416 = vmatprep.subr.bf16.mxu0 %v20089_v38  ;;  %11588 = vmatprep.subr.bf16.mxu1 %v20092_v27  ;;  %v20111_v38 = vld [vmem:[#allocation2 + $0x2a50] ss:$112 sps:$4 sm:$0xff]   ;;  %v20114_v27 = vld [vmem:[#allocation2 + $0x2a58] ss:$112 sps:$4 sm:$0xff]  }
 0x5a5   :  { %11417 = vmatpush1.bf16.msra.mxu0 %v20087_v45  ;;  %11589 = vmatpush1.bf16.msra.mxu1 %v20090_v42  ;;  %v20119_v45 = vld [vmem:[#allocation2 + $0x2b34] ss:$112 sps:$4 sm:$0xff]   ;;  %v20122_v42 = vld [vmem:[#allocation2 + $0x2b3c] ss:$112 sps:$4 sm:$0xff]  }
 0x5a6   :  { %11418 = vmatprep.subr.bf16.mxu0 %v20095_v57  ;;  %11590 = vmatprep.subr.bf16.mxu1 %v20098_v58  ;;  %v21155_v57 = vld [vmem:[%s21403_s0 + $0x10] ss:$28 sps:$4 sm:$0xff]  }
 0x5a7   :  { %v20117_v58 = vld [vmem:[#allocation2 + $0x2b30] ss:$112 sps:$4 sm:$0xff]  }
 0x5a9   :  { %11419 = vmatpush1.bf16.msra.mxu0 %v20093_v3  ;;  %11591 = vmatpush1.bf16.msra.mxu1 %v20096_v39  ;;  %v20120_v3 = vld [vmem:[#allocation2 + $0x2b38] ss:$112 sps:$4 sm:$0xff]   ;;  %v20125_v39 = vld [vmem:[#allocation2 + $0x2c14] ss:$112 sps:$4 sm:$0xff]  }
 0x5aa   :  { %11420 = vmatprep.subr.bf16.mxu0 %v20101_v4  ;;  %11592 = vmatprep.subr.bf16.mxu1 %v20104_v0  ;;  %v20128_v4 = vld [vmem:[#allocation2 + $0x2c1c] ss:$112 sps:$4 sm:$0xff]   ;;  %v20123_v0 = vld [vmem:[#allocation2 + $0x2c10] ss:$112 sps:$4 sm:$0xff]  }
 0x5ad   :  { %11421 = vmatpush1.bf16.msra.mxu0 %v20099_v5  ;;  %11593 = vmatpush1.bf16.msra.mxu1 %v20102_v19  ;;  %v20126_v5 = vld [vmem:[#allocation2 + $0x2c18] ss:$112 sps:$4 sm:$0xff]   ;;  %v20131_v19 = vld [vmem:[#allocation2 + $0x2cf4] ss:$112 sps:$4 sm:$0xff]  }
 0x5ae   :  { %11422 = vmatprep.subr.bf16.mxu0 %v20107_v2  ;;  %11594 = vmatprep.subr.bf16.mxu1 %v20110_v6  ;;  %v20134_v2 = vld [vmem:[#allocation2 + $0x2cfc] ss:$112 sps:$4 sm:$0xff]   ;;  %v20129_v6 = vld [vmem:[#allocation2 + $0x2cf0] ss:$112 sps:$4 sm:$0xff]  }
 0x5b1   :  { %11423 = vmatpush1.bf16.msra.mxu0 %v20105_v8  ;;  %11595 = vmatpush1.bf16.msra.mxu1 %v20108_v9  ;;  %v20132_v8 = vld [vmem:[#allocation2 + $0x2cf8] ss:$112 sps:$4 sm:$0xff]   ;;  %v20137_v9 = vld [vmem:[#allocation2 + $0x2dd4] ss:$112 sps:$4 sm:$0xff]  }
 0x5b2   :  { %11435 = vmatprep.subr.bf16.mxu0 %v20113_v10  ;;  %11607 = vmatprep.subr.bf16.mxu1 %v20116_v26  ;;  %v20140_v10 = vld [vmem:[#allocation2 + $0x2ddc] ss:$112 sps:$4 sm:$0xff]   ;;  %v20135_v26 = vld [vmem:[#allocation2 + $0x2dd0] ss:$112 sps:$4 sm:$0xff]  }
 0x5b4   :  { %11425 = vmatmul.mubr.bf16.vlgmr.msra.gmra.mrb[20].mxu0 %v21155_v57  ;;  %11597 = vmatmul.mubr.bf16.vlgmr.msra.gmra.mrb[20].mxu1 %v21155_v57 }
 0x5b5   :  { %11436 = vmatpush1.bf16.msra.mxu0 %v20111_v38  ;;  %11608 = vmatpush1.bf16.msra.mxu1 %v20114_v27  ;;  %v20138_v38 = vld [vmem:[#allocation2 + $0x2dd8] ss:$112 sps:$4 sm:$0xff]   ;;  %v20143_v27 = vld [vmem:[#allocation2 + $0x2eb4] ss:$112 sps:$4 sm:$0xff]  }
 0x5b6   :  { %11437 = vmatprep.subr.bf16.mxu0 %v20119_v45  ;;  %11609 = vmatprep.subr.bf16.mxu1 %v20122_v42  ;;  %v20146_v45 = vld [vmem:[#allocation2 + $0x2ebc] ss:$112 sps:$4 sm:$0xff]   ;;  %v20141_v42 = vld [vmem:[#allocation2 + $0x2eb0] ss:$112 sps:$4 sm:$0xff]  }
 0x5b7   :  { %11467 = vmatprep.mubr.bf16.mxu0 %v21413_v16  ;;  %11639 = vmatprep.mubr.bf16.mxu1 %v21413_v16 }
 0x5b9   :  { %11438 = vmatpush1.bf16.msra.mxu0 %v20117_v58  ;;  %11610 = vmatpush1.bf16.msra.mxu1 %v20120_v3  ;;  %v20144_v58 = vld [vmem:[#allocation2 + $0x2eb8] ss:$112 sps:$4 sm:$0xff]   ;;  %v20149_v3 = vld [vmem:[#allocation2 + $0x2f94] ss:$112 sps:$4 sm:$0xff]  }
 0x5ba   :  { %11439 = vmatprep.subr.bf16.mxu0 %v20125_v39  ;;  %11611 = vmatprep.subr.bf16.mxu1 %v20128_v4  ;;  %v20152_v39 = vld [vmem:[#allocation2 + $0x2f9c] ss:$112 sps:$4 sm:$0xff]  }
 0x5bd   :  { %11440 = vmatpush1.bf16.msra.mxu0 %v20123_v0  ;;  %11612 = vmatpush1.bf16.msra.mxu1 %v20126_v5 }
 0x5be   :  { %11441 = vmatprep.subr.bf16.mxu0 %v20131_v19  ;;  %11613 = vmatprep.subr.bf16.mxu1 %v20134_v2 }
 0x5c1   :  { %11442 = vmatpush1.bf16.msra.mxu0 %v20129_v6  ;;  %11614 = vmatpush1.bf16.msra.mxu1 %v20132_v8  ;;  %v20147_v8 = vld [vmem:[#allocation2 + $0x2f90] ss:$112 sps:$4 sm:$0xff]  }
 0x5c2   :  { %11443 = vmatprep.subr.bf16.mxu0 %v20137_v9  ;;  %11615 = vmatprep.subr.bf16.mxu1 %v20140_v10  ;;  %v20150_v9 = vld [vmem:[#allocation2 + $0x2f98] ss:$112 sps:$4 sm:$0xff]  }
 0x5c5   :  { %11444 = vmatpush1.bf16.msra.mxu0 %v20135_v26  ;;  %11616 = vmatpush1.bf16.msra.mxu1 %v20138_v38  ;;  %v20155_v38 = vld [vmem:[#allocation2 + $0x3074] ss:$112 sps:$4 sm:$0xff]  }
 0x5c6   :  { %11445 = vmatprep.subr.bf16.mxu0 %v20143_v27  ;;  %11617 = vmatprep.subr.bf16.mxu1 %v20146_v45  ;;  %v20158_v27 = vld [vmem:[#allocation2 + $0x307c] ss:$112 sps:$4 sm:$0xff]   ;;  %v20153_v45 = vld [vmem:[#allocation2 + $0x3070] ss:$112 sps:$4 sm:$0xff]  }
 0x5c7   :  { %v21161_v4 = vpop.f32.mrb[16].mxu0  ;;  %v21163_v0 = vpop.f32.mrb[16].mxu1 }
 0x5c8   :  { %v21165_v5 = vpop.f32.mrb[17].mxu0  ;;  %v21167_v19 = vpop.f32.mrb[17].mxu1 }
 0x5c9   :  { %v21169_v2 = vpop.f32.mrb[18].mxu0  ;;  %v21171_v6 = vpop.f32.mrb[18].mxu1  ;;  %11446 = vmatpush1.bf16.msra.mxu0 %v20141_v42  ;;  %11618 = vmatpush1.bf16.msra.mxu1 %v20144_v58  ;;  %v20159_v42 = vld [vmem:[#allocation2 + $0x60] ss:$112 sps:$4 sm:$0xff]   ;;  %v20162_v58 = vld [vmem:[#allocation2 + $0x68] ss:$112 sps:$4 sm:$0xff]  }
 0x5ca   :  { %v21173_v10 = vpop.f32.mrb[19].mxu0  ;;  %v21175_v26 = vpop.f32.mrb[19].mxu1  ;;  %11447 = vmatprep.subr.bf16.mxu0 %v20149_v3  ;;  %11619 = vmatprep.subr.bf16.mxu1 %v20152_v39  ;;  %v21180_v3 = vld [vmem:[%s21403_s0 + $0x18] ss:$28 sps:$4 sm:$0xff]   ;;  %v20165_v39 = vld [vmem:[#allocation2 + $0x140] ss:$112 sps:$4 sm:$0xff]  }
 0x5cd   :  { %11448 = vmatpush1.bf16.msra.mxu0 %v20147_v8  ;;  %11620 = vmatpush1.bf16.msra.mxu1 %v20150_v9  ;;  %v20168_v8 = vld [vmem:[#allocation2 + $0x148] ss:$112 sps:$4 sm:$0xff]   ;;  %v20171_v9 = vld [vmem:[#allocation2 + $0x220] ss:$112 sps:$4 sm:$0xff]  }
 0x5ce   :  { %11449 = vmatprep.subr.bf16.mxu0 %v20155_v38  ;;  %11621 = vmatprep.subr.bf16.mxu1 %v20158_v27  ;;  %v20174_v38 = vld [vmem:[#allocation2 + $0x228] ss:$112 sps:$4 sm:$0xff]   ;;  %v20179_v27 = vld [vmem:[#allocation2 + $0x304] ss:$112 sps:$4 sm:$0xff]  }
 0x5d1   :  { %11450 = vmatpush1.bf16.msra.mxu0 %v20153_v45  ;;  %11622 = vmatpush1.bf16.msra.mxu1 %v20156_v63  ;;  %v20173_v63 = vld [vmem:[#allocation2 + $0x224] ss:$112 sps:$4 sm:$0xff]   ;;  %v20182_v45 = vld [vmem:[#allocation2 + $0x30c] ss:$112 sps:$4 sm:$0xff]  }
 0x5d2   :  { %11650 = vmatprep.subr.bf16.mxu0 %v20161_v7  ;;  %11822 = vmatprep.subr.bf16.mxu1 %v20164_v60  ;;  %v20176_v7 = vld [vmem:[#allocation2 + $0x22c] ss:$112 sps:$4 sm:$0xff]   ;;  %v20547_v60 = vld [vmem:[%s21403_s0 + $0x4] ss:$28 sps:$4 sm:$0xff]  }
 0x5d4   :  { %11468 = vmatmul.mubr.bf16.vlgmr.msra.gmra.mrb[20].mxu0 %v21180_v3  ;;  %11640 = vmatmul.mubr.bf16.vlgmr.msra.gmra.mrb[20].mxu1 %v21180_v3 }
 0x5d5   :  { %11651 = vmatpush1.bf16.msra.mxu0 %v20159_v42  ;;  %11823 = vmatpush1.bf16.msra.mxu1 %v20162_v58  ;;  %v20185_v42 = vld [vmem:[#allocation2 + $0x3e4] ss:$112 sps:$4 sm:$0xff]   ;;  %v20188_v58 = vld [vmem:[#allocation2 + $0x3ec] ss:$112 sps:$4 sm:$0xff]  }
 0x5d6   :  { %11652 = vmatprep.subr.bf16.mxu0 %v20167_v28  ;;  %11824 = vmatprep.subr.bf16.mxu1 %v20170_v54  ;;  %v20177_v28 = vld [vmem:[#allocation2 + $0x300] ss:$112 sps:$4 sm:$0xff]   ;;  %v20180_v54 = vld [vmem:[#allocation2 + $0x308] ss:$112 sps:$4 sm:$0xff]  }
 0x5d7   :  { %11682 = vmatprep.mubr.bf16.mxu0 %v20547_v60  ;;  %11854 = vmatprep.mubr.bf16.mxu1 %v20547_v60  ;;  %v20186_v60 = vld [vmem:[#allocation2 + $0x3e8] ss:$112 sps:$4 sm:$0xff]  }
 0x5d9   :  { %11653 = vmatpush1.bf16.msra.mxu0 %v20165_v39  ;;  %11825 = vmatpush1.bf16.msra.mxu1 %v20168_v8  ;;  %v20191_v39 = vld [vmem:[#allocation2 + $0x4c4] ss:$112 sps:$4 sm:$0xff]   ;;  %v20194_v8 = vld [vmem:[#allocation2 + $0x4cc] ss:$112 sps:$4 sm:$0xff]  }
 0x5da   :  { %11654 = vmatprep.subr.bf16.mxu0 %v20173_v63  ;;  %11826 = vmatprep.subr.bf16.mxu1 %v20176_v7  ;;  %v20189_v63 = vld [vmem:[#allocation2 + $0x4c0] ss:$112 sps:$4 sm:$0xff]   ;;  %v20192_v7 = vld [vmem:[#allocation2 + $0x4c8] ss:$112 sps:$4 sm:$0xff]  }
 0x5dd   :  { %11655 = vmatpush1.bf16.msra.mxu0 %v20171_v9  ;;  %11827 = vmatpush1.bf16.msra.mxu1 %v20174_v38  ;;  %v20197_v9 = vld [vmem:[#allocation2 + $0x5a4] ss:$112 sps:$4 sm:$0xff]   ;;  %v20200_v38 = vld [vmem:[#allocation2 + $0x5ac] ss:$112 sps:$4 sm:$0xff]  }
 0x5de   :  { %11656 = vmatprep.subr.bf16.mxu0 %v20179_v27  ;;  %11828 = vmatprep.subr.bf16.mxu1 %v20182_v45  ;;  %v20195_v27 = vld [vmem:[#allocation2 + $0x5a0] ss:$112 sps:$4 sm:$0xff]   ;;  %v20198_v45 = vld [vmem:[#allocation2 + $0x5a8] ss:$112 sps:$4 sm:$0xff]  }
 0x5e1   :  { %11657 = vmatpush1.bf16.msra.mxu0 %v20177_v28  ;;  %11829 = vmatpush1.bf16.msra.mxu1 %v20180_v54  ;;  %v20203_v28 = vld [vmem:[#allocation2 + $0x684] ss:$112 sps:$4 sm:$0xff]   ;;  %v20206_v54 = vld [vmem:[#allocation2 + $0x68c] ss:$112 sps:$4 sm:$0xff]  }
 0x5e2   :  { %11658 = vmatprep.subr.bf16.mxu0 %v20185_v42  ;;  %11830 = vmatprep.subr.bf16.mxu1 %v20188_v58  ;;  %v20201_v42 = vld [vmem:[#allocation2 + $0x680] ss:$112 sps:$4 sm:$0xff]   ;;  %v20204_v58 = vld [vmem:[#allocation2 + $0x688] ss:$112 sps:$4 sm:$0xff]  }
 0x5e5   :  { %11659 = vmatpush1.bf16.msra.mxu0 %v20183_v23  ;;  %11831 = vmatpush1.bf16.msra.mxu1 %v20186_v60  ;;  %v20209_v23 = vld [vmem:[#allocation2 + $0x764] ss:$112 sps:$4 sm:$0xff]   ;;  %v20212_v60 = vld [vmem:[#allocation2 + $0x76c] ss:$112 sps:$4 sm:$0xff]  }
 0x5e6   :  { %11660 = vmatprep.subr.bf16.mxu0 %v20191_v39  ;;  %11832 = vmatprep.subr.bf16.mxu1 %v20194_v8  ;;  %v20207_v39 = vld [vmem:[#allocation2 + $0x760] ss:$112 sps:$4 sm:$0xff]   ;;  %v20210_v8 = vld [vmem:[#allocation2 + $0x768] ss:$112 sps:$4 sm:$0xff]  }
 0x5e9   :  { %11661 = vmatpush1.bf16.msra.mxu0 %v20189_v63  ;;  %11833 = vmatpush1.bf16.msra.mxu1 %v20192_v7  ;;  %v20215_v63 = vld [vmem:[#allocation2 + $0x844] ss:$112 sps:$4 sm:$0xff]   ;;  %v20218_v7 = vld [vmem:[#allocation2 + $0x84c] ss:$112 sps:$4 sm:$0xff]  }
 0x5ea   :  { %11662 = vmatprep.subr.bf16.mxu0 %v20197_v9  ;;  %11834 = vmatprep.subr.bf16.mxu1 %v20200_v38  ;;  %v20213_v9 = vld [vmem:[#allocation2 + $0x840] ss:$112 sps:$4 sm:$0xff]   ;;  %v20216_v38 = vld [vmem:[#allocation2 + $0x848] ss:$112 sps:$4 sm:$0xff]  }
 0x5ed   :  { %11663 = vmatpush1.bf16.msra.mxu0 %v20195_v27  ;;  %11835 = vmatpush1.bf16.msra.mxu1 %v20198_v45  ;;  %v20221_v27 = vld [vmem:[#allocation2 + $0x924] ss:$112 sps:$4 sm:$0xff]   ;;  %v20224_v45 = vld [vmem:[#allocation2 + $0x92c] ss:$112 sps:$4 sm:$0xff]  }
 0x5ee   :  { %11664 = vmatprep.subr.bf16.mxu0 %v20203_v28  ;;  %11836 = vmatprep.subr.bf16.mxu1 %v20206_v54  ;;  %v20219_v28 = vld [vmem:[#allocation2 + $0x920] ss:$112 sps:$4 sm:$0xff]   ;;  %v20222_v54 = vld [vmem:[#allocation2 + $0x928] ss:$112 sps:$4 sm:$0xff]  }
 0x5f1   :  { %11665 = vmatpush1.bf16.msra.mxu0 %v20201_v42  ;;  %11837 = vmatpush1.bf16.msra.mxu1 %v20204_v58  ;;  %v20227_v42 = vld [vmem:[#allocation2 + $0xa04] ss:$112 sps:$4 sm:$0xff]   ;;  %v20230_v58 = vld [vmem:[#allocation2 + $0xa0c] ss:$112 sps:$4 sm:$0xff]  }
 0x5f2   :  { %11666 = vmatprep.subr.bf16.mxu0 %v20209_v23  ;;  %11838 = vmatprep.subr.bf16.mxu1 %v20212_v60  ;;  %v20225_v23 = vld [vmem:[#allocation2 + $0xa00] ss:$112 sps:$4 sm:$0xff]   ;;  %v20228_v60 = vld [vmem:[#allocation2 + $0xa08] ss:$112 sps:$4 sm:$0xff]  }
 0x5f5   :  { %11667 = vmatpush1.bf16.msra.mxu0 %v20207_v39  ;;  %11839 = vmatpush1.bf16.msra.mxu1 %v20210_v8  ;;  %v20233_v39 = vld [vmem:[#allocation2 + $0xae4] ss:$112 sps:$4 sm:$0xff]   ;;  %v20236_v8 = vld [vmem:[#allocation2 + $0xaec] ss:$112 sps:$4 sm:$0xff]  }
 0x5f6   :  { %11668 = vmatprep.subr.bf16.mxu0 %v20215_v63  ;;  %11840 = vmatprep.subr.bf16.mxu1 %v20218_v7  ;;  %v20231_v63 = vld [vmem:[#allocation2 + $0xae0] ss:$112 sps:$4 sm:$0xff]   ;;  %v20234_v7 = vld [vmem:[#allocation2 + $0xae8] ss:$112 sps:$4 sm:$0xff]  }
 0x5f9   :  { %11669 = vmatpush1.bf16.msra.mxu0 %v20213_v9  ;;  %11841 = vmatpush1.bf16.msra.mxu1 %v20216_v38  ;;  %v20239_v9 = vld [vmem:[#allocation2 + $0xbc4] ss:$112 sps:$4 sm:$0xff]   ;;  %v20242_v38 = vld [vmem:[#allocation2 + $0xbcc] ss:$112 sps:$4 sm:$0xff]  }
 0x5fa   :  { %11670 = vmatprep.subr.bf16.mxu0 %v20221_v27  ;;  %11842 = vmatprep.subr.bf16.mxu1 %v20224_v45  ;;  %v20237_v27 = vld [vmem:[#allocation2 + $0xbc0] ss:$112 sps:$4 sm:$0xff]   ;;  %v20240_v45 = vld [vmem:[#allocation2 + $0xbc8] ss:$112 sps:$4 sm:$0xff]  }
 0x5fd   :  { %11671 = vmatpush1.bf16.msra.mxu0 %v20219_v28  ;;  %11843 = vmatpush1.bf16.msra.mxu1 %v20222_v54  ;;  %v20245_v28 = vld [vmem:[#allocation2 + $0xca4] ss:$112 sps:$4 sm:$0xff]   ;;  %v20248_v54 = vld [vmem:[#allocation2 + $0xcac] ss:$112 sps:$4 sm:$0xff]  }
 0x5fe   :  { %11672 = vmatprep.subr.bf16.mxu0 %v20227_v42  ;;  %11844 = vmatprep.subr.bf16.mxu1 %v20230_v58  ;;  %v20243_v42 = vld [vmem:[#allocation2 + $0xca0] ss:$112 sps:$4 sm:$0xff]   ;;  %v20246_v58 = vld [vmem:[#allocation2 + $0xca8] ss:$112 sps:$4 sm:$0xff]  }
 0x601   :  { %11673 = vmatpush1.bf16.msra.mxu0 %v20225_v23  ;;  %11845 = vmatpush1.bf16.msra.mxu1 %v20228_v60  ;;  %v20251_v23 = vld [vmem:[#allocation2 + $0xd84] ss:$112 sps:$4 sm:$0xff]   ;;  %v20254_v60 = vld [vmem:[#allocation2 + $0xd8c] ss:$112 sps:$4 sm:$0xff]  }
 0x602   :  { %11674 = vmatprep.subr.bf16.mxu0 %v20233_v39  ;;  %11846 = vmatprep.subr.bf16.mxu1 %v20236_v8  ;;  %v20249_v39 = vld [vmem:[#allocation2 + $0xd80] ss:$112 sps:$4 sm:$0xff]   ;;  %v20252_v8 = vld [vmem:[#allocation2 + $0xd88] ss:$112 sps:$4 sm:$0xff]  }
 0x605   :  { %11675 = vmatpush1.bf16.msra.mxu0 %v20231_v63  ;;  %11847 = vmatpush1.bf16.msra.mxu1 %v20234_v7  ;;  %v20257_v63 = vld [vmem:[#allocation2 + $0xe64] ss:$112 sps:$4 sm:$0xff]   ;;  %v20260_v7 = vld [vmem:[#allocation2 + $0xe6c] ss:$112 sps:$4 sm:$0xff]  }
 0x606   :  { %11676 = vmatprep.subr.bf16.mxu0 %v20239_v9  ;;  %11848 = vmatprep.subr.bf16.mxu1 %v20242_v38  ;;  %v20255_v9 = vld [vmem:[#allocation2 + $0xe60] ss:$112 sps:$4 sm:$0xff]   ;;  %v20258_v38 = vld [vmem:[#allocation2 + $0xe68] ss:$112 sps:$4 sm:$0xff]  }
 0x609   :  { %11677 = vmatpush1.bf16.msra.mxu0 %v20237_v27  ;;  %11849 = vmatpush1.bf16.msra.mxu1 %v20240_v45  ;;  %v20263_v27 = vld [vmem:[#allocation2 + $0xf44] ss:$112 sps:$4 sm:$0xff]   ;;  %v20266_v45 = vld [vmem:[#allocation2 + $0xf4c] ss:$112 sps:$4 sm:$0xff]  }
 0x60a   :  { %11678 = vmatprep.subr.bf16.mxu0 %v20245_v28  ;;  %11850 = vmatprep.subr.bf16.mxu1 %v20248_v54  ;;  %v20548_v28 = vld [vmem:[%s21403_s0] ss:$28 sps:$4 sm:$0xff]  }
 0x60b   :  { %v20261_v54 = vld [vmem:[#allocation2 + $0xf40] ss:$112 sps:$4 sm:$0xff]  }
 0x60d   :  { %11679 = vmatpush1.bf16.msra.mxu0 %v20243_v42  ;;  %11851 = vmatpush1.bf16.msra.mxu1 %v20246_v58  ;;  %v20264_v42 = vld [vmem:[#allocation2 + $0xf48] ss:$112 sps:$4 sm:$0xff]   ;;  %v20269_v58 = vld [vmem:[#allocation2 + $0x1024] ss:$112 sps:$4 sm:$0xff]  }
 0x60e   :  { %11680 = vmatprep.subr.bf16.mxu0 %v20251_v23  ;;  %11852 = vmatprep.subr.bf16.mxu1 %v20254_v60  ;;  %v20272_v23 = vld [vmem:[#allocation2 + $0x102c] ss:$112 sps:$4 sm:$0xff]  }
 0x60f   :  { %v20549_v60 = vld [vmem:[%s21403_s0 + $0xc] ss:$28 sps:$4 sm:$0xff]  }
 0x611   :  { %11681 = vmatpush1.bf16.msra.mxu0 %v20249_v39  ;;  %11853 = vmatpush1.bf16.msra.mxu1 %v20252_v8  ;;  %v20267_v39 = vld [vmem:[#allocation2 + $0x1020] ss:$112 sps:$4 sm:$0xff]   ;;  %v20270_v8 = vld [vmem:[#allocation2 + $0x1028] ss:$112 sps:$4 sm:$0xff]  }
 0x612   :  { %11693 = vmatprep.subr.bf16.mxu0 %v20257_v63  ;;  %11865 = vmatprep.subr.bf16.mxu1 %v20260_v7  ;;  %v20275_v63 = vld [vmem:[#allocation2 + $0x1104] ss:$112 sps:$4 sm:$0xff]   ;;  %v20278_v7 = vld [vmem:[#allocation2 + $0x110c] ss:$112 sps:$4 sm:$0xff]  }
 0x614   :  { %11683 = vmatmul.mubr.bf16.vlgmr.msra.gmra.mrb[24].mxu0 %v20548_v28  ;;  %11855 = vmatmul.mubr.bf16.vlgmr.msra.gmra.mrb[24].mxu1 %v20548_v28  ;;  %v20279_v28 = vld [vmem:[#allocation2 + $0x11e0] ss:$112 sps:$4 sm:$0xff]  }
 0x615   :  { %11694 = vmatpush1.bf16.msra.mxu0 %v20255_v9  ;;  %11866 = vmatpush1.bf16.msra.mxu1 %v20258_v38  ;;  %v20273_v9 = vld [vmem:[#allocation2 + $0x1100] ss:$112 sps:$4 sm:$0xff]   ;;  %v20276_v38 = vld [vmem:[#allocation2 + $0x1108] ss:$112 sps:$4 sm:$0xff]  }
 0x616   :  { %11695 = vmatprep.subr.bf16.mxu0 %v20263_v27  ;;  %11867 = vmatprep.subr.bf16.mxu1 %v20266_v45  ;;  %v20281_v27 = vld [vmem:[#allocation2 + $0x11e4] ss:$112 sps:$4 sm:$0xff]   ;;  %v20284_v45 = vld [vmem:[#allocation2 + $0x11ec] ss:$112 sps:$4 sm:$0xff]  }
 0x617   :  { %11725 = vmatprep.mubr.bf16.mxu0 %v20549_v60  ;;  %11897 = vmatprep.mubr.bf16.mxu1 %v20549_v60  ;;  %v20282_v60 = vld [vmem:[#allocation2 + $0x11e8] ss:$112 sps:$4 sm:$0xff]  }
 0x619   :  { %11696 = vmatpush1.bf16.msra.mxu0 %v20261_v54  ;;  %11868 = vmatpush1.bf16.msra.mxu1 %v20264_v42  ;;  %v20287_v54 = vld [vmem:[#allocation2 + $0x12c4] ss:$112 sps:$4 sm:$0xff]   ;;  %v20290_v42 = vld [vmem:[#allocation2 + $0x12cc] ss:$112 sps:$4 sm:$0xff]  }
 0x61a   :  { %11697 = vmatprep.subr.bf16.mxu0 %v20269_v58  ;;  %11869 = vmatprep.subr.bf16.mxu1 %v20272_v23  ;;  %v20285_v58 = vld [vmem:[#allocation2 + $0x12c0] ss:$112 sps:$4 sm:$0xff]   ;;  %v20288_v23 = vld [vmem:[#allocation2 + $0x12c8] ss:$112 sps:$4 sm:$0xff]  }
 0x61d   :  { %11698 = vmatpush1.bf16.msra.mxu0 %v20267_v39  ;;  %11870 = vmatpush1.bf16.msra.mxu1 %v20270_v8  ;;  %v20293_v39 = vld [vmem:[#allocation2 + $0x13a4] ss:$112 sps:$4 sm:$0xff]   ;;  %v20296_v8 = vld [vmem:[#allocation2 + $0x13ac] ss:$112 sps:$4 sm:$0xff]  }
 0x61e   :  { %11699 = vmatprep.subr.bf16.mxu0 %v20275_v63  ;;  %11871 = vmatprep.subr.bf16.mxu1 %v20278_v7  ;;  %v20291_v63 = vld [vmem:[#allocation2 + $0x13a0] ss:$112 sps:$4 sm:$0xff]   ;;  %v20294_v7 = vld [vmem:[#allocation2 + $0x13a8] ss:$112 sps:$4 sm:$0xff]  }
 0x621   :  { %11700 = vmatpush1.bf16.msra.mxu0 %v20273_v9  ;;  %11872 = vmatpush1.bf16.msra.mxu1 %v20276_v38  ;;  %v20299_v9 = vld [vmem:[#allocation2 + $0x1484] ss:$112 sps:$4 sm:$0xff]   ;;  %v20302_v38 = vld [vmem:[#allocation2 + $0x148c] ss:$112 sps:$4 sm:$0xff]  }
 0x622   :  { %11701 = vmatprep.subr.bf16.mxu0 %v20281_v27  ;;  %11873 = vmatprep.subr.bf16.mxu1 %v20284_v45  ;;  %v20297_v27 = vld [vmem:[#allocation2 + $0x1480] ss:$112 sps:$4 sm:$0xff]   ;;  %v20300_v45 = vld [vmem:[#allocation2 + $0x1488] ss:$112 sps:$4 sm:$0xff]  }
 0x625   :  { %11702 = vmatpush1.bf16.msra.mxu0 %v20279_v28  ;;  %11874 = vmatpush1.bf16.msra.mxu1 %v20282_v60  ;;  %v20305_v28 = vld [vmem:[#allocation2 + $0x1564] ss:$112 sps:$4 sm:$0xff]   ;;  %v20308_v60 = vld [vmem:[#allocation2 + $0x156c] ss:$112 sps:$4 sm:$0xff]  }
 0x626   :  { %11703 = vmatprep.subr.bf16.mxu0 %v20287_v54  ;;  %11875 = vmatprep.subr.bf16.mxu1 %v20290_v42  ;;  %v20303_v54 = vld [vmem:[#allocation2 + $0x1560] ss:$112 sps:$4 sm:$0xff]   ;;  %v20306_v42 = vld [vmem:[#allocation2 + $0x1568] ss:$112 sps:$4 sm:$0xff]  }
 0x629   :  { %11704 = vmatpush1.bf16.msra.mxu0 %v20285_v58  ;;  %11876 = vmatpush1.bf16.msra.mxu1 %v20288_v23  ;;  %v20311_v58 = vld [vmem:[#allocation2 + $0x1644] ss:$112 sps:$4 sm:$0xff]   ;;  %v20314_v23 = vld [vmem:[#allocation2 + $0x164c] ss:$112 sps:$4 sm:$0xff]  }
 0x62a   :  { %11705 = vmatprep.subr.bf16.mxu0 %v20293_v39  ;;  %11877 = vmatprep.subr.bf16.mxu1 %v20296_v8  ;;  %v20309_v39 = vld [vmem:[#allocation2 + $0x1640] ss:$112 sps:$4 sm:$0xff]   ;;  %v20312_v8 = vld [vmem:[#allocation2 + $0x1648] ss:$112 sps:$4 sm:$0xff]  }
 0x62d   :  { %11706 = vmatpush1.bf16.msra.mxu0 %v20291_v63  ;;  %11878 = vmatpush1.bf16.msra.mxu1 %v20294_v7  ;;  %v20317_v63 = vld [vmem:[#allocation2 + $0x1724] ss:$112 sps:$4 sm:$0xff]   ;;  %v20320_v7 = vld [vmem:[#allocation2 + $0x172c] ss:$112 sps:$4 sm:$0xff]  }
 0x62e   :  { %11707 = vmatprep.subr.bf16.mxu0 %v20299_v9  ;;  %11879 = vmatprep.subr.bf16.mxu1 %v20302_v38  ;;  %v20315_v9 = vld [vmem:[#allocation2 + $0x1720] ss:$112 sps:$4 sm:$0xff]   ;;  %v20318_v38 = vld [vmem:[#allocation2 + $0x1728] ss:$112 sps:$4 sm:$0xff]  }
 0x631   :  { %11708 = vmatpush1.bf16.msra.mxu0 %v20297_v27  ;;  %11880 = vmatpush1.bf16.msra.mxu1 %v20300_v45  ;;  %v20323_v27 = vld [vmem:[#allocation2 + $0x1804] ss:$112 sps:$4 sm:$0xff]   ;;  %v20326_v45 = vld [vmem:[#allocation2 + $0x180c] ss:$112 sps:$4 sm:$0xff]  }
 0x632   :  { %11709 = vmatprep.subr.bf16.mxu0 %v20305_v28  ;;  %11881 = vmatprep.subr.bf16.mxu1 %v20308_v60  ;;  %v20321_v28 = vld [vmem:[#allocation2 + $0x1800] ss:$112 sps:$4 sm:$0xff]   ;;  %v20324_v60 = vld [vmem:[#allocation2 + $0x1808] ss:$112 sps:$4 sm:$0xff]  }
 0x635   :  { %11710 = vmatpush1.bf16.msra.mxu0 %v20303_v54  ;;  %11882 = vmatpush1.bf16.msra.mxu1 %v20306_v42  ;;  %v20329_v54 = vld [vmem:[#allocation2 + $0x18e4] ss:$112 sps:$4 sm:$0xff]   ;;  %v20332_v42 = vld [vmem:[#allocation2 + $0x18ec] ss:$112 sps:$4 sm:$0xff]  }
 0x636   :  { %11711 = vmatprep.subr.bf16.mxu0 %v20311_v58  ;;  %11883 = vmatprep.subr.bf16.mxu1 %v20314_v23  ;;  %v20327_v58 = vld [vmem:[#allocation2 + $0x18e0] ss:$112 sps:$4 sm:$0xff]   ;;  %v20330_v23 = vld [vmem:[#allocation2 + $0x18e8] ss:$112 sps:$4 sm:$0xff]  }
 0x639   :  { %11712 = vmatpush1.bf16.msra.mxu0 %v20309_v39  ;;  %11884 = vmatpush1.bf16.msra.mxu1 %v20312_v8  ;;  %v20335_v39 = vld [vmem:[#allocation2 + $0x19c4] ss:$112 sps:$4 sm:$0xff]   ;;  %v20338_v8 = vld [vmem:[#allocation2 + $0x19cc] ss:$112 sps:$4 sm:$0xff]  }
 0x63a   :  { %11713 = vmatprep.subr.bf16.mxu0 %v20317_v63  ;;  %11885 = vmatprep.subr.bf16.mxu1 %v20320_v7  ;;  %v20333_v63 = vld [vmem:[#allocation2 + $0x19c0] ss:$112 sps:$4 sm:$0xff]   ;;  %v20336_v7 = vld [vmem:[#allocation2 + $0x19c8] ss:$112 sps:$4 sm:$0xff]  }
 0x63d   :  { %11714 = vmatpush1.bf16.msra.mxu0 %v20315_v9  ;;  %11886 = vmatpush1.bf16.msra.mxu1 %v20318_v38  ;;  %v20341_v9 = vld [vmem:[#allocation2 + $0x1aa4] ss:$112 sps:$4 sm:$0xff]   ;;  %v20344_v38 = vld [vmem:[#allocation2 + $0x1aac] ss:$112 sps:$4 sm:$0xff]  }
 0x63e   :  { %11715 = vmatprep.subr.bf16.mxu0 %v20323_v27  ;;  %11887 = vmatprep.subr.bf16.mxu1 %v20326_v45  ;;  %v20339_v27 = vld [vmem:[#allocation2 + $0x1aa0] ss:$112 sps:$4 sm:$0xff]   ;;  %v20342_v45 = vld [vmem:[#allocation2 + $0x1aa8] ss:$112 sps:$4 sm:$0xff]  }
 0x641   :  { %11716 = vmatpush1.bf16.msra.mxu0 %v20321_v28  ;;  %11888 = vmatpush1.bf16.msra.mxu1 %v20324_v60  ;;  %v20347_v28 = vld [vmem:[#allocation2 + $0x1b84] ss:$112 sps:$4 sm:$0xff]   ;;  %v20350_v60 = vld [vmem:[#allocation2 + $0x1b8c] ss:$112 sps:$4 sm:$0xff]  }
 0x642   :  { %11717 = vmatprep.subr.bf16.mxu0 %v20329_v54  ;;  %11889 = vmatprep.subr.bf16.mxu1 %v20332_v42  ;;  %v20345_v54 = vld [vmem:[#allocation2 + $0x1b80] ss:$112 sps:$4 sm:$0xff]   ;;  %v20348_v42 = vld [vmem:[#allocation2 + $0x1b88] ss:$112 sps:$4 sm:$0xff]  }
 0x645   :  { %11718 = vmatpush1.bf16.msra.mxu0 %v20327_v58  ;;  %11890 = vmatpush1.bf16.msra.mxu1 %v20330_v23  ;;  %v20353_v58 = vld [vmem:[#allocation2 + $0x1c64] ss:$112 sps:$4 sm:$0xff]   ;;  %v20356_v23 = vld [vmem:[#allocation2 + $0x1c6c] ss:$112 sps:$4 sm:$0xff]  }
 0x646   :  { %11719 = vmatprep.subr.bf16.mxu0 %v20335_v39  ;;  %11891 = vmatprep.subr.bf16.mxu1 %v20338_v8  ;;  %v20351_v39 = vld [vmem:[#allocation2 + $0x1c60] ss:$112 sps:$4 sm:$0xff]   ;;  %v20354_v8 = vld [vmem:[#allocation2 + $0x1c68] ss:$112 sps:$4 sm:$0xff]  }
 0x649   :  { %11720 = vmatpush1.bf16.msra.mxu0 %v20333_v63  ;;  %11892 = vmatpush1.bf16.msra.mxu1 %v20336_v7  ;;  %v20359_v63 = vld [vmem:[#allocation2 + $0x1d44] ss:$112 sps:$4 sm:$0xff]   ;;  %v20362_v7 = vld [vmem:[#allocation2 + $0x1d4c] ss:$112 sps:$4 sm:$0xff]  }
 0x64a   :  { %11721 = vmatprep.subr.bf16.mxu0 %v20341_v9  ;;  %11893 = vmatprep.subr.bf16.mxu1 %v20344_v38  ;;  %v20550_v9 = vld [vmem:[%s21403_s0 + $0x8] ss:$28 sps:$4 sm:$0xff]   ;;  %v20357_v38 = vld [vmem:[#allocation2 + $0x1d40] ss:$112 sps:$4 sm:$0xff]  }
 0x64d   :  { %11722 = vmatpush1.bf16.msra.mxu0 %v20339_v27  ;;  %11894 = vmatpush1.bf16.msra.mxu1 %v20342_v45  ;;  %v20360_v27 = vld [vmem:[#allocation2 + $0x1d48] ss:$112 sps:$4 sm:$0xff]   ;;  %v20365_v45 = vld [vmem:[#allocation2 + $0x1e24] ss:$112 sps:$4 sm:$0xff]  }
 0x64e   :  { %11723 = vmatprep.subr.bf16.mxu0 %v20347_v28  ;;  %11895 = vmatprep.subr.bf16.mxu1 %v20350_v60  ;;  %v20368_v28 = vld [vmem:[#allocation2 + $0x1e2c] ss:$112 sps:$4 sm:$0xff]   ;;  %v20551_v60 = vld [vmem:[%s21403_s0 + $0x14] ss:$28 sps:$4 sm:$0xff]  }
 0x651   :  { %11724 = vmatpush1.bf16.msra.mxu0 %v20345_v54  ;;  %11896 = vmatpush1.bf16.msra.mxu1 %v20348_v42  ;;  %v20363_v54 = vld [vmem:[#allocation2 + $0x1e20] ss:$112 sps:$4 sm:$0xff]   ;;  %v20366_v42 = vld [vmem:[#allocation2 + $0x1e28] ss:$112 sps:$4 sm:$0xff]  }
 0x652   :  { %11736 = vmatprep.subr.bf16.mxu0 %v20353_v58  ;;  %11908 = vmatprep.subr.bf16.mxu1 %v20356_v23  ;;  %v20371_v58 = vld [vmem:[#allocation2 + $0x1f04] ss:$112 sps:$4 sm:$0xff]   ;;  %v20374_v23 = vld [vmem:[#allocation2 + $0x1f0c] ss:$112 sps:$4 sm:$0xff]  }
 0x654   :  { %11726 = vmatmul.mubr.bf16.vlgmr.msra.gmra.mrb[24].mxu0 %v20550_v9  ;;  %11898 = vmatmul.mubr.bf16.vlgmr.msra.gmra.mrb[24].mxu1 %v20550_v9  ;;  %v20375_v9 = vld [vmem:[#allocation2 + $0x1fe0] ss:$112 sps:$4 sm:$0xff]  }
 0x655   :  { %11737 = vmatpush1.bf16.msra.mxu0 %v20351_v39  ;;  %11909 = vmatpush1.bf16.msra.mxu1 %v20354_v8  ;;  %v20369_v39 = vld [vmem:[#allocation2 + $0x1f00] ss:$112 sps:$4 sm:$0xff]   ;;  %v20372_v8 = vld [vmem:[#allocation2 + $0x1f08] ss:$112 sps:$4 sm:$0xff]  }
 0x656   :  { %11738 = vmatprep.subr.bf16.mxu0 %v20359_v63  ;;  %11910 = vmatprep.subr.bf16.mxu1 %v20362_v7  ;;  %v20377_v63 = vld [vmem:[#allocation2 + $0x1fe4] ss:$112 sps:$4 sm:$0xff]   ;;  %v20380_v7 = vld [vmem:[#allocation2 + $0x1fec] ss:$112 sps:$4 sm:$0xff]  }
 0x657   :  { %11768 = vmatprep.mubr.bf16.mxu0 %v20551_v60  ;;  %11940 = vmatprep.mubr.bf16.mxu1 %v20551_v60  ;;  %v20378_v60 = vld [vmem:[#allocation2 + $0x1fe8] ss:$112 sps:$4 sm:$0xff]  }
 0x659   :  { %11739 = vmatpush1.bf16.msra.mxu0 %v20357_v38  ;;  %11911 = vmatpush1.bf16.msra.mxu1 %v20360_v27  ;;  %v20383_v38 = vld [vmem:[#allocation2 + $0x20c4] ss:$112 sps:$4 sm:$0xff]   ;;  %v20386_v27 = vld [vmem:[#allocation2 + $0x20cc] ss:$112 sps:$4 sm:$0xff]  }
 0x65a   :  { %11740 = vmatprep.subr.bf16.mxu0 %v20365_v45  ;;  %11912 = vmatprep.subr.bf16.mxu1 %v20368_v28  ;;  %v20381_v45 = vld [vmem:[#allocation2 + $0x20c0] ss:$112 sps:$4 sm:$0xff]   ;;  %v20384_v28 = vld [vmem:[#allocation2 + $0x20c8] ss:$112 sps:$4 sm:$0xff]  }
 0x65d   :  { %11741 = vmatpush1.bf16.msra.mxu0 %v20363_v54  ;;  %11913 = vmatpush1.bf16.msra.mxu1 %v20366_v42  ;;  %v20389_v54 = vld [vmem:[#allocation2 + $0x21a4] ss:$112 sps:$4 sm:$0xff]   ;;  %v20392_v42 = vld [vmem:[#allocation2 + $0x21ac] ss:$112 sps:$4 sm:$0xff]  }
 0x65e   :  { %11742 = vmatprep.subr.bf16.mxu0 %v20371_v58  ;;  %11914 = vmatprep.subr.bf16.mxu1 %v20374_v23  ;;  %v20387_v58 = vld [vmem:[#allocation2 + $0x21a0] ss:$112 sps:$4 sm:$0xff]   ;;  %v20390_v23 = vld [vmem:[#allocation2 + $0x21a8] ss:$112 sps:$4 sm:$0xff]  }
 0x661   :  { %11743 = vmatpush1.bf16.msra.mxu0 %v20369_v39  ;;  %11915 = vmatpush1.bf16.msra.mxu1 %v20372_v8  ;;  %v20395_v39 = vld [vmem:[#allocation2 + $0x2284] ss:$112 sps:$4 sm:$0xff]   ;;  %v20398_v8 = vld [vmem:[#allocation2 + $0x228c] ss:$112 sps:$4 sm:$0xff]  }
 0x662   :  { %11744 = vmatprep.subr.bf16.mxu0 %v20377_v63  ;;  %11916 = vmatprep.subr.bf16.mxu1 %v20380_v7  ;;  %v20393_v63 = vld [vmem:[#allocation2 + $0x2280] ss:$112 sps:$4 sm:$0xff]   ;;  %v20396_v7 = vld [vmem:[#allocation2 + $0x2288] ss:$112 sps:$4 sm:$0xff]  }
 0x665   :  { %11745 = vmatpush1.bf16.msra.mxu0 %v20375_v9  ;;  %11917 = vmatpush1.bf16.msra.mxu1 %v20378_v60  ;;  %v20401_v9 = vld [vmem:[#allocation2 + $0x2364] ss:$112 sps:$4 sm:$0xff]   ;;  %v20404_v60 = vld [vmem:[#allocation2 + $0x236c] ss:$112 sps:$4 sm:$0xff]  }
 0x666   :  { %11746 = vmatprep.subr.bf16.mxu0 %v20383_v38  ;;  %11918 = vmatprep.subr.bf16.mxu1 %v20386_v27  ;;  %v20399_v38 = vld [vmem:[#allocation2 + $0x2360] ss:$112 sps:$4 sm:$0xff]   ;;  %v20402_v27 = vld [vmem:[#allocation2 + $0x2368] ss:$112 sps:$4 sm:$0xff]  }
 0x669   :  { %11747 = vmatpush1.bf16.msra.mxu0 %v20381_v45  ;;  %11919 = vmatpush1.bf16.msra.mxu1 %v20384_v28  ;;  %v20407_v45 = vld [vmem:[#allocation2 + $0x2444] ss:$112 sps:$4 sm:$0xff]   ;;  %v20410_v28 = vld [vmem:[#allocation2 + $0x244c] ss:$112 sps:$4 sm:$0xff]  }
 0x66a   :  { %11748 = vmatprep.subr.bf16.mxu0 %v20389_v54  ;;  %11920 = vmatprep.subr.bf16.mxu1 %v20392_v42  ;;  %v20405_v54 = vld [vmem:[#allocation2 + $0x2440] ss:$112 sps:$4 sm:$0xff]   ;;  %v20408_v42 = vld [vmem:[#allocation2 + $0x2448] ss:$112 sps:$4 sm:$0xff]  }
 0x66d   :  { %11749 = vmatpush1.bf16.msra.mxu0 %v20387_v58  ;;  %11921 = vmatpush1.bf16.msra.mxu1 %v20390_v23  ;;  %v20413_v58 = vld [vmem:[#allocation2 + $0x2524] ss:$112 sps:$4 sm:$0xff]   ;;  %v20416_v23 = vld [vmem:[#allocation2 + $0x252c] ss:$112 sps:$4 sm:$0xff]  }
 0x66e   :  { %11750 = vmatprep.subr.bf16.mxu0 %v20395_v39  ;;  %11922 = vmatprep.subr.bf16.mxu1 %v20398_v8  ;;  %v20411_v39 = vld [vmem:[#allocation2 + $0x2520] ss:$112 sps:$4 sm:$0xff]   ;;  %v20414_v8 = vld [vmem:[#allocation2 + $0x2528] ss:$112 sps:$4 sm:$0xff]  }
 0x671   :  { %11751 = vmatpush1.bf16.msra.mxu0 %v20393_v63  ;;  %11923 = vmatpush1.bf16.msra.mxu1 %v20396_v7  ;;  %v20419_v63 = vld [vmem:[#allocation2 + $0x2604] ss:$112 sps:$4 sm:$0xff]   ;;  %v20422_v7 = vld [vmem:[#allocation2 + $0x260c] ss:$112 sps:$4 sm:$0xff]  }
 0x672   :  { %11752 = vmatprep.subr.bf16.mxu0 %v20401_v9  ;;  %11924 = vmatprep.subr.bf16.mxu1 %v20404_v60  ;;  %v20417_v9 = vld [vmem:[#allocation2 + $0x2600] ss:$112 sps:$4 sm:$0xff]   ;;  %v20420_v60 = vld [vmem:[#allocation2 + $0x2608] ss:$112 sps:$4 sm:$0xff]  }
 0x675   :  { %11753 = vmatpush1.bf16.msra.mxu0 %v20399_v38  ;;  %11925 = vmatpush1.bf16.msra.mxu1 %v20402_v27  ;;  %v20425_v38 = vld [vmem:[#allocation2 + $0x26e4] ss:$112 sps:$4 sm:$0xff]   ;;  %v20428_v27 = vld [vmem:[#allocation2 + $0x26ec] ss:$112 sps:$4 sm:$0xff]  }
 0x676   :  { %11754 = vmatprep.subr.bf16.mxu0 %v20407_v45  ;;  %11926 = vmatprep.subr.bf16.mxu1 %v20410_v28  ;;  %v20423_v45 = vld [vmem:[#allocation2 + $0x26e0] ss:$112 sps:$4 sm:$0xff]   ;;  %v20426_v28 = vld [vmem:[#allocation2 + $0x26e8] ss:$112 sps:$4 sm:$0xff]  }
 0x679   :  { %11755 = vmatpush1.bf16.msra.mxu0 %v20405_v54  ;;  %11927 = vmatpush1.bf16.msra.mxu1 %v20408_v42  ;;  %v20431_v54 = vld [vmem:[#allocation2 + $0x27c4] ss:$112 sps:$4 sm:$0xff]   ;;  %v20434_v42 = vld [vmem:[#allocation2 + $0x27cc] ss:$112 sps:$4 sm:$0xff]  }
 0x67a   :  { %11756 = vmatprep.subr.bf16.mxu0 %v20413_v58  ;;  %11928 = vmatprep.subr.bf16.mxu1 %v20416_v23  ;;  %v20429_v58 = vld [vmem:[#allocation2 + $0x27c0] ss:$112 sps:$4 sm:$0xff]   ;;  %v20432_v23 = vld [vmem:[#allocation2 + $0x27c8] ss:$112 sps:$4 sm:$0xff]  }
 0x67d   :  { %11757 = vmatpush1.bf16.msra.mxu0 %v20411_v39  ;;  %11929 = vmatpush1.bf16.msra.mxu1 %v20414_v8  ;;  %v20437_v39 = vld [vmem:[#allocation2 + $0x28a4] ss:$112 sps:$4 sm:$0xff]   ;;  %v20440_v8 = vld [vmem:[#allocation2 + $0x28ac] ss:$112 sps:$4 sm:$0xff]  }
 0x67e   :  { %11758 = vmatprep.subr.bf16.mxu0 %v20419_v63  ;;  %11930 = vmatprep.subr.bf16.mxu1 %v20422_v7  ;;  %v20435_v63 = vld [vmem:[#allocation2 + $0x28a0] ss:$112 sps:$4 sm:$0xff]   ;;  %v20438_v7 = vld [vmem:[#allocation2 + $0x28a8] ss:$112 sps:$4 sm:$0xff]  }
 0x681   :  { %11759 = vmatpush1.bf16.msra.mxu0 %v20417_v9  ;;  %11931 = vmatpush1.bf16.msra.mxu1 %v20420_v60  ;;  %v20443_v9 = vld [vmem:[#allocation2 + $0x2984] ss:$112 sps:$4 sm:$0xff]   ;;  %v20446_v60 = vld [vmem:[#allocation2 + $0x298c] ss:$112 sps:$4 sm:$0xff]  }
 0x682   :  { %11760 = vmatprep.subr.bf16.mxu0 %v20425_v38  ;;  %11932 = vmatprep.subr.bf16.mxu1 %v20428_v27  ;;  %v20441_v38 = vld [vmem:[#allocation2 + $0x2980] ss:$112 sps:$4 sm:$0xff]   ;;  %v20444_v27 = vld [vmem:[#allocation2 + $0x2988] ss:$112 sps:$4 sm:$0xff]  }
 0x685   :  { %11761 = vmatpush1.bf16.msra.mxu0 %v20423_v45  ;;  %11933 = vmatpush1.bf16.msra.mxu1 %v20426_v28  ;;  %v20449_v45 = vld [vmem:[#allocation2 + $0x2a64] ss:$112 sps:$4 sm:$0xff]   ;;  %v20452_v28 = vld [vmem:[#allocation2 + $0x2a6c] ss:$112 sps:$4 sm:$0xff]  }
 0x686   :  { %11762 = vmatprep.subr.bf16.mxu0 %v20431_v54  ;;  %11934 = vmatprep.subr.bf16.mxu1 %v20434_v42  ;;  %v20447_v54 = vld [vmem:[#allocation2 + $0x2a60] ss:$112 sps:$4 sm:$0xff]   ;;  %v20450_v42 = vld [vmem:[#allocation2 + $0x2a68] ss:$112 sps:$4 sm:$0xff]  }
 0x689   :  { %11763 = vmatpush1.bf16.msra.mxu0 %v20429_v58  ;;  %11935 = vmatpush1.bf16.msra.mxu1 %v20432_v23  ;;  %v20455_v58 = vld [vmem:[#allocation2 + $0x2b44] ss:$112 sps:$4 sm:$0xff]   ;;  %v20458_v23 = vld [vmem:[#allocation2 + $0x2b4c] ss:$112 sps:$4 sm:$0xff]  }
 0x68a   :  { %11764 = vmatprep.subr.bf16.mxu0 %v20437_v39  ;;  %11936 = vmatprep.subr.bf16.mxu1 %v20440_v8  ;;  %v20453_v39 = vld [vmem:[#allocation2 + $0x2b40] ss:$112 sps:$4 sm:$0xff]   ;;  %v20456_v8 = vld [vmem:[#allocation2 + $0x2b48] ss:$112 sps:$4 sm:$0xff]  }
 0x68d   :  { %11765 = vmatpush1.bf16.msra.mxu0 %v20435_v63  ;;  %11937 = vmatpush1.bf16.msra.mxu1 %v20438_v7  ;;  %v20461_v63 = vld [vmem:[#allocation2 + $0x2c24] ss:$112 sps:$4 sm:$0xff]   ;;  %v20464_v7 = vld [vmem:[#allocation2 + $0x2c2c] ss:$112 sps:$4 sm:$0xff]  }
 0x68e   :  { %11766 = vmatprep.subr.bf16.mxu0 %v20443_v9  ;;  %11938 = vmatprep.subr.bf16.mxu1 %v20446_v60  ;;  %v20459_v9 = vld [vmem:[#allocation2 + $0x2c20] ss:$112 sps:$4 sm:$0xff]   ;;  %v20462_v60 = vld [vmem:[#allocation2 + $0x2c28] ss:$112 sps:$4 sm:$0xff]  }
 0x691   :  { %11767 = vmatpush1.bf16.msra.mxu0 %v20441_v38  ;;  %11939 = vmatpush1.bf16.msra.mxu1 %v20444_v27  ;;  %v20467_v38 = vld [vmem:[#allocation2 + $0x2d04] ss:$112 sps:$4 sm:$0xff]   ;;  %v12038_v27 = vlaneseq }
 0x692   :  { %11779 = vmatprep.subr.bf16.mxu0 %v20449_v45  ;;  %11951 = vmatprep.subr.bf16.mxu1 %v20452_v28  ;;  %v20465_v45 = vld [vmem:[#allocation2 + $0x2d00] ss:$112 sps:$4 sm:$0xff]   ;;  %v20468_v28 = vld [vmem:[#allocation2 + $0x2d08] ss:$112 sps:$4 sm:$0xff]  }
 0x694   :  { %11769 = vmatmul.mubr.bf16.vlgmr.msra.gmra.mrb[24].mxu0 %v21155_v57  ;;  %11941 = vmatmul.mubr.bf16.vlgmr.msra.gmra.mrb[24].mxu1 %v21155_v57  ;;  %v20470_v57 = vld [vmem:[#allocation2 + $0x2d0c] ss:$112 sps:$4 sm:$0xff]  }
 0x695   :  { %11780 = vmatpush1.bf16.msra.mxu0 %v20447_v54  ;;  %11952 = vmatpush1.bf16.msra.mxu1 %v20450_v42  ;;  %v20473_v54 = vld [vmem:[#allocation2 + $0x2de4] ss:$112 sps:$4 sm:$0xff]   ;;  %v20476_v42 = vld [vmem:[#allocation2 + $0x2dec] ss:$112 sps:$4 sm:$0xff]  }
 0x696   :  { %11781 = vmatprep.subr.bf16.mxu0 %v20455_v58  ;;  %11953 = vmatprep.subr.bf16.mxu1 %v20458_v23  ;;  %v21203_v58 = vshrl.u32 %v12038_v27, 7  ;;  %v20471_v23 = vld [vmem:[#allocation2 + $0x2de0] ss:$112 sps:$4 sm:$0xff]  }
 0x697   :  { %11811 = vmatprep.mubr.bf16.mxu0 %v21413_v16  ;;  %11983 = vmatprep.mubr.bf16.mxu1 %v21413_v16 }
 0x698   :  { %v12048_v27 = vsub.s32 2, %v21203_v58 }
 0x699   :  { %11782 = vmatpush1.bf16.msra.mxu0 %v20453_v39  ;;  %11954 = vmatpush1.bf16.msra.mxu1 %v20456_v8  ;;  %v20474_v39 = vld [vmem:[#allocation2 + $0x2de8] ss:$112 sps:$4 sm:$0xff]   ;;  %v20479_v8 = vld [vmem:[#allocation2 + $0x2ec4] ss:$112 sps:$4 sm:$0xff]  }
 0x69a   :  { %11783 = vmatprep.subr.bf16.mxu0 %v20461_v63  ;;  %11955 = vmatprep.subr.bf16.mxu1 %v20464_v7  ;;  %v20482_v63 = vld [vmem:[#allocation2 + $0x2ecc] ss:$112 sps:$4 sm:$0xff]   ;;  %v21415_v7 = vsub.s32 1, %v21203_v58 }
 0x69d   :  { %11784 = vmatpush1.bf16.msra.mxu0 %v20459_v9  ;;  %11956 = vmatpush1.bf16.msra.mxu1 %v20462_v60  ;;  %v21206_v9 = vld [vmem:[#allocation4] sm:$0xff]  ;;  %v21416_v60 = vsub.s32 0, %v21203_v58 }
 0x69e   :  { %11785 = vmatprep.subr.bf16.mxu0 %v20467_v38  ;;  %11957 = vmatprep.subr.bf16.mxu1 %v20470_v57  ;;  %v20477_v38 = vld [vmem:[#allocation2 + $0x2ec0] ss:$112 sps:$4 sm:$0xff]   ;;  %v20480_v57 = vld [vmem:[#allocation2 + $0x2ec8] ss:$112 sps:$4 sm:$0xff]   ;;  %v12049_v53 = vrot.slane %v21206_v9, %v12048_v27  ;;  %v21421_v27 = vmax.f32 %v20964_v20, %v21054_v55 }
 0x6a1   :  { %11786 = vmatpush1.bf16.msra.mxu0 %v20465_v45  ;;  %11958 = vmatpush1.bf16.msra.mxu1 %v20468_v28  ;;  %v20485_v45 = vld [vmem:[#allocation2 + $0x2fa4] ss:$112 sps:$4 sm:$0xff]   ;;  %v20488_v28 = vld [vmem:[#allocation2 + $0x2fac] ss:$112 sps:$4 sm:$0xff]  }
 0x6a2   :  { %11787 = vmatprep.subr.bf16.mxu0 %v20473_v54  ;;  %11959 = vmatprep.subr.bf16.mxu1 %v20476_v42 }
 0x6a5   :  { %11788 = vmatpush1.bf16.msra.mxu0 %v20471_v23  ;;  %11960 = vmatpush1.bf16.msra.mxu1 %v20474_v39  ;;  %v12045_v23 = vrot.slane %v21206_v9, %v21415_v7 }
 0x6a6   :  { %11789 = vmatprep.subr.bf16.mxu0 %v20479_v8  ;;  %11961 = vmatprep.subr.bf16.mxu1 %v20482_v63  ;;  %v12041_v8 = vrot.slane %v21206_v9, %v21416_v60  ;;  %v12098_v60 = vld [vmem:[#allocation6 + $0x20] sm:$0xff] }
 0x6a7   :  { %v21210_v54 = vpop.f32.mrb[20].mxu0  ;;  %v11641_v42 = vpop.f32.mrb[20].mxu1 }
 0x6a8   :  { %v12009_v16 = vmax.f32 %v21124_v25, %v11641_v42  ;;  %v11471_v39 = vpop.f32.mrb[21].mxu0  ;;  %v11643_v50 = vpop.f32.mrb[21].mxu1  ;;  %v20483_v25 = vld [vmem:[#allocation2 + $0x2fa0] ss:$112 sps:$4 sm:$0xff]   ;;  %v20486_v42 = vld [vmem:[#allocation2 + $0x2fa8] ss:$112 sps:$4 sm:$0xff]  }
 0x6a9   :  { %v12008_v1 = vmax.f32 %v21118_v22, %v11471_v39  ;;  %v12010_v63 = vmax.f32 %v21161_v4, %v11643_v50  ;;  %v21221_v44 = vpop.f32.mrb[22].mxu0  ;;  %v11645_v59 = vpop.f32.mrb[22].mxu1  ;;  %11790 = vmatpush1.bf16.msra.mxu0 %v20477_v38  ;;  %11962 = vmatpush1.bf16.msra.mxu1 %v20480_v57  ;;  %v20491_v50 = vld [vmem:[#allocation2 + $0x3084] ss:$112 sps:$4 sm:$0xff]   ;;  %v12094_v4 = vld [vmem:[#allocation6] sm:$0xff]  ;;  %v21419_v38 = vmax.f32 %v20952_v11, %v20997_v34 }
 0x6aa   :  { %v12023_v7 = vmax.f32 %v11995_v49, %v12009_v16  ;;  %v12016_v22 = vmax.f32 %v21136_v46, %v11645_v59  ;;  %v11475_v39 = vpop.f32.mrb[23].mxu0  ;;  %v11647_v35 = vpop.f32.mrb[23].mxu1  ;;  %11791 = vmatprep.subr.bf16.mxu0 %v20485_v45  ;;  %11963 = vmatprep.subr.bf16.mxu1 %v20488_v28  ;;  %v20494_v49 = vld [vmem:[#allocation2 + $0x308c] ss:$112 sps:$4 sm:$0xff]   ;;  %v12095_v59 = vld [vmem:[#allocation6 + $0x8] sm:$0xff]  ;;  %v21422_v28 = vmax.f32 %v20960_v15, %v21007_v41 }
 0x6ab   :  { %v12022_v57 = vmax.f32 %v21419_v38, %v12008_v1  ;;  %v12024_v13 = vmax.f32 %v21420_v43, %v12010_v63  ;;  %v12015_v16 = vmax.f32 %v21130_v30, %v11475_v39  ;;  %v12017_v47 = vmax.f32 %v21169_v2, %v11647_v35  ;;  %v12099_v46 = vld [vmem:[#allocation6 + $0x28] sm:$0xff]  ;;  %v20492_v43 = vld [vmem:[#allocation2 + $0x3088] ss:$112 sps:$4 sm:$0xff]  }
 0x6ac   :  { %v12030_v45 = vmax.f32 %v21421_v27, %v12016_v22  ;;  %v21423_v34 = vmax.f32 %v20962_v17, %v21062_v61  ;;  %v17376_v1 = vcombine.high %v12094_v4, %v12098_v60  ;;  %v12074_v30 = vadd.f32 %v12045_v23, %v12023_v7  ;;  %v12102_v41 = vld [vmem:[#allocation6 + $0x40] sm:$0xff]  ;;  %v12123_v27 = vld [vmem:[#allocation6 + $0xe8] sm:$0xff] }
 0x6ad   :  { %v12029_v11 = vmax.f32 %v21422_v28, %v12015_v16  ;;  %11792 = vmatpush1.bf16.msra.mxu0 %v20483_v25  ;;  %11964 = vmatpush1.bf16.msra.mxu1 %v20486_v42  ;;  %v17378_v2 = vcombine.high %v12095_v59, %v12099_v46  ;;  %v12073_v63 = vadd.f32 %v12041_v8, %v12022_v57  ;;  %v12106_v39 = vld [vmem:[#allocation6 + $0x60] sm:$0xff]  ;;  %v12107_v25 = vld [vmem:[#allocation6 + $0x68] sm:$0xff] }
 0x6ae   :  { %v12031_v12 = vmax.f32 %v21423_v34, %v12017_v47  ;;  %v12081_v35 = vadd.f32 %v12045_v23, %v12030_v45  ;;  %11793 = vmatprep.subr.bf16.mxu0 %v20491_v50  ;;  %v12075_v20 = vadd.f32 %v12049_v53, %v12024_v13  ;;  %11965 = vmatprep.subr.bf16.mxu1 %v20494_v49  ;;  %v12103_v23 = vld [vmem:[#allocation6 + $0x48] sm:$0xff] }
 0x6af   :  { %v12080_v55 = vadd.f32 %v12041_v8, %v12029_v11  ;;  %v17375_v7 = vcombine.low %v12094_v4, %v12098_v60  ;;  %v17377_v42 = vcombine.low %v12095_v59, %v12099_v46  ;;  %v17384_v50 = vcombine.high %v12102_v41, %v12106_v39  ;;  %v12110_v8 = vld [vmem:[#allocation6 + $0x80] sm:$0xff]  ;;  %v12111_v57 = vld [vmem:[#allocation6 + $0x88] sm:$0xff] }
 0x6b0   :  { %v12082_v22 = vadd.f32 %v12049_v53, %v12031_v12  ;;  %v21245_v15 = vpack.c.bf16 %v12081_v35, %v12074_v30  ;;  %v12114_v53 = vld [vmem:[#allocation6 + $0xa0] sm:$0xff]  ;;  %v17386_v38 = vcombine.high %v12103_v23, %v12107_v25  ;;  %v12115_v13 = vld [vmem:[#allocation6 + $0xa8] sm:$0xff]  ;;  %v17383_v60 = vcombine.low %v12102_v41, %v12106_v39 }
 0x6b1   :  { %v21247_v17 = vpack.c.bf16 %v12080_v55, %v12073_v63  ;;  %11794 = vmatpush1.bf16.msra.mxu0 %v20489_v51  ;;  %11966 = vmatpush1.bf16.msra.mxu1 %v20492_v43  ;;  %v20552_v16 = vld [vmem:[%s21403_s0 + $0x18] ss:$28 sps:$4 sm:$0xff]   ;;  %v17385_v4 = vcombine.low %v12103_v23, %v12107_v25  ;;  %v17392_v47 = vcombine.high %v12110_v8, %v12114_v53  ;;  %v12122_v59 = vld [vmem:[#allocation6 + $0xe0] sm:$0xff] }
 0x6b2   :  { %v21249_v61 = vpack.c.bf16 %v12082_v22, %v12075_v20  ;;  %14782 = vmatprep.subr.bf16.mxu0 %v17376_v1  ;;  %14954 = vmatprep.subr.bf16.mxu1 %v17378_v2  ;;  %v17394_v49 = vcombine.high %v12111_v57, %v12115_v13  ;;  %v12119_v46 = vld [vmem:[#allocation6 + $0xc8] sm:$0xff]  ;;  %v17391_v45 = vcombine.low %v12110_v8, %v12114_v53  ;;  %v12126_v12 = vld [vmem:[#allocation6 + $0x100] sm:$0xff] }
 0x6b3   :  { %v17393_v28 = vcombine.low %v12111_v57, %v12115_v13  ;;  %v17402_v34 = vcombine.high %v12119_v46, %v12123_v27  ;;  %v12130_v51 = vld [vmem:[#allocation6 + $0x120] sm:$0xff]  ;;  %v12127_v1 = vld [vmem:[#allocation6 + $0x108] sm:$0xff]  ;;  %v17401_v43 = vcombine.low %v12119_v46, %v12123_v27 }
 0x6b4   :  { %11812 = vmatmul.mubr.bf16.vlgmr.msra.gmra.mrb[24].mxu0 %v21180_v3  ;;  %11984 = vmatmul.mubr.bf16.vlgmr.msra.gmra.mrb[24].mxu1 %v20552_v16  ;;  %v12118_v3 = vld [vmem:[#allocation6 + $0xc0] sm:$0xff]  ;;  %v12131_v30 = vld [vmem:[#allocation6 + $0x128] sm:$0xff]  ;;  %v17408_v2 = vcombine.high %v12126_v12, %v12130_v51  ;;  %v17407_v39 = vcombine.low %v12126_v12, %v12130_v51 }
 0x6b5   :  { %14783 = vmatpush1.bf16.msra.mxu0 %v17375_v7  ;;  %14814 = vmatprep.mubr.bf16.mxu0 %v21245_v15  ;;  %v17400_v11 = vcombine.high %v12118_v3, %v12122_v59  ;;  %v17399_v35 = vcombine.low %v12118_v3, %v12122_v59  ;;  %v17410_v63 = vcombine.high %v12127_v1, %v12131_v30  ;;  %v12134_v20 = vld [vmem:[#allocation6 + $0x140] sm:$0xff]  ;;  %v12135_v22 = vld [vmem:[#allocation6 + $0x148] sm:$0xff] }
 0x6b6   :  { %14955 = vmatpush1.bf16.msra.mxu1 %v17377_v42  ;;  %14986 = vmatprep.mubr.bf16.mxu1 %v21245_v15  ;;  %v12138_v55 = vld [vmem:[#allocation6 + $0x160] sm:$0xff]  ;;  %v12139_v41 = vld [vmem:[#allocation6 + $0x168] sm:$0xff]  ;;  %v17409_v7 = vcombine.low %v12127_v1, %v12131_v30 }
 0x6b7   :  { %14784 = vmatprep.subr.bf16.mxu0 %v17384_v50  ;;  %14956 = vmatprep.subr.bf16.mxu1 %v17386_v38  ;;  %v17416_v23 = vcombine.high %v12134_v20, %v12138_v55  ;;  %v17418_v25 = vcombine.high %v12135_v22, %v12139_v41  ;;  %v12142_v42 = vld [vmem:[#allocation6 + $0x180] sm:$0xff]  ;;  %v12143_v8 = vld [vmem:[#allocation6 + $0x188] sm:$0xff]  ;;  %v17415_v38 = vcombine.low %v12134_v20, %v12138_v55 }
 0x6b8   :  { %v12146_v50 = vld [vmem:[#allocation6 + $0x1a0] sm:$0xff]  ;;  %v12147_v53 = vld [vmem:[#allocation6 + $0x1a8] sm:$0xff]  ;;  %v17417_v57 = vcombine.low %v12135_v22, %v12139_v41 }
 0x6b9   :  { %14785 = vmatpush1.bf16.msra.mxu0 %v17383_v60  ;;  %v17424_v13 = vcombine.high %v12142_v42, %v12146_v50  ;;  %v17426_v16 = vcombine.high %v12143_v8, %v12147_v53  ;;  %v12150_v60 = vld [vmem:[#allocation6 + $0x1c0] sm:$0xff]  ;;  %v17423_v3 = vcombine.low %v12142_v42, %v12146_v50  ;;  %v17425_v59 = vcombine.low %v12143_v8, %v12147_v53 }
 0x6ba   :  { %14957 = vmatpush1.bf16.msra.mxu1 %v17385_v4  ;;  %14786 = vmatprep.subr.bf16.mxu0 %v17392_v47  ;;  %v12154_v4 = vld [vmem:[#allocation6 + $0x1e0] sm:$0xff]  ;;  %v12151_v47 = vld [vmem:[#allocation6 + $0x1c8] sm:$0xff] }
 0x6bb   :  { %14958 = vmatprep.subr.bf16.mxu1 %v17394_v49  ;;  %v12155_v49 = vld [vmem:[#allocation6 + $0x1e8] sm:$0xff]  ;;  %v17432_v46 = vcombine.high %v12150_v60, %v12154_v4  ;;  %v17431_v12 = vcombine.low %v12150_v60, %v12154_v4 }
 0x6bc   :  { %v17434_v27 = vcombine.high %v12151_v47, %v12155_v49  ;;  %v17433_v51 = vcombine.low %v12151_v47, %v12155_v49 }
 0x6bd   :  { %14787 = vmatpush1.bf16.msra.mxu0 %v17391_v45  ;;  %v12158_v45 = vld [vmem:[#allocation6 + $0x200] sm:$0xff] }
 0x6be   :  { %14959 = vmatpush1.bf16.msra.mxu1 %v17393_v28  ;;  %14788 = vmatprep.subr.bf16.mxu0 %v17400_v11  ;;  %v12162_v28 = vld [vmem:[#allocation6 + $0x220] sm:$0xff]  ;;  %v12159_v11 = vld [vmem:[#allocation6 + $0x208] sm:$0xff] }
 0x6bf   :  { %14960 = vmatprep.subr.bf16.mxu1 %v17402_v34  ;;  %v12163_v34 = vld [vmem:[#allocation6 + $0x228] sm:$0xff]  ;;  %v17440_v1 = vcombine.high %v12158_v45, %v12162_v28  ;;  %v17439_v20 = vcombine.low %v12158_v45, %v12162_v28 }
 0x6c0   :  { %v17442_v30 = vcombine.high %v12159_v11, %v12163_v34  ;;  %v17441_v55 = vcombine.low %v12159_v11, %v12163_v34 }
 0x6c1   :  { %14789 = vmatpush1.bf16.msra.mxu0 %v17399_v35  ;;  %v12166_v35 = vld [vmem:[#allocation6 + $0x240] sm:$0xff] }
 0x6c2   :  { %14961 = vmatpush1.bf16.msra.mxu1 %v17401_v43  ;;  %14790 = vmatprep.subr.bf16.mxu0 %v17408_v2  ;;  %v12170_v43 = vld [vmem:[#allocation6 + $0x260] sm:$0xff]  ;;  %v12167_v2 = vld [vmem:[#allocation6 + $0x248] sm:$0xff] }
 0x6c3   :  { %14962 = vmatprep.subr.bf16.mxu1 %v17410_v63  ;;  %v12171_v63 = vld [vmem:[#allocation6 + $0x268] sm:$0xff]  ;;  %v17448_v22 = vcombine.high %v12166_v35, %v12170_v43  ;;  %v17447_v42 = vcombine.low %v12166_v35, %v12170_v43 }
 0x6c4   :  { %v17450_v41 = vcombine.high %v12167_v2, %v12171_v63  ;;  %v17449_v50 = vcombine.low %v12167_v2, %v12171_v63 }
 0x6c5   :  { %14791 = vmatpush1.bf16.msra.mxu0 %v17407_v39  ;;  %v12174_v39 = vld [vmem:[#allocation6 + $0x280] sm:$0xff] }
 0x6c6   :  { %14963 = vmatpush1.bf16.msra.mxu1 %v17409_v7  ;;  %14792 = vmatprep.subr.bf16.mxu0 %v17416_v23  ;;  %v12178_v7 = vld [vmem:[#allocation6 + $0x2a0] sm:$0xff]  ;;  %v12175_v23 = vld [vmem:[#allocation6 + $0x288] sm:$0xff] }
 0x6c7   :  { %14964 = vmatprep.subr.bf16.mxu1 %v17418_v25  ;;  %v12179_v25 = vld [vmem:[#allocation6 + $0x2a8] sm:$0xff]  ;;  %v17456_v8 = vcombine.high %v12174_v39, %v12178_v7  ;;  %v17455_v60 = vcombine.low %v12174_v39, %v12178_v7 }
 0x6c8   :  { %v17458_v53 = vcombine.high %v12175_v23, %v12179_v25  ;;  %v17457_v4 = vcombine.low %v12175_v23, %v12179_v25 }
 0x6c9   :  { %14793 = vmatpush1.bf16.msra.mxu0 %v17415_v38  ;;  %v12182_v38 = vld [vmem:[#allocation6 + $0x2c0] sm:$0xff] }
 0x6ca   :  { %14965 = vmatpush1.bf16.msra.mxu1 %v17417_v57  ;;  %14794 = vmatprep.subr.bf16.mxu0 %v17424_v13  ;;  %v12186_v57 = vld [vmem:[#allocation6 + $0x2e0] sm:$0xff]  ;;  %v12183_v13 = vld [vmem:[#allocation6 + $0x2c8] sm:$0xff] }
 0x6cb   :  { %14966 = vmatprep.subr.bf16.mxu1 %v17426_v16  ;;  %v12187_v16 = vld [vmem:[#allocation6 + $0x2e8] sm:$0xff]  ;;  %v17464_v47 = vcombine.high %v12182_v38, %v12186_v57  ;;  %v17463_v45 = vcombine.low %v12182_v38, %v12186_v57 }
 0x6cc   :  { %v17466_v49 = vcombine.high %v12183_v13, %v12187_v16  ;;  %v17465_v28 = vcombine.low %v12183_v13, %v12187_v16 }
 0x6cd   :  { %14795 = vmatpush1.bf16.msra.mxu0 %v17423_v3  ;;  %v12190_v3 = vld [vmem:[#allocation6 + $0x300] sm:$0xff] }
 0x6ce   :  { %14967 = vmatpush1.bf16.msra.mxu1 %v17425_v59  ;;  %14796 = vmatprep.subr.bf16.mxu0 %v17432_v46  ;;  %v12194_v59 = vld [vmem:[#allocation6 + $0x320] sm:$0xff]  ;;  %v12191_v46 = vld [vmem:[#allocation6 + $0x308] sm:$0xff] }
 0x6cf   :  { %14968 = vmatprep.subr.bf16.mxu1 %v17434_v27  ;;  %v12195_v27 = vld [vmem:[#allocation6 + $0x328] sm:$0xff]  ;;  %v17472_v11 = vcombine.high %v12190_v3, %v12194_v59  ;;  %v17471_v35 = vcombine.low %v12190_v3, %v12194_v59 }
 0x6d0   :  { %v17474_v34 = vcombine.high %v12191_v46, %v12195_v27  ;;  %v17473_v43 = vcombine.low %v12191_v46, %v12195_v27 }
 0x6d1   :  { %14797 = vmatpush1.bf16.msra.mxu0 %v17431_v12  ;;  %v12198_v12 = vld [vmem:[#allocation6 + $0x340] sm:$0xff] }
 0x6d2   :  { %14969 = vmatpush1.bf16.msra.mxu1 %v17433_v51  ;;  %14798 = vmatprep.subr.bf16.mxu0 %v17440_v1  ;;  %v12202_v51 = vld [vmem:[#allocation6 + $0x360] sm:$0xff]  ;;  %v12199_v1 = vld [vmem:[#allocation6 + $0x348] sm:$0xff] }
 0x6d3   :  { %14970 = vmatprep.subr.bf16.mxu1 %v17442_v30  ;;  %v12203_v30 = vld [vmem:[#allocation6 + $0x368] sm:$0xff]  ;;  %v17480_v2 = vcombine.high %v12198_v12, %v12202_v51  ;;  %v17479_v39 = vcombine.low %v12198_v12, %v12202_v51 }
 0x6d4   :  { %v17482_v63 = vcombine.high %v12199_v1, %v12203_v30  ;;  %v17481_v7 = vcombine.low %v12199_v1, %v12203_v30 }
 0x6d5   :  { %14799 = vmatpush1.bf16.msra.mxu0 %v17439_v20  ;;  %v12206_v20 = vld [vmem:[#allocation6 + $0x380] sm:$0xff] }
 0x6d6   :  { %14971 = vmatpush1.bf16.msra.mxu1 %v17441_v55  ;;  %14800 = vmatprep.subr.bf16.mxu0 %v17448_v22  ;;  %v12210_v55 = vld [vmem:[#allocation6 + $0x3a0] sm:$0xff]  ;;  %v12207_v22 = vld [vmem:[#allocation6 + $0x388] sm:$0xff] }
 0x6d7   :  { %14972 = vmatprep.subr.bf16.mxu1 %v17450_v41  ;;  %v12211_v41 = vld [vmem:[#allocation6 + $0x3a8] sm:$0xff]  ;;  %v17488_v23 = vcombine.high %v12206_v20, %v12210_v55  ;;  %v17487_v38 = vcombine.low %v12206_v20, %v12210_v55 }
 0x6d8   :  { %v17490_v25 = vcombine.high %v12207_v22, %v12211_v41  ;;  %v17489_v57 = vcombine.low %v12207_v22, %v12211_v41 }
 0x6d9   :  { %14801 = vmatpush1.bf16.msra.mxu0 %v17447_v42  ;;  %v12214_v42 = vld [vmem:[#allocation6 + $0x3c0] sm:$0xff] }
 0x6da   :  { %14973 = vmatpush1.bf16.msra.mxu1 %v17449_v50  ;;  %14802 = vmatprep.subr.bf16.mxu0 %v17456_v8  ;;  %v12218_v50 = vld [vmem:[#allocation6 + $0x3e0] sm:$0xff]  ;;  %v12215_v8 = vld [vmem:[#allocation6 + $0x3c8] sm:$0xff] }
 0x6db   :  { %14974 = vmatprep.subr.bf16.mxu1 %v17458_v53  ;;  %v12219_v53 = vld [vmem:[#allocation6 + $0x3e8] sm:$0xff]  ;;  %v17496_v13 = vcombine.high %v12214_v42, %v12218_v50  ;;  %v17495_v3 = vcombine.low %v12214_v42, %v12218_v50 }
 0x6dc   :  { %v17498_v16 = vcombine.high %v12215_v8, %v12219_v53  ;;  %v17497_v59 = vcombine.low %v12215_v8, %v12219_v53 }
 0x6dd   :  { %14803 = vmatpush1.bf16.msra.mxu0 %v17455_v60  ;;  %v12222_v60 = vld [vmem:[#allocation6 + $0x400] sm:$0xff] }
 0x6de   :  { %14975 = vmatpush1.bf16.msra.mxu1 %v17457_v4  ;;  %14804 = vmatprep.subr.bf16.mxu0 %v17464_v47  ;;  %v12226_v4 = vld [vmem:[#allocation6 + $0x420] sm:$0xff]  ;;  %v12223_v47 = vld [vmem:[#allocation6 + $0x408] sm:$0xff] }
 0x6df   :  { %14976 = vmatprep.subr.bf16.mxu1 %v17466_v49  ;;  %v12227_v49 = vld [vmem:[#allocation6 + $0x428] sm:$0xff]  ;;  %v17504_v46 = vcombine.high %v12222_v60, %v12226_v4  ;;  %v17503_v12 = vcombine.low %v12222_v60, %v12226_v4 }
 0x6e0   :  { %v17506_v27 = vcombine.high %v12223_v47, %v12227_v49  ;;  %v17505_v51 = vcombine.low %v12223_v47, %v12227_v49 }
 0x6e1   :  { %14805 = vmatpush1.bf16.msra.mxu0 %v17463_v45  ;;  %v12230_v45 = vld [vmem:[#allocation6 + $0x440] sm:$0xff] }
 0x6e2   :  { %14977 = vmatpush1.bf16.msra.mxu1 %v17465_v28  ;;  %14806 = vmatprep.subr.bf16.mxu0 %v17472_v11  ;;  %v12234_v28 = vld [vmem:[#allocation6 + $0x460] sm:$0xff]  ;;  %v12231_v11 = vld [vmem:[#allocation6 + $0x448] sm:$0xff] }
 0x6e3   :  { %14978 = vmatprep.subr.bf16.mxu1 %v17474_v34  ;;  %v12235_v34 = vld [vmem:[#allocation6 + $0x468] sm:$0xff]  ;;  %v17512_v1 = vcombine.high %v12230_v45, %v12234_v28  ;;  %v17511_v20 = vcombine.low %v12230_v45, %v12234_v28 }
 0x6e4   :  { %v17514_v30 = vcombine.high %v12231_v11, %v12235_v34  ;;  %v17513_v55 = vcombine.low %v12231_v11, %v12235_v34 }
 0x6e5   :  { %14807 = vmatpush1.bf16.msra.mxu0 %v17471_v35  ;;  %v12238_v35 = vld [vmem:[#allocation6 + $0x480] sm:$0xff] }
 0x6e6   :  { %14979 = vmatpush1.bf16.msra.mxu1 %v17473_v43  ;;  %14808 = vmatprep.subr.bf16.mxu0 %v17480_v2  ;;  %v12242_v43 = vld [vmem:[#allocation6 + $0x4a0] sm:$0xff]  ;;  %v12239_v2 = vld [vmem:[#allocation6 + $0x488] sm:$0xff] }
 0x6e7   :  { %14980 = vmatprep.subr.bf16.mxu1 %v17482_v63  ;;  %v12243_v63 = vld [vmem:[#allocation6 + $0x4a8] sm:$0xff]  ;;  %v17520_v22 = vcombine.high %v12238_v35, %v12242_v43  ;;  %v17519_v42 = vcombine.low %v12238_v35, %v12242_v43 }
 0x6e8   :  { %v17522_v41 = vcombine.high %v12239_v2, %v12243_v63  ;;  %v17521_v50 = vcombine.low %v12239_v2, %v12243_v63 }
 0x6e9   :  { %14809 = vmatpush1.bf16.msra.mxu0 %v17479_v39  ;;  %v12246_v39 = vld [vmem:[#allocation6 + $0x4c0] sm:$0xff] }
 0x6ea   :  { %14981 = vmatpush1.bf16.msra.mxu1 %v17481_v7  ;;  %14810 = vmatprep.subr.bf16.mxu0 %v17488_v23  ;;  %v12250_v7 = vld [vmem:[#allocation6 + $0x4e0] sm:$0xff]  ;;  %v12247_v23 = vld [vmem:[#allocation6 + $0x4c8] sm:$0xff] }
 0x6eb   :  { %14982 = vmatprep.subr.bf16.mxu1 %v17490_v25  ;;  %v12251_v25 = vld [vmem:[#allocation6 + $0x4e8] sm:$0xff]  ;;  %v17528_v8 = vcombine.high %v12246_v39, %v12250_v7  ;;  %v17527_v60 = vcombine.low %v12246_v39, %v12250_v7 }
 0x6ec   :  { %v17530_v53 = vcombine.high %v12247_v23, %v12251_v25  ;;  %v17529_v4 = vcombine.low %v12247_v23, %v12251_v25 }
 0x6ed   :  { %14811 = vmatpush1.bf16.msra.mxu0 %v17487_v38  ;;  %v12254_v38 = vld [vmem:[#allocation6 + $0x500] sm:$0xff] }
 0x6ee   :  { %14983 = vmatpush1.bf16.msra.mxu1 %v17489_v57  ;;  %14812 = vmatprep.subr.bf16.mxu0 %v17496_v13  ;;  %v12258_v57 = vld [vmem:[#allocation6 + $0x520] sm:$0xff]  ;;  %v12255_v13 = vld [vmem:[#allocation6 + $0x508] sm:$0xff] }
 0x6ef   :  { %14984 = vmatprep.subr.bf16.mxu1 %v17498_v16  ;;  %v12259_v16 = vld [vmem:[#allocation6 + $0x528] sm:$0xff]  ;;  %v17536_v47 = vcombine.high %v12254_v38, %v12258_v57  ;;  %v17535_v45 = vcombine.low %v12254_v38, %v12258_v57 }
 0x6f0   :  { %v17538_v49 = vcombine.high %v12255_v13, %v12259_v16  ;;  %v17537_v28 = vcombine.low %v12255_v13, %v12259_v16 }
 0x6f1   :  { %14813 = vmatpush1.bf16.msra.mxu0 %v17495_v3  ;;  %v12262_v3 = vld [vmem:[#allocation6 + $0x540] sm:$0xff] }
 0x6f2   :  { %14985 = vmatpush1.bf16.msra.mxu1 %v17497_v59  ;;  %14825 = vmatprep.subr.bf16.mxu0 %v17504_v46  ;;  %v12266_v59 = vld [vmem:[#allocation6 + $0x560] sm:$0xff]  ;;  %v12263_v46 = vld [vmem:[#allocation6 + $0x548] sm:$0xff] }
 0x6f3   :  { %14997 = vmatprep.subr.bf16.mxu1 %v17506_v27  ;;  %v12267_v27 = vld [vmem:[#allocation6 + $0x568] sm:$0xff]  ;;  %v17544_v11 = vcombine.high %v12262_v3, %v12266_v59  ;;  %v17543_v35 = vcombine.low %v12262_v3, %v12266_v59  ;;  %v21259_v59 = vld [vmem:[#allocation6 + $0x800] sm:$0xff] }
 0x6f4   :  { %14815 = vmatmul.mubr.bf16.vlgmr.msra.gmra.mrb[28].mxu0 %v21247_v17  ;;  %v17546_v34 = vcombine.high %v12263_v46, %v12267_v27  ;;  %v17545_v43 = vcombine.low %v12263_v46, %v12267_v27  ;;  %v21261_v46 = vld [vmem:[#allocation6 + $0x820] sm:$0xff]  ;;  %v21263_v27 = vld [vmem:[#allocation6 + $0x808] sm:$0xff] }
 0x6f5   :  { %14987 = vmatmul.mubr.bf16.vlgmr.msra.gmra.mrb[28].mxu1 %v21247_v17  ;;  %14826 = vmatpush1.bf16.msra.mxu0 %v17503_v12  ;;  %v12270_v12 = vld [vmem:[#allocation6 + $0x580] sm:$0xff] }
 0x6f6   :  { %14998 = vmatpush1.bf16.msra.mxu1 %v17505_v51  ;;  %14827 = vmatprep.subr.bf16.mxu0 %v17512_v1  ;;  %v12274_v51 = vld [vmem:[#allocation6 + $0x5a0] sm:$0xff]  ;;  %v12271_v1 = vld [vmem:[#allocation6 + $0x588] sm:$0xff] }
 0x6f7   :  { %14999 = vmatprep.subr.bf16.mxu1 %v17514_v30  ;;  %v12275_v30 = vld [vmem:[#allocation6 + $0x5a8] sm:$0xff]  ;;  %v17552_v2 = vcombine.high %v12270_v12, %v12274_v51  ;;  %v17551_v39 = vcombine.low %v12270_v12, %v12274_v51  ;;  %v12302_v51 = vld [vmem:[#allocation6 + $0x680] sm:$0xff] }
 0x6f8   :  { %v17554_v63 = vcombine.high %v12271_v1, %v12275_v30  ;;  %v17553_v7 = vcombine.low %v12271_v1, %v12275_v30  ;;  %v12306_v1 = vld [vmem:[#allocation6 + $0x6a0] sm:$0xff] }
 0x6f9   :  { %14828 = vmatpush1.bf16.msra.mxu0 %v17511_v20  ;;  %v12278_v20 = vld [vmem:[#allocation6 + $0x5c0] sm:$0xff] }
 0x6fa   :  { %15000 = vmatpush1.bf16.msra.mxu1 %v17513_v55  ;;  %14829 = vmatprep.subr.bf16.mxu0 %v17520_v22  ;;  %v12282_v55 = vld [vmem:[#allocation6 + $0x5e0] sm:$0xff]  ;;  %v12279_v22 = vld [vmem:[#allocation6 + $0x5c8] sm:$0xff] }
 0x6fb   :  { %15001 = vmatprep.subr.bf16.mxu1 %v17522_v41  ;;  %v12283_v41 = vld [vmem:[#allocation6 + $0x5e8] sm:$0xff]  ;;  %v17560_v23 = vcombine.high %v12278_v20, %v12282_v55  ;;  %v17559_v38 = vcombine.low %v12278_v20, %v12282_v55  ;;  %v17584_v20 = vcombine.high %v12302_v51, %v12306_v1 }
 0x6fc   :  { %v17562_v25 = vcombine.high %v12279_v22, %v12283_v41  ;;  %v17561_v57 = vcombine.low %v12279_v22, %v12283_v41  ;;  %v12310_v22 = vld [vmem:[#allocation6 + $0x6c0] sm:$0xff] }
 0x6fd   :  { %14830 = vmatpush1.bf16.msra.mxu0 %v17519_v42  ;;  %v12286_v42 = vld [vmem:[#allocation6 + $0x600] sm:$0xff] }
 0x6fe   :  { %15002 = vmatpush1.bf16.msra.mxu1 %v17521_v50  ;;  %14831 = vmatprep.subr.bf16.mxu0 %v17528_v8  ;;  %v12290_v50 = vld [vmem:[#allocation6 + $0x620] sm:$0xff]  ;;  %v12287_v8 = vld [vmem:[#allocation6 + $0x608] sm:$0xff] }
 0x6ff   :  { %15003 = vmatprep.subr.bf16.mxu1 %v17530_v53  ;;  %v12291_v53 = vld [vmem:[#allocation6 + $0x628] sm:$0xff]  ;;  %v17568_v13 = vcombine.high %v12286_v42, %v12290_v50  ;;  %v17567_v3 = vcombine.low %v12286_v42, %v12290_v50  ;;  %v12314_v41 = vld [vmem:[#allocation6 + $0x6e0] sm:$0xff] }
 0x700   :  { %v17570_v16 = vcombine.high %v12287_v8, %v12291_v53  ;;  %v17592_v42 = vcombine.high %v12310_v22, %v12314_v41 }
 0x701   :  { %14832 = vmatpush1.bf16.msra.mxu0 %v17527_v60  ;;  %v12294_v60 = vld [vmem:[#allocation6 + $0x640] sm:$0xff] }
 0x702   :  { %15004 = vmatpush1.bf16.msra.mxu1 %v17529_v4  ;;  %14833 = vmatprep.subr.bf16.mxu0 %v17536_v47  ;;  %v12298_v4 = vld [vmem:[#allocation6 + $0x660] sm:$0xff]  ;;  %v12295_v47 = vld [vmem:[#allocation6 + $0x648] sm:$0xff] }
 0x703   :  { %15005 = vmatprep.subr.bf16.mxu1 %v17538_v49  ;;  %v12299_v49 = vld [vmem:[#allocation6 + $0x668] sm:$0xff] }
 0x704   :  { %v17578_v12 = vcombine.high %v12295_v47, %v12299_v49 }
 0x705   :  { %14834 = vmatpush1.bf16.msra.mxu0 %v17535_v45  ;;  %v17569_v45 = vcombine.low %v12287_v8, %v12291_v53  ;;  %v12318_v8 = vld [vmem:[#allocation6 + $0x700] sm:$0xff] }
 0x706   :  { %15006 = vmatpush1.bf16.msra.mxu1 %v17537_v28  ;;  %14835 = vmatprep.subr.bf16.mxu0 %v17544_v11  ;;  %v17576_v28 = vcombine.high %v12294_v60, %v12298_v4  ;;  %v17631_v11 = vcombine.low %v21259_v59, %v21261_v46  ;;  %v12322_v53 = vld [vmem:[#allocation6 + $0x720] sm:$0xff] }
 0x707   :  { %15007 = vmatprep.subr.bf16.mxu1 %v17546_v34  ;;  %v21267_v34 = vld [vmem:[#allocation6 + $0x828] sm:$0xff] }
 0x708   :  { %v17633_v30 = vcombine.low %v21263_v27, %v21267_v34 }
 0x709   :  { %14836 = vmatpush1.bf16.msra.mxu0 %v17543_v35  ;;  %v12303_v35 = vld [vmem:[#allocation6 + $0x688] sm:$0xff] }
 0x70a   :  { %15008 = vmatpush1.bf16.msra.mxu1 %v17545_v43  ;;  %14837 = vmatprep.subr.bf16.mxu0 %v17552_v2  ;;  %v12307_v43 = vld [vmem:[#allocation6 + $0x6a8] sm:$0xff]  ;;  %v17575_v2 = vcombine.low %v12294_v60, %v12298_v4  ;;  %v17600_v60 = vcombine.high %v12318_v8, %v12322_v53 }
 0x70b   :  { %15009 = vmatprep.subr.bf16.mxu1 %v17554_v63  ;;  %v17577_v63 = vcombine.low %v12295_v47, %v12299_v49  ;;  %v17586_v55 = vcombine.high %v12303_v35, %v12307_v43  ;;  %v12326_v47 = vld [vmem:[#allocation6 + $0x740] sm:$0xff] }
 0x70c   :  { %v12330_v49 = vld [vmem:[#allocation6 + $0x760] sm:$0xff] }
 0x70d   :  { %14838 = vmatpush1.bf16.msra.mxu0 %v17551_v39  ;;  %v12311_v39 = vld [vmem:[#allocation6 + $0x6c8] sm:$0xff] }
 0x70e   :  { %15010 = vmatpush1.bf16.msra.mxu1 %v17553_v7  ;;  %14839 = vmatprep.subr.bf16.mxu0 %v17560_v23  ;;  %v12315_v7 = vld [vmem:[#allocation6 + $0x6e8] sm:$0xff]  ;;  %v17583_v23 = vcombine.low %v12302_v51, %v12306_v1  ;;  %v17608_v51 = vcombine.high %v12326_v47, %v12330_v49 }
 0x70f   :  { %15011 = vmatprep.subr.bf16.mxu1 %v17562_v25  ;;  %v17585_v25 = vcombine.low %v12303_v35, %v12307_v43  ;;  %v17594_v50 = vcombine.high %v12311_v39, %v12315_v7  ;;  %v12334_v35 = vld [vmem:[#allocation6 + $0x780] sm:$0xff] }
 0x710   :  { %v12338_v43 = vld [vmem:[#allocation6 + $0x7a0] sm:$0xff] }
 0x711   :  { %14840 = vmatpush1.bf16.msra.mxu0 %v17559_v38  ;;  %v12319_v38 = vld [vmem:[#allocation6 + $0x708] sm:$0xff] }
 0x712   :  { %15012 = vmatpush1.bf16.msra.mxu1 %v17561_v57  ;;  %14841 = vmatprep.subr.bf16.mxu0 %v17568_v13  ;;  %v12323_v57 = vld [vmem:[#allocation6 + $0x728] sm:$0xff]  ;;  %v17591_v13 = vcombine.low %v12310_v22, %v12314_v41  ;;  %v17616_v22 = vcombine.high %v12334_v35, %v12338_v43 }
 0x713   :  { %15013 = vmatprep.subr.bf16.mxu1 %v17570_v16  ;;  %v17593_v16 = vcombine.low %v12311_v39, %v12315_v7  ;;  %v17602_v4 = vcombine.high %v12319_v38, %v12323_v57  ;;  %v12342_v39 = vld [vmem:[#allocation6 + $0x7c0] sm:$0xff] }
 0x714   :  { %v12346_v7 = vld [vmem:[#allocation6 + $0x7e0] sm:$0xff] }
 0x715   :  { %14842 = vmatpush1.bf16.msra.mxu0 %v17567_v3  ;;  %v12327_v3 = vld [vmem:[#allocation6 + $0x748] sm:$0xff] }
 0x716   :  { %15014 = vmatpush1.bf16.msra.mxu1 %v17569_v45  ;;  %14843 = vmatprep.subr.bf16.mxu0 %v17576_v28  ;;  %v12331_v45 = vld [vmem:[#allocation6 + $0x768] sm:$0xff]  ;;  %v17599_v28 = vcombine.low %v12318_v8, %v12322_v53  ;;  %v17624_v8 = vcombine.high %v12342_v39, %v12346_v7 }
 0x717   :  { %15015 = vmatprep.subr.bf16.mxu1 %v17578_v12  ;;  %v17601_v12 = vcombine.low %v12319_v38, %v12323_v57  ;;  %v17610_v1 = vcombine.high %v12327_v3, %v12331_v45  ;;  %v17623_v38 = vcombine.low %v12342_v39, %v12346_v7 }
 0x719   :  { %14844 = vmatpush1.bf16.msra.mxu0 %v17575_v2  ;;  %v12335_v2 = vld [vmem:[#allocation6 + $0x788] sm:$0xff] }
 0x71a   :  { %15016 = vmatpush1.bf16.msra.mxu1 %v17577_v63  ;;  %14845 = vmatprep.subr.bf16.mxu0 %v17584_v20  ;;  %v12339_v63 = vld [vmem:[#allocation6 + $0x7a8] sm:$0xff]  ;;  %v17607_v20 = vcombine.low %v12326_v47, %v12330_v49  ;;  %v12056_v47 = vsub.s32 4, %v21203_v58 }
 0x71b   :  { %15017 = vmatprep.subr.bf16.mxu1 %v17586_v55  ;;  %v17609_v55 = vcombine.low %v12327_v3, %v12331_v45  ;;  %v17618_v41 = vcombine.high %v12335_v2, %v12339_v63 }
 0x71d   :  { %14846 = vmatpush1.bf16.msra.mxu0 %v17583_v23  ;;  %v12343_v23 = vld [vmem:[#allocation6 + $0x7c8] sm:$0xff] }
 0x71e   :  { %15018 = vmatpush1.bf16.msra.mxu1 %v17585_v25  ;;  %14847 = vmatprep.subr.bf16.mxu0 %v17592_v42  ;;  %v12347_v25 = vld [vmem:[#allocation6 + $0x7e8] sm:$0xff]  ;;  %v17615_v42 = vcombine.low %v12334_v35, %v12338_v43 }
 0x71f   :  { %15019 = vmatprep.subr.bf16.mxu1 %v17594_v50  ;;  %v17617_v50 = vcombine.low %v12335_v2, %v12339_v63  ;;  %v17626_v53 = vcombine.high %v12343_v23, %v12347_v25  ;;  %v17625_v57 = vcombine.low %v12343_v23, %v12347_v25 }
 0x721   :  { %14848 = vmatpush1.bf16.msra.mxu0 %v17591_v13  ;;  %v17632_v13 = vcombine.high %v21259_v59, %v21261_v46 }
 0x722   :  { %15020 = vmatpush1.bf16.msra.mxu1 %v17593_v16  ;;  %14849 = vmatprep.subr.bf16.mxu0 %v17600_v60  ;;  %v17634_v16 = vcombine.high %v21263_v27, %v21267_v34  ;;  %v12052_v60 = vsub.s32 3, %v21203_v58  ;;  %v12382_v34 = vld [vmem:[#allocation6 + $0x900] sm:$0xff] }
 0x723   :  { %15021 = vmatprep.subr.bf16.mxu1 %v17602_v4  ;;  %v12060_v4 = vsub.s32 5, %v21203_v58 }
 0x725   :  { %14850 = vmatpush1.bf16.msra.mxu0 %v17599_v28  ;;  %v12061_v35 = vrot.slane %v21206_v9, %v12060_v4  ;;  %v12363_v4 = vld [vmem:[#allocation6 + $0x868] sm:$0xff] }
 0x726   :  { %15022 = vmatpush1.bf16.msra.mxu1 %v17601_v12  ;;  %14851 = vmatprep.subr.bf16.mxu0 %v17608_v51  ;;  %v12064_v12 = vsub.s32 6, %v21203_v58  ;;  %v12053_v51 = vrot.slane %v21206_v9, %v12052_v60  ;;  %v12359_v60 = vld [vmem:[#allocation6 + $0x848] sm:$0xff] }
 0x727   :  { %15023 = vmatprep.subr.bf16.mxu1 %v17610_v1 }
 0x729   :  { %14852 = vmatpush1.bf16.msra.mxu0 %v17607_v20  ;;  %v21424_v20 = vmax.f32 %v20958_v14, %v21040_v48 }
 0x72a   :  { %15024 = vmatpush1.bf16.msra.mxu1 %v17609_v55  ;;  %14853 = vmatprep.subr.bf16.mxu0 %v17616_v22 }
 0x72b   :  { %15025 = vmatprep.subr.bf16.mxu1 %v17618_v41 }
 0x72d   :  { %14854 = vmatpush1.bf16.msra.mxu0 %v17615_v42 }
 0x72e   :  { %15026 = vmatpush1.bf16.msra.mxu1 %v17617_v50  ;;  %14855 = vmatprep.subr.bf16.mxu0 %v17624_v8  ;;  %v21428_v8 = vmax.f32 %v20966_v21, %v21056_v56 }
 0x72f   :  { %15027 = vmatprep.subr.bf16.mxu1 %v17626_v53 }
 0x731   :  { %14856 = vmatpush1.bf16.msra.mxu0 %v17623_v38 }
 0x732   :  { %15028 = vmatpush1.bf16.msra.mxu1 %v17625_v57  ;;  %14868 = vmatprep.subr.bf16.mxu0 %v17632_v13  ;;  %v12358_v57 = vld [vmem:[#allocation6 + $0x840] sm:$0xff] }
 0x733   :  { %15040 = vmatprep.subr.bf16.mxu1 %v17634_v16 }
 0x787   :  { %v11813_v49 = vpop.f32.mrb[24].mxu0  ;;  %v11985_v45 = vpop.f32.mrb[24].mxu1 }
 0x788   :  { %v12011_v3 = vmax.f32 %v21165_v5, %v11813_v49  ;;  %v11815_v28 = vpop.f32.mrb[25].mxu0  ;;  %v12013_v1 = vmax.f32 %v21167_v19, %v11985_v45  ;;  %v11987_v2 = vpop.f32.mrb[25].mxu1  ;;  %v12057_v5 = vrot.slane %v21206_v9, %v12056_v47  ;;  %v21425_v19 = vmax.f32 %v20995_v33, %v21116_v18  ;;  %v12366_v49 = vld [vmem:[#allocation6 + $0x880] sm:$0xff] }
 0x789   :  { %v12012_v43 = vmax.f32 %v21163_v0, %v11815_v28  ;;  %v11817_v63 = vpop.f32.mrb[26].mxu0  ;;  %v12014_v22 = vmax.f32 %v21210_v54, %v11987_v2  ;;  %v11989_v39 = vpop.f32.mrb[26].mxu1  ;;  %v21426_v0 = vmax.f32 %v20991_v31, %v21048_v52  ;;  %v21427_v54 = vmax.f32 %v20993_v32, %v21122_v24  ;;  %v21431_v32 = vld [vmem:[#allocation20_spill] sm:$0xff] }
 0x78a   :  { %v12025_v55 = vmax.f32 %v21424_v20, %v12011_v3  ;;  %v12018_v41 = vmax.f32 %v21173_v10, %v11817_v63  ;;  %v11819_v7 = vpop.f32.mrb[27].mxu0  ;;  %v12027_v23 = vmax.f32 %v21425_v19, %v12013_v1  ;;  %v12020_v42 = vmax.f32 %v21175_v26, %v11989_v39  ;;  %v11991_v48 = vpop.f32.mrb[27].mxu1  ;;  %v12370_v28 = vld [vmem:[#allocation6 + $0x8a0] sm:$0xff] }
 0x78b   :  { %v12026_v25 = vmax.f32 %v21426_v0, %v12012_v43  ;;  %v12019_v14 = vmax.f32 %v21171_v6, %v11819_v7  ;;  %v12028_v50 = vmax.f32 %v21427_v54, %v12014_v22  ;;  %v12065_v10 = vrot.slane %v21206_v9, %v12064_v12  ;;  %v12367_v12 = vld [vmem:[#allocation6 + $0x888] sm:$0xff]  ;;  %v12374_v63 = vld [vmem:[#allocation6 + $0x8c0] sm:$0xff] }
 0x78c   :  { %v12032_v33 = vmax.f32 %v21428_v8, %v12018_v41  ;;  %v12021_v18 = vmax.f32 %v21221_v44, %v11991_v48  ;;  %v21429_v31 = vmax.f32 %v21005_v40, %v21128_v29  ;;  %v21430_v6 = vmax.f32 %v21001_v36, %v21064_v62  ;;  %v12362_v44 = vld [vmem:[#allocation6 + $0x860] sm:$0xff]  ;;  %v12383_v22 = vld [vmem:[#allocation6 + $0x908] sm:$0xff] }
 0x78d   :  { %v12076_v53 = vadd.f32 %v12053_v51, %v12025_v55  ;;  %v21432_v24 = vmax.f32 %v21003_v37, %v21431_v32  ;;  %v12078_v13 = vadd.f32 %v12061_v35, %v12027_v23  ;;  %v12077_v21 = vadd.f32 %v12057_v5, %v12026_v25  ;;  %v12378_v20 = vld [vmem:[#allocation6 + $0x8e0] sm:$0xff]  ;;  %v12375_v55 = vld [vmem:[#allocation6 + $0x8c8] sm:$0xff] }
 0x78e   :  { %v12034_v52 = vmax.f32 %v21429_v31, %v12020_v42  ;;  %v12033_v26 = vmax.f32 %v21430_v6, %v12019_v14  ;;  %v12083_v38 = vadd.f32 %v12053_v51, %v12032_v33  ;;  %v12079_v40 = vadd.f32 %v12065_v10, %v12028_v50  ;;  %v12371_v51 = vld [vmem:[#allocation6 + $0x8a8] sm:$0xff]  ;;  %v12390_v0 = vld [vmem:[#allocation6 + $0x940] sm:$0xff] }
 0x78f   :  { %v12035_v9 = vmax.f32 %v21432_v24, %v12021_v18  ;;  %v17640_v37 = vcombine.high %v12358_v57, %v12362_v44  ;;  %v17642_v45 = vcombine.high %v12359_v60, %v12363_v4  ;;  %v17639_v1 = vcombine.low %v12358_v57, %v12362_v44  ;;  %v12387_v41 = vld [vmem:[#allocation6 + $0x928] sm:$0xff]  ;;  %v12394_v25 = vld [vmem:[#allocation6 + $0x960] sm:$0xff] }
 0x790   :  { %v12085_v56 = vadd.f32 %v12061_v35, %v12034_v52  ;;  %v12084_v16 = vadd.f32 %v12057_v5, %v12033_v26  ;;  %v21315_v29 = vpack.c.bf16 %v12083_v38, %v12076_v53  ;;  %v17641_v35 = vcombine.low %v12359_v60, %v12363_v4  ;;  %v12379_v5 = vld [vmem:[#allocation6 + $0x8e8] sm:$0xff]  ;;  %v12398_v8 = vld [vmem:[#allocation6 + $0x980] sm:$0xff] }
 0x791   :  { %v12086_v47 = vadd.f32 %v12065_v10, %v12035_v9  ;;  %v17648_v43 = vcombine.high %v12366_v49, %v12370_v28  ;;  %v17650_v2 = vcombine.high %v12367_v12, %v12371_v51  ;;  %v17647_v59 = vcombine.low %v12366_v49, %v12370_v28  ;;  %v12391_v42 = vld [vmem:[#allocation6 + $0x948] sm:$0xff]  ;;  %v12402_v33 = vld [vmem:[#allocation6 + $0x9a0] sm:$0xff] }
 0x792   :  { %v21317_v36 = vpack.c.bf16 %v12085_v56, %v12078_v13  ;;  %v21319_v62 = vpack.c.bf16 %v12084_v16, %v12077_v21  ;;  %14857 = vmatprep.mubr.bf16.mxu0 %v21315_v29  ;;  %15029 = vmatprep.mubr.bf16.mxu1 %v21315_v29  ;;  %v17649_v46 = vcombine.low %v12367_v12, %v12371_v51  ;;  %v12395_v14 = vld [vmem:[#allocation6 + $0x968] sm:$0xff]  ;;  %v12406_v38 = vld [vmem:[#allocation6 + $0x9c0] sm:$0xff] }
 0x793   :  { %v21321_v3 = vpack.c.bf16 %v12086_v47, %v12079_v40  ;;  %14858 = vmatmul.mubr.bf16.vlgmr.msra.gmra.mrb[28].mxu0 %v21249_v61  ;;  %15030 = vmatmul.mubr.bf16.vlgmr.msra.gmra.mrb[28].mxu1 %v21249_v61  ;;  %v17656_v27 = vcombine.high %v12374_v63, %v12378_v20  ;;  %v17655_v39 = vcombine.low %v12374_v63, %v12378_v20  ;;  %v12399_v18 = vld [vmem:[#allocation6 + $0x988] sm:$0xff]  ;;  %v12410_v32 = vld [vmem:[#allocation6 + $0x9e0] sm:$0xff] }
 0x794   :  { %14869 = vmatpush1.bf16.msra.mxu0 %v17631_v11  ;;  %15041 = vmatpush1.bf16.msra.mxu1 %v17633_v30  ;;  %v17658_v11 = vcombine.high %v12375_v55, %v12379_v5  ;;  %v12386_v30 = vld [vmem:[#allocation6 + $0x920] sm:$0xff]  ;;  %v17657_v7 = vcombine.low %v12375_v55, %v12379_v5  ;;  %v17666_v23 = vcombine.high %v12383_v22, %v12387_v41  ;;  %v12403_v31 = vld [vmem:[#allocation6 + $0x9a8] sm:$0xff] }
 0x795   :  { %14900 = vmatprep.mubr.bf16.mxu0 %v21317_v36  ;;  %15072 = vmatprep.mubr.bf16.mxu1 %v21317_v36  ;;  %v17664_v19 = vcombine.high %v12382_v34, %v12386_v30  ;;  %v17663_v48 = vcombine.low %v12382_v34, %v12386_v30  ;;  %v17665_v54 = vcombine.low %v12383_v22, %v12387_v41  ;;  %v12407_v24 = vld [vmem:[#allocation6 + $0x9c8] sm:$0xff]  ;;  %v12414_v16 = vld [vmem:[#allocation6 + $0xa00] sm:$0xff] }
 0x796   :  { %14870 = vmatprep.subr.bf16.mxu0 %v17640_v37  ;;  %15042 = vmatprep.subr.bf16.mxu1 %v17642_v45  ;;  %v17672_v50 = vcombine.high %v12390_v0, %v12394_v25  ;;  %v17674_v10 = vcombine.high %v12391_v42, %v12395_v14  ;;  %v17671_v52 = vcombine.low %v12390_v0, %v12394_v25  ;;  %v12411_v9 = vld [vmem:[#allocation6 + $0x9e8] sm:$0xff]  ;;  %v12418_v44 = vld [vmem:[#allocation6 + $0xa20] sm:$0xff] }
 0x797   :  { %v17673_v6 = vcombine.low %v12391_v42, %v12395_v14  ;;  %v17680_v26 = vcombine.high %v12398_v8, %v12402_v33  ;;  %v17682_v53 = vcombine.high %v12399_v18, %v12403_v31  ;;  %v17679_v57 = vcombine.low %v12398_v8, %v12402_v33  ;;  %v12415_v60 = vld [vmem:[#allocation6 + $0xa08] sm:$0xff]  ;;  %v12422_v45 = vld [vmem:[#allocation6 + $0xa40] sm:$0xff] }
 0x798   :  { %14871 = vmatpush1.bf16.msra.mxu0 %v17639_v1  ;;  %15043 = vmatpush1.bf16.msra.mxu1 %v17641_v35  ;;  %v17681_v13 = vcombine.low %v12399_v18, %v12403_v31  ;;  %v17688_v21 = vcombine.high %v12406_v38, %v12410_v32  ;;  %v17690_v56 = vcombine.high %v12407_v24, %v12411_v9  ;;  %v12419_v4 = vld [vmem:[#allocation6 + $0xa28] sm:$0xff]  ;;  %v12426_v28 = vld [vmem:[#allocation6 + $0xa60] sm:$0xff] }
 0x799   :  { %14872 = vmatprep.subr.bf16.mxu0 %v17648_v43  ;;  %15044 = vmatprep.subr.bf16.mxu1 %v17650_v2  ;;  %v17687_v40 = vcombine.low %v12406_v38, %v12410_v32  ;;  %v17689_v47 = vcombine.low %v12407_v24, %v12411_v9  ;;  %v17696_v49 = vcombine.high %v12414_v16, %v12418_v44  ;;  %v12423_v12 = vld [vmem:[#allocation6 + $0xa48] sm:$0xff]  ;;  %v12430_v63 = vld [vmem:[#allocation6 + $0xa80] sm:$0xff] }
 0x79a   :  { %v17698_v37 = vcombine.high %v12415_v60, %v12419_v4  ;;  %v12427_v51 = vld [vmem:[#allocation6 + $0xa68] sm:$0xff]  ;;  %v17695_v1 = vcombine.low %v12414_v16, %v12418_v44  ;;  %v17697_v35 = vcombine.low %v12415_v60, %v12419_v4  ;;  %v17704_v43 = vcombine.high %v12422_v45, %v12426_v28  ;;  %v12434_v20 = vld [vmem:[#allocation6 + $0xaa0] sm:$0xff] }
 0x79b   :  { %v17706_v2 = vcombine.high %v12423_v12, %v12427_v51  ;;  %v12431_v55 = vld [vmem:[#allocation6 + $0xa88] sm:$0xff]  ;;  %v12438_v34 = vld [vmem:[#allocation6 + $0xac0] sm:$0xff] }
 0x79c   :  { %14873 = vmatpush1.bf16.msra.mxu0 %v17647_v59  ;;  %15045 = vmatpush1.bf16.msra.mxu1 %v17649_v46  ;;  %v12435_v5 = vld [vmem:[#allocation6 + $0xaa8] sm:$0xff]  ;;  %v17703_v59 = vcombine.low %v12422_v45, %v12426_v28  ;;  %v17705_v46 = vcombine.low %v12423_v12, %v12427_v51  ;;  %v12442_v30 = vld [vmem:[#allocation6 + $0xae0] sm:$0xff] }
 0x79d   :  { %14874 = vmatprep.subr.bf16.mxu0 %v17656_v27  ;;  %15046 = vmatprep.subr.bf16.mxu1 %v17658_v11  ;;  %v17712_v27 = vcombine.high %v12430_v63, %v12434_v20  ;;  %v17714_v11 = vcombine.high %v12431_v55, %v12435_v5  ;;  %v12439_v22 = vld [vmem:[#allocation6 + $0xac8] sm:$0xff]  ;;  %v12446_v0 = vld [vmem:[#allocation6 + $0xb00] sm:$0xff] }
 0x79e   :  { %v12443_v41 = vld [vmem:[#allocation6 + $0xae8] sm:$0xff]  ;;  %v12450_v25 = vld [vmem:[#allocation6 + $0xb20] sm:$0xff] }
 0x79f   :  { %v12447_v42 = vld [vmem:[#allocation6 + $0xb08] sm:$0xff]  ;;  %v12454_v8 = vld [vmem:[#allocation6 + $0xb40] sm:$0xff] }
 0x7a0   :  { %14875 = vmatpush1.bf16.msra.mxu0 %v17655_v39  ;;  %15047 = vmatpush1.bf16.msra.mxu1 %v17657_v7  ;;  %v17711_v39 = vcombine.low %v12430_v63, %v12434_v20  ;;  %v17713_v7 = vcombine.low %v12431_v55, %v12435_v5  ;;  %v12451_v14 = vld [vmem:[#allocation6 + $0xb28] sm:$0xff]  ;;  %v12458_v33 = vld [vmem:[#allocation6 + $0xb60] sm:$0xff] }
 0x7a1   :  { %14876 = vmatprep.subr.bf16.mxu0 %v17664_v19  ;;  %15048 = vmatprep.subr.bf16.mxu1 %v17666_v23  ;;  %v17720_v19 = vcombine.high %v12438_v34, %v12442_v30  ;;  %v17722_v23 = vcombine.high %v12439_v22, %v12443_v41  ;;  %v12455_v18 = vld [vmem:[#allocation6 + $0xb48] sm:$0xff]  ;;  %v12462_v38 = vld [vmem:[#allocation6 + $0xb80] sm:$0xff] }
 0x7a2   :  { %v12459_v31 = vld [vmem:[#allocation6 + $0xb68] sm:$0xff]  ;;  %v12466_v32 = vld [vmem:[#allocation6 + $0xba0] sm:$0xff] }
 0x7a3   :  { %v12463_v24 = vld [vmem:[#allocation6 + $0xb88] sm:$0xff]  ;;  %v12470_v16 = vld [vmem:[#allocation6 + $0xbc0] sm:$0xff] }
 0x7a4   :  { %14877 = vmatpush1.bf16.msra.mxu0 %v17663_v48  ;;  %15049 = vmatpush1.bf16.msra.mxu1 %v17665_v54  ;;  %v17719_v48 = vcombine.low %v12438_v34, %v12442_v30  ;;  %v17721_v54 = vcombine.low %v12439_v22, %v12443_v41  ;;  %v12467_v9 = vld [vmem:[#allocation6 + $0xba8] sm:$0xff]  ;;  %v12474_v44 = vld [vmem:[#allocation6 + $0xbe0] sm:$0xff] }
 0x7a5   :  { %14878 = vmatprep.subr.bf16.mxu0 %v17672_v50  ;;  %15050 = vmatprep.subr.bf16.mxu1 %v17674_v10  ;;  %v17728_v50 = vcombine.high %v12446_v0, %v12450_v25  ;;  %v17730_v10 = vcombine.high %v12447_v42, %v12451_v14  ;;  %v12471_v60 = vld [vmem:[#allocation6 + $0xbc8] sm:$0xff]  ;;  %v12478_v45 = vld [vmem:[#allocation6 + $0xc00] sm:$0xff] }
 0x7a6   :  { %v12475_v4 = vld [vmem:[#allocation6 + $0xbe8] sm:$0xff]  ;;  %v12482_v28 = vld [vmem:[#allocation6 + $0xc20] sm:$0xff] }
 0x7a7   :  { %v12479_v12 = vld [vmem:[#allocation6 + $0xc08] sm:$0xff]  ;;  %v12486_v63 = vld [vmem:[#allocation6 + $0xc40] sm:$0xff] }
 0x7a8   :  { %14879 = vmatpush1.bf16.msra.mxu0 %v17671_v52  ;;  %15051 = vmatpush1.bf16.msra.mxu1 %v17673_v6  ;;  %v17727_v52 = vcombine.low %v12446_v0, %v12450_v25  ;;  %v17729_v6 = vcombine.low %v12447_v42, %v12451_v14  ;;  %v12483_v51 = vld [vmem:[#allocation6 + $0xc28] sm:$0xff]  ;;  %v12490_v20 = vld [vmem:[#allocation6 + $0xc60] sm:$0xff] }
 0x7a9   :  { %14880 = vmatprep.subr.bf16.mxu0 %v17680_v26  ;;  %15052 = vmatprep.subr.bf16.mxu1 %v17682_v53  ;;  %v17736_v26 = vcombine.high %v12454_v8, %v12458_v33  ;;  %v17738_v53 = vcombine.high %v12455_v18, %v12459_v31  ;;  %v12487_v55 = vld [vmem:[#allocation6 + $0xc48] sm:$0xff]  ;;  %v12494_v34 = vld [vmem:[#allocation6 + $0xc80] sm:$0xff] }
 0x7aa   :  { %v12491_v5 = vld [vmem:[#allocation6 + $0xc68] sm:$0xff]  ;;  %v12498_v30 = vld [vmem:[#allocation6 + $0xca0] sm:$0xff] }
 0x7ab   :  { %v12495_v22 = vld [vmem:[#allocation6 + $0xc88] sm:$0xff]  ;;  %v12502_v0 = vld [vmem:[#allocation6 + $0xcc0] sm:$0xff] }
 0x7ac   :  { %14881 = vmatpush1.bf16.msra.mxu0 %v17679_v57  ;;  %15053 = vmatpush1.bf16.msra.mxu1 %v17681_v13  ;;  %v17735_v57 = vcombine.low %v12454_v8, %v12458_v33  ;;  %v17737_v13 = vcombine.low %v12455_v18, %v12459_v31  ;;  %v12499_v41 = vld [vmem:[#allocation6 + $0xca8] sm:$0xff]  ;;  %v12506_v25 = vld [vmem:[#allocation6 + $0xce0] sm:$0xff] }
 0x7ad   :  { %14882 = vmatprep.subr.bf16.mxu0 %v17688_v21  ;;  %15054 = vmatprep.subr.bf16.mxu1 %v17690_v56  ;;  %v17744_v21 = vcombine.high %v12462_v38, %v12466_v32  ;;  %v17746_v56 = vcombine.high %v12463_v24, %v12467_v9  ;;  %v12503_v42 = vld [vmem:[#allocation6 + $0xcc8] sm:$0xff]  ;;  %v12510_v33 = vld [vmem:[#allocation6 + $0xd00] sm:$0xff] }
 0x7ae   :  { %v12507_v14 = vld [vmem:[#allocation6 + $0xce8] sm:$0xff]  ;;  %v12514_v18 = vld [vmem:[#allocation6 + $0xd20] sm:$0xff] }
 0x7af   :  { %v17786_v8 = vcombine.high %v12503_v42, %v12507_v14  ;;  %v12511_v31 = vld [vmem:[#allocation6 + $0xd08] sm:$0xff] }
 0x7b0   :  { %14883 = vmatpush1.bf16.msra.mxu0 %v17687_v40  ;;  %15055 = vmatpush1.bf16.msra.mxu1 %v17689_v47  ;;  %v17743_v40 = vcombine.low %v12462_v38, %v12466_v32  ;;  %v17745_v47 = vcombine.low %v12463_v24, %v12467_v9  ;;  %v12518_v32 = vld [vmem:[#allocation6 + $0xd40] sm:$0xff]  ;;  %v12519_v9 = vld [vmem:[#allocation6 + $0xd48] sm:$0xff] }
 0x7b1   :  { %14884 = vmatprep.subr.bf16.mxu0 %v17696_v49  ;;  %15056 = vmatprep.subr.bf16.mxu1 %v17698_v37  ;;  %v17752_v49 = vcombine.high %v12470_v16, %v12474_v44  ;;  %v17754_v37 = vcombine.high %v12471_v60, %v12475_v4  ;;  %v12522_v24 = vld [vmem:[#allocation6 + $0xd60] sm:$0xff] }
 0x7b4   :  { %14885 = vmatpush1.bf16.msra.mxu0 %v17695_v1  ;;  %15057 = vmatpush1.bf16.msra.mxu1 %v17697_v35  ;;  %v17751_v1 = vcombine.low %v12470_v16, %v12474_v44  ;;  %v17753_v35 = vcombine.low %v12471_v60, %v12475_v4  ;;  %v12526_v44 = vld [vmem:[#allocation6 + $0xd80] sm:$0xff]  ;;  %v12527_v4 = vld [vmem:[#allocation6 + $0xd88] sm:$0xff] }
 0x7b5   :  { %14886 = vmatprep.subr.bf16.mxu0 %v17704_v43  ;;  %15058 = vmatprep.subr.bf16.mxu1 %v17706_v2  ;;  %v17760_v43 = vcombine.high %v12478_v45, %v12482_v28  ;;  %v17762_v2 = vcombine.high %v12479_v12, %v12483_v51  ;;  %v12530_v60 = vld [vmem:[#allocation6 + $0xda0] sm:$0xff] }
 0x7b8   :  { %14887 = vmatpush1.bf16.msra.mxu0 %v17703_v59  ;;  %15059 = vmatpush1.bf16.msra.mxu1 %v17705_v46  ;;  %v17759_v59 = vcombine.low %v12478_v45, %v12482_v28  ;;  %v17761_v46 = vcombine.low %v12479_v12, %v12483_v51  ;;  %v12534_v28 = vld [vmem:[#allocation6 + $0xdc0] sm:$0xff]  ;;  %v12535_v51 = vld [vmem:[#allocation6 + $0xdc8] sm:$0xff] }
 0x7b9   :  { %14888 = vmatprep.subr.bf16.mxu0 %v17712_v27  ;;  %15060 = vmatprep.subr.bf16.mxu1 %v17714_v11  ;;  %v17768_v27 = vcombine.high %v12486_v63, %v12490_v20  ;;  %v17770_v11 = vcombine.high %v12487_v55, %v12491_v5  ;;  %v12538_v12 = vld [vmem:[#allocation6 + $0xde0] sm:$0xff] }
 0x7bc   :  { %14889 = vmatpush1.bf16.msra.mxu0 %v17711_v39  ;;  %15061 = vmatpush1.bf16.msra.mxu1 %v17713_v7  ;;  %v17767_v39 = vcombine.low %v12486_v63, %v12490_v20  ;;  %v17769_v7 = vcombine.low %v12487_v55, %v12491_v5  ;;  %v12096_v20 = vld [vmem:[#allocation6 + $0x10] sm:$0xff]  ;;  %v12097_v5 = vld [vmem:[#allocation6 + $0x18] sm:$0xff] }
 0x7bd   :  { %14890 = vmatprep.subr.bf16.mxu0 %v17720_v19  ;;  %15062 = vmatprep.subr.bf16.mxu1 %v17722_v23  ;;  %v17776_v19 = vcombine.high %v12494_v34, %v12498_v30  ;;  %v17778_v23 = vcombine.high %v12495_v22, %v12499_v41  ;;  %v12100_v55 = vld [vmem:[#allocation6 + $0x30] sm:$0xff] }
 0x7c0   :  { %14891 = vmatpush1.bf16.msra.mxu0 %v17719_v48  ;;  %15063 = vmatpush1.bf16.msra.mxu1 %v17721_v54  ;;  %v21433_v48 = vmov 0   ;;  %v17775_v54 = vcombine.low %v12494_v34, %v12498_v30  ;;  %v12104_v30 = vld [vmem:[#allocation6 + $0x50] sm:$0xff] }
 0x7c1   :  { %14892 = vmatprep.subr.bf16.mxu0 %v17728_v50  ;;  %15064 = vmatprep.subr.bf16.mxu1 %v17730_v10  ;;  %v17777_v50 = vcombine.low %v12495_v22, %v12499_v41  ;;  %v17784_v10 = vcombine.high %v12502_v0, %v12506_v25  ;;  %v12108_v22 = vld [vmem:[#allocation6 + $0x70] sm:$0xff]  ;;  %v12105_v41 = vld [vmem:[#allocation6 + $0x58] sm:$0xff] }
 0x7c4   :  { %14893 = vmatpush1.bf16.msra.mxu0 %v17727_v52  ;;  %15065 = vmatpush1.bf16.msra.mxu1 %v17729_v6  ;;  %v12515_v52 = vld [vmem:[#allocation6 + $0xd28] sm:$0xff]  ;;  %v17783_v6 = vcombine.low %v12502_v0, %v12506_v25  ;;  %v12112_v25 = vld [vmem:[#allocation6 + $0x90] sm:$0xff] }
 0x7c5   :  { %14894 = vmatprep.subr.bf16.mxu0 %v17736_v26  ;;  %15066 = vmatprep.subr.bf16.mxu1 %v17738_v53  ;;  %v17785_v26 = vcombine.low %v12503_v42, %v12507_v14  ;;  %v17792_v53 = vcombine.high %v12510_v33, %v12514_v18  ;;  %v17794_v38 = vcombine.high %v12511_v31, %v12515_v52  ;;  %v12116_v42 = vld [vmem:[#allocation6 + $0xb0] sm:$0xff]  ;;  %v12113_v14 = vld [vmem:[#allocation6 + $0x98] sm:$0xff] }
 0x7c8   :  { %14895 = vmatpush1.bf16.msra.mxu0 %v17735_v57  ;;  %15067 = vmatpush1.bf16.msra.mxu1 %v17737_v13  ;;  %v12523_v57 = vld [vmem:[#allocation6 + $0xd68] sm:$0xff]  ;;  %v17791_v13 = vcombine.low %v12510_v33, %v12514_v18  ;;  %v12120_v18 = vld [vmem:[#allocation6 + $0xd0] sm:$0xff] }
 0x7c9   :  { %14896 = vmatprep.subr.bf16.mxu0 %v17744_v21  ;;  %15068 = vmatprep.subr.bf16.mxu1 %v17746_v56  ;;  %v17793_v21 = vcombine.low %v12511_v31, %v12515_v52  ;;  %v17800_v56 = vcombine.high %v12518_v32, %v12522_v24  ;;  %v17802_v16 = vcombine.high %v12519_v9, %v12523_v57  ;;  %v12124_v31 = vld [vmem:[#allocation6 + $0xf0] sm:$0xff]  ;;  %v12121_v52 = vld [vmem:[#allocation6 + $0xd8] sm:$0xff] }
 0x7cc   :  { %14897 = vmatpush1.bf16.msra.mxu0 %v17743_v40  ;;  %15069 = vmatpush1.bf16.msra.mxu1 %v17745_v47  ;;  %v12531_v40 = vld [vmem:[#allocation6 + $0xda8] sm:$0xff]  ;;  %v17799_v47 = vcombine.low %v12518_v32, %v12522_v24  ;;  %v12128_v24 = vld [vmem:[#allocation6 + $0x110] sm:$0xff] }
 0x7cd   :  { %14898 = vmatprep.subr.bf16.mxu0 %v17752_v49  ;;  %15070 = vmatprep.subr.bf16.mxu1 %v17754_v37  ;;  %v17801_v49 = vcombine.low %v12519_v9, %v12523_v57  ;;  %v17808_v37 = vcombine.high %v12526_v44, %v12530_v60  ;;  %v17810_v45 = vcombine.high %v12527_v4, %v12531_v40  ;;  %v12132_v9 = vld [vmem:[#allocation6 + $0x130] sm:$0xff]  ;;  %v12133_v57 = vld [vmem:[#allocation6 + $0x138] sm:$0xff] }
 0x7d0   :  { %14899 = vmatpush1.bf16.msra.mxu0 %v17751_v1  ;;  %15071 = vmatpush1.bf16.msra.mxu1 %v17753_v35  ;;  %v12539_v1 = vld [vmem:[#allocation6 + $0xde8] sm:$0xff]  ;;  %v17807_v35 = vcombine.low %v12526_v44, %v12530_v60  ;;  %v12136_v44 = vld [vmem:[#allocation6 + $0x150] sm:$0xff] }
 0x7d1   :  { %14911 = vmatprep.subr.bf16.mxu0 %v17760_v43  ;;  %15083 = vmatprep.subr.bf16.mxu1 %v17762_v2  ;;  %v17809_v43 = vcombine.low %v12527_v4, %v12531_v40  ;;  %v17816_v2 = vcombine.high %v12534_v28, %v12538_v12  ;;  %v17818_v63 = vcombine.high %v12535_v51, %v12539_v1  ;;  %v12140_v60 = vld [vmem:[#allocation6 + $0x170] sm:$0xff]  ;;  %v12137_v4 = vld [vmem:[#allocation6 + $0x158] sm:$0xff] }
 0x7d2   :  { %v12141_v40 = vld [vmem:[#allocation6 + $0x178] sm:$0xff] }
 0x7d3   :  { %14901 = vmatmul.mubr.bf16.vlgmr.msra.gmra.mrb[28].mxu0 %v21319_v62  ;;  %15073 = vmatmul.mubr.bf16.vlgmr.msra.gmra.mrb[28].mxu1 %v21319_v62 }
 0x7d4   :  { %14912 = vmatpush1.bf16.msra.mxu0 %v17759_v59  ;;  %15084 = vmatpush1.bf16.msra.mxu1 %v17761_v46  ;;  %v12101_v59 = vld [vmem:[#allocation6 + $0x38] sm:$0xff]  ;;  %v17815_v46 = vcombine.low %v12534_v28, %v12538_v12  ;;  %v12144_v28 = vld [vmem:[#allocation6 + $0x190] sm:$0xff] }
 0x7d5   :  { %14913 = vmatprep.subr.bf16.mxu0 %v17768_v27  ;;  %15085 = vmatprep.subr.bf16.mxu1 %v17770_v11  ;;  %v17817_v27 = vcombine.low %v12535_v51, %v12539_v1  ;;  %v17380_v11 = vcombine.high %v12096_v20, %v12100_v55  ;;  %v17382_v34 = vcombine.high %v12097_v5, %v12101_v59  ;;  %v12148_v12 = vld [vmem:[#allocation6 + $0x1b0] sm:$0xff]  ;;  %v12145_v51 = vld [vmem:[#allocation6 + $0x198] sm:$0xff] }
 0x7d6   :  { %14943 = vmatprep.mubr.bf16.mxu0 %v21433_v48  ;;  %15115 = vmatprep.mubr.bf16.mxu1 %v21433_v48  ;;  %v12149_v1 = vld [vmem:[#allocation6 + $0x1b8] sm:$0xff] }
 0x7d8   :  { %14914 = vmatpush1.bf16.msra.mxu0 %v17767_v39  ;;  %15086 = vmatpush1.bf16.msra.mxu1 %v17769_v7  ;;  %v12109_v39 = vld [vmem:[#allocation6 + $0x78] sm:$0xff]  ;;  %v17379_v7 = vcombine.low %v12096_v20, %v12100_v55  ;;  %v12152_v20 = vld [vmem:[#allocation6 + $0x1d0] sm:$0xff] }
 0x7d9   :  { %14915 = vmatprep.subr.bf16.mxu0 %v17776_v19  ;;  %15087 = vmatprep.subr.bf16.mxu1 %v17778_v23  ;;  %v17381_v19 = vcombine.low %v12097_v5, %v12101_v59  ;;  %v17388_v23 = vcombine.high %v12104_v30, %v12108_v22  ;;  %v17390_v0 = vcombine.high %v12105_v41, %v12109_v39  ;;  %v12156_v55 = vld [vmem:[#allocation6 + $0x1f0] sm:$0xff]  ;;  %v12153_v5 = vld [vmem:[#allocation6 + $0x1d8] sm:$0xff] }
 0x7da   :  { %v12157_v59 = vld [vmem:[#allocation6 + $0x1f8] sm:$0xff] }
 0x7dc   :  { %14916 = vmatpush1.bf16.msra.mxu0 %v17775_v54  ;;  %15088 = vmatpush1.bf16.msra.mxu1 %v17777_v50  ;;  %v12117_v54 = vld [vmem:[#allocation6 + $0xb8] sm:$0xff]  ;;  %v17387_v50 = vcombine.low %v12104_v30, %v12108_v22  ;;  %v12160_v30 = vld [vmem:[#allocation6 + $0x210] sm:$0xff] }
 0x7dd   :  { %14917 = vmatprep.subr.bf16.mxu0 %v17784_v10  ;;  %15089 = vmatprep.subr.bf16.mxu1 %v17786_v8  ;;  %v17389_v10 = vcombine.low %v12105_v41, %v12109_v39  ;;  %v17396_v8 = vcombine.high %v12112_v25, %v12116_v42  ;;  %v17398_v33 = vcombine.high %v12113_v14, %v12117_v54  ;;  %v12164_v22 = vld [vmem:[#allocation6 + $0x230] sm:$0xff]  ;;  %v12161_v41 = vld [vmem:[#allocation6 + $0x218] sm:$0xff] }
 0x7de   :  { %v12165_v39 = vld [vmem:[#allocation6 + $0x238] sm:$0xff] }
 0x7e0   :  { %14918 = vmatpush1.bf16.msra.mxu0 %v17783_v6  ;;  %15090 = vmatpush1.bf16.msra.mxu1 %v17785_v26  ;;  %v12125_v6 = vld [vmem:[#allocation6 + $0xf8] sm:$0xff]  ;;  %v17395_v26 = vcombine.low %v12112_v25, %v12116_v42  ;;  %v12168_v25 = vld [vmem:[#allocation6 + $0x250] sm:$0xff] }
 0x7e1   :  { %14919 = vmatprep.subr.bf16.mxu0 %v17792_v53  ;;  %15091 = vmatprep.subr.bf16.mxu1 %v17794_v38  ;;  %v17397_v53 = vcombine.low %v12113_v14, %v12117_v54  ;;  %v17404_v38 = vcombine.high %v12120_v18, %v12124_v31  ;;  %v17406_v32 = vcombine.high %v12121_v52, %v12125_v6  ;;  %v12172_v42 = vld [vmem:[#allocation6 + $0x270] sm:$0xff]  ;;  %v12169_v14 = vld [vmem:[#allocation6 + $0x258] sm:$0xff] }
 0x7e2   :  { %v12173_v54 = vld [vmem:[#allocation6 + $0x278] sm:$0xff] }
 0x7e4   :  { %14920 = vmatpush1.bf16.msra.mxu0 %v17791_v13  ;;  %15092 = vmatpush1.bf16.msra.mxu1 %v17793_v21  ;;  %v17403_v13 = vcombine.low %v12120_v18, %v12124_v31  ;;  %v17405_v21 = vcombine.low %v12121_v52, %v12125_v6  ;;  %v12176_v18 = vld [vmem:[#allocation6 + $0x290] sm:$0xff]  ;;  %v12177_v52 = vld [vmem:[#allocation6 + $0x298] sm:$0xff] }
 0x7e5   :  { %14921 = vmatprep.subr.bf16.mxu0 %v17800_v56  ;;  %15093 = vmatprep.subr.bf16.mxu1 %v17802_v16  ;;  %v17412_v56 = vcombine.high %v12128_v24, %v12132_v9  ;;  %v12180_v31 = vld [vmem:[#allocation6 + $0x2b0] sm:$0xff]  ;;  %v12181_v6 = vld [vmem:[#allocation6 + $0x2b8] sm:$0xff] }
 0x7e8   :  { %14922 = vmatpush1.bf16.msra.mxu0 %v17799_v47  ;;  %15094 = vmatpush1.bf16.msra.mxu1 %v17801_v49  ;;  %v17411_v47 = vcombine.low %v12128_v24, %v12132_v9  ;;  %v12184_v24 = vld [vmem:[#allocation6 + $0x2d0] sm:$0xff] }
 0x7e9   :  { %14923 = vmatprep.subr.bf16.mxu0 %v17808_v37  ;;  %15095 = vmatprep.subr.bf16.mxu1 %v17810_v45  ;;  %v17420_v37 = vcombine.high %v12136_v44, %v12140_v60  ;;  %v17422_v45 = vcombine.high %v12137_v4, %v12141_v40  ;;  %v12188_v9 = vld [vmem:[#allocation6 + $0x2f0] sm:$0xff] }
 0x7ec   :  { %14924 = vmatpush1.bf16.msra.mxu0 %v17807_v35  ;;  %15096 = vmatpush1.bf16.msra.mxu1 %v17809_v43  ;;  %v17419_v35 = vcombine.low %v12136_v44, %v12140_v60  ;;  %v17421_v43 = vcombine.low %v12137_v4, %v12141_v40  ;;  %v12192_v44 = vld [vmem:[#allocation6 + $0x310] sm:$0xff]  ;;  %v12193_v4 = vld [vmem:[#allocation6 + $0x318] sm:$0xff] }
 0x7ed   :  { %14925 = vmatprep.subr.bf16.mxu0 %v17816_v2  ;;  %15097 = vmatprep.subr.bf16.mxu1 %v17818_v63  ;;  %v17428_v2 = vcombine.high %v12144_v28, %v12148_v12  ;;  %v17430_v63 = vcombine.high %v12145_v51, %v12149_v1  ;;  %v12196_v60 = vld [vmem:[#allocation6 + $0x330] sm:$0xff]  ;;  %v12197_v40 = vld [vmem:[#allocation6 + $0x338] sm:$0xff] }
 0x7f0   :  { %14926 = vmatpush1.bf16.msra.mxu0 %v17815_v46  ;;  %15098 = vmatpush1.bf16.msra.mxu1 %v17817_v27  ;;  %v17427_v46 = vcombine.low %v12144_v28, %v12148_v12  ;;  %v17429_v27 = vcombine.low %v12145_v51, %v12149_v1  ;;  %v12200_v28 = vld [vmem:[#allocation6 + $0x350] sm:$0xff]  ;;  %v12201_v51 = vld [vmem:[#allocation6 + $0x358] sm:$0xff] }
 0x7f1   :  { %15126 = vmatprep.subr.bf16.mxu0 %v17380_v11  ;;  %15298 = vmatprep.subr.bf16.mxu1 %v17382_v34  ;;  %v17436_v11 = vcombine.high %v12152_v20, %v12156_v55  ;;  %v17438_v34 = vcombine.high %v12153_v5, %v12157_v59  ;;  %v12204_v12 = vld [vmem:[#allocation6 + $0x370] sm:$0xff]  ;;  %v12205_v1 = vld [vmem:[#allocation6 + $0x378] sm:$0xff] }
 0x7f3   :  { %14944 = vmatmul.mubr.bf16.vlgmr.msra.gmra.mrb[28].mxu0 %v21321_v3  ;;  %15116 = vmatmul.mubr.bf16.vlgmr.msra.gmra.mrb[28].mxu1 %v21321_v3 }
 0x7f4   :  { %15127 = vmatpush1.bf16.msra.mxu0 %v17379_v7  ;;  %15158 = vmatprep.mubr.bf16.mxu0 %v21245_v15  ;;  %v17435_v7 = vcombine.low %v12152_v20, %v12156_v55  ;;  %v12208_v20 = vld [vmem:[#allocation6 + $0x390] sm:$0xff] }
 0x7f5   :  { %15299 = vmatpush1.bf16.msra.mxu1 %v17381_v19  ;;  %15330 = vmatprep.mubr.bf16.mxu1 %v21245_v15  ;;  %v12129_v15 = vld [vmem:[#allocation6 + $0x118] sm:$0xff]  ;;  %v17437_v19 = vcombine.low %v12153_v5, %v12157_v59  ;;  %v12212_v55 = vld [vmem:[#allocation6 + $0x3b0] sm:$0xff] }
 0x7f6   :  { %15128 = vmatprep.subr.bf16.mxu0 %v17388_v23  ;;  %15300 = vmatprep.subr.bf16.mxu1 %v17390_v0  ;;  %v17414_v16 = vcombine.high %v12129_v15, %v12133_v57  ;;  %v17413_v49 = vcombine.low %v12129_v15, %v12133_v57  ;;  %v17444_v23 = vcombine.high %v12160_v30, %v12164_v22  ;;  %v12185_v15 = vld [vmem:[#allocation6 + $0x2d8] sm:$0xff] }
 0x7f7   :  { %v17446_v0 = vcombine.high %v12161_v41, %v12165_v39  ;;  %v12189_v57 = vld [vmem:[#allocation6 + $0x2f8] sm:$0xff] }
 0x7f8   :  { %15129 = vmatpush1.bf16.msra.mxu0 %v17387_v50  ;;  %v17443_v50 = vcombine.low %v12160_v30, %v12164_v22  ;;  %v12209_v5 = vld [vmem:[#allocation6 + $0x398] sm:$0xff]  ;;  %v12216_v30 = vld [vmem:[#allocation6 + $0x3d0] sm:$0xff] }
 0x7f9   :  { %15301 = vmatpush1.bf16.msra.mxu1 %v17389_v10  ;;  %15130 = vmatprep.subr.bf16.mxu0 %v17396_v8  ;;  %v17445_v10 = vcombine.low %v12161_v41, %v12165_v39  ;;  %v17452_v8 = vcombine.high %v12168_v25, %v12172_v42  ;;  %v12213_v59 = vld [vmem:[#allocation6 + $0x3b8] sm:$0xff]  ;;  %v12220_v22 = vld [vmem:[#allocation6 + $0x3f0] sm:$0xff] }
 0x7fa   :  { %15302 = vmatprep.subr.bf16.mxu1 %v17398_v33  ;;  %v17454_v33 = vcombine.high %v12169_v14, %v12173_v54  ;;  %v12217_v41 = vld [vmem:[#allocation6 + $0x3d8] sm:$0xff] }
 0x7fb   :  { %v12221_v39 = vld [vmem:[#allocation6 + $0x3f8] sm:$0xff] }
 0x7fc   :  { %15131 = vmatpush1.bf16.msra.mxu0 %v17395_v26  ;;  %v17451_v26 = vcombine.low %v12168_v25, %v12172_v42  ;;  %v12224_v25 = vld [vmem:[#allocation6 + $0x410] sm:$0xff] }
 0x7fd   :  { %15303 = vmatpush1.bf16.msra.mxu1 %v17397_v53  ;;  %15132 = vmatprep.subr.bf16.mxu0 %v17404_v38  ;;  %v17453_v53 = vcombine.low %v12169_v14, %v12173_v54  ;;  %v17460_v38 = vcombine.high %v12176_v18, %v12180_v31  ;;  %v12228_v42 = vld [vmem:[#allocation6 + $0x430] sm:$0xff]  ;;  %v12225_v14 = vld [vmem:[#allocation6 + $0x418] sm:$0xff] }
 0x7fe   :  { %15304 = vmatprep.subr.bf16.mxu1 %v17406_v32  ;;  %v17462_v32 = vcombine.high %v12177_v52, %v12181_v6  ;;  %v12229_v54 = vld [vmem:[#allocation6 + $0x438] sm:$0xff] }
 0x800   :  { %15133 = vmatpush1.bf16.msra.mxu0 %v17403_v13  ;;  %v17459_v13 = vcombine.low %v12176_v18, %v12180_v31  ;;  %v12232_v18 = vld [vmem:[#allocation6 + $0x450] sm:$0xff] }
 0x801   :  { %15305 = vmatpush1.bf16.msra.mxu1 %v17405_v21  ;;  %15134 = vmatprep.subr.bf16.mxu0 %v17412_v56  ;;  %v17461_v21 = vcombine.low %v12177_v52, %v12181_v6  ;;  %v17468_v56 = vcombine.high %v12184_v24, %v12188_v9  ;;  %v12236_v31 = vld [vmem:[#allocation6 + $0x470] sm:$0xff]  ;;  %v17507_v52 = vcombine.low %v12224_v25, %v12228_v42  ;;  %v12233_v6 = vld [vmem:[#allocation6 + $0x458] sm:$0xff] }
 0x802   :  { %15306 = vmatprep.subr.bf16.mxu1 %v17414_v16  ;;  %v17470_v16 = vcombine.high %v12185_v15, %v12189_v57 }
 0x804   :  { %15135 = vmatpush1.bf16.msra.mxu0 %v17411_v47  ;;  %v17467_v47 = vcombine.low %v12184_v24, %v12188_v9  ;;  %v12244_v24 = vld [vmem:[#allocation6 + $0x4b0] sm:$0xff] }
 0x805   :  { %15307 = vmatpush1.bf16.msra.mxu1 %v17413_v49  ;;  %15136 = vmatprep.subr.bf16.mxu0 %v17420_v37  ;;  %v17469_v49 = vcombine.low %v12185_v15, %v12189_v57  ;;  %v17476_v37 = vcombine.high %v12192_v44, %v12196_v60  ;;  %v12241_v15 = vld [vmem:[#allocation6 + $0x498] sm:$0xff] }
 0x806   :  { %15308 = vmatprep.subr.bf16.mxu1 %v17422_v45  ;;  %v17478_v45 = vcombine.high %v12193_v4, %v12197_v40  ;;  %v12245_v57 = vld [vmem:[#allocation6 + $0x4b8] sm:$0xff] }
 0x808   :  { %15137 = vmatpush1.bf16.msra.mxu0 %v17419_v35  ;;  %v17475_v35 = vcombine.low %v12192_v44, %v12196_v60  ;;  %v12248_v44 = vld [vmem:[#allocation6 + $0x4d0] sm:$0xff] }
 0x809   :  { %15309 = vmatpush1.bf16.msra.mxu1 %v17421_v43  ;;  %15138 = vmatprep.subr.bf16.mxu0 %v17428_v2  ;;  %v17477_v43 = vcombine.low %v12193_v4, %v12197_v40  ;;  %v17484_v2 = vcombine.high %v12200_v28, %v12204_v12  ;;  %v12252_v60 = vld [vmem:[#allocation6 + $0x4f0] sm:$0xff]  ;;  %v12249_v4 = vld [vmem:[#allocation6 + $0x4d8] sm:$0xff] }
 0x80a   :  { %15310 = vmatprep.subr.bf16.mxu1 %v17430_v63  ;;  %v17486_v63 = vcombine.high %v12201_v51, %v12205_v1  ;;  %v12253_v40 = vld [vmem:[#allocation6 + $0x4f8] sm:$0xff] }
 0x80c   :  { %15139 = vmatpush1.bf16.msra.mxu0 %v17427_v46  ;;  %v17483_v46 = vcombine.low %v12200_v28, %v12204_v12  ;;  %v12260_v28 = vld [vmem:[#allocation6 + $0x530] sm:$0xff]  ;;  %v12257_v12 = vld [vmem:[#allocation6 + $0x518] sm:$0xff] }
 0x80d   :  { %15311 = vmatpush1.bf16.msra.mxu1 %v17429_v27  ;;  %15140 = vmatprep.subr.bf16.mxu0 %v17436_v11  ;;  %v17485_v27 = vcombine.low %v12201_v51, %v12205_v1  ;;  %v17492_v11 = vcombine.high %v12208_v20, %v12212_v55  ;;  %v12261_v51 = vld [vmem:[#allocation6 + $0x538] sm:$0xff]  ;;  %v17533_v1 = vcombine.low %v12249_v4, %v12253_v40 }
 0x80e   :  { %15312 = vmatprep.subr.bf16.mxu1 %v17438_v34  ;;  %v17494_v34 = vcombine.high %v12209_v5, %v12213_v59 }
 0x810   :  { %15141 = vmatpush1.bf16.msra.mxu0 %v17435_v7  ;;  %v17491_v7 = vcombine.low %v12208_v20, %v12212_v55  ;;  %v12265_v20 = vld [vmem:[#allocation6 + $0x558] sm:$0xff] }
 0x811   :  { %15313 = vmatpush1.bf16.msra.mxu1 %v17437_v19  ;;  %15142 = vmatprep.subr.bf16.mxu0 %v17444_v23  ;;  %v17493_v19 = vcombine.low %v12209_v5, %v12213_v59  ;;  %v17500_v23 = vcombine.high %v12216_v30, %v12220_v22  ;;  %v12269_v55 = vld [vmem:[#allocation6 + $0x578] sm:$0xff]  ;;  %v17541_v59 = vcombine.low %v12257_v12, %v12261_v51 }
 0x812   :  { %15314 = vmatprep.subr.bf16.mxu1 %v17446_v0  ;;  %v17502_v0 = vcombine.high %v12217_v41, %v12221_v39 }
 0x814   :  { %15143 = vmatpush1.bf16.msra.mxu0 %v17443_v50  ;;  %v17499_v50 = vcombine.low %v12216_v30, %v12220_v22  ;;  %v12273_v30 = vld [vmem:[#allocation6 + $0x598] sm:$0xff] }
 0x815   :  { %15315 = vmatpush1.bf16.msra.mxu1 %v17445_v10  ;;  %15144 = vmatprep.subr.bf16.mxu0 %v17452_v8  ;;  %v17501_v10 = vcombine.low %v12217_v41, %v12221_v39  ;;  %v17508_v8 = vcombine.high %v12224_v25, %v12228_v42  ;;  %v12277_v22 = vld [vmem:[#allocation6 + $0x5b8] sm:$0xff]  ;;  %v17549_v39 = vcombine.low %v12265_v20, %v12269_v55 }
 0x816   :  { %15316 = vmatprep.subr.bf16.mxu1 %v17454_v33  ;;  %v17510_v33 = vcombine.high %v12225_v14, %v12229_v54  ;;  %v12281_v25 = vld [vmem:[#allocation6 + $0x5d8] sm:$0xff] }
 0x817   :  { %v12285_v42 = vld [vmem:[#allocation6 + $0x5f8] sm:$0xff] }
 0x818   :  { %15145 = vmatpush1.bf16.msra.mxu0 %v17451_v26  ;;  %v12237_v26 = vld [vmem:[#allocation6 + $0x478] sm:$0xff] }
 0x819   :  { %15317 = vmatpush1.bf16.msra.mxu1 %v17453_v53  ;;  %15146 = vmatprep.subr.bf16.mxu0 %v17460_v38  ;;  %v17509_v53 = vcombine.low %v12225_v14, %v12229_v54  ;;  %v17516_v38 = vcombine.high %v12232_v18, %v12236_v31  ;;  %v17518_v9 = vcombine.high %v12233_v6, %v12237_v26 }
 0x81a   :  { %15318 = vmatprep.subr.bf16.mxu1 %v17462_v32  ;;  %v12240_v32 = vld [vmem:[#allocation6 + $0x490] sm:$0xff]  ;;  %v17557_v54 = vcombine.low %v12273_v30, %v12277_v22 }
 0x81c   :  { %15147 = vmatpush1.bf16.msra.mxu0 %v17459_v13  ;;  %v17515_v13 = vcombine.low %v12232_v18, %v12236_v31  ;;  %v12289_v18 = vld [vmem:[#allocation6 + $0x618] sm:$0xff] }
 0x81d   :  { %15319 = vmatpush1.bf16.msra.mxu1 %v17461_v21  ;;  %15148 = vmatprep.subr.bf16.mxu0 %v17468_v56  ;;  %v17517_v21 = vcombine.low %v12233_v6, %v12237_v26  ;;  %v17524_v56 = vcombine.high %v12240_v32, %v12244_v24  ;;  %v12293_v31 = vld [vmem:[#allocation6 + $0x638] sm:$0xff]  ;;  %v17565_v6 = vcombine.low %v12281_v25, %v12285_v42 }
 0x81e   :  { %15320 = vmatprep.subr.bf16.mxu1 %v17470_v16  ;;  %v17526_v16 = vcombine.high %v12241_v15, %v12245_v57 }
 0x820   :  { %15149 = vmatpush1.bf16.msra.mxu0 %v17467_v47  ;;  %v17523_v47 = vcombine.low %v12240_v32, %v12244_v24  ;;  %v12300_v32 = vld [vmem:[#allocation6 + $0x670] sm:$0xff]  ;;  %v12297_v24 = vld [vmem:[#allocation6 + $0x658] sm:$0xff] }
 0x821   :  { %15321 = vmatpush1.bf16.msra.mxu1 %v17469_v49  ;;  %15150 = vmatprep.subr.bf16.mxu0 %v17476_v37  ;;  %v17532_v49 = vcombine.high %v12248_v44, %v12252_v60  ;;  %v17534_v37 = vcombine.high %v12249_v4, %v12253_v40 }
 0x822   :  { %15322 = vmatprep.subr.bf16.mxu1 %v17478_v45  ;;  %v12256_v45 = vld [vmem:[#allocation6 + $0x510] sm:$0xff] }
 0x823   :  { %v17539_v5 = vcombine.low %v12256_v45, %v12260_v28 }
 0x824   :  { %15151 = vmatpush1.bf16.msra.mxu0 %v17475_v35  ;;  %v17540_v35 = vcombine.high %v12256_v45, %v12260_v28  ;;  %v12313_v45 = vld [vmem:[#allocation6 + $0x6d8] sm:$0xff] }
 0x825   :  { %15323 = vmatpush1.bf16.msra.mxu1 %v17477_v43  ;;  %15152 = vmatprep.subr.bf16.mxu0 %v17484_v2  ;;  %v17542_v43 = vcombine.high %v12257_v12, %v12261_v51  ;;  %v12264_v2 = vld [vmem:[#allocation6 + $0x550] sm:$0xff]  ;;  %v12317_v28 = vld [vmem:[#allocation6 + $0x6f8] sm:$0xff] }
 0x826   :  { %15324 = vmatprep.subr.bf16.mxu1 %v17486_v63  ;;  %v12268_v63 = vld [vmem:[#allocation6 + $0x570] sm:$0xff] }
 0x827   :  { %v17547_v41 = vcombine.low %v12264_v2, %v12268_v63 }
 0x828   :  { %15153 = vmatpush1.bf16.msra.mxu0 %v17483_v46  ;;  %v17548_v46 = vcombine.high %v12264_v2, %v12268_v63  ;;  %v12321_v2 = vld [vmem:[#allocation6 + $0x718] sm:$0xff] }
 0x829   :  { %15325 = vmatpush1.bf16.msra.mxu1 %v17485_v27  ;;  %15154 = vmatprep.subr.bf16.mxu0 %v17492_v11  ;;  %v17550_v27 = vcombine.high %v12265_v20, %v12269_v55  ;;  %v12272_v11 = vld [vmem:[#allocation6 + $0x590] sm:$0xff]  ;;  %v12325_v63 = vld [vmem:[#allocation6 + $0x738] sm:$0xff]  ;;  %v17597_v55 = vcombine.low %v12313_v45, %v12317_v28 }
 0x82a   :  { %15326 = vmatprep.subr.bf16.mxu1 %v17494_v34  ;;  %v12276_v34 = vld [vmem:[#allocation6 + $0x5b0] sm:$0xff] }
 0x82b   :  { %v17555_v14 = vcombine.low %v12272_v11, %v12276_v34 }
 0x82c   :  { %15155 = vmatpush1.bf16.msra.mxu0 %v17491_v7  ;;  %v17556_v7 = vcombine.high %v12272_v11, %v12276_v34  ;;  %v12329_v11 = vld [vmem:[#allocation6 + $0x758] sm:$0xff] }
 0x82d   :  { %15327 = vmatpush1.bf16.msra.mxu1 %v17493_v19  ;;  %15156 = vmatprep.subr.bf16.mxu0 %v17500_v23  ;;  %v17558_v19 = vcombine.high %v12273_v30, %v12277_v22  ;;  %v12280_v23 = vld [vmem:[#allocation6 + $0x5d0] sm:$0xff]  ;;  %v12333_v34 = vld [vmem:[#allocation6 + $0x778] sm:$0xff]  ;;  %v17605_v22 = vcombine.low %v12321_v2, %v12325_v63 }
 0x82e   :  { %15328 = vmatprep.subr.bf16.mxu1 %v17502_v0  ;;  %v12284_v0 = vld [vmem:[#allocation6 + $0x5f0] sm:$0xff] }
 0x830   :  { %15157 = vmatpush1.bf16.msra.mxu0 %v17499_v50  ;;  %v17564_v50 = vcombine.high %v12280_v23, %v12284_v0 }
 0x831   :  { %15329 = vmatpush1.bf16.msra.mxu1 %v17501_v10  ;;  %15169 = vmatprep.subr.bf16.mxu0 %v17508_v8  ;;  %v17566_v10 = vcombine.high %v12281_v25, %v12285_v42  ;;  %v12288_v8 = vld [vmem:[#allocation6 + $0x610] sm:$0xff]  ;;  %v17613_v42 = vcombine.low %v12329_v11, %v12333_v34 }
 0x832   :  { %15341 = vmatprep.subr.bf16.mxu1 %v17510_v33  ;;  %v12292_v33 = vld [vmem:[#allocation6 + $0x630] sm:$0xff] }
 0x833   :  { %15159 = vmatmul.mubr.bf16.vlgmr.msra.gmra.mrb[32].mxu0 %v21247_v17  ;;  %v17572_v26 = vcombine.high %v12288_v8, %v12292_v33 }
 0x834   :  { %15331 = vmatmul.mubr.bf16.vlgmr.msra.gmra.mrb[32].mxu1 %v21247_v17  ;;  %15170 = vmatpush1.bf16.msra.mxu0 %v17507_v52  ;;  %v17525_v17 = vcombine.low %v12241_v15, %v12245_v57  ;;  %v17563_v52 = vcombine.low %v12280_v23, %v12284_v0  ;;  %v17571_v15 = vcombine.low %v12288_v8, %v12292_v33  ;;  %v12337_v23 = vld [vmem:[#allocation6 + $0x798] sm:$0xff] }
 0x835   :  { %15201 = vmatprep.mubr.bf16.mxu0 %v21315_v29  ;;  %15342 = vmatpush1.bf16.msra.mxu1 %v17509_v53  ;;  %v17574_v53 = vcombine.high %v12289_v18, %v12293_v31  ;;  %v17573_v57 = vcombine.low %v12289_v18, %v12293_v31  ;;  %v12341_v0 = vld [vmem:[#allocation6 + $0x7b8] sm:$0xff] }
 0x836   :  { %15373 = vmatprep.mubr.bf16.mxu1 %v21315_v29  ;;  %15171 = vmatprep.subr.bf16.mxu0 %v17516_v38  ;;  %v17531_v29 = vcombine.low %v12248_v44, %v12252_v60  ;;  %v12296_v38 = vld [vmem:[#allocation6 + $0x650] sm:$0xff]  ;;  %v12305_v44 = vld [vmem:[#allocation6 + $0x698] sm:$0xff]  ;;  %v17621_v31 = vcombine.low %v12337_v23, %v12341_v0 }
 0x837   :  { %15343 = vmatprep.subr.bf16.mxu1 %v17518_v9  ;;  %v12301_v9 = vld [vmem:[#allocation6 + $0x678] sm:$0xff]  ;;  %v17579_v4 = vcombine.low %v12296_v38, %v12300_v32 }
 0x838   :  { %15172 = vmatpush1.bf16.msra.mxu0 %v17515_v13  ;;  %v17580_v13 = vcombine.high %v12296_v38, %v12300_v32  ;;  %v12309_v60 = vld [vmem:[#allocation6 + $0x6b8] sm:$0xff]  ;;  %v17581_v40 = vcombine.low %v12297_v24, %v12301_v9 }
 0x839   :  { %15344 = vmatpush1.bf16.msra.mxu1 %v17517_v21  ;;  %15173 = vmatprep.subr.bf16.mxu0 %v17524_v56  ;;  %v17582_v21 = vcombine.high %v12297_v24, %v12301_v9  ;;  %v12304_v56 = vld [vmem:[#allocation6 + $0x690] sm:$0xff]  ;;  %v17589_v51 = vcombine.low %v12305_v44, %v12309_v60  ;;  %v12345_v8 = vld [vmem:[#allocation6 + $0x7d8] sm:$0xff] }
 0x83a   :  { %15345 = vmatprep.subr.bf16.mxu1 %v17526_v16  ;;  %v12308_v16 = vld [vmem:[#allocation6 + $0x6b0] sm:$0xff]  ;;  %v12349_v33 = vld [vmem:[#allocation6 + $0x7f8] sm:$0xff] }
 0x83b   :  { %v17587_v12 = vcombine.low %v12304_v56, %v12308_v16  ;;  %v12353_v38 = vld [vmem:[#allocation6 + $0x818] sm:$0xff]  ;;  %v17629_v9 = vcombine.low %v12345_v8, %v12349_v33 }
 0x83c   :  { %15174 = vmatpush1.bf16.msra.mxu0 %v17523_v47  ;;  %v17588_v47 = vcombine.high %v12304_v56, %v12308_v16  ;;  %v12357_v32 = vld [vmem:[#allocation6 + $0x838] sm:$0xff] }
 0x83d   :  { %15346 = vmatpush1.bf16.msra.mxu1 %v17525_v17  ;;  %15175 = vmatprep.subr.bf16.mxu0 %v17532_v49  ;;  %v17590_v17 = vcombine.high %v12305_v44, %v12309_v60  ;;  %v12312_v49 = vld [vmem:[#allocation6 + $0x6d0] sm:$0xff]  ;;  %v12361_v16 = vld [vmem:[#allocation6 + $0x858] sm:$0xff]  ;;  %v17637_v60 = vcombine.low %v12353_v38, %v12357_v32 }
 0x83e   :  { %15347 = vmatprep.subr.bf16.mxu1 %v17534_v37  ;;  %v12316_v37 = vld [vmem:[#allocation6 + $0x6f0] sm:$0xff]  ;;  %v12365_v44 = vld [vmem:[#allocation6 + $0x878] sm:$0xff] }
 0x83f   :  { %v17595_v20 = vcombine.low %v12312_v49, %v12316_v37 }
 0x840   :  { %15176 = vmatpush1.bf16.msra.mxu0 %v17531_v29  ;;  %v17596_v29 = vcombine.high %v12312_v49, %v12316_v37  ;;  %v12369_v49 = vld [vmem:[#allocation6 + $0x898] sm:$0xff] }
 0x841   :  { %15348 = vmatpush1.bf16.msra.mxu1 %v17533_v1  ;;  %15177 = vmatprep.subr.bf16.mxu0 %v17540_v35  ;;  %v17598_v1 = vcombine.high %v12313_v45, %v12317_v28  ;;  %v12320_v35 = vld [vmem:[#allocation6 + $0x710] sm:$0xff]  ;;  %v12373_v37 = vld [vmem:[#allocation6 + $0x8b8] sm:$0xff]  ;;  %v17645_v28 = vcombine.low %v12361_v16, %v12365_v44 }
 0x842   :  { %15349 = vmatprep.subr.bf16.mxu1 %v17542_v43  ;;  %v12324_v43 = vld [vmem:[#allocation6 + $0x730] sm:$0xff] }
 0x843   :  { %v17603_v30 = vcombine.low %v12320_v35, %v12324_v43 }
 0x844   :  { %15178 = vmatpush1.bf16.msra.mxu0 %v17539_v5  ;;  %v17604_v5 = vcombine.high %v12320_v35, %v12324_v43  ;;  %v12377_v35 = vld [vmem:[#allocation6 + $0x8d8] sm:$0xff] }
 0x845   :  { %15350 = vmatpush1.bf16.msra.mxu1 %v17541_v59  ;;  %15179 = vmatprep.subr.bf16.mxu0 %v17548_v46  ;;  %v17606_v59 = vcombine.high %v12321_v2, %v12325_v63  ;;  %v12328_v46 = vld [vmem:[#allocation6 + $0x750] sm:$0xff]  ;;  %v12381_v43 = vld [vmem:[#allocation6 + $0x8f8] sm:$0xff] }
 0x846   :  { %15351 = vmatprep.subr.bf16.mxu1 %v17550_v27  ;;  %v12332_v27 = vld [vmem:[#allocation6 + $0x770] sm:$0xff] }
 0x847   :  { %v17611_v25 = vcombine.low %v12328_v46, %v12332_v27 }
 0x848   :  { %15180 = vmatpush1.bf16.msra.mxu0 %v17547_v41  ;;  %v17612_v41 = vcombine.high %v12328_v46, %v12332_v27  ;;  %v12389_v46 = vld [vmem:[#allocation6 + $0x938] sm:$0xff]  ;;  %v17661_v27 = vcombine.low %v12377_v35, %v12381_v43 }
 0x849   :  { %15352 = vmatpush1.bf16.msra.mxu1 %v17549_v39  ;;  %15181 = vmatprep.subr.bf16.mxu0 %v17556_v7  ;;  %v17614_v39 = vcombine.high %v12329_v11, %v12333_v34  ;;  %v12336_v7 = vld [vmem:[#allocation6 + $0x790] sm:$0xff] }
 0x84a   :  { %15353 = vmatprep.subr.bf16.mxu1 %v17558_v19  ;;  %v12340_v19 = vld [vmem:[#allocation6 + $0x7b0] sm:$0xff] }
 0x84b   :  { %v17619_v18 = vcombine.low %v12336_v7, %v12340_v19 }
 0x84c   :  { %15182 = vmatpush1.bf16.msra.mxu0 %v17555_v14  ;;  %v17620_v14 = vcombine.high %v12336_v7, %v12340_v19 }
 0x84d   :  { %15354 = vmatpush1.bf16.msra.mxu1 %v17557_v54  ;;  %15183 = vmatprep.subr.bf16.mxu0 %v17564_v50  ;;  %v17622_v54 = vcombine.high %v12337_v23, %v12341_v0  ;;  %v12344_v50 = vld [vmem:[#allocation6 + $0x7d0] sm:$0xff] }
 0x84e   :  { %15355 = vmatprep.subr.bf16.mxu1 %v17566_v10  ;;  %v12348_v10 = vld [vmem:[#allocation6 + $0x7f0] sm:$0xff] }
 0x84f   :  { %v17627_v24 = vcombine.low %v12344_v50, %v12348_v10 }
 0x850   :  { %15184 = vmatpush1.bf16.msra.mxu0 %v17563_v52  ;;  %v17628_v52 = vcombine.high %v12344_v50, %v12348_v10 }
 0x851   :  { %15356 = vmatpush1.bf16.msra.mxu1 %v17565_v6  ;;  %15185 = vmatprep.subr.bf16.mxu0 %v17572_v26  ;;  %v17630_v6 = vcombine.high %v12345_v8, %v12349_v33  ;;  %v12352_v26 = vld [vmem:[#allocation6 + $0x810] sm:$0xff] }
 0x852   :  { %15357 = vmatprep.subr.bf16.mxu1 %v17574_v53  ;;  %v12356_v53 = vld [vmem:[#allocation6 + $0x830] sm:$0xff] }
 0x853   :  { %v17635_v56 = vcombine.low %v12352_v26, %v12356_v53 }
 0x854   :  { %15186 = vmatpush1.bf16.msra.mxu0 %v17571_v15  ;;  %v17636_v15 = vcombine.high %v12352_v26, %v12356_v53 }
 0x855   :  { %15358 = vmatpush1.bf16.msra.mxu1 %v17573_v57  ;;  %15187 = vmatprep.subr.bf16.mxu0 %v17580_v13  ;;  %v17638_v57 = vcombine.high %v12353_v38, %v12357_v32  ;;  %v12360_v13 = vld [vmem:[#allocation6 + $0x850] sm:$0xff] }
 0x856   :  { %15359 = vmatprep.subr.bf16.mxu1 %v17582_v21  ;;  %v12364_v21 = vld [vmem:[#allocation6 + $0x870] sm:$0xff] }
 0x857   :  { %v17643_v45 = vcombine.low %v12360_v13, %v12364_v21 }
 0x858   :  { %15188 = vmatpush1.bf16.msra.mxu0 %v17579_v4  ;;  %v17644_v4 = vcombine.high %v12360_v13, %v12364_v21 }
 0x859   :  { %15360 = vmatpush1.bf16.msra.mxu1 %v17581_v40  ;;  %15189 = vmatprep.subr.bf16.mxu0 %v17588_v47  ;;  %v12368_v40 = vld [vmem:[#allocation6 + $0x890] sm:$0xff] }
 0x85a   :  { %15361 = vmatprep.subr.bf16.mxu1 %v17590_v17  ;;  %v12372_v47 = vld [vmem:[#allocation6 + $0x8b0] sm:$0xff]  ;;  %v17646_v17 = vcombine.high %v12361_v16, %v12365_v44 }
 0x85b   :  { %v17651_v2 = vcombine.low %v12368_v40, %v12372_v47  ;;  %v12424_v44 = vld [vmem:[#allocation6 + $0xa50] sm:$0xff] }
 0x85c   :  { %15190 = vmatpush1.bf16.msra.mxu0 %v17587_v12  ;;  %v17652_v12 = vcombine.high %v12368_v40, %v12372_v47  ;;  %v12429_v40 = vld [vmem:[#allocation6 + $0xa78] sm:$0xff] }
 0x85d   :  { %15362 = vmatpush1.bf16.msra.mxu1 %v17589_v51  ;;  %15191 = vmatprep.subr.bf16.mxu0 %v17596_v29  ;;  %v17654_v51 = vcombine.high %v12369_v49, %v12373_v37  ;;  %v12376_v29 = vld [vmem:[#allocation6 + $0x8d0] sm:$0xff] }
 0x85e   :  { %15363 = vmatprep.subr.bf16.mxu1 %v17598_v1  ;;  %v12380_v1 = vld [vmem:[#allocation6 + $0x8f0] sm:$0xff] }
 0x85f   :  { %v17660_v63 = vcombine.high %v12376_v29, %v12380_v1 }
 0x860   :  { %15192 = vmatpush1.bf16.msra.mxu0 %v17595_v20  ;;  %v17662_v20 = vcombine.high %v12377_v35, %v12381_v43 }
 0x861   :  { %15364 = vmatpush1.bf16.msra.mxu1 %v17597_v55  ;;  %15193 = vmatprep.subr.bf16.mxu0 %v17604_v5  ;;  %v12384_v55 = vld [vmem:[#allocation6 + $0x910] sm:$0xff] }
 0x862   :  { %15365 = vmatprep.subr.bf16.mxu1 %v17606_v59  ;;  %v12388_v5 = vld [vmem:[#allocation6 + $0x930] sm:$0xff]  ;;  %v12385_v59 = vld [vmem:[#allocation6 + $0x918] sm:$0xff] }
 0x863   :  { %v17668_v11 = vcombine.high %v12384_v55, %v12388_v5  ;;  %v17670_v34 = vcombine.high %v12385_v59, %v12389_v46  ;;  %v17667_v7 = vcombine.low %v12384_v55, %v12388_v5  ;;  %v17669_v19 = vcombine.low %v12385_v59, %v12389_v46 }
 0x864   :  { %15194 = vmatpush1.bf16.msra.mxu0 %v17603_v30  ;;  %v12392_v30 = vld [vmem:[#allocation6 + $0x950] sm:$0xff] }
 0x865   :  { %15366 = vmatpush1.bf16.msra.mxu1 %v17605_v22  ;;  %15195 = vmatprep.subr.bf16.mxu0 %v17612_v41  ;;  %v12396_v22 = vld [vmem:[#allocation6 + $0x970] sm:$0xff]  ;;  %v12393_v41 = vld [vmem:[#allocation6 + $0x958] sm:$0xff] }
 0x866   :  { %15367 = vmatprep.subr.bf16.mxu1 %v17614_v39  ;;  %v12397_v39 = vld [vmem:[#allocation6 + $0x978] sm:$0xff]  ;;  %v17676_v23 = vcombine.high %v12392_v30, %v12396_v22  ;;  %v17675_v50 = vcombine.low %v12392_v30, %v12396_v22 }
 0x867   :  { %v17678_v0 = vcombine.high %v12393_v41, %v12397_v39  ;;  %v17677_v10 = vcombine.low %v12393_v41, %v12397_v39 }
 0x868   :  { %15196 = vmatpush1.bf16.msra.mxu0 %v17611_v25  ;;  %v12400_v25 = vld [vmem:[#allocation6 + $0x990] sm:$0xff] }
 0x869   :  { %15368 = vmatpush1.bf16.msra.mxu1 %v17613_v42  ;;  %15197 = vmatprep.subr.bf16.mxu0 %v17620_v14  ;;  %v12404_v42 = vld [vmem:[#allocation6 + $0x9b0] sm:$0xff]  ;;  %v12401_v14 = vld [vmem:[#allocation6 + $0x998] sm:$0xff] }
 0x86a   :  { %15369 = vmatprep.subr.bf16.mxu1 %v17622_v54  ;;  %v12405_v54 = vld [vmem:[#allocation6 + $0x9b8] sm:$0xff]  ;;  %v17684_v8 = vcombine.high %v12400_v25, %v12404_v42  ;;  %v17683_v26 = vcombine.low %v12400_v25, %v12404_v42 }
 0x86b   :  { %v17686_v33 = vcombine.high %v12401_v14, %v12405_v54  ;;  %v17685_v53 = vcombine.low %v12401_v14, %v12405_v54 }
 0x86c   :  { %15198 = vmatpush1.bf16.msra.mxu0 %v17619_v18  ;;  %v12408_v18 = vld [vmem:[#allocation6 + $0x9d0] sm:$0xff] }
 0x86d   :  { %15370 = vmatpush1.bf16.msra.mxu1 %v17621_v31  ;;  %15199 = vmatprep.subr.bf16.mxu0 %v17628_v52  ;;  %v12412_v31 = vld [vmem:[#allocation6 + $0x9f0] sm:$0xff]  ;;  %v12409_v52 = vld [vmem:[#allocation6 + $0x9d8] sm:$0xff] }
 0x86e   :  { %15371 = vmatprep.subr.bf16.mxu1 %v17630_v6  ;;  %v12413_v6 = vld [vmem:[#allocation6 + $0x9f8] sm:$0xff]  ;;  %v17692_v38 = vcombine.high %v12408_v18, %v12412_v31  ;;  %v17691_v13 = vcombine.low %v12408_v18, %v12412_v31 }
 0x86f   :  { %v17694_v32 = vcombine.high %v12409_v52, %v12413_v6  ;;  %v17693_v21 = vcombine.low %v12409_v52, %v12413_v6 }
 0x870   :  { %15200 = vmatpush1.bf16.msra.mxu0 %v17627_v24  ;;  %v12416_v24 = vld [vmem:[#allocation6 + $0xa10] sm:$0xff] }
 0x871   :  { %15372 = vmatpush1.bf16.msra.mxu1 %v17629_v9  ;;  %15212 = vmatprep.subr.bf16.mxu0 %v17636_v15  ;;  %v12420_v9 = vld [vmem:[#allocation6 + $0xa30] sm:$0xff]  ;;  %v12417_v15 = vld [vmem:[#allocation6 + $0xa18] sm:$0xff] }
 0x872   :  { %15384 = vmatprep.subr.bf16.mxu1 %v17638_v57  ;;  %v12421_v57 = vld [vmem:[#allocation6 + $0xa38] sm:$0xff]  ;;  %v17699_v47 = vcombine.low %v12416_v24, %v12420_v9 }
 0x873   :  { %15202 = vmatmul.mubr.bf16.vlgmr.msra.gmra.mrb[32].mxu0 %v21249_v61  ;;  %v17702_v16 = vcombine.high %v12417_v15, %v12421_v57 }
 0x874   :  { %15374 = vmatmul.mubr.bf16.vlgmr.msra.gmra.mrb[32].mxu1 %v21249_v61  ;;  %15213 = vmatpush1.bf16.msra.mxu0 %v17635_v56  ;;  %v17653_v61 = vcombine.low %v12369_v49, %v12373_v37  ;;  %v17700_v56 = vcombine.high %v12416_v24, %v12420_v9 }
 0x875   :  { %15244 = vmatprep.mubr.bf16.mxu0 %v21317_v36  ;;  %15385 = vmatpush1.bf16.msra.mxu1 %v17637_v60  ;;  %v12428_v60 = vld [vmem:[#allocation6 + $0xa70] sm:$0xff] }
 0x876   :  { %15416 = vmatprep.mubr.bf16.mxu1 %v21317_v36  ;;  %15214 = vmatprep.subr.bf16.mxu0 %v17644_v4  ;;  %v17659_v36 = vcombine.low %v12376_v29, %v12380_v1  ;;  %v12425_v4 = vld [vmem:[#allocation6 + $0xa58] sm:$0xff]  ;;  %v17708_v49 = vcombine.high %v12424_v44, %v12428_v60  ;;  %v17707_v29 = vcombine.low %v12424_v44, %v12428_v60 }
 0x877   :  { %15386 = vmatprep.subr.bf16.mxu1 %v17646_v17  ;;  %v17701_v17 = vcombine.low %v12417_v15, %v12421_v57  ;;  %v17710_v37 = vcombine.high %v12425_v4, %v12429_v40  ;;  %v17709_v1 = vcombine.low %v12425_v4, %v12429_v40 }
 0x878   :  { %15215 = vmatpush1.bf16.msra.mxu0 %v17643_v45  ;;  %v12432_v45 = vld [vmem:[#allocation6 + $0xa90] sm:$0xff] }
 0x879   :  { %15387 = vmatpush1.bf16.msra.mxu1 %v17645_v28  ;;  %15216 = vmatprep.subr.bf16.mxu0 %v17652_v12  ;;  %v12436_v28 = vld [vmem:[#allocation6 + $0xab0] sm:$0xff]  ;;  %v12433_v12 = vld [vmem:[#allocation6 + $0xa98] sm:$0xff] }
 0x87a   :  { %15388 = vmatprep.subr.bf16.mxu1 %v17654_v51  ;;  %v12437_v51 = vld [vmem:[#allocation6 + $0xab8] sm:$0xff]  ;;  %v17716_v35 = vcombine.high %v12432_v45, %v12436_v28  ;;  %v17715_v55 = vcombine.low %v12432_v45, %v12436_v28 }
 0x87b   :  { %v17718_v43 = vcombine.high %v12433_v12, %v12437_v51  ;;  %v17717_v5 = vcombine.low %v12433_v12, %v12437_v51 }
 0x87c   :  { %15217 = vmatpush1.bf16.msra.mxu0 %v17651_v2  ;;  %v12440_v2 = vld [vmem:[#allocation6 + $0xad0] sm:$0xff] }
 0x87d   :  { %15389 = vmatpush1.bf16.msra.mxu1 %v17653_v61  ;;  %15218 = vmatprep.subr.bf16.mxu0 %v17660_v63  ;;  %v12444_v61 = vld [vmem:[#allocation6 + $0xaf0] sm:$0xff]  ;;  %v12441_v63 = vld [vmem:[#allocation6 + $0xad8] sm:$0xff] }
 0x87e   :  { %15390 = vmatprep.subr.bf16.mxu1 %v17662_v20  ;;  %v12445_v20 = vld [vmem:[#allocation6 + $0xaf8] sm:$0xff]  ;;  %v17724_v59 = vcombine.high %v12440_v2, %v12444_v61  ;;  %v17723_v30 = vcombine.low %v12440_v2, %v12444_v61 }
 0x87f   :  { %v17726_v46 = vcombine.high %v12441_v63, %v12445_v20  ;;  %v17725_v22 = vcombine.low %v12441_v63, %v12445_v20 }
 0x880   :  { %15219 = vmatpush1.bf16.msra.mxu0 %v17659_v36  ;;  %v12448_v36 = vld [vmem:[#allocation6 + $0xb10] sm:$0xff] }
 0x881   :  { %15391 = vmatpush1.bf16.msra.mxu1 %v17661_v27  ;;  %15220 = vmatprep.subr.bf16.mxu0 %v17668_v11  ;;  %v12452_v27 = vld [vmem:[#allocation6 + $0xb30] sm:$0xff]  ;;  %v12449_v11 = vld [vmem:[#allocation6 + $0xb18] sm:$0xff] }
 0x882   :  { %15392 = vmatprep.subr.bf16.mxu1 %v17670_v34  ;;  %v12453_v34 = vld [vmem:[#allocation6 + $0xb38] sm:$0xff]  ;;  %v17732_v41 = vcombine.high %v12448_v36, %v12452_v27  ;;  %v17731_v25 = vcombine.low %v12448_v36, %v12452_v27 }
 0x883   :  { %v17734_v39 = vcombine.high %v12449_v11, %v12453_v34  ;;  %v17733_v42 = vcombine.low %v12449_v11, %v12453_v34  ;;  %v12512_v34 = vld [vmem:[#allocation6 + $0xd10] sm:$0xff] }
 0x884   :  { %15221 = vmatpush1.bf16.msra.mxu0 %v17667_v7  ;;  %v12456_v7 = vld [vmem:[#allocation6 + $0xb50] sm:$0xff] }
 0x885   :  { %15393 = vmatpush1.bf16.msra.mxu1 %v17669_v19  ;;  %15222 = vmatprep.subr.bf16.mxu0 %v17676_v23  ;;  %v12460_v19 = vld [vmem:[#allocation6 + $0xb70] sm:$0xff]  ;;  %v12457_v23 = vld [vmem:[#allocation6 + $0xb58] sm:$0xff] }
 0x886   :  { %15394 = vmatprep.subr.bf16.mxu1 %v17678_v0  ;;  %v12461_v0 = vld [vmem:[#allocation6 + $0xb78] sm:$0xff]  ;;  %v17740_v14 = vcombine.high %v12456_v7, %v12460_v19  ;;  %v17739_v18 = vcombine.low %v12456_v7, %v12460_v19 }
 0x887   :  { %v17742_v54 = vcombine.high %v12457_v23, %v12461_v0  ;;  %v17741_v31 = vcombine.low %v12457_v23, %v12461_v0  ;;  %v12520_v23 = vld [vmem:[#allocation6 + $0xd50] sm:$0xff] }
 0x888   :  { %15223 = vmatpush1.bf16.msra.mxu0 %v17675_v50  ;;  %v12464_v50 = vld [vmem:[#allocation6 + $0xb90] sm:$0xff] }
 0x889   :  { %15395 = vmatpush1.bf16.msra.mxu1 %v17677_v10  ;;  %15224 = vmatprep.subr.bf16.mxu0 %v17684_v8  ;;  %v12468_v10 = vld [vmem:[#allocation6 + $0xbb0] sm:$0xff]  ;;  %v12465_v8 = vld [vmem:[#allocation6 + $0xb98] sm:$0xff] }
 0x88a   :  { %15396 = vmatprep.subr.bf16.mxu1 %v17686_v33  ;;  %v12469_v33 = vld [vmem:[#allocation6 + $0xbb8] sm:$0xff]  ;;  %v17748_v52 = vcombine.high %v12464_v50, %v12468_v10  ;;  %v17747_v24 = vcombine.low %v12464_v50, %v12468_v10  ;;  %v12524_v0 = vld [vmem:[#allocation6 + $0xd70] sm:$0xff] }
 0x88b   :  { %v17750_v6 = vcombine.high %v12465_v8, %v12469_v33  ;;  %v17749_v9 = vcombine.low %v12465_v8, %v12469_v33  ;;  %v17804_v50 = vcombine.high %v12520_v23, %v12524_v0  ;;  %v12528_v8 = vld [vmem:[#allocation6 + $0xd90] sm:$0xff] }
 0x88c   :  { %15225 = vmatpush1.bf16.msra.mxu0 %v17683_v26  ;;  %v12472_v26 = vld [vmem:[#allocation6 + $0xbd0] sm:$0xff] }
 0x88d   :  { %15397 = vmatpush1.bf16.msra.mxu1 %v17685_v53  ;;  %15226 = vmatprep.subr.bf16.mxu0 %v17692_v38  ;;  %v12476_v53 = vld [vmem:[#allocation6 + $0xbf0] sm:$0xff]  ;;  %v12473_v38 = vld [vmem:[#allocation6 + $0xbd8] sm:$0xff] }
 0x88e   :  { %15398 = vmatprep.subr.bf16.mxu1 %v17694_v32  ;;  %v12477_v32 = vld [vmem:[#allocation6 + $0xbf8] sm:$0xff]  ;;  %v17756_v15 = vcombine.high %v12472_v26, %v12476_v53  ;;  %v17755_v44 = vcombine.low %v12472_v26, %v12476_v53  ;;  %v12532_v33 = vld [vmem:[#allocation6 + $0xdb0] sm:$0xff] }
 0x88f   :  { %v17758_v57 = vcombine.high %v12473_v38, %v12477_v32  ;;  %v17757_v60 = vcombine.low %v12473_v38, %v12477_v32  ;;  %v17812_v26 = vcombine.high %v12528_v8, %v12532_v33 }
 0x890   :  { %15227 = vmatpush1.bf16.msra.mxu0 %v17691_v13  ;;  %v12480_v13 = vld [vmem:[#allocation6 + $0xc10] sm:$0xff] }
 0x891   :  { %15399 = vmatpush1.bf16.msra.mxu1 %v17693_v21  ;;  %15228 = vmatprep.subr.bf16.mxu0 %v17700_v56  ;;  %v12484_v21 = vld [vmem:[#allocation6 + $0xc30] sm:$0xff]  ;;  %v12481_v56 = vld [vmem:[#allocation6 + $0xc18] sm:$0xff] }
 0x892   :  { %15400 = vmatprep.subr.bf16.mxu1 %v17702_v16  ;;  %v12485_v16 = vld [vmem:[#allocation6 + $0xc38] sm:$0xff]  ;;  %v17764_v4 = vcombine.high %v12480_v13, %v12484_v21  ;;  %v17763_v45 = vcombine.low %v12480_v13, %v12484_v21 }
 0x893   :  { %v17766_v40 = vcombine.high %v12481_v56, %v12485_v16  ;;  %v17765_v28 = vcombine.low %v12481_v56, %v12485_v16  ;;  %v12537_v21 = vld [vmem:[#allocation6 + $0xdd8] sm:$0xff] }
 0x894   :  { %15229 = vmatpush1.bf16.msra.mxu0 %v17699_v47  ;;  %v12488_v47 = vld [vmem:[#allocation6 + $0xc50] sm:$0xff]  ;;  %v12541_v56 = vld [vmem:[#allocation6 + $0xdf8] sm:$0xff] }
 0x895   :  { %15401 = vmatpush1.bf16.msra.mxu1 %v17701_v17  ;;  %15230 = vmatprep.subr.bf16.mxu0 %v17708_v49  ;;  %v12492_v17 = vld [vmem:[#allocation6 + $0xc70] sm:$0xff]  ;;  %v12489_v49 = vld [vmem:[#allocation6 + $0xc58] sm:$0xff] }
 0x896   :  { %15402 = vmatprep.subr.bf16.mxu1 %v17710_v37  ;;  %v12493_v37 = vld [vmem:[#allocation6 + $0xc78] sm:$0xff]  ;;  %v17772_v12 = vcombine.high %v12488_v47, %v12492_v17  ;;  %v17771_v2 = vcombine.low %v12488_v47, %v12492_v17 }
 0x897   :  { %v17774_v51 = vcombine.high %v12489_v49, %v12493_v37  ;;  %v17773_v61 = vcombine.low %v12489_v49, %v12493_v37 }
 0x898   :  { %15231 = vmatpush1.bf16.msra.mxu0 %v17707_v29  ;;  %v12496_v29 = vld [vmem:[#allocation6 + $0xc90] sm:$0xff] }
 0x899   :  { %15403 = vmatpush1.bf16.msra.mxu1 %v17709_v1  ;;  %15232 = vmatprep.subr.bf16.mxu0 %v17716_v35  ;;  %v12500_v1 = vld [vmem:[#allocation6 + $0xcb0] sm:$0xff]  ;;  %v12497_v35 = vld [vmem:[#allocation6 + $0xc98] sm:$0xff] }
 0x89a   :  { %15404 = vmatprep.subr.bf16.mxu1 %v17718_v43  ;;  %v12501_v43 = vld [vmem:[#allocation6 + $0xcb8] sm:$0xff]  ;;  %v17780_v63 = vcombine.high %v12496_v29, %v12500_v1  ;;  %v17779_v36 = vcombine.low %v12496_v29, %v12500_v1  ;;  %v20495_v29 = vld [vmem:[#allocation9 + $0x40] sm:$0xff]  }
 0x89b   :  { %v17782_v20 = vcombine.high %v12497_v35, %v12501_v43  ;;  %v20496_v1 = vld [vmem:[#allocation9] sm:$0xff]  }
 0x89c   :  { %15233 = vmatpush1.bf16.msra.mxu0 %v17715_v55  ;;  %v12504_v55 = vld [vmem:[#allocation6 + $0xcd0] sm:$0xff] }
 0x89d   :  { %15405 = vmatpush1.bf16.msra.mxu1 %v17717_v5  ;;  %15234 = vmatprep.subr.bf16.mxu0 %v17724_v59  ;;  %v12508_v5 = vld [vmem:[#allocation6 + $0xcf0] sm:$0xff]  ;;  %v12505_v59 = vld [vmem:[#allocation6 + $0xcd8] sm:$0xff] }
 0x89e   :  { %15406 = vmatprep.subr.bf16.mxu1 %v17726_v46  ;;  %v12509_v46 = vld [vmem:[#allocation6 + $0xcf8] sm:$0xff]  ;;  %v17788_v27 = vcombine.high %v12504_v55, %v12508_v5 }
 0x89f   :  { %v17790_v11 = vcombine.high %v12505_v59, %v12509_v46  ;;  %v17789_v7 = vcombine.low %v12505_v59, %v12509_v46  ;;  %v20505_v59 = vld [vmem:[#allocation9 + $0x68] sm:$0xff]  }
 0x8a0   :  { %15235 = vmatpush1.bf16.msra.mxu0 %v17723_v30  ;;  %v12516_v30 = vld [vmem:[#allocation6 + $0xd30] sm:$0xff] }
 0x8a1   :  { %15407 = vmatpush1.bf16.msra.mxu1 %v17725_v22  ;;  %15236 = vmatprep.subr.bf16.mxu0 %v17732_v41  ;;  %v12513_v22 = vld [vmem:[#allocation6 + $0xd18] sm:$0xff]  ;;  %v17796_v19 = vcombine.high %v12512_v34, %v12516_v30  ;;  %v20506_v46 = vld [vmem:[#allocation9 + $0x28] sm:$0xff]  }
 0x8a2   :  { %15408 = vmatprep.subr.bf16.mxu1 %v17734_v39  ;;  %v12517_v41 = vld [vmem:[#allocation6 + $0xd38] sm:$0xff]  ;;  %v17787_v39 = vcombine.low %v12504_v55, %v12508_v5  ;;  %v20503_v55 = vld [vmem:[#allocation9 + $0x60] sm:$0xff]  }
 0x8a3   :  { %v20504_v5 = vld [vmem:[#allocation9 + $0x20] sm:$0xff]  }
 0x8a4   :  { %15237 = vmatpush1.bf16.msra.mxu0 %v17731_v25  ;;  %v12521_v25 = vld [vmem:[#allocation6 + $0xd58] sm:$0xff] }
 0x8a5   :  { %15409 = vmatpush1.bf16.msra.mxu1 %v17733_v42  ;;  %15238 = vmatprep.subr.bf16.mxu0 %v17740_v14  ;;  %v12525_v42 = vld [vmem:[#allocation6 + $0xd78] sm:$0xff]  ;;  %v17795_v14 = vcombine.low %v12512_v34, %v12516_v30  ;;  %v20754_v34 = vmov 0.0   ;;  %v20512_v30 = vld [vmem:[#allocation12 + $0x8] sm:$0xff]  }
 0x8a6   :  { %15410 = vmatprep.subr.bf16.mxu1 %v17742_v54  ;;  %v17797_v54 = vcombine.low %v12513_v22, %v12517_v41  ;;  %v17806_v10 = vcombine.high %v12521_v25, %v12525_v42 }
 0x8a8   :  { %15239 = vmatpush1.bf16.msra.mxu0 %v17739_v18  ;;  %v12529_v18 = vld [vmem:[#allocation6 + $0xd98] sm:$0xff] }
 0x8a9   :  { %15411 = vmatpush1.bf16.msra.mxu1 %v17741_v31  ;;  %15240 = vmatprep.subr.bf16.mxu0 %v17748_v52  ;;  %v12533_v31 = vld [vmem:[#allocation6 + $0xdb8] sm:$0xff]  ;;  %v17803_v52 = vcombine.low %v12520_v23, %v12524_v0  ;;  %v15482_v23 = vld [vmem:[#allocation7] sm:$0x3] }
 0x8aa   :  { %15412 = vmatprep.subr.bf16.mxu1 %v17750_v6  ;;  %v17805_v6 = vcombine.low %v12521_v25, %v12525_v42  ;;  %v17814_v32 = vcombine.high %v12529_v18, %v12533_v31  ;;  %v17813_v49 = vcombine.low %v12529_v18, %v12533_v31 }
 0x8ac   :  { %15241 = vmatpush1.bf16.msra.mxu0 %v17747_v24  ;;  %v12536_v24 = vld [vmem:[#allocation6 + $0xdd0] sm:$0xff] }
 0x8ad   :  { %15413 = vmatpush1.bf16.msra.mxu1 %v17749_v9  ;;  %15242 = vmatprep.subr.bf16.mxu0 %v17756_v15  ;;  %v12540_v9 = vld [vmem:[#allocation6 + $0xdf0] sm:$0xff] }
 0x8ae   :  { %15414 = vmatprep.subr.bf16.mxu1 %v17758_v57  ;;  %v17820_v37 = vcombine.high %v12536_v24, %v12540_v9 }
 0x8b0   :  { %15243 = vmatpush1.bf16.msra.mxu0 %v17755_v44 }
 0x8b1   :  { %15415 = vmatpush1.bf16.msra.mxu1 %v17757_v60  ;;  %15255 = vmatprep.subr.bf16.mxu0 %v17764_v4  ;;  %v17811_v4 = vcombine.low %v12528_v8, %v12532_v33  ;;  %v21434_v33 = vsub.s32 0, %v21203_v58 }
 0x8b2   :  { %15427 = vmatprep.subr.bf16.mxu1 %v17766_v40 }
 0x8b3   :  { %15245 = vmatmul.mubr.bf16.vlgmr.msra.gmra.mrb[32].mxu0 %v21319_v62  ;;  %v15487_v18 = vrot.slane %v15482_v23, %v21434_v33 }
 0x8b4   :  { %15417 = vmatmul.mubr.bf16.vlgmr.msra.gmra.mrb[32].mxu1 %v21319_v62  ;;  %15256 = vmatpush1.bf16.msra.mxu0 %v17763_v45  ;;  %v17781_v62 = vcombine.low %v12497_v35, %v12501_v43  ;;  %v20497_v35 = vld [vmem:[#allocation9 + $0x48] sm:$0xff]  }
 0x8b5   :  { %15428 = vmatpush1.bf16.msra.mxu1 %v17765_v28  ;;  %15257 = vmatprep.subr.bf16.mxu0 %v17772_v12  ;;  %v17822_v28 = vcombine.high %v12537_v21, %v12541_v56  ;;  %v17819_v12 = vcombine.low %v12536_v24, %v12540_v9  ;;  %v20498_v43 = vld [vmem:[#allocation9 + $0x8] sm:$0xff]  }
 0x8b6   :  { %15429 = vmatprep.subr.bf16.mxu1 %v17774_v51  ;;  %15287 = vmatprep.mubr.bf16.mxu0 %v21433_v48  ;;  %v17821_v51 = vcombine.low %v12537_v21, %v12541_v56 }
 0x8b7   :  { %15459 = vmatprep.mubr.bf16.mxu1 %v21433_v48  ;;  %v17798_v48 = vcombine.high %v12513_v22, %v12517_v41  ;;  %v20513_v22 = vld [vmem:[#allocation12 + $0x10] sm:$0xff]   ;;  %v20514_v41 = vld [vmem:[#allocation12 + $0x18] sm:$0xff]  }
 0x8b8   :  { %15258 = vmatpush1.bf16.msra.mxu0 %v17771_v2  ;;  %v20499_v2 = vld [vmem:[#allocation9 + $0x50] sm:$0xff]  }
 0x8b9   :  { %15430 = vmatpush1.bf16.msra.mxu1 %v17773_v61  ;;  %15259 = vmatprep.subr.bf16.mxu0 %v17780_v63  ;;  %v20500_v61 = vld [vmem:[#allocation9 + $0x10] sm:$0xff]   ;;  %v20501_v63 = vld [vmem:[#allocation9 + $0x58] sm:$0xff]  }
 0x8ba   :  { %15431 = vmatprep.subr.bf16.mxu1 %v17782_v20  ;;  %v20502_v20 = vld [vmem:[#allocation9 + $0x18] sm:$0xff]  }
 0x8bc   :  { %15260 = vmatpush1.bf16.msra.mxu0 %v17779_v36  ;;  %v20508_v36 = vld [vmem:[#allocation9 + $0x30] sm:$0xff]  }
 0x8bd   :  { %15432 = vmatpush1.bf16.msra.mxu1 %v17781_v62  ;;  %15261 = vmatprep.subr.bf16.mxu0 %v17788_v27  ;;  %v20509_v62 = vld [vmem:[#allocation9 + $0x78] sm:$0xff]  }
 0x8be   :  { %15433 = vmatprep.subr.bf16.mxu1 %v17790_v11  ;;  %v20510_v27 = vld [vmem:[#allocation9 + $0x38] sm:$0xff]   ;;  %v20511_v11 = vld [vmem:[#allocation12] sm:$0xff]  }
 0x8c0   :  { %15262 = vmatpush1.bf16.msra.mxu0 %v17787_v39  ;;  %v20515_v39 = vld [vmem:[#allocation12 + $0x20] sm:$0xff]  }
 0x8c1   :  { %15434 = vmatpush1.bf16.msra.mxu1 %v17789_v7  ;;  %15263 = vmatprep.subr.bf16.mxu0 %v17796_v19  ;;  %v20516_v7 = vld [vmem:[#allocation12 + $0x28] sm:$0xff]  }
 0x8c2   :  { %15435 = vmatprep.subr.bf16.mxu1 %v17798_v48 }
 0x8c4   :  { %15264 = vmatpush1.bf16.msra.mxu0 %v17795_v14 }
 0x8c5   :  { %15436 = vmatpush1.bf16.msra.mxu1 %v17797_v54  ;;  %15265 = vmatprep.subr.bf16.mxu0 %v17804_v50 }
 0x8c6   :  { %v21355_v53 = vpop.f32.mrb[28].mxu0  ;;  %v21357_v38 = vpop.f32.mrb[28].mxu1  ;;  %15437 = vmatprep.subr.bf16.mxu1 %v17806_v10 }
 0x8c7   :  { %v15470_v15 = vmax.f32 %v21355_v53, %v21357_v38  ;;  %v21361_v57 = vpop.f32.mrb[29].mxu0  ;;  %v21363_v13 = vpop.f32.mrb[29].mxu1 }
 0x8c8   :  { %v15471_v16 = vmax.f32 %v21361_v57, %v21363_v13  ;;  %v21367_v44 = vpop.f32.mrb[30].mxu0  ;;  %v21369_v60 = vpop.f32.mrb[30].mxu1  ;;  %15266 = vmatpush1.bf16.msra.mxu0 %v17803_v52  ;;  %v20517_v57 = vld [vmem:[#allocation12 + $0x30] sm:$0xff]  }
 0x8c9   :  { %v15472_v40 = vmax.f32 %v21367_v44, %v21369_v60  ;;  %15438 = vmatpush1.bf16.msra.mxu1 %v17805_v6  ;;  %v21373_v47 = vpop.f32.mrb[31].mxu0  ;;  %v21375_v17 = vpop.f32.mrb[31].mxu1  ;;  %15267 = vmatprep.subr.bf16.mxu0 %v17812_v26  ;;  %v21435_v26 = vsub.s32 1, %v21203_v58  ;;  %v20518_v58 = vld [vmem:[#allocation12 + $0x38] sm:$0xff]  }
 0x8ca   :  { %v15473_v45 = vmax.f32 %v21373_v47, %v21375_v17  ;;  %15439 = vmatprep.subr.bf16.mxu1 %v17814_v32 }
 0x8cb   :  { %v15491_v32 = vrot.slane %v15482_v23, %v21435_v26 }
 0x8cc   :  { %15268 = vmatpush1.bf16.msra.mxu0 %v17811_v4 }
 0x8cd   :  { %15440 = vmatpush1.bf16.msra.mxu1 %v17813_v49  ;;  %15269 = vmatprep.subr.bf16.mxu0 %v17820_v37 }
 0x8ce   :  { %15441 = vmatprep.subr.bf16.mxu1 %v17822_v28 }
 0x8d0   :  { %15270 = vmatpush1.bf16.msra.mxu0 %v17819_v12  ;;  %v17840_v12 = vld [vmem:[#allocation13] ss:$0 sm:$0xff] }
 0x8d1   :  { %15442 = vmatpush1.bf16.msra.mxu1 %v17821_v51  ;;  %17849 = vmatprep.subr.bf16.mxu0 %v20495_v29 }
 0x8d2   :  { %17880 = vmatprep.subr.bf16.mxu1 %v20754_v34 }
 0x8d3   :  { %15288 = vmatmul.mubr.bf16.vlgmr.msra.gmra.mrb[32].mxu0 %v21321_v3 }
 0x8d4   :  { %15460 = vmatmul.mubr.bf16.vlgmr.msra.gmra.mrb[32].mxu1 %v21321_v3  ;;  %17850 = vmatpush3.bf16.msra.mxu0 %v20496_v1  ;;  %v20507_v3 = vld [vmem:[#allocation9 + $0x70] sm:$0xff]  }
 0x8d5   :  { %17851 = vmatprep.subr.bf16.mxu0 %v20497_v35  ;;  %17881 = vmatpush3.bf16.msra.mxu1 %v20511_v11 }
 0x8d6   :  { %17882 = vmatprep.subr.bf16.mxu1 %v20754_v34  ;;  %17896 = vmatprep.mubr.msk.bf16.mxu1 %vm20755_vm0, %v20754_v34 }
 0x8d8   :  { %17852 = vmatpush3.bf16.msra.mxu0 %v20498_v43 }
 0x8d9   :  { %17853 = vmatprep.subr.bf16.mxu0 %v20499_v2  ;;  %17883 = vmatpush3.bf16.msra.mxu1 %v20512_v30 }
 0x8da   :  { %17884 = vmatprep.subr.bf16.mxu1 %v20754_v34 }
 0x8dc   :  { %17854 = vmatpush3.bf16.msra.mxu0 %v20500_v61 }
 0x8dd   :  { %17855 = vmatprep.subr.bf16.mxu0 %v20501_v63  ;;  %17885 = vmatpush3.bf16.msra.mxu1 %v20513_v22 }
 0x8de   :  { %17886 = vmatprep.subr.bf16.mxu1 %v20754_v34 }
 0x8e0   :  { %17856 = vmatpush3.bf16.msra.mxu0 %v20502_v20 }
 0x8e1   :  { %17857 = vmatprep.subr.bf16.mxu0 %v20503_v55  ;;  %17887 = vmatpush3.bf16.msra.mxu1 %v20514_v41 }
 0x8e2   :  { %17888 = vmatprep.subr.bf16.mxu1 %v20754_v34 }
 0x8e4   :  { %17858 = vmatpush3.bf16.msra.mxu0 %v20504_v5 }
 0x8e5   :  { %17859 = vmatprep.subr.bf16.mxu0 %v20505_v59  ;;  %17889 = vmatpush3.bf16.msra.mxu1 %v20515_v39 }
 0x8e6   :  { %17890 = vmatprep.subr.bf16.mxu1 %v20754_v34 }
 0x8e8   :  { %17860 = vmatpush3.bf16.msra.mxu0 %v20506_v46 }
 0x8e9   :  { %17861 = vmatprep.subr.bf16.mxu0 %v20507_v3  ;;  %17891 = vmatpush3.bf16.msra.mxu1 %v20516_v7 }
 0x8ea   :  { %17892 = vmatprep.subr.bf16.mxu1 %v20754_v34 }
 0x8ec   :  { %17862 = vmatpush3.bf16.msra.mxu0 %v20508_v36 }
 0x8ed   :  { %17863 = vmatprep.subr.bf16.mxu0 %v20509_v62  ;;  %17893 = vmatpush3.bf16.msra.mxu1 %v20517_v57 }
 0x8ee   :  { %17894 = vmatprep.subr.bf16.mxu1 %v20754_v34 }
 0x8f0   :  { %17864 = vmatpush3.bf16.msra.mxu0 %v20510_v27 }
 0x8f1   :  { %17895 = vmatpush3.bf16.msra.mxu1 %v20518_v58 }
 0x9a6   :  { %v15289_v19 = vpop.f32.mrb[32].mxu0 }
 0x9a7   :  { %v15461_v48 = vpop.f32.mrb[32].mxu1  ;;  %v15291_v0 = vpop.f32.mrb[33].mxu0 }
 0x9a8   :  { %v15474_v25 = vmax.f32 %v15289_v19, %v15461_v48  ;;  %v15463_v42 = vpop.f32.mrb[33].mxu1  ;;  %v15293_v14 = vpop.f32.mrb[34].mxu0 }
 0x9a9   :  { %v15475_v54 = vmax.f32 %v15291_v0, %v15463_v42  ;;  %v15465_v50 = vpop.f32.mrb[34].mxu1  ;;  %v15295_v10 = vpop.f32.mrb[35].mxu0 }
 0x9aa   :  { %v15478_v8 = vmax.f32 %v15470_v15, %v15474_v25  ;;  %v15476_v31 = vmax.f32 %v15293_v14, %v15465_v50  ;;  %v15467_v52 = vpop.f32.mrb[35].mxu1 }
 0x9ab   :  { %v15479_v6 = vmax.f32 %v15471_v16, %v15475_v54  ;;  %v15477_v24 = vmax.f32 %v15295_v10, %v15467_v52 }
 0x9ac   :  { %v15480_v9 = vmax.f32 %v15472_v40, %v15476_v31  ;;  %v15494_v38 = vadd.f32 %v15487_v18, %v15478_v8  ;;  %v17823_v40 = vld [vmem:[#allocation10] ss:$0 sm:$0xff] }
 0x9ad   :  { %v15481_v53 = vmax.f32 %v15473_v45, %v15477_v24  ;;  %v15495_v21 = vadd.f32 %v15491_v32, %v15479_v6 }
 0x9ae   :  { %v15496_v15 = vadd.f32 %v15487_v18, %v15480_v9 }
 0x9af   :  { %v15497_v56 = vadd.f32 %v15491_v32, %v15481_v53 }
 0x9b0   :  { %v15498_v4 = vpack.c.bf16 %v15496_v15, %v15494_v38 }
 0x9b1   :  { %v15499_v49 = vpack.c.bf16 %v15497_v56, %v15495_v21 }
 0x9b3   :  { %15667 = vmatprep.mubr.bf16.mxu0 %v15499_v49 }
 0x9b4   :  { %15668 = vmatmul.mubr.bf16.vlgmr.msra.gmra.mrb[36].mxu0 %v15498_v4 }
 0xa87   :  { %v17865_v13 = vpop.f32.mrb[36].mxu0 }
 0xa88   :  { %v17866_v16 = vpop.f32.mrb[37].mxu0 }
 0xa89   :  { %v17867_v44 = vadd.f32 %v17866_v16, %v17865_v13  ;;  %v17868_v60 = vpop.f32.mrb[38].mxu0 }
 0xa8a   :  { %v17869_v47 = vpop.f32.mrb[39].mxu0 }
 0xa8b   :  { %v17870_v17 = vadd.f32 %v17869_v47, %v17868_v60  ;;  %v15670_v37 = vadd.f32 %v17867_v44, %v17823_v40 }
 0xa8d   :  { %v15673_v45 = vadd.f32 %v17870_v17, %v17823_v40 }
 0xa8f   :  { %v15676_v28 = vpack.c.bf16 %v15673_v45, %v15670_v37 }
 0xa91   :  { %17897 = vmatmul.mubr.bf16.vlgmr.msra.gmra.mrb[36].mxu1 %v15676_v28 }
 0xb64   :  { %v15782_v51 = vpop.f32.mrb[36].mxu1 }
 0xb65   :  { %v15783_v29 = vadd.f32 %v17840_v12, %v15782_v51  ;;  %v17898_v1 = vpop.f32.mrb[37].mxu1 }
 0xb66   :  { %v15785_v35 = vpop.f32.mrb[38].mxu1 }
 0xb67   :  { %15789 = vst [vmem:[%s21412_s9] sm:$0xff] %v15783_v29  ;;  %v15786_v43 = vadd.f32 %v17840_v12, %v15785_v35  ;;  %v17899_v2 = vpop.f32.mrb[39].mxu1 }
 0xb69   :  { %15790 = vst [vmem:[%s21412_s9 + $0x8] sm:$0xff] %v15786_v43 }
 0xb6a   :  { %15795 = vsyncpa [#allocation3], 1 }
 0xb6b   :  { %15796 = vsyncpa [#allocation5], 1 }
 0xb6c   :  { %15797 = vsyncpa [#allocation8], 1 }
 0xb6d   :  { %15798 = vsyncpa [#allocation11], 1 }
 0xb6e   :  { %15799 = vsyncpa [#allocation14], 1 }

</bundles_post_ra>
